<compile_context>
chip_gen: v7x
topology: tpu7x:2x2x1
jax: 0.10.0
libtpu: 0.0.40
codegen_flags: <defaults>
</compile_context>

<pallas_src>
import numpy as np
import jax
import jax.numpy as jnp
from jax import lax
from jax.experimental import pallas as pl
from jax.experimental.pallas import tpu as pltpu


# --------------------------------------------------------------------------
# deterministic init-time helpers (numpy): gaussian taps, mask pyramid,
# banded convolution / pooling matrices
# --------------------------------------------------------------------------
def _fspecial_gauss_1d(size, sigma):
    coords = np.arange(size, dtype=np.float32) - size // 2
    g = np.exp(-coords ** 2 / (2.0 * sigma ** 2))
    g = g / g.sum()
    return g.astype(np.float32)                       # (size,)


def _gaussian_valid_blur_np(img, win):
    """Separable 'valid' gaussian blur of a 2-D array (numpy, init-time)."""
    ws = int(win.shape[0])
    H, W = img.shape
    Hc, Wc = H - ws + 1, W - ws + 1
    acc = np.zeros((Hc, W), np.float32)
    for k in range(ws):
        acc += win[k] * img[k:k + Hc, :]
    out = np.zeros((Hc, Wc), np.float32)
    for k in range(ws):
        out += win[k] * acc[:, k:k + Wc]
    return out


def _avg_pool2d_np(img, ph, pw):
    """F.avg_pool2d(kernel=2, stride=2, padding=(ph,pw), count_include_pad=True)."""
    H, W = img.shape
    Hp = (H + 2 * ph - 2) // 2 + 1
    Wp = (W + 2 * pw - 2) // 2 + 1
    p = np.pad(img.astype(np.float32), ((ph, ph), (pw, pw)))
    out = 0.25 * (p[0:2 * Hp:2, 0:2 * Wp:2] + p[1:2 * Hp:2, 0:2 * Wp:2]
                  + p[0:2 * Hp:2, 1:2 * Wp:2] + p[1:2 * Hp:2, 1:2 * Wp:2])
    return out.astype(np.float32)


def _valid_conv_matrix(n, win):
    """(n-ws+1, n) banded matrix M with M[j, j:j+ws] = win, so M @ x is a 1-D valid conv."""
    ws = int(win.shape[0])
    nc = n - ws + 1
    m = np.zeros((nc, n), dtype=np.float32)
    for j in range(nc):
        m[j, j:j + ws] = win
    return m


def _pool_matrices(h, w):
    """Banded matrices so that PhT @ X @ Pw == avg_pool2d(X, k=2, s=2, pad=(h%2,w%2))."""
    ph, pw = h % 2, w % 2
    hp = (h + 2 * ph - 2) // 2 + 1
    wp = (w + 2 * pw - 2) // 2 + 1
    phT = np.zeros((hp, h), dtype=np.float32)
    for i in range(hp):
        for r in (2 * i - ph, 2 * i + 1 - ph):
            if 0 <= r < h:
                phT[i, r] = 0.5
    pwm = np.zeros((w, wp), dtype=np.float32)
    for j in range(wp):
        for c in (2 * j - pw, 2 * j + 1 - pw):
            if 0 <= c < w:
                pwm[c, j] = 0.5
    return phT, pwm, hp, wp


# --------------------------------------------------------------------------
# Pallas kernel: one SSIM pyramid level, B (n, c) image planes per grid step
# --------------------------------------------------------------------------
def _make_level_kernel(C1, C2, with_pool, B):
    """C1/C2: python floats baked in; with_pool: also emit 2x2 avg-pooled X/Y;
    B: number of image planes processed per grid step (static unroll)."""

    def precise_recip(x):
        # approx reciprocal on the EUP slot + one Newton step (VALU) -> ~f32 accurate
        r = pl.reciprocal(x, approx=True)
        return r * (2.0 - x * r)

    def kernel(ghT_ref, gw_ref, mask_ref, x_ref, y_ref, *rest):
        if with_pool:
            phT_ref, pwm_ref, ssim_ref, cs_ref, xp_ref, yp_ref = rest
        else:
            ssim_ref, cs_ref = rest

        ghT = ghT_ref[...]                 # (Hc, H)   resident
        gw = gw_ref[...]                   # (W, Wc)   resident
        m = mask_ref[...]                  # (Hc, Wc)  resident
        if with_pool:
            phT = phT_ref[...]             # (Hp, H)
            pwm = pwm_ref[...]             # (W, Wp)

        def gfilt(t):
            # separable valid Gaussian conv as two MXU matmuls
            a = jnp.dot(ghT, t, preferred_element_type=jnp.float32)    # (Hc, W)
            return jnp.dot(a, gw, preferred_element_type=jnp.float32)  # (Hc, Wc)

        # per-plane partial sums packed lane-dense into one (8,128) block
        lane = lax.broadcasted_iota(jnp.int32, (8, 128), 1)
        ssim_block = jnp.zeros((8, 128), jnp.float32)
        cs_block = jnp.zeros((8, 128), jnp.float32)

        for b in range(B):                 # static unroll (B is small, capped)
            X = x_ref[b]                   # (H, W)
            Y = y_ref[b]                   # (H, W)

            mu1 = gfilt(X)
            mu2 = gfilt(Y)
            exx = gfilt(X * X)
            eyy = gfilt(Y * Y)
            exy = gfilt(X * Y)

            mu1_sq = mu1 * mu1
            mu2_sq = mu2 * mu2
            mu1_mu2 = mu1 * mu2
            sigma1_sq = exx - mu1_sq       # compensation = 1.0
            sigma2_sq = eyy - mu2_sq
            sigma12 = exy - mu1_mu2

            cs_map = (2.0 * sigma12 + C2) * precise_recip(sigma1_sq + sigma2_sq + C2)
            lum = (2.0 * mu1_mu2 + C1) * precise_recip(mu1_sq + mu2_sq + C1)

            mcs = cs_map * m
            cs_s = jnp.sum(mcs)
            ssim_s = jnp.sum(mcs * lum)    # == sum(mask * ssim_map)

            ssim_block = jnp.where(lane == b, ssim_s, ssim_block)
            cs_block = jnp.where(lane == b, cs_s, cs_block)

            if with_pool:
                # fused 2x2 avg-pool downsample (count_include_pad=True) on the MXU
                xp_ref[b] = jnp.dot(
                    jnp.dot(phT, X, preferred_element_type=jnp.float32),
                    pwm, preferred_element_type=jnp.float32)
                yp_ref[b] = jnp.dot(
                    jnp.dot(phT, Y, preferred_element_type=jnp.float32),
                    pwm, preferred_element_type=jnp.float32)

        # lane-dense full-block stores of the packed per-plane partial sums
        ssim_ref[0] = ssim_block
        cs_ref[0] = cs_block

    return kernel


def _vmem_bytes_estimate(B, H, W, Hc, Wc, with_pool, Hp, Wp):
    f = 4  # f32
    est = 2 * 2 * B * H * W * f                  # X / Y blocks, double-buffered
    est += 2 * (Hc * H + W * Wc + Hc * Wc) * f   # ghT, gw, mask (resident, x2 safety)
    est += B * (5 * Hc * W + 12 * Hc * Wc) * f   # live temporaries (conservative: xB)
    est += 2 * 2 * 8 * 128 * f                   # partial-sum output blocks
    if with_pool:
        est += 2 * (Hp * H + W * Wp) * f
        est += 2 * 2 * B * Hp * Wp * f
    return est


_PLANE_BLOCK_CAP = 16                 # compile-time unroll cap per grid step
_VMEM_BUDGET = 24 * 1024 * 1024       # conservative; safe on v5e/v6e/v7x


def _choose_plane_block(NC, H, W, Hc, Wc, with_pool, Hp, Wp):
    """Largest divisor of NC (<= cap) whose VMEM estimate fits the budget."""
    best = 1
    for d in range(1, min(NC, _PLANE_BLOCK_CAP) + 1):
        if NC % d != 0:
            continue
        if _vmem_bytes_estimate(d, H, W, Hc, Wc, with_pool, Hp, Wp) <= _VMEM_BUDGET:
            best = d
    return best


def _ssim_level_pallas(X, Y, mask, ghT, gw, C1, C2, pool_mats=None):
    """One pyramid level. Returns (ssim_sum (N,C), cs_sum (N,C), X_pooled, Y_pooled)."""
    N, C, H, W = X.shape
    NC = N * C
    Hc, Wc = mask.shape
    Xf = X.reshape(NC, H, W)
    Yf = Y.reshape(NC, H, W)
    with_pool = pool_mats is not None

    Hp = Wp = 0
    if with_pool:
        phT, pwm = pool_mats
        Hp, Wp = int(phT.shape[0]), int(pwm.shape[1])

    B = _choose_plane_block(NC, H, W, Hc, Wc, with_pool, Hp, Wp)
    n_blocks = NC // B

    kernel = _make_level_kernel(float(C1), float(C2), with_pool, B)

    in_specs = [
        pl.BlockSpec((Hc, H), lambda i: (0, 0)),        # ghT (resident)
        pl.BlockSpec((W, Wc), lambda i: (0, 0)),        # gw  (resident)
        pl.BlockSpec((Hc, Wc), lambda i: (0, 0)),       # mask (resident)
        pl.BlockSpec((B, H, W), lambda i: (i, 0, 0)),   # X plane block
        pl.BlockSpec((B, H, W), lambda i: (i, 0, 0)),   # Y plane block
    ]
    inputs = [ghT, gw, mask, Xf, Yf]
    out_shape = [jax.ShapeDtypeStruct((n_blocks, 8, 128), jnp.float32),
                 jax.ShapeDtypeStruct((n_blocks, 8, 128), jnp.float32)]
    out_specs = [pl.BlockSpec((1, 8, 128), lambda i: (i, 0, 0)),
                 pl.BlockSpec((1, 8, 128), lambda i: (i, 0, 0))]

    if with_pool:
        in_specs += [pl.BlockSpec((Hp, H), lambda i: (0, 0)),
                     pl.BlockSpec((W, Wp), lambda i: (0, 0))]
        inputs += [pool_mats[0], pool_mats[1]]
        out_shape += [jax.ShapeDtypeStruct((NC, Hp, Wp), jnp.float32),
                      jax.ShapeDtypeStruct((NC, Hp, Wp), jnp.float32)]
        out_specs += [pl.BlockSpec((B, Hp, Wp), lambda i: (i, 0, 0)),
                      pl.BlockSpec((B, Hp, Wp), lambda i: (i, 0, 0))]

    est = _vmem_bytes_estimate(B, H, W, Hc, Wc, with_pool, Hp, Wp)
    vmem_limit = int(min(max(2 * est, 32 * 1024 * 1024), 64 * 1024 * 1024))
    # TODO(synk): for very large images (H*W f32 plane > ~8 MiB) add H-tiling
    # with a (win_size-1)-row halo; current per-plane tiling is fine for typical
    # pyramid-level sizes and fits v7x's 64 MiB VMEM.

    outs = pl.pallas_call(
        kernel,
        out_shape=tuple(out_shape),
        grid=(n_blocks,),
        in_specs=in_specs,
        out_specs=tuple(out_specs),
        compiler_params=pltpu.CompilerParams(
            dimension_semantics=("parallel",),
            vmem_limit_bytes=vmem_limit),
    )(*inputs)

    ssim_sum = outs[0][:, 0, :B].reshape(N, C)
    cs_sum = outs[1][:, 0, :B].reshape(N, C)
    if with_pool:
        Xp = outs[2].reshape(N, C, Hp, Wp)
        Yp = outs[3].reshape(N, C, Hp, Wp)
        return ssim_sum, cs_sum, Xp, Yp
    return ssim_sum, cs_sum, None, None


# --------------------------------------------------------------------------
# Module equivalent
# --------------------------------------------------------------------------
class MaskedMSSSIMPallas:
    def __init__(self, not_valid_mask, weights, data_range=255,
                 size_average=True, win_size=11, win_sigma=1.5,
                 channel=3, K=(0.01, 0.03)):
        if win_size % 2 != 1:
            raise ValueError("Window size should be odd.")
        self.win_size = int(win_size)
        self.win = _fspecial_gauss_1d(win_size, win_sigma)     # (win_size,)
        weights = np.asarray(weights, np.float32)
        self.weights = jnp.asarray(weights)
        self.data_range = data_range
        self.size_average = size_average
        self.K = K
        self.channel = channel
        self.levels = int(weights.shape[0])

        nv = np.asarray(not_valid_mask, np.float32)
        assert nv.ndim == 2
        H0, W0 = nv.shape
        assert min(H0, W0) > (win_size - 1) * 2 ** 4, \
            "Image size should be larger than %d" % ((win_size - 1) * 2 ** 4)

        # Per-level precompute: valid masks (reference recipe), n_valid,
        # banded Gaussian conv matrices and pooling matrices.
        self.level_shapes = []
        self.level_masks = []
        self.level_n_valid = []
        self.level_ghT = []
        self.level_gw = []
        self.level_phT = []
        self.level_pw = []

        ws = self.win_size
        h, w = H0, W0
        nv_iter = nv
        for lvl in range(self.levels):
            assert min(h, w) >= ws, "Gaussian window does not fit at level %d" % lvl
            blurred = _gaussian_valid_blur_np(nv_iter, self.win)
            mask = (blurred == 0.0).astype(np.float32)   # valid = no invalid pixel in window
            n_valid = float(mask.sum())
            assert n_valid > 0.0, "All pixels invalid at pyramid level %d" % lvl
            self.level_shapes.append((h, w))
            self.level_masks.append(jnp.asarray(mask))
            self.level_n_valid.append(n_valid)
            self.level_ghT.append(jnp.asarray(_valid_conv_matrix(h, self.win)))      # (Hc,H)
            self.level_gw.append(jnp.asarray(_valid_conv_matrix(w, self.win).T))     # (W,Wc)
            if lvl < self.levels - 1:
                ph, pw = h % 2, w % 2
                phT, pwm, hp, wp = _pool_matrices(h, w)
                self.level_phT.append(jnp.asarray(phT))
                self.level_pw.append(jnp.asarray(pwm))
                pooled = _avg_pool2d_np(nv_iter, ph, pw)
                nv_iter = (pooled != 0.0).astype(np.float32)
                h, w = hp, wp

    def __call__(self, X, Y):
        assert X.shape == Y.shape and X.ndim == 4
        assert tuple(X.shape[2:]) == self.level_shapes[0]
        K1, K2 = self.K
        C1 = (K1 * self.data_range) ** 2
        C2 = (K2 * self.data_range) ** 2

        X = jnp.asarray(X, jnp.float32)
        Y = jnp.asarray(Y, jnp.float32)
        # TODO(synk): optionally stream X/Y as bfloat16 on v6e/v7x (f32 MXU
        # accumulation) to halve HBM traffic; kept f32 to match reference numerics.

        mcs = []
        ssim_per_channel = None
        for lvl in range(self.levels):
            with_pool = lvl < self.levels - 1
            pool_mats = ((self.level_phT[lvl], self.level_pw[lvl])
                         if with_pool else None)
            ssim_sum, cs_sum, Xp, Yp = _ssim_level_pallas(
                X, Y, self.level_masks[lvl],
                self.level_ghT[lvl], self.level_gw[lvl],
                C1, C2, pool_mats)
            inv_n = np.float32(1.0 / self.level_n_valid[lvl])
            ssim_per_channel = ssim_sum * inv_n          # (N, C)
            cs = cs_sum * inv_n                          # (N, C)
            if with_pool:
                mcs.append(jax.nn.relu(cs))
                X, Y = Xp, Yp                            # fused in-kernel 2x2 avg-pool

        ssim_per_channel = jax.nn.relu(ssim_per_channel)
        mcs_and_ssim = jnp.stack(mcs + [ssim_per_channel], axis=0)   # (L, N, C)
        ms_ssim_val = jnp.prod(
            mcs_and_ssim ** self.weights.reshape(-1, 1, 1), axis=0)  # (N, C)
        if self.size_average:
            return ms_ssim_val.mean()
        return ms_ssim_val.mean(axis=1)


# --------------------------------------------------------------------------
# main
# --------------------------------------------------------------------------
if __name__ == "__main__":
    # win_size=3 requires min(H, W) > (3-1)*2**4 = 32 (reference assert).
    N, C, H, W = 2, 3, 48, 48
    win_size, win_sigma = 3, 1.5
    data_range = 255.0
    weights = np.array([0.2, 0.3, 0.5], dtype=np.float32)   # 3 pyramid levels

    # Deterministic "not valid" mask: an invalid 8x8 block in the corner.
    not_valid = np.zeros((H, W), dtype=np.float32)
    not_valid[:8, :8] = 1.0

    key = jax.random.PRNGKey(0)
    kx, ky = jax.random.split(key)
    X = jax.random.uniform(kx, (N, C, H, W), jnp.float32, 0.0, 255.0)
    Y = jax.random.uniform(ky, (N, C, H, W), jnp.float32, 0.0, 255.0)

    model = MaskedMSSSIMPallas(not_valid, weights, data_range=data_range,
                               size_average=True, win_size=win_size,
                               win_sigma=win_sigma, channel=C)
    out = model(X, Y)
    out = jax.block_until_ready(out)
    assert out.shape == () and np.isfinite(np.asarray(out))
    print("KERNEL_OK")
</pallas_src>

<mosaic_0001>
module attributes {stable_mosaic.version = 11 : i64} {
  func.func @kernel(%arg0: i32, %arg1: memref<46x48xf32, #tpu.memory_space<vmem>>, %arg2: memref<48x46xf32, #tpu.memory_space<vmem>>, %arg3: memref<46x46xf32, #tpu.memory_space<vmem>>, %arg4: memref<6x48x48xf32, #tpu.memory_space<vmem>>, %arg5: memref<6x48x48xf32, #tpu.memory_space<vmem>>, %arg6: memref<24x48xf32, #tpu.memory_space<vmem>>, %arg7: memref<48x24xf32, #tpu.memory_space<vmem>>, %arg8: memref<1x8x128xf32, #tpu.memory_space<vmem>>, %arg9: memref<1x8x128xf32, #tpu.memory_space<vmem>>, %arg10: memref<6x24x24xf32, #tpu.memory_space<vmem>>, %arg11: memref<6x24x24xf32, #tpu.memory_space<vmem>>) attributes {dimension_semantics = [#tpu.dimension_semantics<parallel>], iteration_bounds = array<i64: 1>, scalar_prefetch = 0 : i64, scratch_operands = 0 : i64, tpu.core_type = #tpu.core_type<tc>, window_params = [{pipeline_mode = #tpu.pipeline_mode<synchronous>, transform_indices = @transform_0, window_bounds = array<i64: 46, 48>}, {pipeline_mode = #tpu.pipeline_mode<synchronous>, transform_indices = @transform_1, window_bounds = array<i64: 48, 46>}, {pipeline_mode = #tpu.pipeline_mode<synchronous>, transform_indices = @transform_2, window_bounds = array<i64: 46, 46>}, {transform_indices = @transform_3, window_bounds = array<i64: 6, 48, 48>}, {transform_indices = @transform_4, window_bounds = array<i64: 6, 48, 48>}, {pipeline_mode = #tpu.pipeline_mode<synchronous>, transform_indices = @transform_5, window_bounds = array<i64: 24, 48>}, {pipeline_mode = #tpu.pipeline_mode<synchronous>, transform_indices = @transform_6, window_bounds = array<i64: 48, 24>}, {transform_indices = @transform_7, window_bounds = array<i64: 1, 8, 128>}, {transform_indices = @transform_8, window_bounds = array<i64: 1, 8, 128>}, {transform_indices = @transform_9, window_bounds = array<i64: 6, 24, 24>}, {transform_indices = @transform_10, window_bounds = array<i64: 6, 24, 24>}]} {
    %c0 = arith.constant 0 : index
    %c0_0 = arith.constant 0 : index
    %0 = vector.load %arg1[%c0, %c0_0] : memref<46x48xf32, #tpu.memory_space<vmem>>, vector<46x48xf32>
    %c0_1 = arith.constant 0 : index
    %c0_2 = arith.constant 0 : index
    %1 = vector.load %arg2[%c0_1, %c0_2] : memref<48x46xf32, #tpu.memory_space<vmem>>, vector<48x46xf32>
    %c0_3 = arith.constant 0 : index
    %c0_4 = arith.constant 0 : index
    %2 = vector.load %arg3[%c0_3, %c0_4] : memref<46x46xf32, #tpu.memory_space<vmem>>, vector<46x46xf32>
    %c0_5 = arith.constant 0 : index
    %c0_6 = arith.constant 0 : index
    %3 = vector.load %arg6[%c0_5, %c0_6] : memref<24x48xf32, #tpu.memory_space<vmem>>, vector<24x48xf32>
    %c0_7 = arith.constant 0 : index
    %c0_8 = arith.constant 0 : index
    %4 = vector.load %arg7[%c0_7, %c0_8] : memref<48x24xf32, #tpu.memory_space<vmem>>, vector<48x24xf32>
    %5 = tpu.iota {dimensions = array<i32: 1>} : vector<8x128xi32>
    %cst = arith.constant 0.000000e+00 : f32
    %6 = vector.broadcast %cst : f32 to vector<8x128xf32>
    %cst_9 = arith.constant 0.000000e+00 : f32
    %7 = vector.broadcast %cst_9 : f32 to vector<8x128xf32>
    %c0_10 = arith.constant 0 : index
    %c0_11 = arith.constant 0 : index
    %c0_12 = arith.constant 0 : index
    %8 = vector.load %arg4[%c0_10, %c0_11, %c0_12] : memref<6x48x48xf32, #tpu.memory_space<vmem>>, vector<1x48x48xf32>
    %9 = vector.shape_cast %8 : vector<1x48x48xf32> to vector<48x48xf32>
    %c0_13 = arith.constant 0 : index
    %c0_14 = arith.constant 0 : index
    %c0_15 = arith.constant 0 : index
    %10 = vector.load %arg5[%c0_13, %c0_14, %c0_15] : memref<6x48x48xf32, #tpu.memory_space<vmem>>, vector<1x48x48xf32>
    %11 = vector.shape_cast %10 : vector<1x48x48xf32> to vector<48x48xf32>
    %cst_16 = arith.constant dense<0.000000e+00> : vector<46x48xf32>
    %12 = tpu.matmul %0, %9, %cst_16 {dimension_numbers = #tpu.dot_dimension_numbers<[1], [0], [0], [1], [0, 0, 1, 1], [], []>} : vector<46x48xf32>, vector<48x48xf32>, vector<46x48xf32> -> vector<46x48xf32>
    %cst_17 = arith.constant dense<0.000000e+00> : vector<46x46xf32>
    %13 = tpu.matmul %12, %1, %cst_17 {dimension_numbers = #tpu.dot_dimension_numbers<[1], [0], [0], [1], [0, 0, 1, 1], [], []>} : vector<46x48xf32>, vector<48x46xf32>, vector<46x46xf32> -> vector<46x46xf32>
    %cst_18 = arith.constant dense<0.000000e+00> : vector<46x48xf32>
    %14 = tpu.matmul %0, %11, %cst_18 {dimension_numbers = #tpu.dot_dimension_numbers<[1], [0], [0], [1], [0, 0, 1, 1], [], []>} : vector<46x48xf32>, vector<48x48xf32>, vector<46x48xf32> -> vector<46x48xf32>
    %cst_19 = arith.constant dense<0.000000e+00> : vector<46x46xf32>
    %15 = tpu.matmul %14, %1, %cst_19 {dimension_numbers = #tpu.dot_dimension_numbers<[1], [0], [0], [1], [0, 0, 1, 1], [], []>} : vector<46x48xf32>, vector<48x46xf32>, vector<46x46xf32> -> vector<46x46xf32>
    %16 = arith.mulf %9, %9 : vector<48x48xf32>
    %cst_20 = arith.constant dense<0.000000e+00> : vector<46x48xf32>
    %17 = tpu.matmul %0, %16, %cst_20 {dimension_numbers = #tpu.dot_dimension_numbers<[1], [0], [0], [1], [0, 0, 1, 1], [], []>} : vector<46x48xf32>, vector<48x48xf32>, vector<46x48xf32> -> vector<46x48xf32>
    %cst_21 = arith.constant dense<0.000000e+00> : vector<46x46xf32>
    %18 = tpu.matmul %17, %1, %cst_21 {dimension_numbers = #tpu.dot_dimension_numbers<[1], [0], [0], [1], [0, 0, 1, 1], [], []>} : vector<46x48xf32>, vector<48x46xf32>, vector<46x46xf32> -> vector<46x46xf32>
    %19 = arith.mulf %11, %11 : vector<48x48xf32>
    %cst_22 = arith.constant dense<0.000000e+00> : vector<46x48xf32>
    %20 = tpu.matmul %0, %19, %cst_22 {dimension_numbers = #tpu.dot_dimension_numbers<[1], [0], [0], [1], [0, 0, 1, 1], [], []>} : vector<46x48xf32>, vector<48x48xf32>, vector<46x48xf32> -> vector<46x48xf32>
    %cst_23 = arith.constant dense<0.000000e+00> : vector<46x46xf32>
    %21 = tpu.matmul %20, %1, %cst_23 {dimension_numbers = #tpu.dot_dimension_numbers<[1], [0], [0], [1], [0, 0, 1, 1], [], []>} : vector<46x48xf32>, vector<48x46xf32>, vector<46x46xf32> -> vector<46x46xf32>
    %22 = arith.mulf %9, %11 : vector<48x48xf32>
    %cst_24 = arith.constant dense<0.000000e+00> : vector<46x48xf32>
    %23 = tpu.matmul %0, %22, %cst_24 {dimension_numbers = #tpu.dot_dimension_numbers<[1], [0], [0], [1], [0, 0, 1, 1], [], []>} : vector<46x48xf32>, vector<48x48xf32>, vector<46x48xf32> -> vector<46x48xf32>
    %cst_25 = arith.constant dense<0.000000e+00> : vector<46x46xf32>
    %24 = tpu.matmul %23, %1, %cst_25 {dimension_numbers = #tpu.dot_dimension_numbers<[1], [0], [0], [1], [0, 0, 1, 1], [], []>} : vector<46x48xf32>, vector<48x46xf32>, vector<46x46xf32> -> vector<46x46xf32>
    %25 = arith.mulf %13, %13 : vector<46x46xf32>
    %26 = arith.mulf %15, %15 : vector<46x46xf32>
    %27 = arith.mulf %13, %15 : vector<46x46xf32>
    %28 = arith.subf %18, %25 : vector<46x46xf32>
    %29 = arith.subf %21, %26 : vector<46x46xf32>
    %30 = arith.subf %24, %27 : vector<46x46xf32>
    %cst_26 = arith.constant 2.000000e+00 : f32
    %31 = vector.broadcast %cst_26 : f32 to vector<46x46xf32>
    %32 = arith.mulf %31, %30 : vector<46x46xf32>
    %cst_27 = arith.constant 5.852250e+01 : f32
    %33 = vector.broadcast %cst_27 : f32 to vector<46x46xf32>
    %34 = arith.addf %32, %33 : vector<46x46xf32>
    %35 = arith.addf %28, %29 : vector<46x46xf32>
    %cst_28 = arith.constant 5.852250e+01 : f32
    %36 = vector.broadcast %cst_28 : f32 to vector<46x46xf32>
    %37 = arith.addf %35, %36 : vector<46x46xf32>
    %38 = tpu.reciprocal %37 {approx = true} : vector<46x46xf32> -> vector<46x46xf32>
    %39 = arith.mulf %37, %38 : vector<46x46xf32>
    %cst_29 = arith.constant 2.000000e+00 : f32
    %40 = vector.broadcast %cst_29 : f32 to vector<46x46xf32>
    %41 = arith.subf %40, %39 : vector<46x46xf32>
    %42 = arith.mulf %38, %41 : vector<46x46xf32>
    %43 = arith.mulf %34, %42 : vector<46x46xf32>
    %cst_30 = arith.constant 2.000000e+00 : f32
    %44 = vector.broadcast %cst_30 : f32 to vector<46x46xf32>
    %45 = arith.mulf %44, %27 : vector<46x46xf32>
    %cst_31 = arith.constant 6.502500e+00 : f32
    %46 = vector.broadcast %cst_31 : f32 to vector<46x46xf32>
    %47 = arith.addf %45, %46 : vector<46x46xf32>
    %48 = arith.addf %25, %26 : vector<46x46xf32>
    %cst_32 = arith.constant 6.502500e+00 : f32
    %49 = vector.broadcast %cst_32 : f32 to vector<46x46xf32>
    %50 = arith.addf %48, %49 : vector<46x46xf32>
    %51 = tpu.reciprocal %50 {approx = true} : vector<46x46xf32> -> vector<46x46xf32>
    %52 = arith.mulf %50, %51 : vector<46x46xf32>
    %cst_33 = arith.constant 2.000000e+00 : f32
    %53 = vector.broadcast %cst_33 : f32 to vector<46x46xf32>
    %54 = arith.subf %53, %52 : vector<46x46xf32>
    %55 = arith.mulf %51, %54 : vector<46x46xf32>
    %56 = arith.mulf %47, %55 : vector<46x46xf32>
    %57 = arith.mulf %43, %2 : vector<46x46xf32>
    %58 = vector.shape_cast %57 : vector<46x46xf32> to vector<1x46x46xf32>
    %cst_34 = arith.constant dense<0.000000e+00> : vector<1xf32>
    %59 = vector.multi_reduction <add>, %58, %cst_34 [1, 2] : vector<1x46x46xf32> to vector<1xf32>
    %60 = vector.shape_cast %59 : vector<1xf32> to vector<1x1x1xf32>
    %61 = vector.extract %60[0, 0, 0] : f32 from vector<1x1x1xf32>
    %62 = arith.mulf %57, %56 : vector<46x46xf32>
    %63 = vector.shape_cast %62 : vector<46x46xf32> to vector<1x46x46xf32>
    %cst_35 = arith.constant dense<0.000000e+00> : vector<1xf32>
    %64 = vector.multi_reduction <add>, %63, %cst_35 [1, 2] : vector<1x46x46xf32> to vector<1xf32>
    %65 = vector.shape_cast %64 : vector<1xf32> to vector<1x1x1xf32>
    %66 = vector.extract %65[0, 0, 0] : f32 from vector<1x1x1xf32>
    %c0_i32 = arith.constant 0 : i32
    %67 = vector.broadcast %c0_i32 : i32 to vector<8x128xi32>
    %68 = arith.cmpi eq, %5, %67 : vector<8x128xi32>
    %69 = vector.broadcast %66 : f32 to vector<8x128xf32>
    %70 = arith.select %68, %69, %6 : vector<8x128xi1>, vector<8x128xf32>
    %c0_i32_36 = arith.constant 0 : i32
    %71 = vector.broadcast %c0_i32_36 : i32 to vector<8x128xi32>
    %72 = arith.cmpi eq, %5, %71 : vector<8x128xi32>
    %73 = vector.broadcast %61 : f32 to vector<8x128xf32>
    %74 = arith.select %72, %73, %7 : vector<8x128xi1>, vector<8x128xf32>
    %cst_37 = arith.constant dense<0.000000e+00> : vector<24x48xf32>
    %75 = tpu.matmul %3, %9, %cst_37 {dimension_numbers = #tpu.dot_dimension_numbers<[1], [0], [0], [1], [0, 0, 1, 1], [], []>} : vector<24x48xf32>, vector<48x48xf32>, vector<24x48xf32> -> vector<24x48xf32>
    %cst_38 = arith.constant dense<0.000000e+00> : vector<24x24xf32>
    %76 = tpu.matmul %75, %4, %cst_38 {dimension_numbers = #tpu.dot_dimension_numbers<[1], [0], [0], [1], [0, 0, 1, 1], [], []>} : vector<24x48xf32>, vector<48x24xf32>, vector<24x24xf32> -> vector<24x24xf32>
    %c0_39 = arith.constant 0 : index
    %c0_40 = arith.constant 0 : index
    %c0_41 = arith.constant 0 : index
    %77 = vector.load %arg10[%c0_39, %c0_40, %c0_41] : memref<6x24x24xf32, #tpu.memory_space<vmem>>, vector<1x24x24xf32>
    %78 = vector.shape_cast %77 : vector<1x24x24xf32> to vector<24x24xf32>
    %79 = vector.shape_cast %76 : vector<24x24xf32> to vector<1x24x24xf32>
    tpu.vector_store %arg10[%c0_39, %c0_40, %c0_41], %79 {strides = array<i32>} : memref<6x24x24xf32, #tpu.memory_space<vmem>>, vector<1x24x24xf32>,
    %cst_42 = arith.constant dense<0.000000e+00> : vector<24x48xf32>
    %80 = tpu.matmul %3, %11, %cst_42 {dimension_numbers = #tpu.dot_dimension_numbers<[1], [0], [0], [1], [0, 0, 1, 1], [], []>} : vector<24x48xf32>, vector<48x48xf32>, vector<24x48xf32> -> vector<24x48xf32>
    %cst_43 = arith.constant dense<0.000000e+00> : vector<24x24xf32>
    %81 = tpu.matmul %80, %4, %cst_43 {dimension_numbers = #tpu.dot_dimension_numbers<[1], [0], [0], [1], [0, 0, 1, 1], [], []>} : vector<24x48xf32>, vector<48x24xf32>, vector<24x24xf32> -> vector<24x24xf32>
    %c0_44 = arith.constant 0 : index
    %c0_45 = arith.constant 0 : index
    %c0_46 = arith.constant 0 : index
    %82 = vector.load %arg11[%c0_44, %c0_45, %c0_46] : memref<6x24x24xf32, #tpu.memory_space<vmem>>, vector<1x24x24xf32>
    %83 = vector.shape_cast %82 : vector<1x24x24xf32> to vector<24x24xf32>
    %84 = vector.shape_cast %81 : vector<24x24xf32> to vector<1x24x24xf32>
    tpu.vector_store %arg11[%c0_44, %c0_45, %c0_46], %84 {strides = array<i32>} : memref<6x24x24xf32, #tpu.memory_space<vmem>>, vector<1x24x24xf32>,
    %c1 = arith.constant 1 : index
    %c0_47 = arith.constant 0 : index
    %c0_48 = arith.constant 0 : index
    %85 = vector.load %arg4[%c1, %c0_47, %c0_48] : memref<6x48x48xf32, #tpu.memory_space<vmem>>, vector<1x48x48xf32>
    %86 = vector.shape_cast %85 : vector<1x48x48xf32> to vector<48x48xf32>
    %c1_49 = arith.constant 1 : index
    %c0_50 = arith.constant 0 : index
    %c0_51 = arith.constant 0 : index
    %87 = vector.load %arg5[%c1_49, %c0_50, %c0_51] : memref<6x48x48xf32, #tpu.memory_space<vmem>>, vector<1x48x48xf32>
    %88 = vector.shape_cast %87 : vector<1x48x48xf32> to vector<48x48xf32>
    %cst_52 = arith.constant dense<0.000000e+00> : vector<46x48xf32>
    %89 = tpu.matmul %0, %86, %cst_52 {dimension_numbers = #tpu.dot_dimension_numbers<[1], [0], [0], [1], [0, 0, 1, 1], [], []>} : vector<46x48xf32>, vector<48x48xf32>, vector<46x48xf32> -> vector<46x48xf32>
    %cst_53 = arith.constant dense<0.000000e+00> : vector<46x46xf32>
    %90 = tpu.matmul %89, %1, %cst_53 {dimension_numbers = #tpu.dot_dimension_numbers<[1], [0], [0], [1], [0, 0, 1, 1], [], []>} : vector<46x48xf32>, vector<48x46xf32>, vector<46x46xf32> -> vector<46x46xf32>
    %cst_54 = arith.constant dense<0.000000e+00> : vector<46x48xf32>
    %91 = tpu.matmul %0, %88, %cst_54 {dimension_numbers = #tpu.dot_dimension_numbers<[1], [0], [0], [1], [0, 0, 1, 1], [], []>} : vector<46x48xf32>, vector<48x48xf32>, vector<46x48xf32> -> vector<46x48xf32>
    %cst_55 = arith.constant dense<0.000000e+00> : vector<46x46xf32>
    %92 = tpu.matmul %91, %1, %cst_55 {dimension_numbers = #tpu.dot_dimension_numbers<[1], [0], [0], [1], [0, 0, 1, 1], [], []>} : vector<46x48xf32>, vector<48x46xf32>, vector<46x46xf32> -> vector<46x46xf32>
    %93 = arith.mulf %86, %86 : vector<48x48xf32>
    %cst_56 = arith.constant dense<0.000000e+00> : vector<46x48xf32>
    %94 = tpu.matmul %0, %93, %cst_56 {dimension_numbers = #tpu.dot_dimension_numbers<[1], [0], [0], [1], [0, 0, 1, 1], [], []>} : vector<46x48xf32>, vector<48x48xf32>, vector<46x48xf32> -> vector<46x48xf32>
    %cst_57 = arith.constant dense<0.000000e+00> : vector<46x46xf32>
    %95 = tpu.matmul %94, %1, %cst_57 {dimension_numbers = #tpu.dot_dimension_numbers<[1], [0], [0], [1], [0, 0, 1, 1], [], []>} : vector<46x48xf32>, vector<48x46xf32>, vector<46x46xf32> -> vector<46x46xf32>
    %96 = arith.mulf %88, %88 : vector<48x48xf32>
    %cst_58 = arith.constant dense<0.000000e+00> : vector<46x48xf32>
    %97 = tpu.matmul %0, %96, %cst_58 {dimension_numbers = #tpu.dot_dimension_numbers<[1], [0], [0], [1], [0, 0, 1, 1], [], []>} : vector<46x48xf32>, vector<48x48xf32>, vector<46x48xf32> -> vector<46x48xf32>
    %cst_59 = arith.constant dense<0.000000e+00> : vector<46x46xf32>
    %98 = tpu.matmul %97, %1, %cst_59 {dimension_numbers = #tpu.dot_dimension_numbers<[1], [0], [0], [1], [0, 0, 1, 1], [], []>} : vector<46x48xf32>, vector<48x46xf32>, vector<46x46xf32> -> vector<46x46xf32>
    %99 = arith.mulf %86, %88 : vector<48x48xf32>
    %cst_60 = arith.constant dense<0.000000e+00> : vector<46x48xf32>
    %100 = tpu.matmul %0, %99, %cst_60 {dimension_numbers = #tpu.dot_dimension_numbers<[1], [0], [0], [1], [0, 0, 1, 1], [], []>} : vector<46x48xf32>, vector<48x48xf32>, vector<46x48xf32> -> vector<46x48xf32>
    %cst_61 = arith.constant dense<0.000000e+00> : vector<46x46xf32>
    %101 = tpu.matmul %100, %1, %cst_61 {dimension_numbers = #tpu.dot_dimension_numbers<[1], [0], [0], [1], [0, 0, 1, 1], [], []>} : vector<46x48xf32>, vector<48x46xf32>, vector<46x46xf32> -> vector<46x46xf32>
    %102 = arith.mulf %90, %90 : vector<46x46xf32>
    %103 = arith.mulf %92, %92 : vector<46x46xf32>
    %104 = arith.mulf %90, %92 : vector<46x46xf32>
    %105 = arith.subf %95, %102 : vector<46x46xf32>
    %106 = arith.subf %98, %103 : vector<46x46xf32>
    %107 = arith.subf %101, %104 : vector<46x46xf32>
    %cst_62 = arith.constant 2.000000e+00 : f32
    %108 = vector.broadcast %cst_62 : f32 to vector<46x46xf32>
    %109 = arith.mulf %108, %107 : vector<46x46xf32>
    %cst_63 = arith.constant 5.852250e+01 : f32
    %110 = vector.broadcast %cst_63 : f32 to vector<46x46xf32>
    %111 = arith.addf %109, %110 : vector<46x46xf32>
    %112 = arith.addf %105, %106 : vector<46x46xf32>
    %cst_64 = arith.constant 5.852250e+01 : f32
    %113 = vector.broadcast %cst_64 : f32 to vector<46x46xf32>
    %114 = arith.addf %112, %113 : vector<46x46xf32>
    %115 = tpu.reciprocal %114 {approx = true} : vector<46x46xf32> -> vector<46x46xf32>
    %116 = arith.mulf %114, %115 : vector<46x46xf32>
    %cst_65 = arith.constant 2.000000e+00 : f32
    %117 = vector.broadcast %cst_65 : f32 to vector<46x46xf32>
    %118 = arith.subf %117, %116 : vector<46x46xf32>
    %119 = arith.mulf %115, %118 : vector<46x46xf32>
    %120 = arith.mulf %111, %119 : vector<46x46xf32>
    %cst_66 = arith.constant 2.000000e+00 : f32
    %121 = vector.broadcast %cst_66 : f32 to vector<46x46xf32>
    %122 = arith.mulf %121, %104 : vector<46x46xf32>
    %cst_67 = arith.constant 6.502500e+00 : f32
    %123 = vector.broadcast %cst_67 : f32 to vector<46x46xf32>
    %124 = arith.addf %122, %123 : vector<46x46xf32>
    %125 = arith.addf %102, %103 : vector<46x46xf32>
    %cst_68 = arith.constant 6.502500e+00 : f32
    %126 = vector.broadcast %cst_68 : f32 to vector<46x46xf32>
    %127 = arith.addf %125, %126 : vector<46x46xf32>
    %128 = tpu.reciprocal %127 {approx = true} : vector<46x46xf32> -> vector<46x46xf32>
    %129 = arith.mulf %127, %128 : vector<46x46xf32>
    %cst_69 = arith.constant 2.000000e+00 : f32
    %130 = vector.broadcast %cst_69 : f32 to vector<46x46xf32>
    %131 = arith.subf %130, %129 : vector<46x46xf32>
    %132 = arith.mulf %128, %131 : vector<46x46xf32>
    %133 = arith.mulf %124, %132 : vector<46x46xf32>
    %134 = arith.mulf %120, %2 : vector<46x46xf32>
    %135 = vector.shape_cast %134 : vector<46x46xf32> to vector<1x46x46xf32>
    %cst_70 = arith.constant dense<0.000000e+00> : vector<1xf32>
    %136 = vector.multi_reduction <add>, %135, %cst_70 [1, 2] : vector<1x46x46xf32> to vector<1xf32>
    %137 = vector.shape_cast %136 : vector<1xf32> to vector<1x1x1xf32>
    %138 = vector.extract %137[0, 0, 0] : f32 from vector<1x1x1xf32>
    %139 = arith.mulf %134, %133 : vector<46x46xf32>
    %140 = vector.shape_cast %139 : vector<46x46xf32> to vector<1x46x46xf32>
    %cst_71 = arith.constant dense<0.000000e+00> : vector<1xf32>
    %141 = vector.multi_reduction <add>, %140, %cst_71 [1, 2] : vector<1x46x46xf32> to vector<1xf32>
    %142 = vector.shape_cast %141 : vector<1xf32> to vector<1x1x1xf32>
    %143 = vector.extract %142[0, 0, 0] : f32 from vector<1x1x1xf32>
    %c1_i32 = arith.constant 1 : i32
    %144 = vector.broadcast %c1_i32 : i32 to vector<8x128xi32>
    %145 = arith.cmpi eq, %5, %144 : vector<8x128xi32>
    %146 = vector.broadcast %143 : f32 to vector<8x128xf32>
    %147 = arith.select %145, %146, %70 : vector<8x128xi1>, vector<8x128xf32>
    %c1_i32_72 = arith.constant 1 : i32
    %148 = vector.broadcast %c1_i32_72 : i32 to vector<8x128xi32>
    %149 = arith.cmpi eq, %5, %148 : vector<8x128xi32>
    %150 = vector.broadcast %138 : f32 to vector<8x128xf32>
    %151 = arith.select %149, %150, %74 : vector<8x128xi1>, vector<8x128xf32>
    %cst_73 = arith.constant dense<0.000000e+00> : vector<24x48xf32>
    %152 = tpu.matmul %3, %86, %cst_73 {dimension_numbers = #tpu.dot_dimension_numbers<[1], [0], [0], [1], [0, 0, 1, 1], [], []>} : vector<24x48xf32>, vector<48x48xf32>, vector<24x48xf32> -> vector<24x48xf32>
    %cst_74 = arith.constant dense<0.000000e+00> : vector<24x24xf32>
    %153 = tpu.matmul %152, %4, %cst_74 {dimension_numbers = #tpu.dot_dimension_numbers<[1], [0], [0], [1], [0, 0, 1, 1], [], []>} : vector<24x48xf32>, vector<48x24xf32>, vector<24x24xf32> -> vector<24x24xf32>
    %c1_75 = arith.constant 1 : index
    %c0_76 = arith.constant 0 : index
    %c0_77 = arith.constant 0 : index
    %154 = vector.load %arg10[%c1_75, %c0_76, %c0_77] : memref<6x24x24xf32, #tpu.memory_space<vmem>>, vector<1x24x24xf32>
    %155 = vector.shape_cast %154 : vector<1x24x24xf32> to vector<24x24xf32>
    %156 = vector.shape_cast %153 : vector<24x24xf32> to vector<1x24x24xf32>
    tpu.vector_store %arg10[%c1_75, %c0_76, %c0_77], %156 {strides = array<i32>} : memref<6x24x24xf32, #tpu.memory_space<vmem>>, vector<1x24x24xf32>,
    %cst_78 = arith.constant dense<0.000000e+00> : vector<24x48xf32>
    %157 = tpu.matmul %3, %88, %cst_78 {dimension_numbers = #tpu.dot_dimension_numbers<[1], [0], [0], [1], [0, 0, 1, 1], [], []>} : vector<24x48xf32>, vector<48x48xf32>, vector<24x48xf32> -> vector<24x48xf32>
    %cst_79 = arith.constant dense<0.000000e+00> : vector<24x24xf32>
    %158 = tpu.matmul %157, %4, %cst_79 {dimension_numbers = #tpu.dot_dimension_numbers<[1], [0], [0], [1], [0, 0, 1, 1], [], []>} : vector<24x48xf32>, vector<48x24xf32>, vector<24x24xf32> -> vector<24x24xf32>
    %c1_80 = arith.constant 1 : index
    %c0_81 = arith.constant 0 : index
    %c0_82 = arith.constant 0 : index
    %159 = vector.load %arg11[%c1_80, %c0_81, %c0_82] : memref<6x24x24xf32, #tpu.memory_space<vmem>>, vector<1x24x24xf32>
    %160 = vector.shape_cast %159 : vector<1x24x24xf32> to vector<24x24xf32>
    %161 = vector.shape_cast %158 : vector<24x24xf32> to vector<1x24x24xf32>
    tpu.vector_store %arg11[%c1_80, %c0_81, %c0_82], %161 {strides = array<i32>} : memref<6x24x24xf32, #tpu.memory_space<vmem>>, vector<1x24x24xf32>,
    %c2 = arith.constant 2 : index
    %c0_83 = arith.constant 0 : index
    %c0_84 = arith.constant 0 : index
    %162 = vector.load %arg4[%c2, %c0_83, %c0_84] : memref<6x48x48xf32, #tpu.memory_space<vmem>>, vector<1x48x48xf32>
    %163 = vector.shape_cast %162 : vector<1x48x48xf32> to vector<48x48xf32>
    %c2_85 = arith.constant 2 : index
    %c0_86 = arith.constant 0 : index
    %c0_87 = arith.constant 0 : index
    %164 = vector.load %arg5[%c2_85, %c0_86, %c0_87] : memref<6x48x48xf32, #tpu.memory_space<vmem>>, vector<1x48x48xf32>
    %165 = vector.shape_cast %164 : vector<1x48x48xf32> to vector<48x48xf32>
    %cst_88 = arith.constant dense<0.000000e+00> : vector<46x48xf32>
    %166 = tpu.matmul %0, %163, %cst_88 {dimension_numbers = #tpu.dot_dimension_numbers<[1], [0], [0], [1], [0, 0, 1, 1], [], []>} : vector<46x48xf32>, vector<48x48xf32>, vector<46x48xf32> -> vector<46x48xf32>
    %cst_89 = arith.constant dense<0.000000e+00> : vector<46x46xf32>
    %167 = tpu.matmul %166, %1, %cst_89 {dimension_numbers = #tpu.dot_dimension_numbers<[1], [0], [0], [1], [0, 0, 1, 1], [], []>} : vector<46x48xf32>, vector<48x46xf32>, vector<46x46xf32> -> vector<46x46xf32>
    %cst_90 = arith.constant dense<0.000000e+00> : vector<46x48xf32>
    %168 = tpu.matmul %0, %165, %cst_90 {dimension_numbers = #tpu.dot_dimension_numbers<[1], [0], [0], [1], [0, 0, 1, 1], [], []>} : vector<46x48xf32>, vector<48x48xf32>, vector<46x48xf32> -> vector<46x48xf32>
    %cst_91 = arith.constant dense<0.000000e+00> : vector<46x46xf32>
    %169 = tpu.matmul %168, %1, %cst_91 {dimension_numbers = #tpu.dot_dimension_numbers<[1], [0], [0], [1], [0, 0, 1, 1], [], []>} : vector<46x48xf32>, vector<48x46xf32>, vector<46x46xf32> -> vector<46x46xf32>
    %170 = arith.mulf %163, %163 : vector<48x48xf32>
    %cst_92 = arith.constant dense<0.000000e+00> : vector<46x48xf32>
    %171 = tpu.matmul %0, %170, %cst_92 {dimension_numbers = #tpu.dot_dimension_numbers<[1], [0], [0], [1], [0, 0, 1, 1], [], []>} : vector<46x48xf32>, vector<48x48xf32>, vector<46x48xf32> -> vector<46x48xf32>
    %cst_93 = arith.constant dense<0.000000e+00> : vector<46x46xf32>
    %172 = tpu.matmul %171, %1, %cst_93 {dimension_numbers = #tpu.dot_dimension_numbers<[1], [0], [0], [1], [0, 0, 1, 1], [], []>} : vector<46x48xf32>, vector<48x46xf32>, vector<46x46xf32> -> vector<46x46xf32>
    %173 = arith.mulf %165, %165 : vector<48x48xf32>
    %cst_94 = arith.constant dense<0.000000e+00> : vector<46x48xf32>
    %174 = tpu.matmul %0, %173, %cst_94 {dimension_numbers = #tpu.dot_dimension_numbers<[1], [0], [0], [1], [0, 0, 1, 1], [], []>} : vector<46x48xf32>, vector<48x48xf32>, vector<46x48xf32> -> vector<46x48xf32>
    %cst_95 = arith.constant dense<0.000000e+00> : vector<46x46xf32>
    %175 = tpu.matmul %174, %1, %cst_95 {dimension_numbers = #tpu.dot_dimension_numbers<[1], [0], [0], [1], [0, 0, 1, 1], [], []>} : vector<46x48xf32>, vector<48x46xf32>, vector<46x46xf32> -> vector<46x46xf32>
    %176 = arith.mulf %163, %165 : vector<48x48xf32>
    %cst_96 = arith.constant dense<0.000000e+00> : vector<46x48xf32>
    %177 = tpu.matmul %0, %176, %cst_96 {dimension_numbers = #tpu.dot_dimension_numbers<[1], [0], [0], [1], [0, 0, 1, 1], [], []>} : vector<46x48xf32>, vector<48x48xf32>, vector<46x48xf32> -> vector<46x48xf32>
    %cst_97 = arith.constant dense<0.000000e+00> : vector<46x46xf32>
    %178 = tpu.matmul %177, %1, %cst_97 {dimension_numbers = #tpu.dot_dimension_numbers<[1], [0], [0], [1], [0, 0, 1, 1], [], []>} : vector<46x48xf32>, vector<48x46xf32>, vector<46x46xf32> -> vector<46x46xf32>
    %179 = arith.mulf %167, %167 : vector<46x46xf32>
    %180 = arith.mulf %169, %169 : vector<46x46xf32>
    %181 = arith.mulf %167, %169 : vector<46x46xf32>
    %182 = arith.subf %172, %179 : vector<46x46xf32>
    %183 = arith.subf %175, %180 : vector<46x46xf32>
    %184 = arith.subf %178, %181 : vector<46x46xf32>
    %cst_98 = arith.constant 2.000000e+00 : f32
    %185 = vector.broadcast %cst_98 : f32 to vector<46x46xf32>
    %186 = arith.mulf %185, %184 : vector<46x46xf32>
    %cst_99 = arith.constant 5.852250e+01 : f32
    %187 = vector.broadcast %cst_99 : f32 to vector<46x46xf32>
    %188 = arith.addf %186, %187 : vector<46x46xf32>
    %189 = arith.addf %182, %183 : vector<46x46xf32>
    %cst_100 = arith.constant 5.852250e+01 : f32
    %190 = vector.broadcast %cst_100 : f32 to vector<46x46xf32>
    %191 = arith.addf %189, %190 : vector<46x46xf32>
    %192 = tpu.reciprocal %191 {approx = true} : vector<46x46xf32> -> vector<46x46xf32>
    %193 = arith.mulf %191, %192 : vector<46x46xf32>
    %cst_101 = arith.constant 2.000000e+00 : f32
    %194 = vector.broadcast %cst_101 : f32 to vector<46x46xf32>
    %195 = arith.subf %194, %193 : vector<46x46xf32>
    %196 = arith.mulf %192, %195 : vector<46x46xf32>
    %197 = arith.mulf %188, %196 : vector<46x46xf32>
    %cst_102 = arith.constant 2.000000e+00 : f32
    %198 = vector.broadcast %cst_102 : f32 to vector<46x46xf32>
    %199 = arith.mulf %198, %181 : vector<46x46xf32>
    %cst_103 = arith.constant 6.502500e+00 : f32
    %200 = vector.broadcast %cst_103 : f32 to vector<46x46xf32>
    %201 = arith.addf %199, %200 : vector<46x46xf32>
    %202 = arith.addf %179, %180 : vector<46x46xf32>
    %cst_104 = arith.constant 6.502500e+00 : f32
    %203 = vector.broadcast %cst_104 : f32 to vector<46x46xf32>
    %204 = arith.addf %202, %203 : vector<46x46xf32>
    %205 = tpu.reciprocal %204 {approx = true} : vector<46x46xf32> -> vector<46x46xf32>
    %206 = arith.mulf %204, %205 : vector<46x46xf32>
    %cst_105 = arith.constant 2.000000e+00 : f32
    %207 = vector.broadcast %cst_105 : f32 to vector<46x46xf32>
    %208 = arith.subf %207, %206 : vector<46x46xf32>
    %209 = arith.mulf %205, %208 : vector<46x46xf32>
    %210 = arith.mulf %201, %209 : vector<46x46xf32>
    %211 = arith.mulf %197, %2 : vector<46x46xf32>
    %212 = vector.shape_cast %211 : vector<46x46xf32> to vector<1x46x46xf32>
    %cst_106 = arith.constant dense<0.000000e+00> : vector<1xf32>
    %213 = vector.multi_reduction <add>, %212, %cst_106 [1, 2] : vector<1x46x46xf32> to vector<1xf32>
    %214 = vector.shape_cast %213 : vector<1xf32> to vector<1x1x1xf32>
    %215 = vector.extract %214[0, 0, 0] : f32 from vector<1x1x1xf32>
    %216 = arith.mulf %211, %210 : vector<46x46xf32>
    %217 = vector.shape_cast %216 : vector<46x46xf32> to vector<1x46x46xf32>
    %cst_107 = arith.constant dense<0.000000e+00> : vector<1xf32>
    %218 = vector.multi_reduction <add>, %217, %cst_107 [1, 2] : vector<1x46x46xf32> to vector<1xf32>
    %219 = vector.shape_cast %218 : vector<1xf32> to vector<1x1x1xf32>
    %220 = vector.extract %219[0, 0, 0] : f32 from vector<1x1x1xf32>
    %c2_i32 = arith.constant 2 : i32
    %221 = vector.broadcast %c2_i32 : i32 to vector<8x128xi32>
    %222 = arith.cmpi eq, %5, %221 : vector<8x128xi32>
    %223 = vector.broadcast %220 : f32 to vector<8x128xf32>
    %224 = arith.select %222, %223, %147 : vector<8x128xi1>, vector<8x128xf32>
    %c2_i32_108 = arith.constant 2 : i32
    %225 = vector.broadcast %c2_i32_108 : i32 to vector<8x128xi32>
    %226 = arith.cmpi eq, %5, %225 : vector<8x128xi32>
    %227 = vector.broadcast %215 : f32 to vector<8x128xf32>
    %228 = arith.select %226, %227, %151 : vector<8x128xi1>, vector<8x128xf32>
    %cst_109 = arith.constant dense<0.000000e+00> : vector<24x48xf32>
    %229 = tpu.matmul %3, %163, %cst_109 {dimension_numbers = #tpu.dot_dimension_numbers<[1], [0], [0], [1], [0, 0, 1, 1], [], []>} : vector<24x48xf32>, vector<48x48xf32>, vector<24x48xf32> -> vector<24x48xf32>
    %cst_110 = arith.constant dense<0.000000e+00> : vector<24x24xf32>
    %230 = tpu.matmul %229, %4, %cst_110 {dimension_numbers = #tpu.dot_dimension_numbers<[1], [0], [0], [1], [0, 0, 1, 1], [], []>} : vector<24x48xf32>, vector<48x24xf32>, vector<24x24xf32> -> vector<24x24xf32>
    %c2_111 = arith.constant 2 : index
    %c0_112 = arith.constant 0 : index
    %c0_113 = arith.constant 0 : index
    %231 = vector.load %arg10[%c2_111, %c0_112, %c0_113] : memref<6x24x24xf32, #tpu.memory_space<vmem>>, vector<1x24x24xf32>
    %232 = vector.shape_cast %231 : vector<1x24x24xf32> to vector<24x24xf32>
    %233 = vector.shape_cast %230 : vector<24x24xf32> to vector<1x24x24xf32>
    tpu.vector_store %arg10[%c2_111, %c0_112, %c0_113], %233 {strides = array<i32>} : memref<6x24x24xf32, #tpu.memory_space<vmem>>, vector<1x24x24xf32>,
    %cst_114 = arith.constant dense<0.000000e+00> : vector<24x48xf32>
    %234 = tpu.matmul %3, %165, %cst_114 {dimension_numbers = #tpu.dot_dimension_numbers<[1], [0], [0], [1], [0, 0, 1, 1], [], []>} : vector<24x48xf32>, vector<48x48xf32>, vector<24x48xf32> -> vector<24x48xf32>
    %cst_115 = arith.constant dense<0.000000e+00> : vector<24x24xf32>
    %235 = tpu.matmul %234, %4, %cst_115 {dimension_numbers = #tpu.dot_dimension_numbers<[1], [0], [0], [1], [0, 0, 1, 1], [], []>} : vector<24x48xf32>, vector<48x24xf32>, vector<24x24xf32> -> vector<24x24xf32>
    %c2_116 = arith.constant 2 : index
    %c0_117 = arith.constant 0 : index
    %c0_118 = arith.constant 0 : index
    %236 = vector.load %arg11[%c2_116, %c0_117, %c0_118] : memref<6x24x24xf32, #tpu.memory_space<vmem>>, vector<1x24x24xf32>
    %237 = vector.shape_cast %236 : vector<1x24x24xf32> to vector<24x24xf32>
    %238 = vector.shape_cast %235 : vector<24x24xf32> to vector<1x24x24xf32>
    tpu.vector_store %arg11[%c2_116, %c0_117, %c0_118], %238 {strides = array<i32>} : memref<6x24x24xf32, #tpu.memory_space<vmem>>, vector<1x24x24xf32>,
    %c3 = arith.constant 3 : index
    %c0_119 = arith.constant 0 : index
    %c0_120 = arith.constant 0 : index
    %239 = vector.load %arg4[%c3, %c0_119, %c0_120] : memref<6x48x48xf32, #tpu.memory_space<vmem>>, vector<1x48x48xf32>
    %240 = vector.shape_cast %239 : vector<1x48x48xf32> to vector<48x48xf32>
    %c3_121 = arith.constant 3 : index
    %c0_122 = arith.constant 0 : index
    %c0_123 = arith.constant 0 : index
    %241 = vector.load %arg5[%c3_121, %c0_122, %c0_123] : memref<6x48x48xf32, #tpu.memory_space<vmem>>, vector<1x48x48xf32>
    %242 = vector.shape_cast %241 : vector<1x48x48xf32> to vector<48x48xf32>
    %cst_124 = arith.constant dense<0.000000e+00> : vector<46x48xf32>
    %243 = tpu.matmul %0, %240, %cst_124 {dimension_numbers = #tpu.dot_dimension_numbers<[1], [0], [0], [1], [0, 0, 1, 1], [], []>} : vector<46x48xf32>, vector<48x48xf32>, vector<46x48xf32> -> vector<46x48xf32>
    %cst_125 = arith.constant dense<0.000000e+00> : vector<46x46xf32>
    %244 = tpu.matmul %243, %1, %cst_125 {dimension_numbers = #tpu.dot_dimension_numbers<[1], [0], [0], [1], [0, 0, 1, 1], [], []>} : vector<46x48xf32>, vector<48x46xf32>, vector<46x46xf32> -> vector<46x46xf32>
    %cst_126 = arith.constant dense<0.000000e+00> : vector<46x48xf32>
    %245 = tpu.matmul %0, %242, %cst_126 {dimension_numbers = #tpu.dot_dimension_numbers<[1], [0], [0], [1], [0, 0, 1, 1], [], []>} : vector<46x48xf32>, vector<48x48xf32>, vector<46x48xf32> -> vector<46x48xf32>
    %cst_127 = arith.constant dense<0.000000e+00> : vector<46x46xf32>
    %246 = tpu.matmul %245, %1, %cst_127 {dimension_numbers = #tpu.dot_dimension_numbers<[1], [0], [0], [1], [0, 0, 1, 1], [], []>} : vector<46x48xf32>, vector<48x46xf32>, vector<46x46xf32> -> vector<46x46xf32>
    %247 = arith.mulf %240, %240 : vector<48x48xf32>
    %cst_128 = arith.constant dense<0.000000e+00> : vector<46x48xf32>
    %248 = tpu.matmul %0, %247, %cst_128 {dimension_numbers = #tpu.dot_dimension_numbers<[1], [0], [0], [1], [0, 0, 1, 1], [], []>} : vector<46x48xf32>, vector<48x48xf32>, vector<46x48xf32> -> vector<46x48xf32>
    %cst_129 = arith.constant dense<0.000000e+00> : vector<46x46xf32>
    %249 = tpu.matmul %248, %1, %cst_129 {dimension_numbers = #tpu.dot_dimension_numbers<[1], [0], [0], [1], [0, 0, 1, 1], [], []>} : vector<46x48xf32>, vector<48x46xf32>, vector<46x46xf32> -> vector<46x46xf32>
    %250 = arith.mulf %242, %242 : vector<48x48xf32>
    %cst_130 = arith.constant dense<0.000000e+00> : vector<46x48xf32>
    %251 = tpu.matmul %0, %250, %cst_130 {dimension_numbers = #tpu.dot_dimension_numbers<[1], [0], [0], [1], [0, 0, 1, 1], [], []>} : vector<46x48xf32>, vector<48x48xf32>, vector<46x48xf32> -> vector<46x48xf32>
    %cst_131 = arith.constant dense<0.000000e+00> : vector<46x46xf32>
    %252 = tpu.matmul %251, %1, %cst_131 {dimension_numbers = #tpu.dot_dimension_numbers<[1], [0], [0], [1], [0, 0, 1, 1], [], []>} : vector<46x48xf32>, vector<48x46xf32>, vector<46x46xf32> -> vector<46x46xf32>
    %253 = arith.mulf %240, %242 : vector<48x48xf32>
    %cst_132 = arith.constant dense<0.000000e+00> : vector<46x48xf32>
    %254 = tpu.matmul %0, %253, %cst_132 {dimension_numbers = #tpu.dot_dimension_numbers<[1], [0], [0], [1], [0, 0, 1, 1], [], []>} : vector<46x48xf32>, vector<48x48xf32>, vector<46x48xf32> -> vector<46x48xf32>
    %cst_133 = arith.constant dense<0.000000e+00> : vector<46x46xf32>
    %255 = tpu.matmul %254, %1, %cst_133 {dimension_numbers = #tpu.dot_dimension_numbers<[1], [0], [0], [1], [0, 0, 1, 1], [], []>} : vector<46x48xf32>, vector<48x46xf32>, vector<46x46xf32> -> vector<46x46xf32>
    %256 = arith.mulf %244, %244 : vector<46x46xf32>
    %257 = arith.mulf %246, %246 : vector<46x46xf32>
    %258 = arith.mulf %244, %246 : vector<46x46xf32>
    %259 = arith.subf %249, %256 : vector<46x46xf32>
    %260 = arith.subf %252, %257 : vector<46x46xf32>
    %261 = arith.subf %255, %258 : vector<46x46xf32>
    %cst_134 = arith.constant 2.000000e+00 : f32
    %262 = vector.broadcast %cst_134 : f32 to vector<46x46xf32>
    %263 = arith.mulf %262, %261 : vector<46x46xf32>
    %cst_135 = arith.constant 5.852250e+01 : f32
    %264 = vector.broadcast %cst_135 : f32 to vector<46x46xf32>
    %265 = arith.addf %263, %264 : vector<46x46xf32>
    %266 = arith.addf %259, %260 : vector<46x46xf32>
    %cst_136 = arith.constant 5.852250e+01 : f32
    %267 = vector.broadcast %cst_136 : f32 to vector<46x46xf32>
    %268 = arith.addf %266, %267 : vector<46x46xf32>
    %269 = tpu.reciprocal %268 {approx = true} : vector<46x46xf32> -> vector<46x46xf32>
    %270 = arith.mulf %268, %269 : vector<46x46xf32>
    %cst_137 = arith.constant 2.000000e+00 : f32
    %271 = vector.broadcast %cst_137 : f32 to vector<46x46xf32>
    %272 = arith.subf %271, %270 : vector<46x46xf32>
    %273 = arith.mulf %269, %272 : vector<46x46xf32>
    %274 = arith.mulf %265, %273 : vector<46x46xf32>
    %cst_138 = arith.constant 2.000000e+00 : f32
    %275 = vector.broadcast %cst_138 : f32 to vector<46x46xf32>
    %276 = arith.mulf %275, %258 : vector<46x46xf32>
    %cst_139 = arith.constant 6.502500e+00 : f32
    %277 = vector.broadcast %cst_139 : f32 to vector<46x46xf32>
    %278 = arith.addf %276, %277 : vector<46x46xf32>
    %279 = arith.addf %256, %257 : vector<46x46xf32>
    %cst_140 = arith.constant 6.502500e+00 : f32
    %280 = vector.broadcast %cst_140 : f32 to vector<46x46xf32>
    %281 = arith.addf %279, %280 : vector<46x46xf32>
    %282 = tpu.reciprocal %281 {approx = true} : vector<46x46xf32> -> vector<46x46xf32>
    %283 = arith.mulf %281, %282 : vector<46x46xf32>
    %cst_141 = arith.constant 2.000000e+00 : f32
    %284 = vector.broadcast %cst_141 : f32 to vector<46x46xf32>
    %285 = arith.subf %284, %283 : vector<46x46xf32>
    %286 = arith.mulf %282, %285 : vector<46x46xf32>
    %287 = arith.mulf %278, %286 : vector<46x46xf32>
    %288 = arith.mulf %274, %2 : vector<46x46xf32>
    %289 = vector.shape_cast %288 : vector<46x46xf32> to vector<1x46x46xf32>
    %cst_142 = arith.constant dense<0.000000e+00> : vector<1xf32>
    %290 = vector.multi_reduction <add>, %289, %cst_142 [1, 2] : vector<1x46x46xf32> to vector<1xf32>
    %291 = vector.shape_cast %290 : vector<1xf32> to vector<1x1x1xf32>
    %292 = vector.extract %291[0, 0, 0] : f32 from vector<1x1x1xf32>
    %293 = arith.mulf %288, %287 : vector<46x46xf32>
    %294 = vector.shape_cast %293 : vector<46x46xf32> to vector<1x46x46xf32>
    %cst_143 = arith.constant dense<0.000000e+00> : vector<1xf32>
    %295 = vector.multi_reduction <add>, %294, %cst_143 [1, 2] : vector<1x46x46xf32> to vector<1xf32>
    %296 = vector.shape_cast %295 : vector<1xf32> to vector<1x1x1xf32>
    %297 = vector.extract %296[0, 0, 0] : f32 from vector<1x1x1xf32>
    %c3_i32 = arith.constant 3 : i32
    %298 = vector.broadcast %c3_i32 : i32 to vector<8x128xi32>
    %299 = arith.cmpi eq, %5, %298 : vector<8x128xi32>
    %300 = vector.broadcast %297 : f32 to vector<8x128xf32>
    %301 = arith.select %299, %300, %224 : vector<8x128xi1>, vector<8x128xf32>
    %c3_i32_144 = arith.constant 3 : i32
    %302 = vector.broadcast %c3_i32_144 : i32 to vector<8x128xi32>
    %303 = arith.cmpi eq, %5, %302 : vector<8x128xi32>
    %304 = vector.broadcast %292 : f32 to vector<8x128xf32>
    %305 = arith.select %303, %304, %228 : vector<8x128xi1>, vector<8x128xf32>
    %cst_145 = arith.constant dense<0.000000e+00> : vector<24x48xf32>
    %306 = tpu.matmul %3, %240, %cst_145 {dimension_numbers = #tpu.dot_dimension_numbers<[1], [0], [0], [1], [0, 0, 1, 1], [], []>} : vector<24x48xf32>, vector<48x48xf32>, vector<24x48xf32> -> vector<24x48xf32>
    %cst_146 = arith.constant dense<0.000000e+00> : vector<24x24xf32>
    %307 = tpu.matmul %306, %4, %cst_146 {dimension_numbers = #tpu.dot_dimension_numbers<[1], [0], [0], [1], [0, 0, 1, 1], [], []>} : vector<24x48xf32>, vector<48x24xf32>, vector<24x24xf32> -> vector<24x24xf32>
    %c3_147 = arith.constant 3 : index
    %c0_148 = arith.constant 0 : index
    %c0_149 = arith.constant 0 : index
    %308 = vector.load %arg10[%c3_147, %c0_148, %c0_149] : memref<6x24x24xf32, #tpu.memory_space<vmem>>, vector<1x24x24xf32>
    %309 = vector.shape_cast %308 : vector<1x24x24xf32> to vector<24x24xf32>
    %310 = vector.shape_cast %307 : vector<24x24xf32> to vector<1x24x24xf32>
    tpu.vector_store %arg10[%c3_147, %c0_148, %c0_149], %310 {strides = array<i32>} : memref<6x24x24xf32, #tpu.memory_space<vmem>>, vector<1x24x24xf32>,
    %cst_150 = arith.constant dense<0.000000e+00> : vector<24x48xf32>
    %311 = tpu.matmul %3, %242, %cst_150 {dimension_numbers = #tpu.dot_dimension_numbers<[1], [0], [0], [1], [0, 0, 1, 1], [], []>} : vector<24x48xf32>, vector<48x48xf32>, vector<24x48xf32> -> vector<24x48xf32>
    %cst_151 = arith.constant dense<0.000000e+00> : vector<24x24xf32>
    %312 = tpu.matmul %311, %4, %cst_151 {dimension_numbers = #tpu.dot_dimension_numbers<[1], [0], [0], [1], [0, 0, 1, 1], [], []>} : vector<24x48xf32>, vector<48x24xf32>, vector<24x24xf32> -> vector<24x24xf32>
    %c3_152 = arith.constant 3 : index
    %c0_153 = arith.constant 0 : index
    %c0_154 = arith.constant 0 : index
    %313 = vector.load %arg11[%c3_152, %c0_153, %c0_154] : memref<6x24x24xf32, #tpu.memory_space<vmem>>, vector<1x24x24xf32>
    %314 = vector.shape_cast %313 : vector<1x24x24xf32> to vector<24x24xf32>
    %315 = vector.shape_cast %312 : vector<24x24xf32> to vector<1x24x24xf32>
    tpu.vector_store %arg11[%c3_152, %c0_153, %c0_154], %315 {strides = array<i32>} : memref<6x24x24xf32, #tpu.memory_space<vmem>>, vector<1x24x24xf32>,
    %c4 = arith.constant 4 : index
    %c0_155 = arith.constant 0 : index
    %c0_156 = arith.constant 0 : index
    %316 = vector.load %arg4[%c4, %c0_155, %c0_156] : memref<6x48x48xf32, #tpu.memory_space<vmem>>, vector<1x48x48xf32>
    %317 = vector.shape_cast %316 : vector<1x48x48xf32> to vector<48x48xf32>
    %c4_157 = arith.constant 4 : index
    %c0_158 = arith.constant 0 : index
    %c0_159 = arith.constant 0 : index
    %318 = vector.load %arg5[%c4_157, %c0_158, %c0_159] : memref<6x48x48xf32, #tpu.memory_space<vmem>>, vector<1x48x48xf32>
    %319 = vector.shape_cast %318 : vector<1x48x48xf32> to vector<48x48xf32>
    %cst_160 = arith.constant dense<0.000000e+00> : vector<46x48xf32>
    %320 = tpu.matmul %0, %317, %cst_160 {dimension_numbers = #tpu.dot_dimension_numbers<[1], [0], [0], [1], [0, 0, 1, 1], [], []>} : vector<46x48xf32>, vector<48x48xf32>, vector<46x48xf32> -> vector<46x48xf32>
    %cst_161 = arith.constant dense<0.000000e+00> : vector<46x46xf32>
    %321 = tpu.matmul %320, %1, %cst_161 {dimension_numbers = #tpu.dot_dimension_numbers<[1], [0], [0], [1], [0, 0, 1, 1], [], []>} : vector<46x48xf32>, vector<48x46xf32>, vector<46x46xf32> -> vector<46x46xf32>
    %cst_162 = arith.constant dense<0.000000e+00> : vector<46x48xf32>
    %322 = tpu.matmul %0, %319, %cst_162 {dimension_numbers = #tpu.dot_dimension_numbers<[1], [0], [0], [1], [0, 0, 1, 1], [], []>} : vector<46x48xf32>, vector<48x48xf32>, vector<46x48xf32> -> vector<46x48xf32>
    %cst_163 = arith.constant dense<0.000000e+00> : vector<46x46xf32>
    %323 = tpu.matmul %322, %1, %cst_163 {dimension_numbers = #tpu.dot_dimension_numbers<[1], [0], [0], [1], [0, 0, 1, 1], [], []>} : vector<46x48xf32>, vector<48x46xf32>, vector<46x46xf32> -> vector<46x46xf32>
    %324 = arith.mulf %317, %317 : vector<48x48xf32>
    %cst_164 = arith.constant dense<0.000000e+00> : vector<46x48xf32>
    %325 = tpu.matmul %0, %324, %cst_164 {dimension_numbers = #tpu.dot_dimension_numbers<[1], [0], [0], [1], [0, 0, 1, 1], [], []>} : vector<46x48xf32>, vector<48x48xf32>, vector<46x48xf32> -> vector<46x48xf32>
    %cst_165 = arith.constant dense<0.000000e+00> : vector<46x46xf32>
    %326 = tpu.matmul %325, %1, %cst_165 {dimension_numbers = #tpu.dot_dimension_numbers<[1], [0], [0], [1], [0, 0, 1, 1], [], []>} : vector<46x48xf32>, vector<48x46xf32>, vector<46x46xf32> -> vector<46x46xf32>
    %327 = arith.mulf %319, %319 : vector<48x48xf32>
    %cst_166 = arith.constant dense<0.000000e+00> : vector<46x48xf32>
    %328 = tpu.matmul %0, %327, %cst_166 {dimension_numbers = #tpu.dot_dimension_numbers<[1], [0], [0], [1], [0, 0, 1, 1], [], []>} : vector<46x48xf32>, vector<48x48xf32>, vector<46x48xf32> -> vector<46x48xf32>
    %cst_167 = arith.constant dense<0.000000e+00> : vector<46x46xf32>
    %329 = tpu.matmul %328, %1, %cst_167 {dimension_numbers = #tpu.dot_dimension_numbers<[1], [0], [0], [1], [0, 0, 1, 1], [], []>} : vector<46x48xf32>, vector<48x46xf32>, vector<46x46xf32> -> vector<46x46xf32>
    %330 = arith.mulf %317, %319 : vector<48x48xf32>
    %cst_168 = arith.constant dense<0.000000e+00> : vector<46x48xf32>
    %331 = tpu.matmul %0, %330, %cst_168 {dimension_numbers = #tpu.dot_dimension_numbers<[1], [0], [0], [1], [0, 0, 1, 1], [], []>} : vector<46x48xf32>, vector<48x48xf32>, vector<46x48xf32> -> vector<46x48xf32>
    %cst_169 = arith.constant dense<0.000000e+00> : vector<46x46xf32>
    %332 = tpu.matmul %331, %1, %cst_169 {dimension_numbers = #tpu.dot_dimension_numbers<[1], [0], [0], [1], [0, 0, 1, 1], [], []>} : vector<46x48xf32>, vector<48x46xf32>, vector<46x46xf32> -> vector<46x46xf32>
    %333 = arith.mulf %321, %321 : vector<46x46xf32>
    %334 = arith.mulf %323, %323 : vector<46x46xf32>
    %335 = arith.mulf %321, %323 : vector<46x46xf32>
    %336 = arith.subf %326, %333 : vector<46x46xf32>
    %337 = arith.subf %329, %334 : vector<46x46xf32>
    %338 = arith.subf %332, %335 : vector<46x46xf32>
    %cst_170 = arith.constant 2.000000e+00 : f32
    %339 = vector.broadcast %cst_170 : f32 to vector<46x46xf32>
    %340 = arith.mulf %339, %338 : vector<46x46xf32>
    %cst_171 = arith.constant 5.852250e+01 : f32
    %341 = vector.broadcast %cst_171 : f32 to vector<46x46xf32>
    %342 = arith.addf %340, %341 : vector<46x46xf32>
    %343 = arith.addf %336, %337 : vector<46x46xf32>
    %cst_172 = arith.constant 5.852250e+01 : f32
    %344 = vector.broadcast %cst_172 : f32 to vector<46x46xf32>
    %345 = arith.addf %343, %344 : vector<46x46xf32>
    %346 = tpu.reciprocal %345 {approx = true} : vector<46x46xf32> -> vector<46x46xf32>
    %347 = arith.mulf %345, %346 : vector<46x46xf32>
    %cst_173 = arith.constant 2.000000e+00 : f32
    %348 = vector.broadcast %cst_173 : f32 to vector<46x46xf32>
    %349 = arith.subf %348, %347 : vector<46x46xf32>
    %350 = arith.mulf %346, %349 : vector<46x46xf32>
    %351 = arith.mulf %342, %350 : vector<46x46xf32>
    %cst_174 = arith.constant 2.000000e+00 : f32
    %352 = vector.broadcast %cst_174 : f32 to vector<46x46xf32>
    %353 = arith.mulf %352, %335 : vector<46x46xf32>
    %cst_175 = arith.constant 6.502500e+00 : f32
    %354 = vector.broadcast %cst_175 : f32 to vector<46x46xf32>
    %355 = arith.addf %353, %354 : vector<46x46xf32>
    %356 = arith.addf %333, %334 : vector<46x46xf32>
    %cst_176 = arith.constant 6.502500e+00 : f32
    %357 = vector.broadcast %cst_176 : f32 to vector<46x46xf32>
    %358 = arith.addf %356, %357 : vector<46x46xf32>
    %359 = tpu.reciprocal %358 {approx = true} : vector<46x46xf32> -> vector<46x46xf32>
    %360 = arith.mulf %358, %359 : vector<46x46xf32>
    %cst_177 = arith.constant 2.000000e+00 : f32
    %361 = vector.broadcast %cst_177 : f32 to vector<46x46xf32>
    %362 = arith.subf %361, %360 : vector<46x46xf32>
    %363 = arith.mulf %359, %362 : vector<46x46xf32>
    %364 = arith.mulf %355, %363 : vector<46x46xf32>
    %365 = arith.mulf %351, %2 : vector<46x46xf32>
    %366 = vector.shape_cast %365 : vector<46x46xf32> to vector<1x46x46xf32>
    %cst_178 = arith.constant dense<0.000000e+00> : vector<1xf32>
    %367 = vector.multi_reduction <add>, %366, %cst_178 [1, 2] : vector<1x46x46xf32> to vector<1xf32>
    %368 = vector.shape_cast %367 : vector<1xf32> to vector<1x1x1xf32>
    %369 = vector.extract %368[0, 0, 0] : f32 from vector<1x1x1xf32>
    %370 = arith.mulf %365, %364 : vector<46x46xf32>
    %371 = vector.shape_cast %370 : vector<46x46xf32> to vector<1x46x46xf32>
    %cst_179 = arith.constant dense<0.000000e+00> : vector<1xf32>
    %372 = vector.multi_reduction <add>, %371, %cst_179 [1, 2] : vector<1x46x46xf32> to vector<1xf32>
    %373 = vector.shape_cast %372 : vector<1xf32> to vector<1x1x1xf32>
    %374 = vector.extract %373[0, 0, 0] : f32 from vector<1x1x1xf32>
    %c4_i32 = arith.constant 4 : i32
    %375 = vector.broadcast %c4_i32 : i32 to vector<8x128xi32>
    %376 = arith.cmpi eq, %5, %375 : vector<8x128xi32>
    %377 = vector.broadcast %374 : f32 to vector<8x128xf32>
    %378 = arith.select %376, %377, %301 : vector<8x128xi1>, vector<8x128xf32>
    %c4_i32_180 = arith.constant 4 : i32
    %379 = vector.broadcast %c4_i32_180 : i32 to vector<8x128xi32>
    %380 = arith.cmpi eq, %5, %379 : vector<8x128xi32>
    %381 = vector.broadcast %369 : f32 to vector<8x128xf32>
    %382 = arith.select %380, %381, %305 : vector<8x128xi1>, vector<8x128xf32>
    %cst_181 = arith.constant dense<0.000000e+00> : vector<24x48xf32>
    %383 = tpu.matmul %3, %317, %cst_181 {dimension_numbers = #tpu.dot_dimension_numbers<[1], [0], [0], [1], [0, 0, 1, 1], [], []>} : vector<24x48xf32>, vector<48x48xf32>, vector<24x48xf32> -> vector<24x48xf32>
    %cst_182 = arith.constant dense<0.000000e+00> : vector<24x24xf32>
    %384 = tpu.matmul %383, %4, %cst_182 {dimension_numbers = #tpu.dot_dimension_numbers<[1], [0], [0], [1], [0, 0, 1, 1], [], []>} : vector<24x48xf32>, vector<48x24xf32>, vector<24x24xf32> -> vector<24x24xf32>
    %c4_183 = arith.constant 4 : index
    %c0_184 = arith.constant 0 : index
    %c0_185 = arith.constant 0 : index
    %385 = vector.load %arg10[%c4_183, %c0_184, %c0_185] : memref<6x24x24xf32, #tpu.memory_space<vmem>>, vector<1x24x24xf32>
    %386 = vector.shape_cast %385 : vector<1x24x24xf32> to vector<24x24xf32>
    %387 = vector.shape_cast %384 : vector<24x24xf32> to vector<1x24x24xf32>
    tpu.vector_store %arg10[%c4_183, %c0_184, %c0_185], %387 {strides = array<i32>} : memref<6x24x24xf32, #tpu.memory_space<vmem>>, vector<1x24x24xf32>,
    %cst_186 = arith.constant dense<0.000000e+00> : vector<24x48xf32>
    %388 = tpu.matmul %3, %319, %cst_186 {dimension_numbers = #tpu.dot_dimension_numbers<[1], [0], [0], [1], [0, 0, 1, 1], [], []>} : vector<24x48xf32>, vector<48x48xf32>, vector<24x48xf32> -> vector<24x48xf32>
    %cst_187 = arith.constant dense<0.000000e+00> : vector<24x24xf32>
    %389 = tpu.matmul %388, %4, %cst_187 {dimension_numbers = #tpu.dot_dimension_numbers<[1], [0], [0], [1], [0, 0, 1, 1], [], []>} : vector<24x48xf32>, vector<48x24xf32>, vector<24x24xf32> -> vector<24x24xf32>
    %c4_188 = arith.constant 4 : index
    %c0_189 = arith.constant 0 : index
    %c0_190 = arith.constant 0 : index
    %390 = vector.load %arg11[%c4_188, %c0_189, %c0_190] : memref<6x24x24xf32, #tpu.memory_space<vmem>>, vector<1x24x24xf32>
    %391 = vector.shape_cast %390 : vector<1x24x24xf32> to vector<24x24xf32>
    %392 = vector.shape_cast %389 : vector<24x24xf32> to vector<1x24x24xf32>
    tpu.vector_store %arg11[%c4_188, %c0_189, %c0_190], %392 {strides = array<i32>} : memref<6x24x24xf32, #tpu.memory_space<vmem>>, vector<1x24x24xf32>,
    %c5 = arith.constant 5 : index
    %c0_191 = arith.constant 0 : index
    %c0_192 = arith.constant 0 : index
    %393 = vector.load %arg4[%c5, %c0_191, %c0_192] : memref<6x48x48xf32, #tpu.memory_space<vmem>>, vector<1x48x48xf32>
    %394 = vector.shape_cast %393 : vector<1x48x48xf32> to vector<48x48xf32>
    %c5_193 = arith.constant 5 : index
    %c0_194 = arith.constant 0 : index
    %c0_195 = arith.constant 0 : index
    %395 = vector.load %arg5[%c5_193, %c0_194, %c0_195] : memref<6x48x48xf32, #tpu.memory_space<vmem>>, vector<1x48x48xf32>
    %396 = vector.shape_cast %395 : vector<1x48x48xf32> to vector<48x48xf32>
    %cst_196 = arith.constant dense<0.000000e+00> : vector<46x48xf32>
    %397 = tpu.matmul %0, %394, %cst_196 {dimension_numbers = #tpu.dot_dimension_numbers<[1], [0], [0], [1], [0, 0, 1, 1], [], []>} : vector<46x48xf32>, vector<48x48xf32>, vector<46x48xf32> -> vector<46x48xf32>
    %cst_197 = arith.constant dense<0.000000e+00> : vector<46x46xf32>
    %398 = tpu.matmul %397, %1, %cst_197 {dimension_numbers = #tpu.dot_dimension_numbers<[1], [0], [0], [1], [0, 0, 1, 1], [], []>} : vector<46x48xf32>, vector<48x46xf32>, vector<46x46xf32> -> vector<46x46xf32>
    %cst_198 = arith.constant dense<0.000000e+00> : vector<46x48xf32>
    %399 = tpu.matmul %0, %396, %cst_198 {dimension_numbers = #tpu.dot_dimension_numbers<[1], [0], [0], [1], [0, 0, 1, 1], [], []>} : vector<46x48xf32>, vector<48x48xf32>, vector<46x48xf32> -> vector<46x48xf32>
    %cst_199 = arith.constant dense<0.000000e+00> : vector<46x46xf32>
    %400 = tpu.matmul %399, %1, %cst_199 {dimension_numbers = #tpu.dot_dimension_numbers<[1], [0], [0], [1], [0, 0, 1, 1], [], []>} : vector<46x48xf32>, vector<48x46xf32>, vector<46x46xf32> -> vector<46x46xf32>
    %401 = arith.mulf %394, %394 : vector<48x48xf32>
    %cst_200 = arith.constant dense<0.000000e+00> : vector<46x48xf32>
    %402 = tpu.matmul %0, %401, %cst_200 {dimension_numbers = #tpu.dot_dimension_numbers<[1], [0], [0], [1], [0, 0, 1, 1], [], []>} : vector<46x48xf32>, vector<48x48xf32>, vector<46x48xf32> -> vector<46x48xf32>
    %cst_201 = arith.constant dense<0.000000e+00> : vector<46x46xf32>
    %403 = tpu.matmul %402, %1, %cst_201 {dimension_numbers = #tpu.dot_dimension_numbers<[1], [0], [0], [1], [0, 0, 1, 1], [], []>} : vector<46x48xf32>, vector<48x46xf32>, vector<46x46xf32> -> vector<46x46xf32>
    %404 = arith.mulf %396, %396 : vector<48x48xf32>
    %cst_202 = arith.constant dense<0.000000e+00> : vector<46x48xf32>
    %405 = tpu.matmul %0, %404, %cst_202 {dimension_numbers = #tpu.dot_dimension_numbers<[1], [0], [0], [1], [0, 0, 1, 1], [], []>} : vector<46x48xf32>, vector<48x48xf32>, vector<46x48xf32> -> vector<46x48xf32>
    %cst_203 = arith.constant dense<0.000000e+00> : vector<46x46xf32>
    %406 = tpu.matmul %405, %1, %cst_203 {dimension_numbers = #tpu.dot_dimension_numbers<[1], [0], [0], [1], [0, 0, 1, 1], [], []>} : vector<46x48xf32>, vector<48x46xf32>, vector<46x46xf32> -> vector<46x46xf32>
    %407 = arith.mulf %394, %396 : vector<48x48xf32>
    %cst_204 = arith.constant dense<0.000000e+00> : vector<46x48xf32>
    %408 = tpu.matmul %0, %407, %cst_204 {dimension_numbers = #tpu.dot_dimension_numbers<[1], [0], [0], [1], [0, 0, 1, 1], [], []>} : vector<46x48xf32>, vector<48x48xf32>, vector<46x48xf32> -> vector<46x48xf32>
    %cst_205 = arith.constant dense<0.000000e+00> : vector<46x46xf32>
    %409 = tpu.matmul %408, %1, %cst_205 {dimension_numbers = #tpu.dot_dimension_numbers<[1], [0], [0], [1], [0, 0, 1, 1], [], []>} : vector<46x48xf32>, vector<48x46xf32>, vector<46x46xf32> -> vector<46x46xf32>
    %410 = arith.mulf %398, %398 : vector<46x46xf32>
    %411 = arith.mulf %400, %400 : vector<46x46xf32>
    %412 = arith.mulf %398, %400 : vector<46x46xf32>
    %413 = arith.subf %403, %410 : vector<46x46xf32>
    %414 = arith.subf %406, %411 : vector<46x46xf32>
    %415 = arith.subf %409, %412 : vector<46x46xf32>
    %cst_206 = arith.constant 2.000000e+00 : f32
    %416 = vector.broadcast %cst_206 : f32 to vector<46x46xf32>
    %417 = arith.mulf %416, %415 : vector<46x46xf32>
    %cst_207 = arith.constant 5.852250e+01 : f32
    %418 = vector.broadcast %cst_207 : f32 to vector<46x46xf32>
    %419 = arith.addf %417, %418 : vector<46x46xf32>
    %420 = arith.addf %413, %414 : vector<46x46xf32>
    %cst_208 = arith.constant 5.852250e+01 : f32
    %421 = vector.broadcast %cst_208 : f32 to vector<46x46xf32>
    %422 = arith.addf %420, %421 : vector<46x46xf32>
    %423 = tpu.reciprocal %422 {approx = true} : vector<46x46xf32> -> vector<46x46xf32>
    %424 = arith.mulf %422, %423 : vector<46x46xf32>
    %cst_209 = arith.constant 2.000000e+00 : f32
    %425 = vector.broadcast %cst_209 : f32 to vector<46x46xf32>
    %426 = arith.subf %425, %424 : vector<46x46xf32>
    %427 = arith.mulf %423, %426 : vector<46x46xf32>
    %428 = arith.mulf %419, %427 : vector<46x46xf32>
    %cst_210 = arith.constant 2.000000e+00 : f32
    %429 = vector.broadcast %cst_210 : f32 to vector<46x46xf32>
    %430 = arith.mulf %429, %412 : vector<46x46xf32>
    %cst_211 = arith.constant 6.502500e+00 : f32
    %431 = vector.broadcast %cst_211 : f32 to vector<46x46xf32>
    %432 = arith.addf %430, %431 : vector<46x46xf32>
    %433 = arith.addf %410, %411 : vector<46x46xf32>
    %cst_212 = arith.constant 6.502500e+00 : f32
    %434 = vector.broadcast %cst_212 : f32 to vector<46x46xf32>
    %435 = arith.addf %433, %434 : vector<46x46xf32>
    %436 = tpu.reciprocal %435 {approx = true} : vector<46x46xf32> -> vector<46x46xf32>
    %437 = arith.mulf %435, %436 : vector<46x46xf32>
    %cst_213 = arith.constant 2.000000e+00 : f32
    %438 = vector.broadcast %cst_213 : f32 to vector<46x46xf32>
    %439 = arith.subf %438, %437 : vector<46x46xf32>
    %440 = arith.mulf %436, %439 : vector<46x46xf32>
    %441 = arith.mulf %432, %440 : vector<46x46xf32>
    %442 = arith.mulf %428, %2 : vector<46x46xf32>
    %443 = vector.shape_cast %442 : vector<46x46xf32> to vector<1x46x46xf32>
    %cst_214 = arith.constant dense<0.000000e+00> : vector<1xf32>
    %444 = vector.multi_reduction <add>, %443, %cst_214 [1, 2] : vector<1x46x46xf32> to vector<1xf32>
    %445 = vector.shape_cast %444 : vector<1xf32> to vector<1x1x1xf32>
    %446 = vector.extract %445[0, 0, 0] : f32 from vector<1x1x1xf32>
    %447 = arith.mulf %442, %441 : vector<46x46xf32>
    %448 = vector.shape_cast %447 : vector<46x46xf32> to vector<1x46x46xf32>
    %cst_215 = arith.constant dense<0.000000e+00> : vector<1xf32>
    %449 = vector.multi_reduction <add>, %448, %cst_215 [1, 2] : vector<1x46x46xf32> to vector<1xf32>
    %450 = vector.shape_cast %449 : vector<1xf32> to vector<1x1x1xf32>
    %451 = vector.extract %450[0, 0, 0] : f32 from vector<1x1x1xf32>
    %c5_i32 = arith.constant 5 : i32
    %452 = vector.broadcast %c5_i32 : i32 to vector<8x128xi32>
    %453 = arith.cmpi eq, %5, %452 : vector<8x128xi32>
    %454 = vector.broadcast %451 : f32 to vector<8x128xf32>
    %455 = arith.select %453, %454, %378 : vector<8x128xi1>, vector<8x128xf32>
    %c5_i32_216 = arith.constant 5 : i32
    %456 = vector.broadcast %c5_i32_216 : i32 to vector<8x128xi32>
    %457 = arith.cmpi eq, %5, %456 : vector<8x128xi32>
    %458 = vector.broadcast %446 : f32 to vector<8x128xf32>
    %459 = arith.select %457, %458, %382 : vector<8x128xi1>, vector<8x128xf32>
    %cst_217 = arith.constant dense<0.000000e+00> : vector<24x48xf32>
    %460 = tpu.matmul %3, %394, %cst_217 {dimension_numbers = #tpu.dot_dimension_numbers<[1], [0], [0], [1], [0, 0, 1, 1], [], []>} : vector<24x48xf32>, vector<48x48xf32>, vector<24x48xf32> -> vector<24x48xf32>
    %cst_218 = arith.constant dense<0.000000e+00> : vector<24x24xf32>
    %461 = tpu.matmul %460, %4, %cst_218 {dimension_numbers = #tpu.dot_dimension_numbers<[1], [0], [0], [1], [0, 0, 1, 1], [], []>} : vector<24x48xf32>, vector<48x24xf32>, vector<24x24xf32> -> vector<24x24xf32>
    %c5_219 = arith.constant 5 : index
    %c0_220 = arith.constant 0 : index
    %c0_221 = arith.constant 0 : index
    %462 = vector.load %arg10[%c5_219, %c0_220, %c0_221] : memref<6x24x24xf32, #tpu.memory_space<vmem>>, vector<1x24x24xf32>
    %463 = vector.shape_cast %462 : vector<1x24x24xf32> to vector<24x24xf32>
    %464 = vector.shape_cast %461 : vector<24x24xf32> to vector<1x24x24xf32>
    tpu.vector_store %arg10[%c5_219, %c0_220, %c0_221], %464 {strides = array<i32>} : memref<6x24x24xf32, #tpu.memory_space<vmem>>, vector<1x24x24xf32>,
    %cst_222 = arith.constant dense<0.000000e+00> : vector<24x48xf32>
    %465 = tpu.matmul %3, %396, %cst_222 {dimension_numbers = #tpu.dot_dimension_numbers<[1], [0], [0], [1], [0, 0, 1, 1], [], []>} : vector<24x48xf32>, vector<48x48xf32>, vector<24x48xf32> -> vector<24x48xf32>
    %cst_223 = arith.constant dense<0.000000e+00> : vector<24x24xf32>
    %466 = tpu.matmul %465, %4, %cst_223 {dimension_numbers = #tpu.dot_dimension_numbers<[1], [0], [0], [1], [0, 0, 1, 1], [], []>} : vector<24x48xf32>, vector<48x24xf32>, vector<24x24xf32> -> vector<24x24xf32>
    %c5_224 = arith.constant 5 : index
    %c0_225 = arith.constant 0 : index
    %c0_226 = arith.constant 0 : index
    %467 = vector.load %arg11[%c5_224, %c0_225, %c0_226] : memref<6x24x24xf32, #tpu.memory_space<vmem>>, vector<1x24x24xf32>
    %468 = vector.shape_cast %467 : vector<1x24x24xf32> to vector<24x24xf32>
    %469 = vector.shape_cast %466 : vector<24x24xf32> to vector<1x24x24xf32>
    tpu.vector_store %arg11[%c5_224, %c0_225, %c0_226], %469 {strides = array<i32>} : memref<6x24x24xf32, #tpu.memory_space<vmem>>, vector<1x24x24xf32>,
    %c0_227 = arith.constant 0 : index
    %c0_228 = arith.constant 0 : index
    %c0_229 = arith.constant 0 : index
    %470 = vector.load %arg8[%c0_227, %c0_228, %c0_229] : memref<1x8x128xf32, #tpu.memory_space<vmem>>, vector<1x8x128xf32>
    %471 = vector.shape_cast %470 : vector<1x8x128xf32> to vector<8x128xf32>
    %472 = vector.shape_cast %455 : vector<8x128xf32> to vector<1x8x128xf32>
    tpu.vector_store %arg8[%c0_227, %c0_228, %c0_229], %472 {strides = array<i32>} : memref<1x8x128xf32, #tpu.memory_space<vmem>>, vector<1x8x128xf32>,
    %c0_230 = arith.constant 0 : index
    %c0_231 = arith.constant 0 : index
    %c0_232 = arith.constant 0 : index
    %473 = vector.load %arg9[%c0_230, %c0_231, %c0_232] : memref<1x8x128xf32, #tpu.memory_space<vmem>>, vector<1x8x128xf32>
    %474 = vector.shape_cast %473 : vector<1x8x128xf32> to vector<8x128xf32>
    %475 = vector.shape_cast %459 : vector<8x128xf32> to vector<1x8x128xf32>
    tpu.vector_store %arg9[%c0_230, %c0_231, %c0_232], %475 {strides = array<i32>} : memref<1x8x128xf32, #tpu.memory_space<vmem>>, vector<1x8x128xf32>,
    return
  }
  func.func @transform_0(%arg0: i32) -> (i32, i32) {
    %c0_i32 = arith.constant 0 : i32
    %c0_i32_0 = arith.constant 0 : i32
    %c0_i32_1 = arith.constant 0 : i32
    return %c0_i32, %c0_i32_0 : i32, i32
  }
  func.func @transform_1(%arg0: i32) -> (i32, i32) {
    %c0_i32 = arith.constant 0 : i32
    %c0_i32_0 = arith.constant 0 : i32
    %c0_i32_1 = arith.constant 0 : i32
    return %c0_i32, %c0_i32_0 : i32, i32
  }
  func.func @transform_2(%arg0: i32) -> (i32, i32) {
    %c0_i32 = arith.constant 0 : i32
    %c0_i32_0 = arith.constant 0 : i32
    %c0_i32_1 = arith.constant 0 : i32
    return %c0_i32, %c0_i32_0 : i32, i32
  }
  func.func @transform_3(%arg0: i32) -> (i32, i32, i32) {
    %c0_i32 = arith.constant 0 : i32
    %c0_i32_0 = arith.constant 0 : i32
    %c0_i32_1 = arith.constant 0 : i32
    return %arg0, %c0_i32, %c0_i32_0 : i32, i32, i32
  }
  func.func @transform_4(%arg0: i32) -> (i32, i32, i32) {
    %c0_i32 = arith.constant 0 : i32
    %c0_i32_0 = arith.constant 0 : i32
    %c0_i32_1 = arith.constant 0 : i32
    return %arg0, %c0_i32, %c0_i32_0 : i32, i32, i32
  }
  func.func @transform_5(%arg0: i32) -> (i32, i32) {
    %c0_i32 = arith.constant 0 : i32
    %c0_i32_0 = arith.constant 0 : i32
    %c0_i32_1 = arith.constant 0 : i32
    return %c0_i32, %c0_i32_0 : i32, i32
  }
  func.func @transform_6(%arg0: i32) -> (i32, i32) {
    %c0_i32 = arith.constant 0 : i32
    %c0_i32_0 = arith.constant 0 : i32
    %c0_i32_1 = arith.constant 0 : i32
    return %c0_i32, %c0_i32_0 : i32, i32
  }
  func.func @transform_7(%arg0: i32) -> (i32, i32, i32) {
    %c0_i32 = arith.constant 0 : i32
    %c0_i32_0 = arith.constant 0 : i32
    %c0_i32_1 = arith.constant 0 : i32
    return %arg0, %c0_i32, %c0_i32_0 : i32, i32, i32
  }
  func.func @transform_8(%arg0: i32) -> (i32, i32, i32) {
    %c0_i32 = arith.constant 0 : i32
    %c0_i32_0 = arith.constant 0 : i32
    %c0_i32_1 = arith.constant 0 : i32
    return %arg0, %c0_i32, %c0_i32_0 : i32, i32, i32
  }
  func.func @transform_9(%arg0: i32) -> (i32, i32, i32) {
    %c0_i32 = arith.constant 0 : i32
    %c0_i32_0 = arith.constant 0 : i32
    %c0_i32_1 = arith.constant 0 : i32
    return %arg0, %c0_i32, %c0_i32_0 : i32, i32, i32
  }
  func.func @transform_10(%arg0: i32) -> (i32, i32, i32) {
    %c0_i32 = arith.constant 0 : i32
    %c0_i32_0 = arith.constant 0 : i32
    %c0_i32_1 = arith.constant 0 : i32
    return %arg0, %c0_i32, %c0_i32_0 : i32, i32, i32
  }
}

</mosaic_0001>

<bundles_post_ra>
// kernel: tpu_custom_call.1
= control target key start
LH: loop header
LB: loop body
LE: loop exit
PB: predicated region body
PF: predicated region fallthrough
CT: control target
= control target key end

     0   :  { %16 = vsyncpa [#allocation3], 0  ;;  %s17441_s0 = inlined_call_operand.vmem [shape: f32[46,48], index: 0, kind: input, shape index: {}]   ;;  %s17442_s1 = inlined_call_operand.hbm [shape: f32[48,46], index: 1, kind: input, shape index: {}]   ;;  %s17443_s2 = inlined_call_operand.hbm [shape: f32[46,46], index: 2, kind: input, shape index: {}]   ;;  %s17444_s3 = inlined_call_operand.hbm [shape: f32[6,48,48], index: 3, kind: input, shape index: {}]   ;;  %s17445_s4 = inlined_call_operand.hbm [shape: f32[6,48,48], index: 4, kind: input, shape index: {}]   ;;  %s17446_s5 = inlined_call_operand.vmem [shape: f32[24,48], index: 5, kind: input, shape index: {}]   ;;  %s17447_s6 = inlined_call_operand.vmem [shape: f32[48,24], index: 6, kind: input, shape index: {}]   ;;  %s17448_s7 = inlined_call_operand.hbm [shape: f32[1,8,128], index: 7, kind: output, shape index: {0}]   ;;  %s17449_s8 = inlined_call_operand.hbm [shape: f32[1,8,128], index: 8, kind: output, shape index: {1}]   ;;  %s17450_s9 = inlined_call_operand.hbm [shape: f32[6,24,24], index: 9, kind: output, shape index: {2}]   ;;  %s17451_s10 = inlined_call_operand.hbm [shape: f32[6,24,24], index: 10, kind: output, shape index: {3}]  }
   0x1   :  { %17 = vsyncpa [#allocation6], 0 }
   0x2   :  { %18 = vsyncpa [#allocation9], 0 }
   0x3   :  { %19 = vsyncpa [#allocation4], 0 }
   0x4   :  { %20 = vsyncpa [#allocation12], 0 }
   0x5   :  { %21 = vsyncpa [#allocation15], 0  ;;  %s14389_s13 = smov [#allocation5]   ;;  %s14390_s15 = smov [#allocation2]  }
   0x6   :  { %s41_s14 = sshll.u32 %s14389_s13, 4  ;;  %s29_s16 = sshll.u32 %s14390_s15, 4  ;;  %s42_s14 = int_to_ptr.vmem [resolvable:$true] %s41_s14  ;;  %s14457_s16 = int_to_ptr.vmem [resolvable:$true] %s29_s16 }
   0x7   :  { %s14201_s19 = scalar_lea.hbm %s17443_s2, 768 }
   0x8   :  { %p14202_p0 = scmp.ne.s32.totalorder %s17443_s2, %s14201_s19  ;;  %p14205_p1 = scmp.lt.u32.totalorder %s14201_s19, %s17443_s2 }
   0xa   :  { %p14207_p2 = pnand %p14205_p1, %p14202_p0 }
   0xc   :  { %14210 = shalt.err (!%p14207_p2)
}
   0xd   :  { %s14211_s24 = scalar_lea.vmem %s42_s14, 768  ;;  %p14216_p4 = scmp.lt.s32.totalorder %s42_s14, %s42_s14 }
   0xe   :  { %p14212_p3 = scmp.ne.s32.totalorder %s42_s14, %s14211_s24  ;;  %p14217_p5 = scmp.lt.s32.totalorder %s14211_s24, %s14211_s24 }
  0x10   :  { %p14218_p6 = por %p14217_p5, %p14216_p4 }
  0x12   :  { %p14219_p7 = pnand %p14218_p6, %p14212_p3 }
  0x14   :  { %14222 = shalt.err (!%p14219_p7)
}
  0x15   :  { %s14391_s25 = smov 128   ;;  %s14392_s26 = smov 8  }
  0x16   :  { %47 = dma.hbm_to_vmem [thread:$0]  %s17443_s2, 768, %s42_s14, [#allocation6], %s14391_s25, %s14391_s25, %s14392_s26  }
  0x17   :  { %s14223_s11 = scalar_lea.hbm %s17442_s1, 768 }
  0x18   :  { %p14224_p8 = scmp.ne.s32.totalorder %s17442_s1, %s14223_s11  ;;  %p14227_p9 = scmp.lt.u32.totalorder %s14223_s11, %s17442_s1 }
  0x1a   :  { %p14229_p10 = pnand %p14227_p9, %p14224_p8 }
  0x1c   :  { %14232 = shalt.err (!%p14229_p10)
}
  0x1d   :  { %s14233_s18 = scalar_lea.vmem %s14457_s16, 768  ;;  %p14238_p12 = scmp.lt.s32.totalorder %s14457_s16, %s14457_s16 }
  0x1e   :  { %p14234_p11 = scmp.ne.s32.totalorder %s14457_s16, %s14233_s18  ;;  %p14239_p13 = scmp.lt.s32.totalorder %s14233_s18, %s14233_s18 }
  0x20   :  { %p14240_p0 = por %p14239_p13, %p14238_p12 }
  0x22   :  { %p14241_p1 = pnand %p14240_p0, %p14234_p11 }
  0x24   :  { %14244 = shalt.err (!%p14241_p1)
}
  0x25   :  { %35 = dma.hbm_to_vmem [thread:$0]  %s17442_s1, 768, %s14457_s16, [#allocation3], %s14391_s25, %s14391_s25, %s14392_s26  }
  0x26   :  { %s14393_s19 = smov [#allocation7]   ;;  %s14394_s21 = smov [#allocation8]  }
  0x27   :  { %s53_s20 = sshll.u32 %s14393_s19, 4  ;;  %s65_s22 = sshll.u32 %s14394_s21, 4  ;;  %s54_s20 = int_to_ptr.vmem [resolvable:$true] %s53_s20  ;;  %s14494_s22 = int_to_ptr.vmem [resolvable:$true] %s65_s22 }
  0x28   :  { %s14245_s27 = scalar_lea.hbm %s17444_s3, 4608 }
  0x29   :  { %p14246_p2 = scmp.ne.s32.totalorder %s17444_s3, %s14245_s27  ;;  %p14249_p3 = scmp.lt.u32.totalorder %s14245_s27, %s17444_s3 }
  0x2b   :  { %p14251_p4 = pnand %p14249_p3, %p14246_p2 }
  0x2d   :  { %14254 = shalt.err (!%p14251_p4)
}
  0x2e   :  { %s14255_s1 = scalar_lea.vmem %s54_s20, 4608  ;;  %p14260_p6 = scmp.lt.s32.totalorder %s54_s20, %s54_s20 }
  0x2f   :  { %p14256_p5 = scmp.ne.s32.totalorder %s54_s20, %s14255_s1  ;;  %p14261_p7 = scmp.lt.s32.totalorder %s14255_s1, %s14255_s1 }
  0x31   :  { %p14262_p8 = por %p14261_p7, %p14260_p6 }
  0x33   :  { %p14263_p9 = pnand %p14262_p8, %p14256_p5 }
  0x35   :  { %14266 = shalt.err (!%p14263_p9)
}
  0x36   :  { %59 = dma.hbm_to_vmem [thread:$0]  %s17444_s3, 4608, %s54_s20, [#allocation6], %s14391_s25, %s14391_s25, %s14392_s26  }
  0x37   :  { %s14267_s17 = scalar_lea.hbm %s17445_s4, 4608 }
  0x38   :  { %p14268_p10 = scmp.ne.s32.totalorder %s17445_s4, %s14267_s17  ;;  %p14271_p11 = scmp.lt.u32.totalorder %s14267_s17, %s17445_s4 }
  0x3a   :  { %p14273_p12 = pnand %p14271_p11, %p14268_p10 }
  0x3c   :  { %14276 = shalt.err (!%p14273_p12)
}
  0x3d   :  { %s14277_s21 = scalar_lea.vmem %s14494_s22, 4608  ;;  %p14282_p0 = scmp.lt.s32.totalorder %s14494_s22, %s14494_s22 }
  0x3e   :  { %p14278_p13 = scmp.ne.s32.totalorder %s14494_s22, %s14277_s21  ;;  %p14283_p1 = scmp.lt.s32.totalorder %s14277_s21, %s14277_s21 }
  0x40   :  { %p14284_p2 = por %p14283_p1, %p14282_p0 }
  0x42   :  { %p14285_p3 = pnand %p14284_p2, %p14278_p13 }
  0x44   :  { %14288 = shalt.err (!%p14285_p3)
}
  0x45   :  { %71 = dma.hbm_to_vmem [thread:$0]  %s17445_s4, 4608, %s14494_s22, [#allocation9], %s14391_s25, %s14391_s25, %s14392_s26  }
  0x46   :  { %14377 = dma.done.wait [#allocation3], 768  }
  0x47   :  { %14378 = vsyncadd [#allocation3], 4294966528 }
  0x48   :  { %14379 = dma.done.wait [#allocation6], 5376  }
  0x49   :  { %14380 = vsyncadd [#allocation6], 4294961920 }
  0x4a   :  { %14381 = dma.done.wait [#allocation9], 4608  }
  0x4b   :  { %14382 = vsyncadd [#allocation9], 4294962688  ;;  %v14531_v0 = vld [vmem:[#allocation7] sm:$0xff]  ;;  %v14533_v1 = vld [vmem:[#allocation7 + $0x8] sm:$0xff]  ;;  %vm129_vm0 = vcmask 392192   ;;  %v17452_v51 = vmov 0.0|0.0  }
  0x4c   :  { %v14535_v2 = vld [vmem:[#allocation7 + $0x10] sm:$0xff]  ;;  %v14539_v3 = vpack.c.bf16 %v14533_v1, %v14531_v0  ;;  %v14541_v4 = vld [vmem:[#allocation7 + $0x18] sm:$0xff]  ;;  %v14547_v6 = vld [vmem:[#allocation7 + $0x20] sm:$0xff]  ;;  %v564_v23 = vmul.f32 %v14531_v0, %v14531_v0  ;;  %v565_v24 = vmul.f32 %v14533_v1, %v14533_v1  ;;  %vm14396_vm1 = vmmov 0  }
  0x4d   :  { %v14545_v5 = vpack.c.bf16 %v14541_v4, %v14535_v2  ;;  %v14549_v7 = vld [vmem:[#allocation7 + $0x28] sm:$0xff]  ;;  %v14554_v8 = vld [vmem:[%s17441_s0] sm:$0xff]  ;;  %v14575_v13 = vld [vmem:[#allocation8 + $0x10] sm:$0xff]  ;;  %v566_v27 = vmul.f32 %v14535_v2, %v14535_v2  ;;  %v567_v28 = vmul.f32 %v14541_v4, %v14541_v4  ;;  %v568_v30 = vmul.f32 %v14547_v6, %v14547_v6 }
  0x4e   :  { %13055 = vmatprep.subr.bf16.mxu0 %v14539_v3  ;;  %11302 = vmatprep.mubr.msk.f32.mxu0 %vm129_vm0, %v14554_v8  ;;  %v14563_v9 = vpack.c.bf16 %v14549_v7, %v14547_v6  ;;  %v14565_v10 = vld [vmem:[#allocation8] sm:$0xff]  ;;  %v14567_v11 = vld [vmem:[#allocation8 + $0x8] sm:$0xff]  ;;  %v14577_v14 = vld [vmem:[#allocation8 + $0x18] sm:$0xff]  ;;  %v13102_v26 = vpack.c.bf16 %v565_v24, %v564_v23  ;;  %v569_v31 = vmul.f32 %v14549_v7, %v14549_v7  ;;  %v17454_v52 = vmov 0.0  }
  0x4f   :  { %13057 = vmatpush3.bf16.msra.mxu0 %v14539_v3  ;;  %v14573_v12 = vpack.c.bf16 %v14567_v11, %v14565_v10  ;;  %v14583_v15 = vld [vmem:[%s17441_s0 + $0x8] sm:$0xff]  ;;  %v14589_v16 = vld [vmem:[%s17441_s0 + $0x10] sm:$0xff]  ;;  %v14593_v17 = vpack.c.bf16 %v14577_v14, %v14575_v13  ;;  %v14595_v18 = vld [vmem:[#allocation8 + $0x20] sm:$0xff]  ;;  %v13106_v29 = vpack.c.bf16 %v567_v28, %v566_v27  ;;  %v778_v33 = vmul.f32 %v14565_v10, %v14565_v10 }
  0x50   :  { %13059 = vmatprep.subr.bf16.mxu0 %v14545_v5  ;;  %v14597_v19 = vld [vmem:[#allocation8 + $0x28] sm:$0xff]  ;;  %v14607_v20 = vld [vmem:[%s17441_s0 + $0x18] sm:$0xff]  ;;  %v14613_v21 = vld [vmem:[%s17441_s0 + $0x20] sm:$0xff]  ;;  %v13110_v32 = vpack.c.bf16 %v569_v31, %v568_v30  ;;  %v779_v34 = vmul.f32 %v14567_v11, %v14567_v11  ;;  %v780_v36 = vmul.f32 %v14575_v13, %v14575_v13  ;;  %v781_v37 = vmul.f32 %v14577_v14, %v14577_v14 }
  0x51   :  { %v14617_v22 = vpack.c.bf16 %v14597_v19, %v14595_v18  ;;  %v14631_v25 = vld [vmem:[%s17441_s0 + $0x28] sm:$0x3f]  ;;  %v782_v39 = vmul.f32 %v14595_v18, %v14595_v18  ;;  %v783_v40 = vmul.f32 %v14597_v19, %v14597_v19  ;;  %v992_v42 = vmul.f32 %v14565_v10, %v14531_v0  ;;  %v14728_v53 = vld [vmem:[%s17446_s5] sm:$0xff]  ;;  %v14742_v55 = vld [vmem:[#allocation7 + $0x30] sm:$0xff] }
  0x52   :  { %v13126_v35 = vpack.c.bf16 %v779_v34, %v778_v33  ;;  %v13130_v38 = vpack.c.bf16 %v781_v37, %v780_v36  ;;  %v993_v43 = vmul.f32 %v14567_v11, %v14533_v1  ;;  %v994_v45 = vmul.f32 %v14575_v13, %v14535_v2  ;;  %v14739_v54 = vld [vmem:[%s17446_s5 + $0x8] sm:$0xff]  ;;  %v14744_v56 = vld [vmem:[#allocation7 + $0x38] sm:$0xff]  ;;  %v14754_v57 = vld [vmem:[%s17446_s5 + $0x10] sm:$0xff] }
  0x53   :  { %13061 = vmatpush3.bf16.msra.mxu0 %v14545_v5  ;;  %v13134_v41 = vpack.c.bf16 %v783_v40, %v782_v39  ;;  %v995_v46 = vmul.f32 %v14577_v14, %v14541_v4  ;;  %v996_v48 = vmul.f32 %v14595_v18, %v14547_v6  ;;  %v997_v49 = vmul.f32 %v14597_v19, %v14549_v7  ;;  %v14761_v59 = vld [vmem:[#allocation7 + $0x40] sm:$0xff]  ;;  %v14763_v60 = vld [vmem:[#allocation7 + $0x48] sm:$0xff]  ;;  %v14775_v62 = vld [vmem:[#allocation7 + $0x50] sm:$0xff] }
  0x54   :  { %13063 = vmatprep.subr.bf16.mxu0 %v14563_v9  ;;  %v13150_v44 = vpack.c.bf16 %v993_v43, %v992_v42  ;;  %v14759_v58 = vpack.c.bf16 %v14744_v56, %v14742_v55  ;;  %v14773_v61 = vpack.c.bf16 %v14763_v60, %v14761_v59  ;;  %v14777_v63 = vld [vmem:[#allocation7 + $0x58] sm:$0xff]  ;;  %v94_v0 = vld [vmem:[#allocation2] sm:$0xff]  ;;  %v95_v1 = vld [vmem:[#allocation2 + $0x8] sm:$0xff]  ;;  %v2193_v24 = vmul.f32 %v14742_v55, %v14742_v55 }
  0x55   :  { %v13154_v47 = vpack.c.bf16 %v995_v46, %v994_v45  ;;  %v13158_v50 = vpack.c.bf16 %v997_v49, %v996_v48  ;;  %v14781_v2 = vpack.c.bf16 %v95_v1, %v94_v0  ;;  %v14791_v4 = vld [vmem:[#allocation8 + $0x30] sm:$0xff]  ;;  %v97_v7 = vld [vmem:[#allocation2 + $0x18] sm:$0xff]  ;;  %v14809_v11 = vld [vmem:[#allocation8 + $0x40] sm:$0xff]  ;;  %v2195_v28 = vmul.f32 %v14761_v59, %v14761_v59 }
  0x56   :  { %v96_v6 = vld [vmem:[#allocation2 + $0x10] sm:$0xff]  ;;  %v98_v13 = vld [vmem:[#allocation2 + $0x20] sm:$0xff]  ;;  %v99_v14 = vld [vmem:[#allocation2 + $0x28] sm:$0xff]  ;;  %v2197_v31 = vmul.f32 %v14775_v62, %v14775_v62  ;;  %v2407_v34 = vmul.f32 %v14791_v4, %v14791_v4  ;;  %v2409_v37 = vmul.f32 %v14809_v11, %v14809_v11  ;;  %v2621_v43 = vmul.f32 %v14791_v4, %v14742_v55 }
  0x57   :  { %13065 = vmatpush3.bf16.msra.mxu0 %v14563_v9  ;;  %13067 = vmatprep.subr.bf16.mxu1 %v14781_v2  ;;  %v14828_v19 = vld [vmem:[#allocation8 + $0x50] sm:$0xff]  ;;  %v2623_v46 = vmul.f32 %v14809_v11, %v14761_v59  ;;  %v14982_v0 = vld [vmem:[#allocation7 + $0x88] sm:$0xff]  ;;  %vm1587_vm2 = vcmask 195584   ;;  %vm1356_vm3 = vcmask 375808   ;;  %vm1366_vm4 = vcmask 373760  }
  0x58   :  { %13079 = vmatprep.subr.bf16.mxu0 %v14573_v12  ;;  %13069 = vmatpush3.bf16.msra.mxu1 %v14781_v2  ;;  %v2411_v40 = vmul.f32 %v14828_v19, %v14828_v19  ;;  %v2625_v49 = vmul.f32 %v14828_v19, %v14775_v62 }
  0x5a   :  { %11303 = vmatmul.mubr.msk.f32.vlgmr.msra.gmra.mrb[0].mxu0 %vm129_vm0, %v14583_v15 }
  0x5b   :  { %13081 = vmatpush3.bf16.msra.mxu0 %v14573_v12  ;;  %11305 = vmatprep.mubr.msk.f32.mxu0 %vm129_vm0, %v14589_v16 }
  0x5c   :  { %13083 = vmatprep.subr.bf16.mxu0 %v14593_v17 }
  0x5e   :  { %11306 = vmatmul.mubr.msk.f32.gmra.mrb[2].mxu0 %vm129_vm0, %v14607_v20 }
  0x5f   :  { %13085 = vmatpush3.bf16.msra.mxu0 %v14593_v17  ;;  %11308 = vmatprep.mubr.msk.f32.mxu0 %vm129_vm0, %v14613_v21 }
  0x60   :  { %13087 = vmatprep.subr.bf16.mxu0 %v14617_v22 }
  0x62   :  { %11309 = vmatmul.mubr.msk.f32.gmra.mrb[4].mxu0 %vm129_vm0, %v14631_v25 }
  0x63   :  { %13089 = vmatpush3.bf16.msra.mxu0 %v14617_v22  ;;  %11344 = vmatprep.mubr.msk.f32.mxu0 %vm129_vm0, %v14554_v8 }
  0x64   :  { %13103 = vmatprep.subr.bf16.mxu0 %v13102_v26 }
  0x66   :  { %11345 = vmatmul.mubr.msk.f32.vlgmr.msra.gmra.mrb[6].mxu0 %vm129_vm0, %v14583_v15 }
  0x67   :  { %13105 = vmatpush3.bf16.msra.mxu0 %v13102_v26  ;;  %11347 = vmatprep.mubr.msk.f32.mxu0 %vm129_vm0, %v14589_v16  ;;  %v2194_v26 = vmul.f32 %v14744_v56, %v14744_v56 }
  0x68   :  { %13107 = vmatprep.subr.bf16.mxu0 %v13106_v29 }
  0x69   :  { %v13258_v27 = vpack.c.bf16 %v2194_v26, %v2193_v24 }
  0x6a   :  { %11348 = vmatmul.mubr.msk.f32.gmra.mrb[8].mxu0 %vm129_vm0, %v14607_v20 }
  0x6b   :  { %13109 = vmatpush3.bf16.msra.mxu0 %v13106_v29  ;;  %11350 = vmatprep.mubr.msk.f32.mxu0 %vm129_vm0, %v14613_v21  ;;  %v2196_v29 = vmul.f32 %v14763_v60, %v14763_v60 }
  0x6c   :  { %13111 = vmatprep.subr.bf16.mxu0 %v13110_v32 }
  0x6d   :  { %v13262_v30 = vpack.c.bf16 %v2196_v29, %v2195_v28 }
  0x6e   :  { %11351 = vmatmul.mubr.msk.f32.gmra.mrb[10].mxu0 %vm129_vm0, %v14631_v25 }
  0x6f   :  { %13113 = vmatpush3.bf16.msra.mxu0 %v13110_v32  ;;  %11386 = vmatprep.mubr.msk.f32.mxu0 %vm129_vm0, %v14554_v8  ;;  %v2198_v32 = vmul.f32 %v14777_v63, %v14777_v63 }
  0x70   :  { %13127 = vmatprep.subr.bf16.mxu0 %v13126_v35 }
  0x71   :  { %v13266_v33 = vpack.c.bf16 %v2198_v32, %v2197_v31 }
  0x72   :  { %11387 = vmatmul.mubr.msk.f32.vlgmr.msra.gmra.mrb[12].mxu0 %vm129_vm0, %v14583_v15 }
  0x73   :  { %13129 = vmatpush3.bf16.msra.mxu0 %v13126_v35  ;;  %11389 = vmatprep.mubr.msk.f32.mxu0 %vm129_vm0, %v14589_v16 }
  0x74   :  { %13131 = vmatprep.subr.bf16.mxu0 %v13130_v38 }
  0x76   :  { %11390 = vmatmul.mubr.msk.f32.gmra.mrb[14].mxu0 %vm129_vm0, %v14607_v20 }
  0x77   :  { %13133 = vmatpush3.bf16.msra.mxu0 %v13130_v38  ;;  %11392 = vmatprep.mubr.msk.f32.mxu0 %vm129_vm0, %v14613_v21 }
  0x78   :  { %13135 = vmatprep.subr.bf16.mxu0 %v13134_v41 }
  0x7a   :  { %11393 = vmatmul.mubr.msk.f32.gmra.mrb[16].mxu0 %vm129_vm0, %v14631_v25 }
  0x7b   :  { %13137 = vmatpush3.bf16.msra.mxu0 %v13134_v41  ;;  %11428 = vmatprep.mubr.msk.f32.mxu0 %vm129_vm0, %v14554_v8 }
  0x7c   :  { %13151 = vmatprep.subr.bf16.mxu0 %v13150_v44 }
  0x7e   :  { %11429 = vmatmul.mubr.msk.f32.vlgmr.msra.gmra.mrb[18].mxu0 %vm129_vm0, %v14583_v15 }
  0x7f   :  { %13153 = vmatpush3.bf16.msra.mxu0 %v13150_v44  ;;  %11431 = vmatprep.mubr.msk.f32.mxu0 %vm129_vm0, %v14589_v16 }
  0x80   :  { %13155 = vmatprep.subr.bf16.mxu0 %v13154_v47 }
  0x82   :  { %11432 = vmatmul.mubr.msk.f32.gmra.mrb[20].mxu0 %vm129_vm0, %v14607_v20 }
  0x83   :  { %13157 = vmatpush3.bf16.msra.mxu0 %v13154_v47  ;;  %11434 = vmatprep.mubr.msk.f32.mxu0 %vm129_vm0, %v14613_v21 }
  0x84   :  { %13159 = vmatprep.subr.bf16.mxu0 %v13158_v50 }
  0x86   :  { %11435 = vmatmul.mubr.msk.f32.gmra.mrb[22].mxu0 %vm129_vm0, %v14631_v25 }
  0x87   :  { %13161 = vmatpush3.bf16.msra.mxu0 %v13158_v50  ;;  %11470 = vmatprep.mubr.msk.f32.mxu0 %vm129_vm0, %v14554_v8 }
  0x88   :  { %13174 = vmatprep.subr.bf16.mxu0 %v17452_v51 }
  0x8a   :  { %11471 = vmatmul.mubr.msk.f32.vlgmr.msra.gmra.mrb[24].mxu0 %vm129_vm0, %v14583_v15 }
  0x8b   :  { %13176 = vmatpush3.bf16.msra.mxu0 %v14539_v3  ;;  %11473 = vmatprep.mubr.msk.f32.mxu0 %vm129_vm0, %v14589_v16  ;;  %v14789_v3 = vpack.c.bf16 %v14777_v63, %v14775_v62 }
  0x8c   :  { %13177 = vmatprep.subr.bf16.mxu0 %v17452_v51 }
  0x8e   :  { %11474 = vmatmul.mubr.msk.f32.gmra.mrb[26].mxu0 %vm129_vm0, %v14607_v20 }
  0x8f   :  { %13179 = vmatpush3.bf16.msra.mxu0 %v14545_v5  ;;  %11476 = vmatprep.mubr.msk.f32.mxu0 %vm129_vm0, %v14613_v21  ;;  %v14794_v5 = vld [vmem:[#allocation8 + $0x38] sm:$0xff] }
  0x90   :  { %13180 = vmatprep.subr.bf16.mxu0 %v17452_v51  ;;  %v14807_v10 = vpack.c.bf16 %v14794_v5, %v14791_v4  ;;  %v2408_v35 = vmul.f32 %v14794_v5, %v14794_v5  ;;  %v2622_v44 = vmul.f32 %v14794_v5, %v14744_v56  ;;  %v14952_v56 = vld [vmem:[#allocation7 + $0x60] sm:$0xff]  ;;  %v14996_v4 = vld [vmem:[#allocation8 + $0x68] sm:$0xff] }
  0x92   :  { %11477 = vmatmul.mubr.msk.f32.gmra.mrb[28].mxu0 %vm129_vm0, %v14631_v25  ;;  %v13282_v36 = vpack.c.bf16 %v2408_v35, %v2407_v34  ;;  %v13306_v45 = vpack.c.bf16 %v2622_v44, %v2621_v43 }
  0x93   :  { %13182 = vmatpush3.bf16.msra.mxu0 %v14563_v9  ;;  %11512 = vmatprep.mubr.msk.f32.mxu0 %vm14396_vm1, %v17454_v52  ;;  %v14799_v9 = vpack.c.bf16 %v97_v7, %v96_v6  ;;  %v15008_v6 = vld [vmem:[#allocation8 + $0x70] sm:$0xff]  ;;  %v15010_v7 = vld [vmem:[#allocation8 + $0x78] sm:$0xff] }
  0x94   :  { %13192 = vmatprep.subr.bf16.mxu0 %v17452_v51  ;;  %v4028_v32 = vmul.f32 %v15008_v6, %v15008_v6 }
  0x95   :  { %13071 = vmatprep.subr.bf16.mxu1 %v14799_v9 }
  0x96   :  { %11513 = vmatmul.mubr.msk.f32.vlgmr.msra.gmra.mrb[30].mxu0 %vm129_vm0, %v14728_v53  ;;  %13073 = vmatpush3.bf16.msra.mxu1 %v14799_v9 }
  0x97   :  { %13194 = vmatpush3.bf16.msra.mxu0 %v14573_v12  ;;  %11515 = vmatprep.mubr.msk.f32.mxu0 %vm14396_vm1, %v17454_v52  ;;  %v14812_v12 = vld [vmem:[#allocation8 + $0x48] sm:$0xff] }
  0x98   :  { %13195 = vmatprep.subr.bf16.mxu0 %v17452_v51  ;;  %v14825_v18 = vpack.c.bf16 %v14812_v12, %v14809_v11  ;;  %v2410_v38 = vmul.f32 %v14812_v12, %v14812_v12  ;;  %v2624_v47 = vmul.f32 %v14812_v12, %v14763_v60  ;;  %v14966_v60 = vld [vmem:[#allocation7 + $0x70] sm:$0xff]  ;;  %v15022_v11 = vld [vmem:[#allocation8 + $0x80] sm:$0xff]  ;;  %v15024_v12 = vld [vmem:[#allocation8 + $0x88] sm:$0xff] }
  0x99   :  { %v4030_v35 = vmul.f32 %v15022_v11, %v15022_v11 }
  0x9a   :  { %11516 = vmatmul.mubr.msk.f32.gmra.mrb[32].mxu0 %vm129_vm0, %v14739_v54  ;;  %v13286_v39 = vpack.c.bf16 %v2410_v38, %v2409_v37  ;;  %v13310_v48 = vpack.c.bf16 %v2624_v47, %v2623_v46 }
  0x9b   :  { %13197 = vmatpush3.bf16.msra.mxu0 %v14593_v17  ;;  %11518 = vmatprep.mubr.msk.f32.mxu0 %vm14396_vm1, %v17454_v52  ;;  %v14817_v17 = vpack.c.bf16 %v99_v14, %v98_v13  ;;  %v15034_v13 = vpack.c.bf16 %v15024_v12, %v15022_v11  ;;  %v3812_v14 = vmul.f32 %v14952_v56, %v14952_v56 }
  0x9c   :  { %13198 = vmatprep.subr.bf16.mxu0 %v17452_v51 }
  0x9d   :  { %13075 = vmatprep.subr.bf16.mxu1 %v14817_v17 }
  0x9e   :  { %11519 = vmatmul.mubr.msk.f32.gmra.mrb[34].mxu0 %vm129_vm0, %v14754_v57  ;;  %13077 = vmatpush3.bf16.msra.mxu1 %v14817_v17 }
  0x9f   :  { %13200 = vmatpush3.bf16.msra.mxu0 %v14617_v22  ;;  %11554 = vmatprep.mubr.msk.f32.mxu0 %vm14396_vm1, %v17454_v52  ;;  %v14830_v22 = vld [vmem:[#allocation8 + $0x58] sm:$0xff] }
  0xa0   :  { %13211 = vmatprep.subr.bf16.mxu0 %v14759_v58  ;;  %13091 = vmatprep.subr.bf16.mxu1 %v14781_v2  ;;  %v14842_v23 = vpack.c.bf16 %v14830_v22, %v14828_v19  ;;  %v2412_v41 = vmul.f32 %v14830_v22, %v14830_v22  ;;  %v2626_v50 = vmul.f32 %v14830_v22, %v14777_v63  ;;  %v14980_v63 = vld [vmem:[#allocation7 + $0x80] sm:$0xff] }
  0xa1   :  { %v14992_v1 = vpack.c.bf16 %v14982_v0, %v14980_v63  ;;  %v3814_v22 = vmul.f32 %v14966_v60, %v14966_v60  ;;  %v3816_v26 = vmul.f32 %v14980_v63, %v14980_v63  ;;  %v4244_v44 = vmul.f32 %v15022_v11, %v14980_v63 }
  0xa2   :  { %11555 = vmatmul.mubr.msk.f32.vlgmr.msra.gmra.mrb[36].mxu0 %vm129_vm0, %v14728_v53  ;;  %v13290_v42 = vpack.c.bf16 %v2412_v41, %v2411_v40  ;;  %v13314_v55 = vpack.c.bf16 %v2626_v50, %v2625_v49  ;;  %v4242_v41 = vmul.f32 %v15008_v6, %v14966_v60 }
  0xa3   :  { %13213 = vmatpush3.bf16.msra.mxu0 %v14759_v58  ;;  %11557 = vmatprep.mubr.msk.f32.mxu0 %vm14396_vm1, %v17454_v52 }
  0xa4   :  { %13215 = vmatprep.subr.bf16.mxu0 %v14773_v61 }
  0xa6   :  { %11558 = vmatmul.mubr.msk.f32.gmra.mrb[38].mxu0 %vm129_vm0, %v14739_v54 }
  0xa7   :  { %13217 = vmatpush3.bf16.msra.mxu0 %v14773_v61  ;;  %11560 = vmatprep.mubr.msk.f32.mxu0 %vm14396_vm1, %v17454_v52 }
  0xa8   :  { %13219 = vmatprep.subr.bf16.mxu0 %v14789_v3 }
  0xaa   :  { %11561 = vmatmul.mubr.msk.f32.gmra.mrb[40].mxu0 %vm129_vm0, %v14754_v57 }
  0xab   :  { %13221 = vmatpush3.bf16.msra.mxu0 %v14789_v3  ;;  %11596 = vmatprep.mubr.msk.f32.mxu0 %vm129_vm0, %v14554_v8 }
  0xac   :  { %13235 = vmatprep.subr.bf16.mxu0 %v14807_v10 }
  0xae   :  { %11597 = vmatmul.mubr.msk.f32.vlgmr.msra.gmra.mrb[42].mxu0 %vm129_vm0, %v14583_v15 }
  0xaf   :  { %13237 = vmatpush3.bf16.msra.mxu0 %v14807_v10  ;;  %11599 = vmatprep.mubr.msk.f32.mxu0 %vm129_vm0, %v14589_v16 }
  0xb0   :  { %13239 = vmatprep.subr.bf16.mxu0 %v14825_v18 }
  0xb2   :  { %11600 = vmatmul.mubr.msk.f32.gmra.mrb[44].mxu0 %vm129_vm0, %v14607_v20 }
  0xb3   :  { %13241 = vmatpush3.bf16.msra.mxu0 %v14825_v18  ;;  %11602 = vmatprep.mubr.msk.f32.mxu0 %vm129_vm0, %v14613_v21 }
  0xb4   :  { %13243 = vmatprep.subr.bf16.mxu0 %v14842_v23 }
  0xb6   :  { %11603 = vmatmul.mubr.msk.f32.gmra.mrb[46].mxu0 %vm129_vm0, %v14631_v25 }
  0xb7   :  { %13245 = vmatpush3.bf16.msra.mxu0 %v14842_v23  ;;  %11638 = vmatprep.mubr.msk.f32.mxu0 %vm129_vm0, %v14554_v8 }
  0xb8   :  { %13259 = vmatprep.subr.bf16.mxu0 %v13258_v27 }
  0xba   :  { %11639 = vmatmul.mubr.msk.f32.vlgmr.msra.gmra.mrb[48].mxu0 %vm129_vm0, %v14583_v15 }
  0xbb   :  { %13261 = vmatpush3.bf16.msra.mxu0 %v13258_v27  ;;  %11641 = vmatprep.mubr.msk.f32.mxu0 %vm129_vm0, %v14589_v16  ;;  %v3817_v27 = vmul.f32 %v14982_v0, %v14982_v0 }
  0xbc   :  { %13263 = vmatprep.subr.bf16.mxu0 %v13262_v30 }
  0xbd   :  { %v13422_v28 = vpack.c.bf16 %v3817_v27, %v3816_v26  ;;  %v15238_v27 = vld [vmem:[#allocation8 + $0xa0] sm:$0xff] }
  0xbe   :  { %11642 = vmatmul.mubr.msk.f32.gmra.mrb[50].mxu0 %vm129_vm0, %v14607_v20 }
  0xbf   :  { %13265 = vmatpush3.bf16.msra.mxu0 %v13262_v30  ;;  %11644 = vmatprep.mubr.msk.f32.mxu0 %vm129_vm0, %v14613_v21  ;;  %v4027_v30 = vmul.f32 %v14996_v4, %v14996_v4 }
  0xc0   :  { %13267 = vmatprep.subr.bf16.mxu0 %v13266_v33 }
  0xc2   :  { %11645 = vmatmul.mubr.msk.f32.gmra.mrb[52].mxu0 %vm129_vm0, %v14631_v25 }
  0xc3   :  { %13269 = vmatpush3.bf16.msra.mxu0 %v13266_v33  ;;  %11680 = vmatprep.mubr.msk.f32.mxu0 %vm129_vm0, %v14554_v8  ;;  %v4029_v33 = vmul.f32 %v15010_v7, %v15010_v7 }
  0xc4   :  { %13283 = vmatprep.subr.bf16.mxu0 %v13282_v36 }
  0xc5   :  { %v13442_v34 = vpack.c.bf16 %v4029_v33, %v4028_v32  ;;  %v15258_v32 = vld [vmem:[#allocation8 + $0xb8] sm:$0xff]  ;;  %v109_v33 = vld [vmem:[%s17447_s6] sm:$0xff] }
  0xc6   :  { %11681 = vmatmul.mubr.msk.f32.vlgmr.msra.gmra.mrb[54].mxu0 %vm129_vm0, %v14583_v15 }
  0xc7   :  { %13285 = vmatpush3.bf16.msra.mxu0 %v13282_v36  ;;  %11683 = vmatprep.mubr.msk.f32.mxu0 %vm129_vm0, %v14589_v16  ;;  %v4031_v36 = vmul.f32 %v15024_v12, %v15024_v12 }
  0xc8   :  { %13287 = vmatprep.subr.bf16.mxu0 %v13286_v39 }
  0xc9   :  { %v13446_v37 = vpack.c.bf16 %v4031_v36, %v4030_v35 }
  0xca   :  { %11684 = vmatmul.mubr.msk.f32.gmra.mrb[56].mxu0 %vm129_vm0, %v14607_v20 }
  0xcb   :  { %13289 = vmatpush3.bf16.msra.mxu0 %v13286_v39  ;;  %11686 = vmatprep.mubr.msk.f32.mxu0 %vm129_vm0, %v14613_v21 }
  0xcc   :  { %13291 = vmatprep.subr.bf16.mxu0 %v13290_v42 }
  0xce   :  { %11687 = vmatmul.mubr.msk.f32.gmra.mrb[58].mxu0 %vm129_vm0, %v14631_v25 }
  0xcf   :  { %13293 = vmatpush3.bf16.msra.mxu0 %v13290_v42  ;;  %11722 = vmatprep.mubr.msk.f32.mxu0 %vm129_vm0, %v14554_v8 }
  0xd0   :  { %13307 = vmatprep.subr.bf16.mxu0 %v13306_v45 }
  0xd2   :  { %11723 = vmatmul.mubr.msk.f32.vlgmr.msra.gmra.mrb[60].mxu0 %vm129_vm0, %v14583_v15 }
  0xd3   :  { %13309 = vmatpush3.bf16.msra.mxu0 %v13306_v45  ;;  %11725 = vmatprep.mubr.msk.f32.mxu0 %vm129_vm0, %v14589_v16  ;;  %v4245_v45 = vmul.f32 %v15024_v12, %v14982_v0  ;;  %v15166_v0 = vld [vmem:[#allocation7 + $0x90] sm:$0xff] }
  0xd4   :  { %13311 = vmatprep.subr.bf16.mxu0 %v13310_v48 }
  0xd5   :  { %v13470_v46 = vpack.c.bf16 %v4245_v45, %v4244_v44 }
  0xd6   :  { %11726 = vmatmul.mubr.msk.f32.gmra.mrb[62].mxu0 %vm129_vm0, %v14607_v20 }
  0xd7   :  { %13313 = vmatpush3.bf16.msra.mxu0 %v13310_v48  ;;  %11728 = vmatprep.mubr.msk.f32.mxu0 %vm129_vm0, %v14613_v21 }
  0xd8   :  { %13315 = vmatprep.subr.bf16.mxu0 %v13314_v55 }
  0xda   :  { %11729 = vmatmul.mubr.msk.f32.gmra.mrb[64].mxu0 %vm129_vm0, %v14631_v25 }
  0xdb   :  { %13317 = vmatpush3.bf16.msra.mxu0 %v13314_v55  ;;  %11764 = vmatprep.mubr.msk.f32.mxu0 %vm129_vm0, %v14554_v8 }
  0xdc   :  { %13330 = vmatprep.subr.bf16.mxu0 %v17452_v51 }
  0xde   :  { %11765 = vmatmul.mubr.msk.f32.vlgmr.msra.gmra.mrb[66].mxu0 %vm129_vm0, %v14583_v15 }
  0xdf   :  { %13332 = vmatpush3.bf16.msra.mxu0 %v14759_v58  ;;  %11767 = vmatprep.mubr.msk.f32.mxu0 %vm129_vm0, %v14589_v16  ;;  %v14954_v58 = vld [vmem:[#allocation7 + $0x68] sm:$0xff] }
  0xe0   :  { %13333 = vmatprep.subr.bf16.mxu0 %v17452_v51  ;;  %v14964_v59 = vpack.c.bf16 %v14954_v58, %v14952_v56  ;;  %v4241_v39 = vmul.f32 %v14996_v4, %v14954_v58 }
  0xe2   :  { %11768 = vmatmul.mubr.msk.f32.gmra.mrb[68].mxu0 %vm129_vm0, %v14607_v20 }
  0xe3   :  { %13335 = vmatpush3.bf16.msra.mxu0 %v14773_v61  ;;  %11770 = vmatprep.mubr.msk.f32.mxu0 %vm129_vm0, %v14613_v21  ;;  %v14968_v61 = vld [vmem:[#allocation7 + $0x78] sm:$0xff] }
  0xe4   :  { %13336 = vmatprep.subr.bf16.mxu0 %v17452_v51  ;;  %v14978_v62 = vpack.c.bf16 %v14968_v61, %v14966_v60  ;;  %v4243_v42 = vmul.f32 %v15010_v7, %v14968_v61 }
  0xe6   :  { %11771 = vmatmul.mubr.msk.f32.gmra.mrb[70].mxu0 %vm129_vm0, %v14631_v25  ;;  %v13466_v43 = vpack.c.bf16 %v4243_v42, %v4242_v41 }
  0xe7   :  { %13338 = vmatpush3.bf16.msra.mxu0 %v14789_v3  ;;  %11806 = vmatprep.mubr.msk.f32.mxu0 %vm14396_vm1, %v17454_v52  ;;  %v14994_v3 = vld [vmem:[#allocation8 + $0x60] sm:$0xff] }
  0xe8   :  { %13348 = vmatprep.subr.bf16.mxu0 %v17452_v51  ;;  %v15006_v5 = vpack.c.bf16 %v14996_v4, %v14994_v3  ;;  %v4026_v29 = vmul.f32 %v14994_v3, %v14994_v3  ;;  %v4240_v38 = vmul.f32 %v14994_v3, %v14952_v56 }
  0xea   :  { %11807 = vmatmul.mubr.msk.f32.vlgmr.msra.gmra.mrb[72].mxu0 %vm129_vm0, %v14728_v53  ;;  %v13438_v31 = vpack.c.bf16 %v4027_v30, %v4026_v29  ;;  %v13462_v40 = vpack.c.bf16 %v4241_v39, %v4240_v38 }
  0xeb   :  { %13350 = vmatpush3.bf16.msra.mxu0 %v14807_v10  ;;  %11809 = vmatprep.mubr.msk.f32.mxu0 %vm14396_vm1, %v17454_v52  ;;  %v15020_v10 = vpack.c.bf16 %v15010_v7, %v15008_v6  ;;  %v15184_v6 = vld [vmem:[#allocation7 + $0xa0] sm:$0xff]  ;;  %v15186_v7 = vld [vmem:[#allocation7 + $0xa8] sm:$0xff] }
  0xec   :  { %13351 = vmatprep.subr.bf16.mxu0 %v17452_v51  ;;  %v15197_v11 = vpack.c.bf16 %v15186_v7, %v15184_v6  ;;  %v5433_v41 = vmul.f32 %v15184_v6, %v15184_v6 }
  0xee   :  { %11810 = vmatmul.mubr.msk.f32.gmra.mrb[74].mxu0 %vm129_vm0, %v14739_v54 }
  0xef   :  { %13353 = vmatpush3.bf16.msra.mxu0 %v14825_v18  ;;  %11812 = vmatprep.mubr.msk.f32.mxu0 %vm14396_vm1, %v17454_v52  ;;  %v3813_v18 = vmul.f32 %v14954_v58, %v14954_v58 }
  0xf0   :  { %13354 = vmatprep.subr.bf16.mxu0 %v17452_v51 }
  0xf1   :  { %v13414_v19 = vpack.c.bf16 %v3813_v18, %v3812_v14  ;;  %v15204_v14 = vld [vmem:[#allocation7 + $0xb8] sm:$0xff] }
  0xf2   :  { %11813 = vmatmul.mubr.msk.f32.gmra.mrb[76].mxu0 %vm129_vm0, %v14754_v57 }
  0xf3   :  { %13356 = vmatpush3.bf16.msra.mxu0 %v14842_v23  ;;  %11848 = vmatprep.mubr.msk.f32.mxu0 %vm14396_vm1, %v17454_v52  ;;  %v3815_v23 = vmul.f32 %v14968_v61, %v14968_v61 }
  0xf4   :  { %13367 = vmatprep.subr.bf16.mxu0 %v14964_v59 }
  0xf5   :  { %v13418_v24 = vpack.c.bf16 %v3815_v23, %v3814_v22  ;;  %v15220_v22 = vld [vmem:[#allocation8 + $0x90] sm:$0xff]  ;;  %v15222_v23 = vld [vmem:[#allocation8 + $0x98] sm:$0xff] }
  0xf6   :  { %11849 = vmatmul.mubr.msk.f32.vlgmr.msra.gmra.mrb[78].mxu0 %vm129_vm0, %v14728_v53 }
  0xf7   :  { %13369 = vmatpush3.bf16.msra.mxu0 %v14964_v59  ;;  %11851 = vmatprep.mubr.msk.f32.mxu0 %vm14396_vm1, %v17454_v52 }
  0xf8   :  { %13371 = vmatprep.subr.bf16.mxu0 %v14978_v62 }
  0xfa   :  { %11852 = vmatmul.mubr.msk.f32.gmra.mrb[80].mxu0 %vm129_vm0, %v14739_v54 }
  0xfb   :  { %13373 = vmatpush3.bf16.msra.mxu0 %v14978_v62  ;;  %11854 = vmatprep.mubr.msk.f32.mxu0 %vm14396_vm1, %v17454_v52 }
  0xfc   :  { %13375 = vmatprep.subr.bf16.mxu0 %v14992_v1 }
  0xfe   :  { %11855 = vmatmul.mubr.msk.f32.gmra.mrb[82].mxu0 %vm129_vm0, %v14754_v57 }
  0xff   :  { %13377 = vmatpush3.bf16.msra.mxu0 %v14992_v1  ;;  %11890 = vmatprep.mubr.msk.f32.mxu0 %vm129_vm0, %v14554_v8 }
 0x100   :  { %13391 = vmatprep.subr.bf16.mxu0 %v15006_v5 }
 0x102   :  { %11891 = vmatmul.mubr.msk.f32.vlgmr.msra.gmra.mrb[84].mxu0 %vm129_vm0, %v14583_v15 }
 0x103   :  { %13393 = vmatpush3.bf16.msra.mxu0 %v15006_v5  ;;  %11893 = vmatprep.mubr.msk.f32.mxu0 %vm129_vm0, %v14589_v16 }
 0x104   :  { %13395 = vmatprep.subr.bf16.mxu0 %v15020_v10 }
 0x106   :  { %11894 = vmatmul.mubr.msk.f32.gmra.mrb[86].mxu0 %vm129_vm0, %v14607_v20 }
 0x107   :  { %13397 = vmatpush3.bf16.msra.mxu0 %v15020_v10  ;;  %11896 = vmatprep.mubr.msk.f32.mxu0 %vm129_vm0, %v14613_v21 }
 0x108   :  { %13399 = vmatprep.subr.bf16.mxu0 %v15034_v13 }
 0x10a   :  { %11897 = vmatmul.mubr.msk.f32.gmra.mrb[88].mxu0 %vm129_vm0, %v14631_v25 }
 0x10b   :  { %13401 = vmatpush3.bf16.msra.mxu0 %v15034_v13  ;;  %11932 = vmatprep.mubr.msk.f32.mxu0 %vm129_vm0, %v14554_v8 }
 0x10c   :  { %13415 = vmatprep.subr.bf16.mxu0 %v13414_v19 }
 0x10e   :  { %11933 = vmatmul.mubr.msk.f32.vlgmr.msra.gmra.mrb[90].mxu0 %vm129_vm0, %v14583_v15 }
 0x10f   :  { %13417 = vmatpush3.bf16.msra.mxu0 %v13414_v19  ;;  %11935 = vmatprep.mubr.msk.f32.mxu0 %vm129_vm0, %v14589_v16 }
 0x110   :  { %13419 = vmatprep.subr.bf16.mxu0 %v13418_v24 }
 0x112   :  { %11936 = vmatmul.mubr.msk.f32.gmra.mrb[92].mxu0 %vm129_vm0, %v14607_v20 }
 0x113   :  { %13421 = vmatpush3.bf16.msra.mxu0 %v13418_v24  ;;  %11938 = vmatprep.mubr.msk.f32.mxu0 %vm129_vm0, %v14613_v21 }
 0x114   :  { %13423 = vmatprep.subr.bf16.mxu0 %v13422_v28 }
 0x116   :  { %11939 = vmatmul.mubr.msk.f32.gmra.mrb[94].mxu0 %vm129_vm0, %v14631_v25 }
 0x117   :  { %13425 = vmatpush3.bf16.msra.mxu0 %v13422_v28  ;;  %11974 = vmatprep.mubr.msk.f32.mxu0 %vm129_vm0, %v14554_v8  ;;  %v15240_v28 = vld [vmem:[#allocation8 + $0xa8] sm:$0xff] }
 0x118   :  { %13439 = vmatprep.subr.bf16.mxu0 %v13438_v31 }
 0x11a   :  { %11975 = vmatmul.mubr.msk.f32.vlgmr.msra.gmra.mrb[96].mxu0 %vm129_vm0, %v14583_v15 }
 0x11b   :  { %13441 = vmatpush3.bf16.msra.mxu0 %v13438_v31  ;;  %11977 = vmatprep.mubr.msk.f32.mxu0 %vm129_vm0, %v14589_v16  ;;  %v15256_v31 = vld [vmem:[#allocation8 + $0xb0] sm:$0xff] }
 0x11c   :  { %13443 = vmatprep.subr.bf16.mxu0 %v13442_v34 }
 0x11e   :  { %11978 = vmatmul.mubr.msk.f32.gmra.mrb[98].mxu0 %vm129_vm0, %v14607_v20 }
 0x11f   :  { %13445 = vmatpush3.bf16.msra.mxu0 %v13442_v34  ;;  %11980 = vmatprep.mubr.msk.f32.mxu0 %vm129_vm0, %v14613_v21  ;;  %v110_v34 = vld [vmem:[%s17447_s6 + $0x8] sm:$0xff] }
 0x120   :  { %13447 = vmatprep.subr.bf16.mxu0 %v13446_v37 }
 0x122   :  { %11981 = vmatmul.mubr.msk.f32.gmra.mrb[100].mxu0 %vm129_vm0, %v14631_v25 }
 0x123   :  { %13449 = vmatpush3.bf16.msra.mxu0 %v13446_v37  ;;  %12016 = vmatprep.mubr.msk.f32.mxu0 %vm129_vm0, %v14554_v8  ;;  %v15289_v37 = vpack.c.bf16 %v110_v34, %v109_v33  ;;  %v5650_v33 = vmul.f32 %v15258_v32, %v15258_v32 }
 0x124   :  { %13463 = vmatprep.subr.bf16.mxu0 %v13462_v40 }
 0x125   :  { %17466 = vst [vmem:[#allocation22_spill] sm:$0xff] %v15289_v37 }
 0x126   :  { %12017 = vmatmul.mubr.msk.f32.vlgmr.msra.gmra.mrb[102].mxu0 %vm129_vm0, %v14583_v15 }
 0x127   :  { %13465 = vmatpush3.bf16.msra.mxu0 %v13462_v40  ;;  %12019 = vmatprep.mubr.msk.f32.mxu0 %vm129_vm0, %v14589_v16  ;;  %v112_v40 = vld [vmem:[%s17447_s6 + $0x18] sm:$0xff] }
 0x128   :  { %13467 = vmatprep.subr.bf16.mxu0 %v13466_v43 }
 0x12a   :  { %12020 = vmatmul.mubr.msk.f32.gmra.mrb[104].mxu0 %vm129_vm0, %v14607_v20 }
 0x12b   :  { %13469 = vmatpush3.bf16.msra.mxu0 %v13466_v43  ;;  %12022 = vmatprep.mubr.msk.f32.mxu0 %vm129_vm0, %v14613_v21  ;;  %v15312_v43 = vld [vmem:[%s17441_s0] sm:$0xff] }
 0x12c   :  { %13471 = vmatprep.subr.bf16.mxu0 %v13470_v46 }
 0x12d   :  { %v11304_v47 = vpop.f32.mrb[0].mxu0 }
 0x12e   :  { %v214_v48 = vpop.f32.mrb[1].mxu0  ;;  %12023 = vmatmul.mubr.msk.f32.gmra.mrb[106].mxu0 %vm129_vm0, %v14631_v25 }
 0x12f   :  { %11323 = vmatprep.mubr.msk.f32.mxu1 %vm129_vm0, %v214_v48  ;;  %13473 = vmatpush3.bf16.msra.mxu0 %v13470_v46  ;;  %v113_v46 = vld [vmem:[%s17447_s6 + $0x20] sm:$0xff] }
 0x130   :  { %11324 = vmatmul.mubr.msk.f32.vlgmr.msra.gmra.mrb[0].mxu1 %vm129_vm0, %v11304_v47  ;;  %12058 = vmatprep.mubr.msk.f32.mxu0 %vm129_vm0, %v14554_v8  ;;  %v114_v47 = vld [vmem:[%s17447_s6 + $0x28] sm:$0xff] }
 0x131   :  { %v11307_v49 = vpop.f32.mrb[2].mxu0  ;;  %13093 = vmatpush3.bf16.msra.mxu1 %v14781_v2  ;;  %13486 = vmatprep.subr.bf16.mxu0 %v17452_v51 }
 0x132   :  { %v224_v50 = vpop.f32.mrb[3].mxu0  ;;  %12059 = vmatmul.mubr.msk.f32.vlgmr.msra.gmra.mrb[108].mxu0 %vm129_vm0, %v14583_v15  ;;  %13095 = vmatprep.subr.bf16.mxu1 %v14799_v9 }
 0x133   :  { %11326 = vmatprep.mubr.msk.f32.mxu1 %vm129_vm0, %v224_v50  ;;  %13488 = vmatpush3.bf16.msra.mxu0 %v14964_v59 }
 0x134   :  { %11327 = vmatmul.mubr.msk.f32.gmra.mrb[2].mxu1 %vm129_vm0, %v11307_v49  ;;  %12061 = vmatprep.mubr.msk.f32.mxu0 %vm129_vm0, %v14589_v16  ;;  %v5436_v49 = vmul.f32 %v15204_v14, %v15204_v14 }
 0x135   :  { %v11310_v55 = vpop.f32.mrb[4].mxu0  ;;  %13097 = vmatpush3.bf16.msra.mxu1 %v14799_v9  ;;  %13489 = vmatprep.subr.bf16.mxu0 %v17452_v51 }
 0x136   :  { %v234_v56 = vpop.f32.mrb[5].mxu0  ;;  %12062 = vmatmul.mubr.msk.f32.gmra.mrb[110].mxu0 %vm129_vm0, %v14607_v20  ;;  %13099 = vmatprep.subr.bf16.mxu1 %v14817_v17 }
 0x137   :  { %11329 = vmatprep.mubr.msk.f32.mxu1 %vm129_vm0, %v234_v56  ;;  %13491 = vmatpush3.bf16.msra.mxu0 %v14978_v62  ;;  %v15342_v56 = vld [vmem:[%s17441_s0 + $0x10] sm:$0xff] }
 0x138   :  { %11330 = vmatmul.mubr.msk.f32.gmra.mrb[4].mxu1 %vm129_vm0, %v11310_v55  ;;  %12064 = vmatprep.mubr.msk.f32.mxu0 %vm129_vm0, %v14613_v21  ;;  %v15332_v55 = vld [vmem:[%s17441_s0 + $0x8] sm:$0xff] }
 0x139   :  { %v11346_v58 = vpop.f32.mrb[6].mxu0  ;;  %13101 = vmatpush3.bf16.msra.mxu1 %v14817_v17  ;;  %13492 = vmatprep.subr.bf16.mxu0 %v17452_v51 }
 0x13a   :  { %v422_v59 = vpop.f32.mrb[7].mxu0  ;;  %12065 = vmatmul.mubr.msk.f32.gmra.mrb[112].mxu0 %vm129_vm0, %v14631_v25  ;;  %13115 = vmatprep.subr.bf16.mxu1 %v14781_v2 }
 0x13b   :  { %11365 = vmatprep.mubr.msk.f32.mxu1 %vm129_vm0, %v422_v59  ;;  %13494 = vmatpush3.bf16.msra.mxu0 %v14992_v1  ;;  %v15168_v1 = vld [vmem:[#allocation7 + $0x98] sm:$0xff] }
 0x13c   :  { %11366 = vmatmul.mubr.msk.f32.vlgmr.msra.gmra.mrb[6].mxu1 %vm129_vm0, %v11346_v58  ;;  %12100 = vmatprep.mubr.msk.f32.mxu0 %vm14396_vm1, %v17454_v52  ;;  %v15179_v4 = vpack.c.bf16 %v15168_v1, %v15166_v0  ;;  %v5432_v35 = vmul.f32 %v15168_v1, %v15168_v1  ;;  %v15346_v58 = vpack.c.bf16 %v114_v47, %v113_v46 }
 0x13d   :  { %v11349_v60 = vpop.f32.mrb[8].mxu0  ;;  %13117 = vmatpush3.bf16.msra.mxu1 %v14781_v2  ;;  %13504 = vmatprep.subr.bf16.mxu0 %v17452_v51 }
 0x13e   :  { %v432_v61 = vpop.f32.mrb[9].mxu0  ;;  %12101 = vmatmul.mubr.msk.f32.vlgmr.msra.gmra.mrb[114].mxu0 %vm129_vm0, %v14728_v53  ;;  %13119 = vmatprep.subr.bf16.mxu1 %v14799_v9  ;;  %17468 = vst [vmem:[#allocation24_spill] sm:$0xff] %v15346_v58 }
 0x13f   :  { %11368 = vmatprep.mubr.msk.f32.mxu1 %vm129_vm0, %v432_v61  ;;  %13506 = vmatpush3.bf16.msra.mxu0 %v15006_v5  ;;  %v5645_v61 = vmul.f32 %v15220_v22, %v15220_v22 }
 0x140   :  { %11369 = vmatmul.mubr.msk.f32.gmra.mrb[8].mxu1 %vm129_vm0, %v11349_v60  ;;  %12103 = vmatprep.mubr.msk.f32.mxu0 %vm14396_vm1, %v17454_v52 }
 0x141   :  { %v11352_v62 = vpop.f32.mrb[10].mxu0  ;;  %13121 = vmatpush3.bf16.msra.mxu1 %v14799_v9  ;;  %13507 = vmatprep.subr.bf16.mxu0 %v17452_v51 }
 0x142   :  { %v442_v63 = vpop.f32.mrb[11].mxu0  ;;  %12104 = vmatmul.mubr.msk.f32.gmra.mrb[116].mxu0 %vm129_vm0, %v14739_v54  ;;  %13123 = vmatprep.subr.bf16.mxu1 %v14817_v17 }
 0x143   :  { %11371 = vmatprep.mubr.msk.f32.mxu1 %vm129_vm0, %v442_v63  ;;  %13509 = vmatpush3.bf16.msra.mxu0 %v15020_v10 }
 0x144   :  { %11372 = vmatmul.mubr.msk.f32.gmra.mrb[10].mxu1 %vm129_vm0, %v11352_v62  ;;  %12106 = vmatprep.mubr.msk.f32.mxu0 %vm14396_vm1, %v17454_v52  ;;  %v5646_v62 = vmul.f32 %v15222_v23, %v15222_v23 }
 0x145   :  { %v11388_v3 = vpop.f32.mrb[12].mxu0  ;;  %13125 = vmatpush3.bf16.msra.mxu1 %v14817_v17  ;;  %13510 = vmatprep.subr.bf16.mxu0 %v17452_v51 }
 0x146   :  { %v636_v5 = vpop.f32.mrb[13].mxu0  ;;  %12107 = vmatmul.mubr.msk.f32.gmra.mrb[118].mxu0 %vm129_vm0, %v14754_v57  ;;  %13139 = vmatprep.subr.bf16.mxu1 %v14781_v2 }
 0x147   :  { %11407 = vmatprep.mubr.msk.f32.mxu1 %vm129_vm0, %v636_v5  ;;  %13512 = vmatpush3.bf16.msra.mxu0 %v15034_v13  ;;  %v15202_v13 = vld [vmem:[#allocation7 + $0xb0] sm:$0xff]  ;;  %v15366_v5 = vld [vmem:[%s17441_s0 + $0x20] sm:$0xff] }
 0x148   :  { %11408 = vmatmul.mubr.msk.f32.vlgmr.msra.gmra.mrb[12].mxu1 %vm129_vm0, %v11388_v3  ;;  %12142 = vmatprep.mubr.msk.f32.mxu0 %vm14396_vm1, %v17454_v52  ;;  %v5435_v48 = vmul.f32 %v15202_v13, %v15202_v13  ;;  %v15356_v3 = vld [vmem:[%s17441_s0 + $0x18] sm:$0xff] }
 0x149   :  { %v11391_v10 = vpop.f32.mrb[14].mxu0  ;;  %13141 = vmatpush3.bf16.msra.mxu1 %v14781_v2  ;;  %13523 = vmatprep.subr.bf16.mxu0 %v15179_v4 }
 0x14a   :  { %v646_v12 = vpop.f32.mrb[15].mxu0  ;;  %12143 = vmatmul.mubr.msk.f32.vlgmr.msra.gmra.mrb[120].mxu0 %vm129_vm0, %v14728_v53  ;;  %13143 = vmatprep.subr.bf16.mxu1 %v14799_v9  ;;  %v15215_v53 = vpack.c.bf16 %v15204_v14, %v15202_v13  ;;  %v13578_v60 = vpack.c.bf16 %v5436_v49, %v5435_v48  ;;  %v15492_v48 = vld [vmem:[%s17446_s5] sm:$0xff] }
 0x14b   :  { %11410 = vmatprep.mubr.msk.f32.mxu1 %vm129_vm0, %v646_v12  ;;  %13525 = vmatpush3.bf16.msra.mxu0 %v15179_v4  ;;  %v13594_v12 = vpack.c.bf16 %v5646_v62, %v5645_v61 }
 0x14c   :  { %11411 = vmatmul.mubr.msk.f32.gmra.mrb[14].mxu1 %vm129_vm0, %v11391_v10  ;;  %12145 = vmatprep.mubr.msk.f32.mxu0 %vm14396_vm1, %v17454_v52 }
 0x14d   :  { %v11394_v18 = vpop.f32.mrb[16].mxu0  ;;  %13145 = vmatpush3.bf16.msra.mxu1 %v14799_v9  ;;  %13527 = vmatprep.subr.bf16.mxu0 %v15197_v11 }
 0x14e   :  { %v656_v19 = vpop.f32.mrb[17].mxu0  ;;  %12146 = vmatmul.mubr.msk.f32.gmra.mrb[122].mxu0 %vm129_vm0, %v14739_v54  ;;  %13147 = vmatprep.subr.bf16.mxu1 %v14817_v17  ;;  %v15233_v54 = vpack.c.bf16 %v15222_v23, %v15220_v22 }
 0x14f   :  { %11413 = vmatprep.mubr.msk.f32.mxu1 %vm129_vm0, %v656_v19  ;;  %13529 = vmatpush3.bf16.msra.mxu0 %v15197_v11  ;;  %v5648_v19 = vmul.f32 %v15240_v28, %v15240_v28 }
 0x150   :  { %11414 = vmatmul.mubr.msk.f32.gmra.mrb[16].mxu1 %vm129_vm0, %v11394_v18  ;;  %12148 = vmatprep.mubr.msk.f32.mxu0 %vm14396_vm1, %v17454_v52  ;;  %v5647_v18 = vmul.f32 %v15238_v27, %v15238_v27 }
 0x151   :  { %v11430_v24 = vpop.f32.mrb[18].mxu0  ;;  %13149 = vmatpush3.bf16.msra.mxu1 %v14817_v17  ;;  %13531 = vmatprep.subr.bf16.mxu0 %v15215_v53 }
 0x152   :  { %v850_v26 = vpop.f32.mrb[19].mxu0  ;;  %12149 = vmatmul.mubr.msk.f32.gmra.mrb[124].mxu0 %vm129_vm0, %v14754_v57  ;;  %13163 = vmatprep.subr.bf16.mxu1 %v14781_v2  ;;  %v15251_v57 = vpack.c.bf16 %v15240_v28, %v15238_v27 }
 0x153   :  { %11449 = vmatprep.mubr.msk.f32.mxu1 %vm129_vm0, %v850_v26  ;;  %13533 = vmatpush3.bf16.msra.mxu0 %v15215_v53  ;;  %v15378_v26 = vld [vmem:[%s17441_s0 + $0x28] sm:$0x3f] }
 0x154   :  { %11450 = vmatmul.mubr.msk.f32.vlgmr.msra.gmra.mrb[18].mxu1 %vm129_vm0, %v11430_v24  ;;  %12184 = vmatprep.mubr.msk.f32.mxu0 %vm129_vm0, %v14554_v8 }
 0x155   :  { %v11433_v29 = vpop.f32.mrb[20].mxu0  ;;  %13165 = vmatpush3.bf16.msra.mxu1 %v14781_v2  ;;  %13547 = vmatprep.subr.bf16.mxu0 %v15233_v54 }
 0x156   :  { %v860_v30 = vpop.f32.mrb[21].mxu0  ;;  %12185 = vmatmul.mubr.msk.f32.vlgmr.msra.gmra.mrb[126].mxu0 %vm129_vm0, %v14583_v15  ;;  %13167 = vmatprep.subr.bf16.mxu1 %v14799_v9  ;;  %v15269_v15 = vpack.c.bf16 %v15258_v32, %v15256_v31 }
 0x157   :  { %11452 = vmatprep.mubr.msk.f32.mxu1 %vm129_vm0, %v860_v30  ;;  %13549 = vmatpush3.bf16.msra.mxu0 %v15233_v54  ;;  %v13598_v30 = vpack.c.bf16 %v5648_v19, %v5647_v18 }
 0x158   :  { %11453 = vmatmul.mubr.msk.f32.gmra.mrb[20].mxu1 %vm129_vm0, %v11433_v29  ;;  %12187 = vmatprep.mubr.msk.f32.mxu0 %vm129_vm0, %v14589_v16  ;;  %v5431_v16 = vmul.f32 %v15166_v0, %v15166_v0 }
 0x159   :  { %v11436_v8 = vpop.f32.mrb[22].mxu0  ;;  %13169 = vmatpush3.bf16.msra.mxu1 %v14799_v9  ;;  %13551 = vmatprep.subr.bf16.mxu0 %v15251_v57 }
 0x15a   :  { %v870_v36 = vpop.f32.mrb[23].mxu0  ;;  %12188 = vmatmul.mubr.msk.f32.gmra.mrb[128].mxu0 %vm129_vm0, %v14607_v20  ;;  %13171 = vmatprep.subr.bf16.mxu1 %v14817_v17  ;;  %v13570_v39 = vpack.c.bf16 %v5432_v35, %v5431_v16  ;;  %v111_v20 = vld [vmem:[%s17447_s6 + $0x10] sm:$0xff] }
 0x15b   :  { %11455 = vmatprep.mubr.msk.f32.mxu1 %vm129_vm0, %v870_v36  ;;  %13553 = vmatpush3.bf16.msra.mxu0 %v15251_v57  ;;  %v15316_v44 = vpack.c.bf16 %v112_v40, %v111_v20  ;;  %v5859_v36 = vmul.f32 %v15220_v22, %v15166_v0  ;;  %v5862_v22 = vmul.f32 %v15240_v28, %v15186_v7 }
 0x15c   :  { %11456 = vmatmul.mubr.msk.f32.gmra.mrb[22].mxu1 %vm129_vm0, %v11436_v8  ;;  %12190 = vmatprep.mubr.msk.f32.mxu0 %vm129_vm0, %v14613_v21  ;;  %v5434_v21 = vmul.f32 %v15186_v7, %v15186_v7  ;;  %v5649_v8 = vmul.f32 %v15256_v31, %v15256_v31  ;;  %v5863_v7 = vmul.f32 %v15256_v31, %v15202_v13 }
 0x15d   :  { %v11472_v38 = vpop.f32.mrb[24].mxu0  ;;  %13173 = vmatpush3.bf16.msra.mxu1 %v14817_v17  ;;  %13555 = vmatprep.subr.bf16.mxu0 %v15269_v15  ;;  %17467 = vst [vmem:[#allocation23_spill] sm:$0xff] %v15316_v44 }
 0x15e   :  { %v1064_v42 = vpop.f32.mrb[25].mxu0  ;;  %12191 = vmatmul.mubr.msk.f32.gmra.mrb[130].mxu0 %vm129_vm0, %v14631_v25  ;;  %13183 = vmatprep.subr.bf16.mxu1 %v17452_v51  ;;  %v13574_v25 = vpack.c.bf16 %v5434_v21, %v5433_v41  ;;  %v13602_v35 = vpack.c.bf16 %v5650_v33, %v5649_v8  ;;  %v15571_v33 = vld [vmem:[#allocation8 + $0xc0] sm:$0xff] }
 0x15f   :  { %11491 = vmatprep.mubr.msk.f32.mxu1 %vm129_vm0, %v1064_v42  ;;  %13557 = vmatpush3.bf16.msra.mxu0 %v15269_v15 }
 0x160   :  { %11492 = vmatmul.mubr.msk.f32.vlgmr.msra.gmra.mrb[24].mxu1 %vm129_vm0, %v11472_v38  ;;  %12226 = vmatprep.mubr.msk.f32.mxu0 %vm129_vm0, %v15312_v43  ;;  %v5860_v38 = vmul.f32 %v15222_v23, %v15168_v1  ;;  %v5861_v1 = vmul.f32 %v15238_v27, %v15184_v6  ;;  %v5864_v27 = vmul.f32 %v15258_v32, %v15204_v14 }
 0x161   :  { %v11475_v45 = vpop.f32.mrb[26].mxu0  ;;  %13185 = vmatpush3.bf16.msra.mxu1 %v15289_v37  ;;  %13571 = vmatprep.subr.bf16.mxu0 %v13570_v39 }
 0x162   :  { %v1074_v50 = vpop.f32.mrb[27].mxu0  ;;  %12227 = vmatmul.mubr.msk.f32.vlgmr.msra.gmra.mrb[132].mxu0 %vm129_vm0, %v15332_v55  ;;  %13186 = vmatprep.subr.bf16.mxu1 %v17452_v51  ;;  %v13618_v0 = vpack.c.bf16 %v5860_v38, %v5859_v36  ;;  %v13622_v6 = vpack.c.bf16 %v5862_v22, %v5861_v1  ;;  %v13626_v13 = vpack.c.bf16 %v5864_v27, %v5863_v7  ;;  %v15589_v38 = vld [vmem:[#allocation8 + $0xd0] sm:$0xff]  ;;  %v15607_v22 = vld [vmem:[#allocation8 + $0xe0] sm:$0xff] }
 0x163   :  { %11494 = vmatprep.mubr.msk.f32.mxu1 %vm129_vm0, %v1074_v50  ;;  %13573 = vmatpush3.bf16.msra.mxu0 %v13570_v39  ;;  %v15507_v50 = vld [vmem:[%s17446_s5 + $0x8] sm:$0xff] }
 0x164   :  { %11495 = vmatmul.mubr.msk.f32.gmra.mrb[26].mxu1 %vm129_vm0, %v11475_v45  ;;  %12229 = vmatprep.mubr.msk.f32.mxu0 %vm129_vm0, %v15342_v56 }
 0x165   :  { %v11478_v59 = vpop.f32.mrb[28].mxu0  ;;  %13188 = vmatpush3.bf16.msra.mxu1 %v15316_v44  ;;  %13575 = vmatprep.subr.bf16.mxu0 %v13574_v25 }
 0x166   :  { %v1084_v63 = vpop.f32.mrb[29].mxu0  ;;  %12230 = vmatmul.mubr.msk.f32.gmra.mrb[134].mxu0 %vm129_vm0, %v15356_v3  ;;  %13189 = vmatprep.subr.bf16.mxu1 %v17452_v51 }
 0x167   :  { %11497 = vmatprep.mubr.msk.f32.mxu1 %vm129_vm0, %v1084_v63  ;;  %13577 = vmatpush3.bf16.msra.mxu0 %v13574_v25  ;;  %v15530_v63 = vld [vmem:[%s17446_s5 + $0x10] sm:$0xff] }
 0x168   :  { %11498 = vmatmul.mubr.msk.f32.gmra.mrb[28].mxu1 %vm129_vm0, %v11478_v59  ;;  %12232 = vmatprep.mubr.msk.f32.mxu0 %vm129_vm0, %v15366_v5  ;;  %v15514_v59 = vld [vmem:[#allocation7 + $0xc8] sm:$0xff] }
 0x169   :  { %v1484_v10 = vpop.f32.mrb[30].mxu0  ;;  %13191 = vmatpush3.bf16.msra.mxu1 %v15346_v58  ;;  %13579 = vmatprep.subr.bf16.mxu0 %v13578_v60  ;;  %v7051_v27 = vmul.f32 %v15514_v59, %v15514_v59 }
 0x16a   :  { %v11514_v24 = vpop.f32.mrb[31].mxu0  ;;  %12233 = vmatmul.mubr.msk.f32.gmra.mrb[136].mxu0 %vm129_vm0, %v15378_v26  ;;  %11533 = vmatprep.mubr.msk.f32.mxu1 %vm14396_vm1, %v17454_v52 }
 0x16b   :  { %13581 = vmatpush3.bf16.msra.mxu0 %v13578_v60  ;;  %13201 = vmatprep.subr.bf16.mxu1 %v17452_v51  ;;  %v15555_v24 = vld [vmem:[#allocation7 + $0xe8] sm:$0xff] }
 0x16c   :  { %11534 = vmatmul.mubr.msk.f32.vlgmr.msra.gmra.mrb[30].mxu1 %vm129_vm0, %v1484_v10  ;;  %12268 = vmatprep.mubr.msk.f32.mxu0 %vm129_vm0, %v15312_v43  ;;  %v15537_v10 = vld [vmem:[#allocation7 + $0xd8] sm:$0xff] }
 0x16d   :  { %v1489_v29 = vpop.f32.mrb[32].mxu0  ;;  %13203 = vmatpush3.bf16.msra.mxu1 %v15289_v37  ;;  %13595 = vmatprep.subr.bf16.mxu0 %v13594_v12 }
 0x16e   :  { %v11517_v34 = vpop.f32.mrb[33].mxu0  ;;  %12269 = vmatmul.mubr.msk.f32.vlgmr.msra.gmra.mrb[138].mxu0 %vm129_vm0, %v15332_v55  ;;  %11536 = vmatprep.mubr.msk.f32.mxu1 %vm14396_vm1, %v17454_v52 }
 0x16f   :  { %13597 = vmatpush3.bf16.msra.mxu0 %v13594_v12  ;;  %13204 = vmatprep.subr.bf16.mxu1 %v17452_v51  ;;  %v15573_v34 = vld [vmem:[#allocation8 + $0xc8] sm:$0xff] }
 0x170   :  { %11537 = vmatmul.mubr.msk.f32.gmra.mrb[32].mxu1 %vm129_vm0, %v1489_v29  ;;  %12271 = vmatprep.mubr.msk.f32.mxu0 %vm129_vm0, %v15342_v56 }
 0x171   :  { %v1494_v16 = vpop.f32.mrb[34].mxu0  ;;  %13206 = vmatpush3.bf16.msra.mxu1 %v15316_v44  ;;  %13599 = vmatprep.subr.bf16.mxu0 %v13598_v30 }
 0x172   :  { %v11520_v39 = vpop.f32.mrb[35].mxu0  ;;  %12272 = vmatmul.mubr.msk.f32.gmra.mrb[140].mxu0 %vm129_vm0, %v15356_v3  ;;  %11539 = vmatprep.mubr.msk.f32.mxu1 %vm14396_vm1, %v17454_v52 }
 0x173   :  { %13601 = vmatpush3.bf16.msra.mxu0 %v13598_v30  ;;  %13207 = vmatprep.subr.bf16.mxu1 %v17452_v51  ;;  %v15591_v39 = vld [vmem:[#allocation8 + $0xd8] sm:$0xff] }
 0x174   :  { %11540 = vmatmul.mubr.msk.f32.gmra.mrb[34].mxu1 %vm129_vm0, %v1494_v16  ;;  %12274 = vmatprep.mubr.msk.f32.mxu0 %vm129_vm0, %v15366_v5 }
 0x175   :  { %v1657_v20 = vpop.f32.mrb[36].mxu0  ;;  %13209 = vmatpush3.bf16.msra.mxu1 %v15346_v58  ;;  %13603 = vmatprep.subr.bf16.mxu0 %v13602_v35 }
 0x176   :  { %v11556_v23 = vpop.f32.mrb[37].mxu0  ;;  %12275 = vmatmul.mubr.msk.f32.gmra.mrb[142].mxu0 %vm129_vm0, %v15378_v26  ;;  %11575 = vmatprep.mubr.msk.f32.mxu1 %vm14396_vm1, %v17454_v52 }
 0x177   :  { %13605 = vmatpush3.bf16.msra.mxu0 %v13602_v35  ;;  %13223 = vmatprep.subr.bf16.mxu1 %v14781_v2  ;;  %v15584_v35 = vpack.c.bf16 %v15573_v34, %v15571_v33  ;;  %v15609_v23 = vld [vmem:[#allocation8 + $0xe8] sm:$0xff] }
 0x178   :  { %11576 = vmatmul.mubr.msk.f32.vlgmr.msra.gmra.mrb[36].mxu1 %vm129_vm0, %v1657_v20  ;;  %12310 = vmatprep.mubr.msk.f32.mxu0 %vm129_vm0, %v15312_v43 }
 0x179   :  { %v1662_v40 = vpop.f32.mrb[38].mxu0  ;;  %13225 = vmatpush3.bf16.msra.mxu1 %v14781_v2  ;;  %13619 = vmatprep.subr.bf16.mxu0 %v13618_v0 }
 0x17a   :  { %v11559_v28 = vpop.f32.mrb[39].mxu0  ;;  %12311 = vmatmul.mubr.msk.f32.vlgmr.msra.gmra.mrb[144].mxu0 %vm129_vm0, %v15332_v55  ;;  %11578 = vmatprep.mubr.msk.f32.mxu1 %vm14396_vm1, %v17454_v52 }
 0x17b   :  { %13621 = vmatpush3.bf16.msra.mxu0 %v13618_v0  ;;  %13227 = vmatprep.subr.bf16.mxu1 %v14799_v9  ;;  %v15602_v0 = vpack.c.bf16 %v15591_v39, %v15589_v38 }
 0x17c   :  { %11579 = vmatmul.mubr.msk.f32.gmra.mrb[38].mxu1 %vm129_vm0, %v1662_v40  ;;  %12313 = vmatprep.mubr.msk.f32.mxu0 %vm129_vm0, %v15342_v56 }
 0x17d   :  { %v1667_v41 = vpop.f32.mrb[40].mxu0  ;;  %13229 = vmatpush3.bf16.msra.mxu1 %v14799_v9  ;;  %13623 = vmatprep.subr.bf16.mxu0 %v13622_v6 }
 0x17e   :  { %v11562_v14 = vpop.f32.mrb[41].mxu0  ;;  %12314 = vmatmul.mubr.msk.f32.gmra.mrb[146].mxu0 %vm129_vm0, %v15356_v3  ;;  %11581 = vmatprep.mubr.msk.f32.mxu1 %vm14396_vm1, %v17454_v52 }
 0x17f   :  { %13625 = vmatpush3.bf16.msra.mxu0 %v13622_v6  ;;  %13231 = vmatprep.subr.bf16.mxu1 %v14817_v17  ;;  %v15620_v6 = vpack.c.bf16 %v15609_v23, %v15607_v22 }
 0x180   :  { %11582 = vmatmul.mubr.msk.f32.gmra.mrb[40].mxu1 %vm129_vm0, %v1667_v41  ;;  %12316 = vmatprep.mubr.msk.f32.mxu0 %vm129_vm0, %v15366_v5 }
 0x181   :  { %v11598_v31 = vpop.f32.mrb[42].mxu0  ;;  %13233 = vmatpush3.bf16.msra.mxu1 %v14817_v17  ;;  %13627 = vmatprep.subr.bf16.mxu0 %v13626_v13 }
 0x182   :  { %v1843_v32 = vpop.f32.mrb[43].mxu0  ;;  %12317 = vmatmul.mubr.msk.f32.gmra.mrb[148].mxu0 %vm129_vm0, %v15378_v26  ;;  %13247 = vmatprep.subr.bf16.mxu1 %v14781_v2 }
 0x183   :  { %11617 = vmatprep.mubr.msk.f32.mxu1 %vm129_vm0, %v1843_v32  ;;  %13629 = vmatpush3.bf16.msra.mxu0 %v13626_v13 }
 0x184   :  { %11618 = vmatmul.mubr.msk.f32.vlgmr.msra.gmra.mrb[42].mxu1 %vm129_vm0, %v11598_v31  ;;  %12352 = vmatprep.mubr.msk.f32.mxu0 %vm129_vm0, %v15312_v43  ;;  %v7053_v31 = vmul.f32 %v15537_v10, %v15537_v10 }
 0x185   :  { %v11601_v21 = vpop.f32.mrb[44].mxu0  ;;  %13249 = vmatpush3.bf16.msra.mxu1 %v14781_v2  ;;  %13642 = vmatprep.subr.bf16.mxu0 %v17452_v51 }
 0x186   :  { %v1853_v42 = vpop.f32.mrb[45].mxu0  ;;  %12353 = vmatmul.mubr.msk.f32.vlgmr.msra.gmra.mrb[150].mxu0 %vm129_vm0, %v15332_v55  ;;  %13251 = vmatprep.subr.bf16.mxu1 %v14799_v9 }
 0x187   :  { %11620 = vmatprep.mubr.msk.f32.mxu1 %vm129_vm0, %v1853_v42  ;;  %13644 = vmatpush3.bf16.msra.mxu0 %v15179_v4 }
 0x188   :  { %11621 = vmatmul.mubr.msk.f32.gmra.mrb[44].mxu1 %vm129_vm0, %v11601_v21  ;;  %12355 = vmatprep.mubr.msk.f32.mxu0 %vm129_vm0, %v15342_v56 }
 0x189   :  { %v11604_v45 = vpop.f32.mrb[46].mxu0  ;;  %13253 = vmatpush3.bf16.msra.mxu1 %v14799_v9  ;;  %13645 = vmatprep.subr.bf16.mxu0 %v17452_v51 }
 0x18a   :  { %v1863_v25 = vpop.f32.mrb[47].mxu0  ;;  %12356 = vmatmul.mubr.msk.f32.gmra.mrb[152].mxu0 %vm129_vm0, %v15356_v3  ;;  %13255 = vmatprep.subr.bf16.mxu1 %v14817_v17 }
 0x18b   :  { %11623 = vmatprep.mubr.msk.f32.mxu1 %vm129_vm0, %v1863_v25  ;;  %13647 = vmatpush3.bf16.msra.mxu0 %v15197_v11  ;;  %v7055_v25 = vmul.f32 %v15555_v24, %v15555_v24 }
 0x18c   :  { %11624 = vmatmul.mubr.msk.f32.gmra.mrb[46].mxu1 %vm129_vm0, %v11604_v45  ;;  %12358 = vmatprep.mubr.msk.f32.mxu0 %vm129_vm0, %v15366_v5 }
 0x18d   :  { %v11640_v4 = vpop.f32.mrb[48].mxu0  ;;  %13257 = vmatpush3.bf16.msra.mxu1 %v14817_v17  ;;  %13648 = vmatprep.subr.bf16.mxu0 %v17452_v51 }
 0x18e   :  { %v2051_v46 = vpop.f32.mrb[49].mxu0  ;;  %12359 = vmatmul.mubr.msk.f32.gmra.mrb[154].mxu0 %vm129_vm0, %v15378_v26  ;;  %13271 = vmatprep.subr.bf16.mxu1 %v14781_v2 }
 0x18f   :  { %11659 = vmatprep.mubr.msk.f32.mxu1 %vm129_vm0, %v2051_v46  ;;  %13650 = vmatpush3.bf16.msra.mxu0 %v15215_v53 }
 0x190   :  { %11660 = vmatmul.mubr.msk.f32.vlgmr.msra.gmra.mrb[48].mxu1 %vm129_vm0, %v11640_v4  ;;  %12394 = vmatprep.mubr.msk.f32.mxu0 %vm14396_vm1, %v17454_v52 }
 0x191   :  { %v11643_v11 = vpop.f32.mrb[50].mxu0  ;;  %13273 = vmatpush3.bf16.msra.mxu1 %v14781_v2  ;;  %13660 = vmatprep.subr.bf16.mxu0 %v17452_v51 }
 0x192   :  { %v2061_v47 = vpop.f32.mrb[51].mxu0  ;;  %12395 = vmatmul.mubr.msk.f32.vlgmr.msra.gmra.mrb[156].mxu0 %vm129_vm0, %v15492_v48  ;;  %13275 = vmatprep.subr.bf16.mxu1 %v14799_v9 }
 0x193   :  { %11662 = vmatprep.mubr.msk.f32.mxu1 %vm129_vm0, %v2061_v47  ;;  %13662 = vmatpush3.bf16.msra.mxu0 %v15233_v54  ;;  %v15512_v54 = vld [vmem:[#allocation7 + $0xc0] sm:$0xff]  ;;  %v7264_v47 = vmul.f32 %v15571_v33, %v15571_v33 }
 0x194   :  { %11663 = vmatmul.mubr.msk.f32.gmra.mrb[50].mxu1 %vm129_vm0, %v11643_v11  ;;  %12397 = vmatprep.mubr.msk.f32.mxu0 %vm14396_vm1, %v17454_v52  ;;  %v15525_v61 = vpack.c.bf16 %v15514_v59, %v15512_v54  ;;  %v7050_v7 = vmul.f32 %v15512_v54, %v15512_v54 }
 0x195   :  { %v11646_v53 = vpop.f32.mrb[52].mxu0  ;;  %13277 = vmatpush3.bf16.msra.mxu1 %v14799_v9  ;;  %13663 = vmatprep.subr.bf16.mxu0 %v17452_v51 }
 0x196   :  { %v2071_v49 = vpop.f32.mrb[53].mxu0  ;;  %12398 = vmatmul.mubr.msk.f32.gmra.mrb[158].mxu0 %vm129_vm0, %v15507_v50  ;;  %13279 = vmatprep.subr.bf16.mxu1 %v14817_v17  ;;  %v13726_v13 = vpack.c.bf16 %v7051_v27, %v7050_v7  ;;  %v7478_v27 = vmul.f32 %v15571_v33, %v15512_v54  ;;  %v7481_v33 = vmul.f32 %v15591_v39, %v15537_v10 }
 0x197   :  { %11665 = vmatprep.mubr.msk.f32.mxu1 %vm129_vm0, %v2071_v49  ;;  %13665 = vmatpush3.bf16.msra.mxu0 %v15251_v57  ;;  %v15535_v57 = vld [vmem:[#allocation7 + $0xd0] sm:$0xff] }
 0x198   :  { %11666 = vmatmul.mubr.msk.f32.gmra.mrb[52].mxu1 %vm129_vm0, %v11646_v53  ;;  %12400 = vmatprep.mubr.msk.f32.mxu0 %vm14396_vm1, %v17454_v52  ;;  %v15548_v18 = vpack.c.bf16 %v15537_v10, %v15535_v57  ;;  %v7052_v14 = vmul.f32 %v15535_v57, %v15535_v57  ;;  %v7265_v53 = vmul.f32 %v15573_v34, %v15573_v34 }
 0x199   :  { %v11682_v60 = vpop.f32.mrb[54].mxu0  ;;  %13281 = vmatpush3.bf16.msra.mxu1 %v14817_v17  ;;  %13666 = vmatprep.subr.bf16.mxu0 %v17452_v51 }
 0x19a   :  { %v2265_v62 = vpop.f32.mrb[55].mxu0  ;;  %12401 = vmatmul.mubr.msk.f32.gmra.mrb[160].mxu0 %vm129_vm0, %v15530_v63  ;;  %13295 = vmatprep.subr.bf16.mxu1 %v14781_v2  ;;  %v13730_v42 = vpack.c.bf16 %v7053_v31, %v7052_v14 }
 0x19b   :  { %11701 = vmatprep.mubr.msk.f32.mxu1 %vm129_vm0, %v2265_v62  ;;  %13668 = vmatpush3.bf16.msra.mxu0 %v15269_v15  ;;  %v15553_v15 = vld [vmem:[#allocation7 + $0xe0] sm:$0xff]  ;;  %v13750_v62 = vpack.c.bf16 %v7265_v53, %v7264_v47  ;;  %v15801_v47 = vld [vmem:[#allocation7 + $0xf8] sm:$0xff] }
 0x19c   :  { %11702 = vmatmul.mubr.msk.f32.vlgmr.msra.gmra.mrb[54].mxu1 %vm129_vm0, %v11682_v60  ;;  %12436 = vmatprep.mubr.msk.f32.mxu0 %vm14396_vm1, %v17454_v52  ;;  %v15566_v30 = vpack.c.bf16 %v15555_v24, %v15553_v15  ;;  %v7054_v45 = vmul.f32 %v15553_v15, %v15553_v15  ;;  %v7482_v10 = vmul.f32 %v15607_v22, %v15553_v15 }
 0x19d   :  { %v11685_v12 = vpop.f32.mrb[56].mxu0  ;;  %13297 = vmatpush3.bf16.msra.mxu1 %v14781_v2  ;;  %13679 = vmatprep.subr.bf16.mxu0 %v15525_v61 }
 0x19e   :  { %v2275_v19 = vpop.f32.mrb[57].mxu0  ;;  %12437 = vmatmul.mubr.msk.f32.vlgmr.msra.gmra.mrb[162].mxu0 %vm129_vm0, %v15492_v48  ;;  %13299 = vmatprep.subr.bf16.mxu1 %v14799_v9  ;;  %v13734_v11 = vpack.c.bf16 %v7055_v25, %v7054_v45 }
 0x19f   :  { %11704 = vmatprep.mubr.msk.f32.mxu1 %vm129_vm0, %v2275_v19  ;;  %13681 = vmatpush3.bf16.msra.mxu0 %v15525_v61  ;;  %v7267_v19 = vmul.f32 %v15591_v39, %v15591_v39 }
 0x1a0   :  { %11705 = vmatmul.mubr.msk.f32.gmra.mrb[56].mxu1 %vm129_vm0, %v11685_v12  ;;  %12439 = vmatprep.mubr.msk.f32.mxu0 %vm14396_vm1, %v17454_v52  ;;  %v7266_v12 = vmul.f32 %v15589_v38, %v15589_v38 }
 0x1a1   :  { %v11688_v29 = vpop.f32.mrb[58].mxu0  ;;  %13301 = vmatpush3.bf16.msra.mxu1 %v14799_v9  ;;  %13683 = vmatprep.subr.bf16.mxu0 %v15548_v18 }
 0x1a2   :  { %v2285_v8 = vpop.f32.mrb[59].mxu0  ;;  %12440 = vmatmul.mubr.msk.f32.gmra.mrb[164].mxu0 %vm129_vm0, %v15507_v50  ;;  %13303 = vmatprep.subr.bf16.mxu1 %v14817_v17 }
 0x1a3   :  { %11707 = vmatprep.mubr.msk.f32.mxu1 %vm129_vm0, %v2285_v8  ;;  %13685 = vmatpush3.bf16.msra.mxu0 %v15548_v18 }
 0x1a4   :  { %11708 = vmatmul.mubr.msk.f32.gmra.mrb[58].mxu1 %vm129_vm0, %v11688_v29  ;;  %12442 = vmatprep.mubr.msk.f32.mxu0 %vm14396_vm1, %v17454_v52 }
 0x1a5   :  { %v11724_v16 = vpop.f32.mrb[60].mxu0  ;;  %13305 = vmatpush3.bf16.msra.mxu1 %v14817_v17  ;;  %13687 = vmatprep.subr.bf16.mxu0 %v15566_v30 }
 0x1a6   :  { %v2479_v36 = vpop.f32.mrb[61].mxu0  ;;  %12443 = vmatmul.mubr.msk.f32.gmra.mrb[166].mxu0 %vm129_vm0, %v15530_v63  ;;  %13319 = vmatprep.subr.bf16.mxu1 %v14781_v2 }
 0x1a7   :  { %11743 = vmatprep.mubr.msk.f32.mxu1 %vm129_vm0, %v2479_v36  ;;  %13689 = vmatpush3.bf16.msra.mxu0 %v15566_v30  ;;  %v7268_v36 = vmul.f32 %v15607_v22, %v15607_v22 }
 0x1a8   :  { %11744 = vmatmul.mubr.msk.f32.vlgmr.msra.gmra.mrb[60].mxu1 %vm129_vm0, %v11724_v16  ;;  %12478 = vmatprep.mubr.msk.f32.mxu0 %vm129_vm0, %v15312_v43  ;;  %v13754_v16 = vpack.c.bf16 %v7267_v19, %v7266_v12 }
 0x1a9   :  { %v11727_v20 = vpop.f32.mrb[62].mxu0  ;;  %13321 = vmatpush3.bf16.msra.mxu1 %v14781_v2  ;;  %13703 = vmatprep.subr.bf16.mxu0 %v15584_v35 }
 0x1aa   :  { %v2489_v1 = vpop.f32.mrb[63].mxu0  ;;  %12479 = vmatmul.mubr.msk.f32.vlgmr.msra.gmra.mrb[168].mxu0 %vm129_vm0, %v15332_v55  ;;  %13323 = vmatprep.subr.bf16.mxu1 %v14799_v9 }
 0x1ab   :  { %11746 = vmatprep.mubr.msk.f32.mxu1 %vm129_vm0, %v2489_v1  ;;  %13705 = vmatpush3.bf16.msra.mxu0 %v15584_v35 }
 0x1ac   :  { %11747 = vmatmul.mubr.msk.f32.gmra.mrb[62].mxu1 %vm129_vm0, %v11727_v20  ;;  %12481 = vmatprep.mubr.msk.f32.mxu0 %vm129_vm0, %v15342_v56  ;;  %v7269_v20 = vmul.f32 %v15609_v23, %v15609_v23 }
 0x1ad   :  { %v11730_v40 = vpop.f32.mrb[64].mxu0  ;;  %13325 = vmatpush3.bf16.msra.mxu1 %v14799_v9  ;;  %13707 = vmatprep.subr.bf16.mxu0 %v15602_v0 }
 0x1ae   :  { %v2499_v28 = vpop.f32.mrb[65].mxu0  ;;  %12482 = vmatmul.mubr.msk.f32.gmra.mrb[170].mxu0 %vm129_vm0, %v15356_v3  ;;  %13327 = vmatprep.subr.bf16.mxu1 %v14817_v17  ;;  %v13758_v7 = vpack.c.bf16 %v7269_v20, %v7268_v36  ;;  %v15853_v36 = vld [vmem:[#allocation8 + $0xf0] sm:$0xff]  ;;  %v15855_v20 = vld [vmem:[#allocation8 + $0xf8] sm:$0xff] }
 0x1af   :  { %11749 = vmatprep.mubr.msk.f32.mxu1 %vm129_vm0, %v2499_v28  ;;  %13709 = vmatpush3.bf16.msra.mxu0 %v15602_v0  ;;  %v7479_v28 = vmul.f32 %v15573_v34, %v15514_v59  ;;  %v7480_v59 = vmul.f32 %v15589_v38, %v15535_v57  ;;  %v7483_v38 = vmul.f32 %v15609_v23, %v15555_v24 }
 0x1b0   :  { %11750 = vmatmul.mubr.msk.f32.gmra.mrb[64].mxu1 %vm129_vm0, %v11730_v40  ;;  %12484 = vmatprep.mubr.msk.f32.mxu0 %vm129_vm0, %v15366_v5 }
 0x1b1   :  { %v11766_v41 = vpop.f32.mrb[66].mxu0  ;;  %13329 = vmatpush3.bf16.msra.mxu1 %v14817_v17  ;;  %13711 = vmatprep.subr.bf16.mxu0 %v15620_v6  ;;  %v13774_v54 = vpack.c.bf16 %v7479_v28, %v7478_v27  ;;  %v13778_v57 = vpack.c.bf16 %v7481_v33, %v7480_v59  ;;  %v13782_v15 = vpack.c.bf16 %v7483_v38, %v7482_v10  ;;  %v15873_v27 = vld [vmem:[#allocation8 + $0x108] sm:$0xff] }
 0x1b2   :  { %v2693_v32 = vpop.f32.mrb[67].mxu0  ;;  %12485 = vmatmul.mubr.msk.f32.gmra.mrb[172].mxu0 %vm129_vm0, %v15378_v26  ;;  %13339 = vmatprep.subr.bf16.mxu1 %v17452_v51  ;;  %v8670_v33 = vmul.f32 %v15801_v47, %v15801_v47 }
 0x1b3   :  { %11785 = vmatprep.mubr.msk.f32.mxu1 %vm129_vm0, %v2693_v32  ;;  %13713 = vmatpush3.bf16.msra.mxu0 %v15620_v6 }
 0x1b4   :  { %11786 = vmatmul.mubr.msk.f32.vlgmr.msra.gmra.mrb[66].mxu1 %vm129_vm0, %v11766_v41  ;;  %12520 = vmatprep.mubr.msk.f32.mxu0 %vm129_vm0, %v15312_v43 }
 0x1b5   :  { %v11769_v21 = vpop.f32.mrb[68].mxu0  ;;  %13341 = vmatpush3.bf16.msra.mxu1 %v15289_v37  ;;  %13727 = vmatprep.subr.bf16.mxu0 %v13726_v13 }
 0x1b6   :  { %v2703_v4 = vpop.f32.mrb[69].mxu0  ;;  %12521 = vmatmul.mubr.msk.f32.vlgmr.msra.gmra.mrb[174].mxu0 %vm129_vm0, %v15332_v55  ;;  %13342 = vmatprep.subr.bf16.mxu1 %v17452_v51 }
 0x1b7   :  { %11788 = vmatprep.mubr.msk.f32.mxu1 %vm129_vm0, %v2703_v4  ;;  %13729 = vmatpush3.bf16.msra.mxu0 %v13726_v13 }
 0x1b8   :  { %11789 = vmatmul.mubr.msk.f32.gmra.mrb[68].mxu1 %vm129_vm0, %v11769_v21  ;;  %12523 = vmatprep.mubr.msk.f32.mxu0 %vm129_vm0, %v15342_v56 }
 0x1b9   :  { %v11772_v46 = vpop.f32.mrb[70].mxu0  ;;  %13344 = vmatpush3.bf16.msra.mxu1 %v15316_v44  ;;  %13731 = vmatprep.subr.bf16.mxu0 %v13730_v42 }
 0x1ba   :  { %v2713_v49 = vpop.f32.mrb[71].mxu0  ;;  %12524 = vmatmul.mubr.msk.f32.gmra.mrb[176].mxu0 %vm129_vm0, %v15356_v3  ;;  %13345 = vmatprep.subr.bf16.mxu1 %v17452_v51 }
 0x1bb   :  { %11791 = vmatprep.mubr.msk.f32.mxu1 %vm129_vm0, %v2713_v49  ;;  %13733 = vmatpush3.bf16.msra.mxu0 %v13730_v42 }
 0x1bc   :  { %11792 = vmatmul.mubr.msk.f32.gmra.mrb[70].mxu1 %vm129_vm0, %v11772_v46  ;;  %12526 = vmatprep.mubr.msk.f32.mxu0 %vm129_vm0, %v15366_v5 }
 0x1bd   :  { %v3102_v60 = vpop.f32.mrb[72].mxu0  ;;  %13347 = vmatpush3.bf16.msra.mxu1 %v15346_v58  ;;  %13735 = vmatprep.subr.bf16.mxu0 %v13734_v11 }
 0x1be   :  { %v11808_v29 = vpop.f32.mrb[73].mxu0  ;;  %12527 = vmatmul.mubr.msk.f32.gmra.mrb[178].mxu0 %vm129_vm0, %v15378_v26  ;;  %11827 = vmatprep.mubr.msk.f32.mxu1 %vm14396_vm1, %v17454_v52 }
 0x1bf   :  { %13737 = vmatpush3.bf16.msra.mxu0 %v13734_v11  ;;  %13357 = vmatprep.subr.bf16.mxu1 %v17452_v51  ;;  %v15799_v11 = vld [vmem:[#allocation7 + $0xf0] sm:$0xff]  ;;  %v15837_v29 = vld [vmem:[#allocation7 + $0x118] sm:$0xff] }
 0x1c0   :  { %11828 = vmatmul.mubr.msk.f32.vlgmr.msra.gmra.mrb[72].mxu1 %vm129_vm0, %v3102_v60  ;;  %12562 = vmatprep.mubr.msk.f32.mxu0 %vm129_vm0, %v15312_v43  ;;  %v15812_v53 = vpack.c.bf16 %v15801_v47, %v15799_v11  ;;  %v15819_v60 = vld [vmem:[#allocation7 + $0x108] sm:$0xff]  ;;  %v8669_v59 = vmul.f32 %v15799_v11, %v15799_v11 }
 0x1c1   :  { %v3107_v8 = vpop.f32.mrb[74].mxu0  ;;  %13359 = vmatpush3.bf16.msra.mxu1 %v15289_v37  ;;  %13751 = vmatprep.subr.bf16.mxu0 %v13750_v62  ;;  %v8672_v38 = vmul.f32 %v15819_v60, %v15819_v60 }
 0x1c2   :  { %v11811_v1 = vpop.f32.mrb[75].mxu0  ;;  %12563 = vmatmul.mubr.msk.f32.vlgmr.msra.gmra.mrb[180].mxu0 %vm129_vm0, %v15332_v55  ;;  %11830 = vmatprep.mubr.msk.f32.mxu1 %vm14396_vm1, %v17454_v52  ;;  %v13882_v10 = vpack.c.bf16 %v8670_v33, %v8669_v59 }
 0x1c3   :  { %13753 = vmatpush3.bf16.msra.mxu0 %v13750_v62  ;;  %13360 = vmatprep.subr.bf16.mxu1 %v17452_v51 }
 0x1c4   :  { %11831 = vmatmul.mubr.msk.f32.gmra.mrb[74].mxu1 %vm129_vm0, %v3107_v8  ;;  %12565 = vmatprep.mubr.msk.f32.mxu0 %vm129_vm0, %v15342_v56 }
 0x1c5   :  { %v3112_v40 = vpop.f32.mrb[76].mxu0  ;;  %13362 = vmatpush3.bf16.msra.mxu1 %v15316_v44  ;;  %13755 = vmatprep.subr.bf16.mxu0 %v13754_v16 }
 0x1c6   :  { %v11814_v41 = vpop.f32.mrb[77].mxu0  ;;  %12566 = vmatmul.mubr.msk.f32.gmra.mrb[182].mxu0 %vm129_vm0, %v15356_v3  ;;  %11833 = vmatprep.mubr.msk.f32.mxu1 %vm14396_vm1, %v17454_v52 }
 0x1c7   :  { %13757 = vmatpush3.bf16.msra.mxu0 %v13754_v16  ;;  %13363 = vmatprep.subr.bf16.mxu1 %v17452_v51 }
 0x1c8   :  { %11834 = vmatmul.mubr.msk.f32.gmra.mrb[76].mxu1 %vm129_vm0, %v3112_v40  ;;  %12568 = vmatprep.mubr.msk.f32.mxu0 %vm129_vm0, %v15366_v5 }
 0x1c9   :  { %v3275_v13 = vpop.f32.mrb[78].mxu0  ;;  %13365 = vmatpush3.bf16.msra.mxu1 %v15346_v58  ;;  %13759 = vmatprep.subr.bf16.mxu0 %v13758_v7 }
 0x1ca   :  { %v11850_v34 = vpop.f32.mrb[79].mxu0  ;;  %12569 = vmatmul.mubr.msk.f32.gmra.mrb[184].mxu0 %vm129_vm0, %v15378_v26  ;;  %11869 = vmatprep.mubr.msk.f32.mxu1 %vm14396_vm1, %v17454_v52 }
 0x1cb   :  { %13761 = vmatpush3.bf16.msra.mxu0 %v13758_v7  ;;  %13379 = vmatprep.subr.bf16.mxu1 %v14781_v2  ;;  %v15871_v7 = vld [vmem:[#allocation8 + $0x100] sm:$0xff] }
 0x1cc   :  { %11870 = vmatmul.mubr.msk.f32.vlgmr.msra.gmra.mrb[78].mxu1 %vm129_vm0, %v3275_v13  ;;  %12604 = vmatprep.mubr.msk.f32.mxu0 %vm129_vm0, %v15312_v43  ;;  %v15889_v13 = vld [vmem:[#allocation8 + $0x110] sm:$0xff] }
 0x1cd   :  { %v3280_v14 = vpop.f32.mrb[80].mxu0  ;;  %13381 = vmatpush3.bf16.msra.mxu1 %v14781_v2  ;;  %13775 = vmatprep.subr.bf16.mxu0 %v13774_v54 }
 0x1ce   :  { %v11853_v39 = vpop.f32.mrb[81].mxu0  ;;  %12605 = vmatmul.mubr.msk.f32.vlgmr.msra.gmra.mrb[186].mxu0 %vm129_vm0, %v15332_v55  ;;  %11872 = vmatprep.mubr.msk.f32.mxu1 %vm14396_vm1, %v17454_v52 }
 0x1cf   :  { %13777 = vmatpush3.bf16.msra.mxu0 %v13774_v54  ;;  %13383 = vmatprep.subr.bf16.mxu1 %v14799_v9  ;;  %v15891_v54 = vld [vmem:[#allocation8 + $0x118] sm:$0xff] }
 0x1d0   :  { %11873 = vmatmul.mubr.msk.f32.gmra.mrb[80].mxu1 %vm129_vm0, %v3280_v14  ;;  %12607 = vmatprep.mubr.msk.f32.mxu0 %vm129_vm0, %v15342_v56 }
 0x1d1   :  { %v3285_v31 = vpop.f32.mrb[82].mxu0  ;;  %13385 = vmatpush3.bf16.msra.mxu1 %v14799_v9  ;;  %13779 = vmatprep.subr.bf16.mxu0 %v13778_v57 }
 0x1d2   :  { %v11856_v24 = vpop.f32.mrb[83].mxu0  ;;  %12608 = vmatmul.mubr.msk.f32.gmra.mrb[188].mxu0 %vm129_vm0, %v15356_v3  ;;  %11875 = vmatprep.mubr.msk.f32.mxu1 %vm14396_vm1, %v17454_v52 }
 0x1d3   :  { %13781 = vmatpush3.bf16.msra.mxu0 %v13778_v57  ;;  %13387 = vmatprep.subr.bf16.mxu1 %v14817_v17 }
 0x1d4   :  { %11876 = vmatmul.mubr.msk.f32.gmra.mrb[82].mxu1 %vm129_vm0, %v3285_v31  ;;  %12610 = vmatprep.mubr.msk.f32.mxu0 %vm129_vm0, %v15366_v5 }
 0x1d5   :  { %v11892_v22 = vpop.f32.mrb[84].mxu0  ;;  %13389 = vmatpush3.bf16.msra.mxu1 %v14817_v17  ;;  %13783 = vmatprep.subr.bf16.mxu0 %v13782_v15 }
 0x1d6   :  { %v3462_v23 = vpop.f32.mrb[85].mxu0  ;;  %12611 = vmatmul.mubr.msk.f32.gmra.mrb[190].mxu0 %vm129_vm0, %v15378_v26  ;;  %13403 = vmatprep.subr.bf16.mxu1 %v14781_v2 }
 0x1d7   :  { %11911 = vmatprep.mubr.msk.f32.mxu1 %vm129_vm0, %v3462_v23  ;;  %13785 = vmatpush3.bf16.msra.mxu0 %v13782_v15  ;;  %v15935_v15 = vld [vmem:[%s17441_s0] sm:$0xff]  ;;  %v8674_v23 = vmul.f32 %v15837_v29, %v15837_v29 }
 0x1d8   :  { %11912 = vmatmul.mubr.msk.f32.vlgmr.msra.gmra.mrb[84].mxu1 %vm129_vm0, %v11892_v22  ;;  %12646 = vmatprep.mubr.msk.f32.mxu0 %vm129_vm0, %v15312_v43 }
 0x1d9   :  { %v11895_v32 = vpop.f32.mrb[86].mxu0  ;;  %13405 = vmatpush3.bf16.msra.mxu1 %v14781_v2  ;;  %13798 = vmatprep.subr.bf16.mxu0 %v17452_v51 }
 0x1da   :  { %v3472_v21 = vpop.f32.mrb[87].mxu0  ;;  %12647 = vmatmul.mubr.msk.f32.vlgmr.msra.gmra.mrb[192].mxu0 %vm129_vm0, %v15332_v55  ;;  %13407 = vmatprep.subr.bf16.mxu1 %v14799_v9 }
 0x1db   :  { %11914 = vmatprep.mubr.msk.f32.mxu1 %vm129_vm0, %v3472_v21  ;;  %13800 = vmatpush3.bf16.msra.mxu0 %v15525_v61  ;;  %v15947_v21 = vld [vmem:[%s17441_s0 + $0x8] sm:$0xff] }
 0x1dc   :  { %11915 = vmatmul.mubr.msk.f32.gmra.mrb[86].mxu1 %vm129_vm0, %v11895_v32  ;;  %12649 = vmatprep.mubr.msk.f32.mxu0 %vm129_vm0, %v15342_v56 }
 0x1dd   :  { %v11898_v42 = vpop.f32.mrb[88].mxu0  ;;  %13409 = vmatpush3.bf16.msra.mxu1 %v14799_v9  ;;  %13801 = vmatprep.subr.bf16.mxu0 %v17452_v51 }
 0x1de   :  { %v3482_v45 = vpop.f32.mrb[89].mxu0  ;;  %12650 = vmatmul.mubr.msk.f32.gmra.mrb[194].mxu0 %vm129_vm0, %v15356_v3  ;;  %13411 = vmatprep.subr.bf16.mxu1 %v14817_v17 }
 0x1df   :  { %11917 = vmatprep.mubr.msk.f32.mxu1 %vm129_vm0, %v3482_v45  ;;  %13803 = vmatpush3.bf16.msra.mxu0 %v15548_v18  ;;  %v8883_v45 = vmul.f32 %v15853_v36, %v15853_v36 }
 0x1e0   :  { %11918 = vmatmul.mubr.msk.f32.gmra.mrb[88].mxu1 %vm129_vm0, %v11898_v42  ;;  %12652 = vmatprep.mubr.msk.f32.mxu0 %vm129_vm0, %v15366_v5 }
 0x1e1   :  { %v11934_v61 = vpop.f32.mrb[90].mxu0  ;;  %13413 = vmatpush3.bf16.msra.mxu1 %v14817_v17  ;;  %13804 = vmatprep.subr.bf16.mxu0 %v17452_v51 }
 0x1e2   :  { %v3670_v25 = vpop.f32.mrb[91].mxu0  ;;  %12653 = vmatmul.mubr.msk.f32.gmra.mrb[196].mxu0 %vm129_vm0, %v15378_v26  ;;  %13427 = vmatprep.subr.bf16.mxu1 %v14781_v2 }
 0x1e3   :  { %11953 = vmatprep.mubr.msk.f32.mxu1 %vm129_vm0, %v3670_v25  ;;  %13806 = vmatpush3.bf16.msra.mxu0 %v15566_v30 }
 0x1e4   :  { %11954 = vmatmul.mubr.msk.f32.vlgmr.msra.gmra.mrb[90].mxu1 %vm129_vm0, %v11934_v61  ;;  %12688 = vmatprep.mubr.msk.f32.mxu0 %vm14396_vm1, %v17454_v52  ;;  %v8884_v61 = vmul.f32 %v15855_v20, %v15855_v20 }
 0x1e5   :  { %v11937_v18 = vpop.f32.mrb[92].mxu0  ;;  %13429 = vmatpush3.bf16.msra.mxu1 %v14781_v2  ;;  %13816 = vmatprep.subr.bf16.mxu0 %v17452_v51 }
 0x1e6   :  { %v3680_v4 = vpop.f32.mrb[93].mxu0  ;;  %12689 = vmatmul.mubr.msk.f32.vlgmr.msra.gmra.mrb[198].mxu0 %vm129_vm0, %v15492_v48  ;;  %13431 = vmatprep.subr.bf16.mxu1 %v14799_v9 }
 0x1e7   :  { %11956 = vmatprep.mubr.msk.f32.mxu1 %vm129_vm0, %v3680_v4  ;;  %13818 = vmatpush3.bf16.msra.mxu0 %v15584_v35 }
 0x1e8   :  { %11957 = vmatmul.mubr.msk.f32.gmra.mrb[92].mxu1 %vm129_vm0, %v11937_v18  ;;  %12691 = vmatprep.mubr.msk.f32.mxu0 %vm14396_vm1, %v17454_v52  ;;  %v15965_v18 = vld [vmem:[%s17441_s0 + $0x10] sm:$0xff] }
 0x1e9   :  { %v11940_v30 = vpop.f32.mrb[94].mxu0  ;;  %13433 = vmatpush3.bf16.msra.mxu1 %v14799_v9  ;;  %13819 = vmatprep.subr.bf16.mxu0 %v17452_v51 }
 0x1ea   :  { %v3690_v46 = vpop.f32.mrb[95].mxu0  ;;  %12692 = vmatmul.mubr.msk.f32.gmra.mrb[200].mxu0 %vm129_vm0, %v15507_v50  ;;  %13435 = vmatprep.subr.bf16.mxu1 %v14817_v17 }
 0x1eb   :  { %11959 = vmatprep.mubr.msk.f32.mxu1 %vm129_vm0, %v3690_v46  ;;  %13821 = vmatpush3.bf16.msra.mxu0 %v15602_v0  ;;  %v15817_v0 = vld [vmem:[#allocation7 + $0x100] sm:$0xff] }
 0x1ec   :  { %11960 = vmatmul.mubr.msk.f32.gmra.mrb[94].mxu1 %vm129_vm0, %v11940_v30  ;;  %12694 = vmatprep.mubr.msk.f32.mxu0 %vm14396_vm1, %v17454_v52  ;;  %v15830_v12 = vpack.c.bf16 %v15819_v60, %v15817_v0 }
 0x1ed   :  { %v11976_v35 = vpop.f32.mrb[96].mxu0  ;;  %13437 = vmatpush3.bf16.msra.mxu1 %v14817_v17  ;;  %13822 = vmatprep.subr.bf16.mxu0 %v17452_v51 }
 0x1ee   :  { %v3884_v49 = vpop.f32.mrb[97].mxu0  ;;  %12695 = vmatmul.mubr.msk.f32.gmra.mrb[202].mxu0 %vm129_vm0, %v15530_v63  ;;  %13451 = vmatprep.subr.bf16.mxu1 %v14781_v2 }
 0x1ef   :  { %11995 = vmatprep.mubr.msk.f32.mxu1 %vm129_vm0, %v3884_v49  ;;  %13824 = vmatpush3.bf16.msra.mxu0 %v15620_v6  ;;  %v15835_v6 = vld [vmem:[#allocation7 + $0x110] sm:$0xff] }
 0x1f0   :  { %11996 = vmatmul.mubr.msk.f32.vlgmr.msra.gmra.mrb[96].mxu1 %vm129_vm0, %v11976_v35  ;;  %12730 = vmatprep.mubr.msk.f32.mxu0 %vm14396_vm1, %v17454_v52  ;;  %v8673_v22 = vmul.f32 %v15835_v6, %v15835_v6  ;;  %v15973_v35 = vld [vmem:[%s17441_s0 + $0x18] sm:$0xff] }
 0x1f1   :  { %v11979_v62 = vpop.f32.mrb[98].mxu0  ;;  %13453 = vmatpush3.bf16.msra.mxu1 %v14781_v2  ;;  %13835 = vmatprep.subr.bf16.mxu0 %v15812_v53 }
 0x1f2   :  { %v3894_v19 = vpop.f32.mrb[99].mxu0  ;;  %12731 = vmatmul.mubr.msk.f32.vlgmr.msra.gmra.mrb[204].mxu0 %vm129_vm0, %v15492_v48  ;;  %13455 = vmatprep.subr.bf16.mxu1 %v14799_v9  ;;  %v15848_v48 = vpack.c.bf16 %v15837_v29, %v15835_v6  ;;  %v13890_v30 = vpack.c.bf16 %v8674_v23, %v8673_v22 }
 0x1f3   :  { %11998 = vmatprep.mubr.msk.f32.mxu1 %vm129_vm0, %v3894_v19  ;;  %13837 = vmatpush3.bf16.msra.mxu0 %v15812_v53  ;;  %v8885_v19 = vmul.f32 %v15871_v7, %v15871_v7 }
 0x1f4   :  { %11999 = vmatmul.mubr.msk.f32.gmra.mrb[98].mxu1 %vm129_vm0, %v11979_v62  ;;  %12733 = vmatprep.mubr.msk.f32.mxu0 %vm14396_vm1, %v17454_v52  ;;  %v13906_v62 = vpack.c.bf16 %v8884_v61, %v8883_v45 }
 0x1f5   :  { %v11982_v8 = vpop.f32.mrb[100].mxu0  ;;  %13457 = vmatpush3.bf16.msra.mxu1 %v14799_v9  ;;  %13839 = vmatprep.subr.bf16.mxu0 %v15830_v12 }
 0x1f6   :  { %v3904_v16 = vpop.f32.mrb[101].mxu0  ;;  %12734 = vmatmul.mubr.msk.f32.gmra.mrb[206].mxu0 %vm129_vm0, %v15507_v50  ;;  %13459 = vmatprep.subr.bf16.mxu1 %v14817_v17  ;;  %v15866_v50 = vpack.c.bf16 %v15855_v20, %v15853_v36 }
 0x1f7   :  { %12001 = vmatprep.mubr.msk.f32.mxu1 %vm129_vm0, %v3904_v16  ;;  %13841 = vmatpush3.bf16.msra.mxu0 %v15830_v12 }
 0x1f8   :  { %12002 = vmatmul.mubr.msk.f32.gmra.mrb[100].mxu1 %vm129_vm0, %v11982_v8  ;;  %12736 = vmatprep.mubr.msk.f32.mxu0 %vm14396_vm1, %v17454_v52  ;;  %v8886_v8 = vmul.f32 %v15873_v27, %v15873_v27 }
 0x1f9   :  { %v12018_v1 = vpop.f32.mrb[102].mxu0  ;;  %13461 = vmatpush3.bf16.msra.mxu1 %v14817_v17  ;;  %13843 = vmatprep.subr.bf16.mxu0 %v15848_v48 }
 0x1fa   :  { %v4098_v40 = vpop.f32.mrb[103].mxu0  ;;  %12737 = vmatmul.mubr.msk.f32.gmra.mrb[208].mxu0 %vm129_vm0, %v15530_v63  ;;  %13475 = vmatprep.subr.bf16.mxu1 %v14781_v2  ;;  %v15884_v63 = vpack.c.bf16 %v15873_v27, %v15871_v7 }
 0x1fb   :  { %12037 = vmatprep.mubr.msk.f32.mxu1 %vm129_vm0, %v4098_v40  ;;  %13845 = vmatpush3.bf16.msra.mxu0 %v15848_v48 }
 0x1fc   :  { %12038 = vmatmul.mubr.msk.f32.vlgmr.msra.gmra.mrb[102].mxu1 %vm129_vm0, %v12018_v1  ;;  %12772 = vmatprep.mubr.msk.f32.mxu0 %vm129_vm0, %v15312_v43  ;;  %17469 = vst [vmem:[#allocation25_spill] sm:$0xff] %v15884_v63 }
 0x1fd   :  { %v12021_v28 = vpop.f32.mrb[104].mxu0  ;;  %13477 = vmatpush3.bf16.msra.mxu1 %v14781_v2  ;;  %13859 = vmatprep.subr.bf16.mxu0 %v15866_v50 }
 0x1fe   :  { %v4108_v41 = vpop.f32.mrb[105].mxu0  ;;  %12773 = vmatmul.mubr.msk.f32.vlgmr.msra.gmra.mrb[210].mxu0 %vm129_vm0, %v15332_v55  ;;  %13479 = vmatprep.subr.bf16.mxu1 %v14799_v9  ;;  %v15902_v55 = vpack.c.bf16 %v15891_v54, %v15889_v13 }
 0x1ff   :  { %12040 = vmatprep.mubr.msk.f32.mxu1 %vm129_vm0, %v4108_v41  ;;  %13861 = vmatpush3.bf16.msra.mxu0 %v15866_v50  ;;  %v15993_v41 = vld [vmem:[%s17441_s0 + $0x20] sm:$0xff] }
 0x200   :  { %12041 = vmatmul.mubr.msk.f32.gmra.mrb[104].mxu1 %vm129_vm0, %v12021_v28  ;;  %12775 = vmatprep.mubr.msk.f32.mxu0 %vm129_vm0, %v15342_v56  ;;  %17470 = vst [vmem:[#allocation26_spill] sm:$0xff] %v15902_v55 }
 0x201   :  { %v12024_v43 = vpop.f32.mrb[106].mxu0  ;;  %13481 = vmatpush3.bf16.msra.mxu1 %v14799_v9  ;;  %13863 = vmatprep.subr.bf16.mxu0 %v15884_v63 }
 0x202   :  { %v4118_v34 = vpop.f32.mrb[107].mxu0  ;;  %12776 = vmatmul.mubr.msk.f32.gmra.mrb[212].mxu0 %vm129_vm0, %v15356_v3  ;;  %13483 = vmatprep.subr.bf16.mxu1 %v14817_v17  ;;  %v8671_v3 = vmul.f32 %v15817_v0, %v15817_v0 }
 0x203   :  { %v11325_v56 = vpop.f32.mrb[0].mxu1  ;;  %12043 = vmatprep.mubr.msk.f32.mxu1 %vm129_vm0, %v4118_v34  ;;  %13865 = vmatpush3.bf16.msra.mxu0 %v15884_v63 }
 0x204   :  { %v327_v14 = vpop.f32.mrb[1].mxu1  ;;  %12044 = vmatmul.mubr.msk.f32.gmra.mrb[106].mxu1 %vm129_vm0, %v12024_v43  ;;  %12778 = vmatprep.mubr.msk.f32.mxu0 %vm129_vm0, %v15366_v5  ;;  %v13886_v24 = vpack.c.bf16 %v8672_v38, %v8671_v3  ;;  %v15983_v16 = vmul.f32 %v11325_v56, %v11325_v56  ;;  %v8888_v3 = vmul.f32 %v15891_v54, %v15891_v54 }
 0x205   :  { %v12060_v57 = vpop.f32.mrb[108].mxu0  ;;  %13485 = vmatpush3.bf16.msra.mxu1 %v14817_v17  ;;  %13867 = vmatprep.subr.bf16.mxu0 %v15902_v55  ;;  %v15997_v43 = vmul.f32 %v327_v14, %v327_v14 }
 0x206   :  { %v4312_v39 = vpop.f32.mrb[109].mxu0  ;;  %12779 = vmatmul.mubr.msk.f32.gmra.mrb[214].mxu0 %vm129_vm0, %v15378_v26  ;;  %13495 = vmatprep.subr.bf16.mxu1 %v17452_v51 }
 0x207   :  { %v15925_v31 = vpop.f32.mrb[2].mxu1  ;;  %12079 = vmatprep.mubr.msk.f32.mxu1 %vm129_vm0, %v4312_v39  ;;  %13869 = vmatpush3.bf16.msra.mxu0 %v15902_v55 }
 0x208   :  { %v15929_v5 = vpop.f32.mrb[3].mxu1  ;;  %12080 = vmatmul.mubr.msk.f32.vlgmr.msra.gmra.mrb[108].mxu1 %vm129_vm0, %v12060_v57  ;;  %12814 = vmatprep.mubr.msk.f32.mxu0 %vm129_vm0, %v15935_v15 }
 0x209   :  { %v12063_v26 = vpop.f32.mrb[110].mxu0  ;;  %13497 = vmatpush3.bf16.msra.mxu1 %v15289_v37  ;;  %13883 = vmatprep.subr.bf16.mxu0 %v13882_v10  ;;  %v16038_v61 = vmul.f32 %v15929_v5, %v15929_v5 }
 0x20a   :  { %v4322_v32 = vpop.f32.mrb[111].mxu0  ;;  %12815 = vmatmul.mubr.msk.f32.vlgmr.msra.gmra.mrb[216].mxu0 %vm129_vm0, %v15947_v21  ;;  %13498 = vmatprep.subr.bf16.mxu1 %v17452_v51 }
 0x20b   :  { %v15952_v42 = vpop.f32.mrb[4].mxu1  ;;  %12082 = vmatprep.mubr.msk.f32.mxu1 %vm129_vm0, %v4322_v32  ;;  %13885 = vmatpush3.bf16.msra.mxu0 %v13882_v10  ;;  %v16009_v10 = vld [vmem:[%s17441_s0 + $0x28] sm:$0x3f] }
 0x20c   :  { %v15959_v25 = vpop.f32.mrb[5].mxu1  ;;  %12083 = vmatmul.mubr.msk.f32.gmra.mrb[110].mxu1 %vm129_vm0, %v12063_v26  ;;  %12817 = vmatprep.mubr.msk.f32.mxu0 %vm129_vm0, %v15965_v18  ;;  %v13910_v26 = vpack.c.bf16 %v8886_v8, %v8885_v19 }
 0x20d   :  { %v12066_v4 = vpop.f32.mrb[112].mxu0  ;;  %13500 = vmatpush3.bf16.msra.mxu1 %v15316_v44  ;;  %13887 = vmatprep.subr.bf16.mxu0 %v13886_v24 }
 0x20e   :  { %v4332_v46 = vpop.f32.mrb[113].mxu0  ;;  %12818 = vmatmul.mubr.msk.f32.gmra.mrb[218].mxu0 %vm129_vm0, %v15973_v35  ;;  %13501 = vmatprep.subr.bf16.mxu1 %v17452_v51 }
 0x20f   :  { %v11367_v49 = vpop.f32.mrb[6].mxu1  ;;  %12085 = vmatprep.mubr.msk.f32.mxu1 %vm129_vm0, %v4332_v46  ;;  %13889 = vmatpush3.bf16.msra.mxu0 %v13886_v24  ;;  %v16024_v24 = vmul.f32 %v15925_v31, %v15925_v31 }
 0x210   :  { %v15985_v1 = vmul.f32 %v11367_v49, %v11367_v49  ;;  %v15987_v40 = vmul.f32 %v11367_v49, %v11325_v56  ;;  %v535_v28 = vpop.f32.mrb[7].mxu1  ;;  %12086 = vmatmul.mubr.msk.f32.gmra.mrb[112].mxu1 %vm129_vm0, %v12066_v4  ;;  %12820 = vmatprep.mubr.msk.f32.mxu0 %vm129_vm0, %v15993_v41 }
 0x211   :  { %v15999_v59 = vmul.f32 %v535_v28, %v535_v28  ;;  %v16001_v33 = vmul.f32 %v535_v28, %v327_v14  ;;  %v4721_v34 = vpop.f32.mrb[114].mxu0  ;;  %13503 = vmatpush3.bf16.msra.mxu1 %v15346_v58  ;;  %13891 = vmatprep.subr.bf16.mxu0 %v13890_v30  ;;  %v8887_v14 = vmul.f32 %v15889_v13, %v15889_v13 }
 0x212   :  { %v1309_v56 = vadd.f32 %v15985_v1, %v15983_v16  ;;  %v12102_v57 = vpop.f32.mrb[115].mxu0  ;;  %12821 = vmatmul.mubr.msk.f32.gmra.mrb[220].mxu0 %vm129_vm0, %v16009_v10  ;;  %12121 = vmatprep.mubr.msk.f32.mxu1 %vm14396_vm1, %v17454_v52 }
 0x213   :  { %v1308_v38 = vadd.f32 %v15999_v59, %v15997_v43  ;;  %v11370_v39 = vpop.f32.mrb[8].mxu1  ;;  %13893 = vmatpush3.bf16.msra.mxu0 %v13890_v30  ;;  %13513 = vmatprep.subr.bf16.mxu1 %v17452_v51  ;;  %v13914_v8 = vpack.c.bf16 %v8888_v3, %v8887_v14  ;;  %v16065_v57 = vmul.f32 %v15952_v42, %v15952_v42 }
 0x214   :  { %v16026_v22 = vadd.f32 6.5025, %v1309_v56  ;;  %v16028_v23 = vmul.f32 %v11370_v39, %v11370_v39  ;;  %v16031_v32 = vmul.f32 %v11370_v39, %v15925_v31  ;;  %v545_v45 = vpop.f32.mrb[9].mxu1  ;;  %12122 = vmatmul.mubr.msk.f32.vlgmr.msra.gmra.mrb[114].mxu1 %vm129_vm0, %v4721_v34  ;;  %12856 = vmatprep.mubr.msk.f32.mxu0 %vm129_vm0, %v15935_v15  ;;  %v9097_v34 = vmul.f32 %v15853_v36, %v15799_v11 }
 0x215   :  { %v16040_v4 = vadd.f32 6.5025, %v1308_v38  ;;  %v16042_v30 = vmul.f32 %v545_v45, %v545_v45  ;;  %v16045_v46 = vmul.f32 %v545_v45, %v15929_v5  ;;  %v4726_v49 = vpop.f32.mrb[116].mxu0  ;;  %13515 = vmatpush3.bf16.msra.mxu1 %v15289_v37  ;;  %13907 = vmatprep.subr.bf16.mxu0 %v13906_v62  ;;  %v9098_v56 = vmul.f32 %v15855_v20, %v15801_v47 }
 0x216   :  { %14027 = vrcp.f32 %v16026_v22  ;;  %v1311_v31 = vadd.f32 %v16028_v23, %v16024_v24  ;;  %v12105_v19 = vpop.f32.mrb[117].mxu0  ;;  %12857 = vmatmul.mubr.msk.f32.vlgmr.msra.gmra.mrb[222].mxu0 %vm129_vm0, %v15947_v21  ;;  %12124 = vmatprep.mubr.msk.f32.mxu1 %vm14396_vm1, %v17454_v52  ;;  %v16079_v11 = vmul.f32 %v15959_v25, %v15959_v25 }
 0x217   :  { %14029 = vrcp.f32 %v16040_v4  ;;  %v1310_v5 = vadd.f32 %v16042_v30, %v16038_v61  ;;  %v11373_v28 = vpop.f32.mrb[10].mxu1  ;;  %13909 = vmatpush3.bf16.msra.mxu0 %v13906_v62  ;;  %13516 = vmatprep.subr.bf16.mxu1 %v17452_v51  ;;  %v1296_v19 = vmul.f32 2.0, %v16001_v33 }
 0x218   :  { %v16067_v14 = vadd.f32 6.5025, %v1311_v31  ;;  %v16069_v3 = vmul.f32 %v11373_v28, %v11373_v28  ;;  %v16072_v38 = vmul.f32 %v11373_v28, %v15952_v42  ;;  %v555_v62 = vpop.f32.mrb[11].mxu1  ;;  %12125 = vmatmul.mubr.msk.f32.gmra.mrb[116].mxu1 %vm129_vm0, %v4726_v49  ;;  %12859 = vmatprep.mubr.msk.f32.mxu0 %vm129_vm0, %v15965_v18  ;;  %v13930_v28 = vpack.c.bf16 %v9098_v56, %v9097_v34 }
 0x219   :  { %v16081_v47 = vadd.f32 6.5025, %v1310_v5  ;;  %v16083_v36 = vmul.f32 %v555_v62, %v555_v62  ;;  %v16086_v20 = vmul.f32 %v555_v62, %v15959_v25  ;;  %v4731_v39 = vpop.f32.mrb[118].mxu0  ;;  %13518 = vmatpush3.bf16.msra.mxu1 %v15316_v44  ;;  %13911 = vmatprep.subr.bf16.mxu0 %v13910_v26  ;;  %v9102_v56 = vmul.f32 %v15891_v54, %v15837_v29 }
 0x21a   :  { %14031 = vrcp.f32 %v16067_v14  ;;  %v1313_v42 = vadd.f32 %v16069_v3, %v16065_v57  ;;  %v12108_v45 = vpop.f32.mrb[119].mxu0  ;;  %12860 = vmatmul.mubr.msk.f32.gmra.mrb[224].mxu0 %vm129_vm0, %v15973_v35  ;;  %12127 = vmatprep.mubr.msk.f32.mxu1 %vm14396_vm1, %v17454_v52  ;;  %v1299_v54 = vmul.f32 2.0, %v16031_v32 }
 0x21b   :  { %14033 = vrcp.f32 %v16081_v47  ;;  %v1312_v25 = vadd.f32 %v16083_v36, %v16079_v11  ;;  %v16099_v49 = vpop.f32.mrb[12].mxu1  ;;  %13913 = vmatpush3.bf16.msra.mxu0 %v13910_v26  ;;  %13519 = vmatprep.subr.bf16.mxu1 %v17452_v51  ;;  %v9100_v51 = vmul.f32 %v15873_v27, %v15819_v60  ;;  %v9101_v27 = vmul.f32 %v15889_v13, %v15835_v6 }
 0x21c   :  { %v16102_v31 = vadd.f32 6.5025, %v1313_v42  ;;  %v16106_v5 = vpop.f32.mrb[13].mxu1  ;;  %12128 = vmatmul.mubr.msk.f32.gmra.mrb[118].mxu1 %vm129_vm0, %v4731_v39  ;;  %12862 = vmatprep.mubr.msk.f32.mxu0 %vm129_vm0, %v15993_v41  ;;  %v9099_v42 = vmul.f32 %v15871_v7, %v15817_v0  ;;  %v1298_v60 = vmul.f32 2.0, %v16045_v46 }
 0x21d   :  { %v16111_v62 = vadd.f32 6.5025, %v1312_v25  ;;  %v4894_v45 = vpop.f32.mrb[120].mxu0  ;;  %13521 = vmatpush3.bf16.msra.mxu1 %v15346_v58  ;;  %13915 = vmatprep.subr.bf16.mxu0 %v13914_v8  ;;  %v1297_v25 = vmul.f32 2.0, %v15987_v40 }
 0x21e   :  { %14035 = vrcp.f32 %v16102_v31  ;;  %v12144_v39 = vpop.f32.mrb[121].mxu0  ;;  %12863 = vmatmul.mubr.msk.f32.gmra.mrb[226].mxu0 %vm129_vm0, %v16009_v10  ;;  %12163 = vmatprep.mubr.msk.f32.mxu1 %vm14396_vm1, %v17454_v52 }
 0x21f   :  { %14037 = vrcp.f32 %v16111_v62  ;;  %v16126_v34 = vpop.f32.mrb[14].mxu1  ;;  %13917 = vmatpush3.bf16.msra.mxu0 %v13914_v8  ;;  %13535 = vmatprep.subr.bf16.mxu1 %v14781_v2  ;;  %v1303_v58 = vadd.f32 6.5025, %v1297_v25 }
 0x220   :  { %v14028_v0 = vpop.eup %14027  ;;  %v16131_v7 = vpop.f32.mrb[15].mxu1  ;;  %12164 = vmatmul.mubr.msk.f32.vlgmr.msra.gmra.mrb[120].mxu1 %vm129_vm0, %v4894_v45  ;;  %12898 = vmatprep.mubr.msk.f32.mxu0 %vm129_vm0, %v15935_v15  ;;  %v13934_v45 = vpack.c.bf16 %v9100_v51, %v9099_v42 }
 0x221   :  { %v14030_v8 = vpop.eup %14029  ;;  %v1327_v39 = vmul.f32 %v14028_v0, %v16026_v22  ;;  %v4899_v26 = vpop.f32.mrb[122].mxu0  ;;  %13537 = vmatpush3.bf16.msra.mxu1 %v14781_v2  ;;  %13931 = vmatprep.subr.bf16.mxu0 %v13930_v28 }
 0x222   :  { %v1326_v6 = vmul.f32 %v14030_v8, %v16040_v4  ;;  %v12147_v13 = vpop.f32.mrb[123].mxu0  ;;  %12899 = vmatmul.mubr.msk.f32.vlgmr.msra.gmra.mrb[228].mxu0 %vm129_vm0, %v15947_v21  ;;  %12166 = vmatprep.mubr.msk.f32.mxu1 %vm14396_vm1, %v17454_v52  ;;  %v1302_v4 = vadd.f32 6.5025, %v1296_v19 }
 0x223   :  { %v1333_v29 = vsub.f32 2.0, %v1327_v39  ;;  %v16152_v22 = vpop.f32.mrb[16].mxu1  ;;  %13933 = vmatpush3.bf16.msra.mxu0 %v13930_v28  ;;  %13539 = vmatprep.subr.bf16.mxu1 %v14799_v9  ;;  %v13938_v39 = vpack.c.bf16 %v9102_v56, %v9101_v27  ;;  %v17471_v27 = vmov 0.0  }
 0x224   :  { %v14032_v51 = vpop.eup %14031  ;;  %v1332_v42 = vsub.f32 2.0, %v1326_v6  ;;  %v16158_v13 = vpop.f32.mrb[17].mxu1  ;;  %12167 = vmatmul.mubr.msk.f32.gmra.mrb[122].mxu1 %vm129_vm0, %v4899_v26  ;;  %12901 = vmatprep.mubr.msk.f32.mxu0 %vm129_vm0, %v15965_v18 }
 0x225   :  { %v14034_v52 = vpop.eup %14033  ;;  %v1339_v28 = vmul.f32 %v14028_v0, %v1333_v29  ;;  %v1329_v44 = vmul.f32 %v14032_v51, %v16067_v14  ;;  %v1228_v6 = vsub.f32 %v16158_v13, %v16079_v11  ;;  %v4904_v37 = vpop.f32.mrb[124].mxu0  ;;  %13541 = vmatpush3.bf16.msra.mxu1 %v14799_v9  ;;  %13935 = vmatprep.subr.bf16.mxu0 %v13934_v45  ;;  %v1305_v14 = vadd.f32 6.5025, %v1299_v54 }
 0x226   :  { %v1338_v55 = vmul.f32 %v14030_v8, %v1332_v42  ;;  %v1328_v26 = vmul.f32 %v14034_v52, %v16081_v47  ;;  %v12150_v63 = vpop.f32.mrb[125].mxu0  ;;  %12902 = vmatmul.mubr.msk.f32.gmra.mrb[230].mxu0 %vm129_vm0, %v15973_v35  ;;  %12169 = vmatprep.mubr.msk.f32.mxu1 %vm14396_vm1, %v17471_v27  ;;  %v1304_v8 = vadd.f32 6.5025, %v1298_v60 }
 0x227   :  { %v16172_v0 = vmul.f32 %v1339_v28, %v1303_v58  ;;  %v1335_v56 = vsub.f32 2.0, %v1329_v44  ;;  %v11451_v25 = vpop.f32.mrb[18].mxu1  ;;  %13937 = vmatpush3.bf16.msra.mxu0 %v13934_v45  ;;  %13543 = vmatprep.subr.bf16.mxu1 %v14817_v17  ;;  %v1301_v44 = vmul.f32 2.0, %v16072_v38 }
 0x228   :  { %v14036_v29 = vpop.eup %14035  ;;  %v16175_v19 = vmul.f32 %v1338_v55, %v1302_v4  ;;  %v1334_v47 = vsub.f32 2.0, %v1328_v26  ;;  %v1231_v63 = vsub.f32 %v11451_v25, %v15985_v1  ;;  %v963_v42 = vpop.f32.mrb[19].mxu1  ;;  %12170 = vmatmul.mubr.msk.f32.gmra.mrb[124].mxu1 %vm129_vm0, %v4904_v37  ;;  %12904 = vmatprep.mubr.msk.f32.mxu0 %vm129_vm0, %v15993_v41  ;;  %v1300_v1 = vmul.f32 2.0, %v16086_v20 }
 0x229   :  { %v14038_v58 = vpop.eup %14037  ;;  %v1341_v54 = vmul.f32 %v14032_v51, %v1335_v56  ;;  %v1331_v45 = vmul.f32 %v14036_v29, %v16102_v31  ;;  %v1230_v28 = vsub.f32 %v963_v42, %v15999_v59  ;;  %v12186_v55 = vpop.f32.mrb[126].mxu0  ;;  %13545 = vmatpush3.bf16.msra.mxu1 %v14817_v17  ;;  %13939 = vmatprep.subr.bf16.mxu0 %v13938_v39 }
 0x22a   :  { %v1340_v60 = vmul.f32 %v14034_v52, %v1334_v47  ;;  %v1330_v37 = vmul.f32 %v14038_v58, %v16111_v62  ;;  %v17472_v4 = vsub.f32 %v16099_v49, %v15983_v16  ;;  %v5081_v51 = vpop.f32.mrb[127].mxu0  ;;  %12905 = vmatmul.mubr.msk.f32.gmra.mrb[232].mxu0 %vm129_vm0, %v16009_v10  ;;  %13559 = vmatprep.subr.bf16.mxu1 %v14781_v2 }
 0x22b   :  { %v16193_v59 = vmul.f32 %v1341_v54, %v1305_v14  ;;  %v1337_v31 = vsub.f32 2.0, %v1331_v45  ;;  %v17473_v52 = vsub.f32 %v16106_v5, %v15997_v43  ;;  %v11454_v25 = vpop.f32.mrb[20].mxu1  ;;  %12205 = vmatprep.mubr.msk.f32.mxu1 %vm129_vm0, %v5081_v51  ;;  %13941 = vmatpush3.bf16.msra.mxu0 %v13938_v39  ;;  %v1307_v14 = vadd.f32 6.5025, %v1301_v44 }
 0x22c   :  { %v1255_v26 = vadd.f32 %v1231_v63, %v17472_v4  ;;  %v16199_v62 = vmul.f32 %v1340_v60, %v1304_v8  ;;  %v1336_v16 = vsub.f32 2.0, %v1330_v37  ;;  %v1233_v47 = vsub.f32 %v11454_v25, %v16028_v23  ;;  %v973_v63 = vpop.f32.mrb[21].mxu1  ;;  %12206 = vmatmul.mubr.msk.f32.vlgmr.msra.gmra.mrb[126].mxu1 %vm129_vm0, %v12186_v55  ;;  %12940 = vmatprep.mubr.msk.f32.mxu0 %vm129_vm0, %v15935_v15 }
 0x22d   :  { %v1254_v56 = vadd.f32 %v1230_v28, %v17473_v52  ;;  %v1343_v43 = vmul.f32 %v14036_v29, %v1337_v31  ;;  %v1232_v42 = vsub.f32 %v973_v63, %v16042_v30  ;;  %v12189_v39 = vpop.f32.mrb[128].mxu0  ;;  %13561 = vmatpush3.bf16.msra.mxu1 %v14781_v2  ;;  %v17474_v8 = vmov 0.0|0.0  }
 0x22e   :  { %v16201_v49 = vadd.f32 58.5225, %v1255_v26  ;;  %13954 = vmatprep.subr.bf16.mxu0 %v17474_v8  ;;  %v1306_v54 = vadd.f32 6.5025, %v1300_v1  ;;  %v1342_v45 = vmul.f32 %v14038_v58, %v1336_v16  ;;  %v17475_v23 = vsub.f32 %v16126_v34, %v16024_v24  ;;  %v5091_v15 = vpop.f32.mrb[129].mxu0  ;;  %12941 = vmatmul.mubr.msk.f32.vlgmr.msra.gmra.mrb[234].mxu0 %vm129_vm0, %v15947_v21 }
 0x22f   :  { %v16207_v5 = vadd.f32 58.5225, %v1254_v56  ;;  %13563 = vmatprep.subr.bf16.mxu1 %v14799_v9  ;;  %v16219_v30 = vmul.f32 %v1343_v43, %v1307_v14  ;;  %v17476_v29 = vsub.f32 %v16131_v7, %v16038_v61  ;;  %v11457_v44 = vpop.f32.mrb[22].mxu1  ;;  %12208 = vmatprep.mubr.msk.f32.mxu1 %vm129_vm0, %v5091_v15 }
 0x230   :  { %14039 = vrcp.f32 %v16201_v49  ;;  %v1257_v28 = vadd.f32 %v1233_v47, %v17475_v23  ;;  %12943 = vmatprep.mubr.msk.f32.mxu0 %vm129_vm0, %v15965_v18  ;;  %v16228_v24 = vmul.f32 %v1342_v45, %v1306_v54  ;;  %v1235_v21 = vsub.f32 %v11457_v44, %v16069_v3  ;;  %v983_v55 = vpop.f32.mrb[23].mxu1  ;;  %12209 = vmatmul.mubr.msk.f32.gmra.mrb[128].mxu1 %vm129_vm0, %v12189_v39 }
 0x231   :  { %14041 = vrcp.f32 %v16207_v5  ;;  %v1256_v58 = vadd.f32 %v1232_v42, %v17476_v29  ;;  %13956 = vmatpush3.bf16.msra.mxu0 %v15812_v53  ;;  %v1234_v61 = vsub.f32 %v983_v55, %v16083_v36  ;;  %v12192_v7 = vpop.f32.mrb[130].mxu0  ;;  %13565 = vmatpush3.bf16.msra.mxu1 %v14799_v9  ;;  %v17477_v18 = vsub.f32 %v16152_v22, %v16065_v57  ;;  %v16308_v55 = vld [vmem:[%s17446_s5 + $0x8] sm:$0xff] }
 0x232   :  { %v16230_v34 = vadd.f32 58.5225, %v1257_v28  ;;  %13957 = vmatprep.subr.bf16.mxu0 %v17474_v8  ;;  %v5101_v1 = vpop.f32.mrb[131].mxu0  ;;  %12944 = vmatmul.mubr.msk.f32.gmra.mrb[236].mxu0 %vm129_vm0, %v15973_v35  ;;  %v16298_v28 = vld [vmem:[#allocation5 + $0x8] sm:$0xff] }
 0x233   :  { %v16235_v60 = vadd.f32 58.5225, %v1256_v58  ;;  %v1259_v3 = vadd.f32 %v1235_v21, %v17477_v18  ;;  %13567 = vmatprep.subr.bf16.mxu1 %v14817_v17  ;;  %v1258_v53 = vadd.f32 %v1234_v61, %v1228_v6  ;;  %v11493_v36 = vpop.f32.mrb[24].mxu1  ;;  %12211 = vmatprep.mubr.msk.f32.mxu1 %vm129_vm0, %v5101_v1 }
 0x234   :  { %14043 = vrcp.f32 %v16230_v34  ;;  %12946 = vmatprep.mubr.msk.f32.mxu0 %vm129_vm0, %v15993_v41  ;;  %v1237_v22 = vsub.f32 %v11493_v36, %v15987_v40  ;;  %v1177_v37 = vpop.f32.mrb[25].mxu1  ;;  %12212 = vmatmul.mubr.msk.f32.gmra.mrb[130].mxu1 %vm129_vm0, %v12192_v7 }
 0x235   :  { %14045 = vrcp.f32 %v16235_v60  ;;  %v16254_v57 = vadd.f32 58.5225, %v1259_v3  ;;  %13959 = vmatpush3.bf16.msra.mxu0 %v15830_v12  ;;  %v16259_v35 = vadd.f32 58.5225, %v1258_v53  ;;  %v1236_v11 = vsub.f32 %v1177_v37, %v16001_v33  ;;  %v12228_v13 = vpop.f32.mrb[132].mxu0  ;;  %13569 = vmatpush3.bf16.msra.mxu1 %v14817_v17  ;;  %v17478_v53 = vld [vmem:[#allocation25_spill] sm:$0xff] }
 0x236   :  { %13960 = vmatprep.subr.bf16.mxu0 %v17474_v8  ;;  %v5289_v41 = vpop.f32.mrb[133].mxu0  ;;  %12947 = vmatmul.mubr.msk.f32.gmra.mrb[238].mxu0 %vm129_vm0, %v16009_v10  ;;  %v1243_v26 = vmul.f32 2.0, %v1237_v22 }
 0x237   :  { %14047 = vrcp.f32 %v16254_v57  ;;  %13583 = vmatprep.subr.bf16.mxu1 %v14781_v2  ;;  %v11496_v12 = vpop.f32.mrb[26].mxu1  ;;  %12247 = vmatprep.mubr.msk.f32.mxu1 %vm129_vm0, %v5289_v41  ;;  %v1242_v56 = vmul.f32 2.0, %v1236_v11 }
 0x238   :  { %14049 = vrcp.f32 %v16259_v35  ;;  %12982 = vmatprep.mubr.msk.f32.mxu0 %vm14396_vm1, %v17471_v27  ;;  %v1239_v33 = vsub.f32 %v11496_v12, %v16031_v32  ;;  %v1187_v6 = vpop.f32.mrb[27].mxu1  ;;  %12248 = vmatmul.mubr.msk.f32.vlgmr.msra.gmra.mrb[132].mxu1 %vm129_vm0, %v12228_v13  ;;  %v1249_v39 = vadd.f32 58.5225, %v1243_v26 }
 0x239   :  { %13962 = vmatpush3.bf16.msra.mxu0 %v15848_v48  ;;  %v1238_v51 = vsub.f32 %v1187_v6, %v16045_v46  ;;  %v12231_v31 = vpop.f32.mrb[134].mxu0  ;;  %13585 = vmatpush3.bf16.msra.mxu1 %v14781_v2  ;;  %v16285_v48 = vld [vmem:[%s17446_s5] sm:$0xff]  ;;  %v1248_v15 = vadd.f32 58.5225, %v1242_v56  ;;  %v16334_v56 = vld [vmem:[%s17446_s5 + $0x10] sm:$0xff]  ;;  %s14398_s5 = smov [#allocation14]  }
 0x23a   :  { %v14040_v40 = vpop.eup %14039  ;;  %13972 = vmatprep.subr.bf16.mxu0 %v17474_v8  ;;  %v5299_v32 = vpop.f32.mrb[135].mxu0  ;;  %13587 = vmatprep.subr.bf16.mxu1 %v14799_v9  ;;  %v1245_v47 = vmul.f32 2.0, %v1239_v33  ;;  %v16322_v33 = vld [vmem:[#allocation5 + $0x18] sm:$0xff]  ;;  %s9897_s21 = sshll.u32 %s14398_s5, 4  ;;  %s9898_s21 = int_to_ptr.vmem [resolvable:$true] %s9897_s21 }
 0x23b   :  { %v14042_v4 = vpop.eup %14041  ;;  %v1273_v10 = vmul.f32 %v14040_v40, %v16201_v49  ;;  %v11499_v16 = vpop.f32.mrb[28].mxu1  ;;  %12250 = vmatprep.mubr.msk.f32.mxu1 %vm129_vm0, %v5299_v32  ;;  %v1244_v63 = vmul.f32 2.0, %v1238_v51  ;;  %s14289_s3 = scalar_lea.vmem %s9898_s21, 2304  ;;  %p14294_p5 = scmp.lt.s32.totalorder %s9898_s21, %s9898_s21 }
 0x23c   :  { %v1272_v52 = vmul.f32 %v14042_v4, %v16207_v5  ;;  %12983 = vmatmul.mubr.msk.f32.vlgmr.msra.gmra.mrb[240].mxu0 %vm129_vm0, %v16285_v48  ;;  %v1241_v14 = vsub.f32 %v11499_v16, %v16072_v38  ;;  %v1197_v43 = vpop.f32.mrb[29].mxu1  ;;  %12251 = vmatmul.mubr.msk.f32.gmra.mrb[134].mxu1 %vm129_vm0, %v12231_v31  ;;  %v1251_v18 = vadd.f32 58.5225, %v1245_v47  ;;  %p14290_p4 = scmp.ne.s32.totalorder %s9898_s21, %s14289_s3  ;;  %p14295_p6 = scmp.lt.s32.totalorder %s14289_s3, %s14289_s3 }
 0x23d   :  { %v1279_v25 = vsub.f32 2.0, %v1273_v10  ;;  %13974 = vmatpush3.bf16.msra.mxu0 %v15866_v50  ;;  %v1240_v45 = vsub.f32 %v1197_v43, %v16086_v20  ;;  %v12234_v23 = vpop.f32.mrb[136].mxu0  ;;  %13589 = vmatpush3.bf16.msra.mxu1 %v14799_v9  ;;  %v1250_v3 = vadd.f32 58.5225, %v1244_v63 }
 0x23e   :  { %v14044_v46 = vpop.eup %14043  ;;  %v1278_v49 = vsub.f32 2.0, %v1272_v52  ;;  %12985 = vmatprep.mubr.msk.f32.mxu0 %vm14396_vm1, %v17471_v27  ;;  %v1247_v50 = vmul.f32 2.0, %v1241_v14  ;;  %v5309_v58 = vpop.f32.mrb[137].mxu0  ;;  %13591 = vmatprep.subr.bf16.mxu1 %v14817_v17  ;;  %v16328_v52 = vld [vmem:[#allocation5 + $0x10] sm:$0xff]  ;;  %p14296_p7 = por %p14295_p6, %p14294_p5 }
 0x23f   :  { %v14046_v5 = vpop.eup %14045  ;;  %v1275_v42 = vmul.f32 %v14044_v46, %v16230_v34  ;;  %v1285_v54 = vmul.f32 %v14040_v40, %v1279_v25  ;;  %13975 = vmatprep.subr.bf16.mxu0 %v17474_v8  ;;  %v16302_v34 = vld [vmem:[#allocation5] sm:$0xff]  ;;  %v1573_v21 = vpop.f32.mrb[30].mxu1  ;;  %12253 = vmatprep.mubr.msk.f32.mxu1 %vm129_vm0, %v5309_v58  ;;  %v1246_v13 = vmul.f32 2.0, %v1240_v45 }
 0x240   :  { %v1274_v38 = vmul.f32 %v14046_v5, %v16235_v60  ;;  %v1284_v29 = vmul.f32 %v14042_v4, %v1278_v49  ;;  %12986 = vmatmul.mubr.msk.f32.gmra.mrb[242].mxu0 %vm129_vm0, %v16308_v55  ;;  %1588 = vst.msk [vmem:[#allocation13] sm:$0xff] %vm1587_vm2, %v1573_v21  ;;  %v11535_v1 = vpop.f32.mrb[31].mxu1  ;;  %12254 = vmatmul.mubr.msk.f32.gmra.mrb[136].mxu1 %vm129_vm0, %v12234_v23  ;;  %v1253_v4 = vadd.f32 58.5225, %v1247_v50  ;;  %v17479_v49 = vld [vmem:[#allocation26_spill] sm:$0xff]  ;;  %p14297_p8 = pnand %p14296_p7, %p14290_p4 }
 0x241   :  { %v1281_v44 = vsub.f32 2.0, %v1275_v42  ;;  %v1291_v20 = vmul.f32 %v1285_v54, %v1249_v39  ;;  %v14048_v60 = vpop.eup %14047  ;;  %13977 = vmatpush3.bf16.msra.mxu0 %v17478_v53  ;;  %v12270_v41 = vpop.f32.mrb[138].mxu0  ;;  %13593 = vmatpush3.bf16.msra.mxu1 %v14817_v17  ;;  %v1252_v39 = vadd.f32 58.5225, %v1246_v13  ;;  %v16351_v23 = vld [vmem:[#allocation5 + $0x28] sm:$0x3f] }
 0x242   :  { %v1280_v61 = vsub.f32 2.0, %v1274_v38  ;;  %v1290_v7 = vmul.f32 %v1284_v29, %v1248_v15  ;;  %v14050_v36 = vpop.eup %14049  ;;  %v1277_v22 = vmul.f32 %v14048_v60, %v16254_v57  ;;  %12988 = vmatprep.mubr.msk.f32.mxu0 %vm14396_vm1, %v17471_v27  ;;  %v5503_v10 = vpop.f32.mrb[139].mxu0  ;;  %13607 = vmatprep.subr.bf16.mxu1 %v14781_v2  ;;  %v16355_v50 = vld [vmem:[#allocation5 + $0x20] sm:$0xff] }
 0x243   :  { %v1351_v37 = vmul.f32 %v1291_v20, %v16298_v28  ;;  %v1287_v11 = vmul.f32 %v14044_v46, %v1281_v44  ;;  %v1276_v12 = vmul.f32 %v14050_v36, %v16259_v35  ;;  %13978 = vmatprep.subr.bf16.mxu0 %v17474_v8  ;;  %v1578_v35 = vpop.f32.mrb[32].mxu1  ;;  %12289 = vmatprep.mubr.msk.f32.mxu1 %vm129_vm0, %v5503_v10 }
 0x244   :  { %v1350_v40 = vmul.f32 %v1290_v7, %v16302_v34  ;;  %v1286_v6 = vmul.f32 %v14046_v5, %v1280_v61  ;;  %v1283_v57 = vsub.f32 2.0, %v1277_v22  ;;  %12989 = vmatmul.mubr.msk.f32.gmra.mrb[244].mxu0 %vm129_vm0, %v16334_v56  ;;  %1589 = vst.msk [vmem:[#allocation13 + $0x8] sm:$0xff] %vm1587_vm2, %v1578_v35  ;;  %v11538_v46 = vpop.f32.mrb[33].mxu1  ;;  %12290 = vmatmul.mubr.msk.f32.vlgmr.msra.gmra.mrb[138].mxu1 %vm129_vm0, %v12270_v41 }
 0x245   :  { %v1358_v26 = vsel %vm1356_vm3, %v1351_v37, 0.0  ;;  %v1379_v51 = vmul.f32 %v1351_v37, %v16172_v0  ;;  %v1293_v31 = vmul.f32 %v1287_v11, %v1251_v18  ;;  %v1282_v32 = vsub.f32 2.0, %v1276_v12  ;;  %13980 = vmatpush3.bf16.msra.mxu0 %v17479_v49  ;;  %v12273_v43 = vpop.f32.mrb[140].mxu0  ;;  %13609 = vmatpush3.bf16.msra.mxu1 %v14781_v2 }
 0x246   :  { %v1357_v25 = vsel %vm1356_vm3, %v1350_v40, 0.0  ;;  %v1378_v16 = vmul.f32 %v1350_v40, %v16175_v19  ;;  %v1292_v0 = vmul.f32 %v1286_v6, %v1250_v3  ;;  %v1289_v14 = vmul.f32 %v14048_v60, %v1283_v57  ;;  %13024 = vmatprep.mubr.msk.f32.mxu0 %vm14396_vm1, %v17471_v27  ;;  %v5513_v45 = vpop.f32.mrb[141].mxu0  ;;  %13611 = vmatprep.subr.bf16.mxu1 %v14799_v9 }
 0x247   :  { %v1385_v47 = vsel %vm1356_vm3, %v1379_v51, 0.0  ;;  %v1353_v63 = vmul.f32 %v1293_v31, %v16322_v33  ;;  %v1359_v5 = vadd.f32 %v1358_v26, %v1357_v25  ;;  %v1288_v54 = vmul.f32 %v14050_v36, %v1282_v32  ;;  %v1583_v29 = vpop.f32.mrb[34].mxu1  ;;  %12292 = vmatprep.mubr.msk.f32.mxu1 %vm129_vm0, %v5513_v45 }
 0x248   :  { %v1384_v19 = vsel %vm1356_vm3, %v1378_v16, 0.0  ;;  %v1352_v42 = vmul.f32 %v1292_v0, %v16328_v52  ;;  %v1295_v15 = vmul.f32 %v1289_v14, %v1253_v4  ;;  %13025 = vmatmul.mubr.msk.f32.vlgmr.msra.gmra.mrb[246].mxu0 %vm129_vm0, %v16285_v48  ;;  %1590 = vst.msk [vmem:[#allocation13 + $0x10] sm:$0xff] %vm1587_vm2, %v1583_v29  ;;  %v11541_v21 = vpop.f32.mrb[35].mxu1  ;;  %12293 = vmatmul.mubr.msk.f32.gmra.mrb[140].mxu1 %vm129_vm0, %v12273_v43 }
 0x249   :  { %v1381_v38 = vmul.f32 %v1353_v63, %v16193_v59  ;;  %v1386_v58 = vadd.f32 %v1385_v47, %v1384_v19  ;;  %v1294_v20 = vmul.f32 %v1288_v54, %v1252_v39  ;;  %13027 = vmatprep.mubr.msk.f32.mxu0 %vm14396_vm1, %v17471_v27  ;;  %v12276_v60 = vpop.f32.mrb[142].mxu0  ;;  %13613 = vmatpush3.bf16.msra.mxu1 %v14799_v9  ;;  %v1362_v18 = vsel %vm1356_vm3, %v1353_v63, 0.0  ;;  %v17480_v19 = vld [vmem:[#allocation22_spill] sm:$0xff] }
 0x24a   :  { %v1380_v44 = vmul.f32 %v1352_v42, %v16199_v62  ;;  %v1360_v59 = vsel %vm1356_vm3, %v1352_v42, 0.0  ;;  %v1355_v61 = vmul.f32 %v1295_v15, %v16351_v23  ;;  %v5523_v48 = vpop.f32.mrb[143].mxu0  ;;  %13615 = vmatprep.subr.bf16.mxu1 %v14817_v17 }
 0x24b   :  { %v1361_v7 = vadd.f32 %v1360_v59, %v1359_v5  ;;  %v1354_v62 = vmul.f32 %v1294_v20, %v16355_v50  ;;  %v1746_v1 = vpop.f32.mrb[36].mxu1  ;;  %12295 = vmatprep.mubr.msk.f32.mxu1 %vm129_vm0, %v5523_v48  ;;  %v1389_v41 = vsel %vm1356_vm3, %v1381_v38, 0.0  ;;  %v17481_v38 = vld [vmem:[#allocation23_spill] sm:$0xff]  ;;  %v17482_v48 = vld [vmem:[#allocation24_spill] sm:$0xff] }
 0x24c   :  { %v1387_v3 = vsel %vm1356_vm3, %v1380_v44, 0.0  ;;  %v1383_v36 = vmul.f32 %v1355_v61, %v16219_v30  ;;  %13028 = vmatmul.mubr.msk.f32.gmra.mrb[248].mxu0 %vm129_vm0, %v16308_v55  ;;  %1760 = vst.msk [vmem:[#allocation14] sm:$0xff] %vm1587_vm2, %v1746_v1  ;;  %v11577_v37 = vpop.f32.mrb[37].mxu1  ;;  %12296 = vmatmul.mubr.msk.f32.gmra.mrb[142].mxu1 %vm129_vm0, %v12276_v60  ;;  %v1367_v6 = vsel %vm1366_vm4, %v1355_v61, 0.0 }
 0x24d   :  { %v1363_v53 = vadd.f32 %v1362_v18, %v1361_v7  ;;  %v1388_v22 = vadd.f32 %v1387_v3, %v1386_v58  ;;  %v1364_v11 = vsel %vm1356_vm3, %v1354_v62, 0.0  ;;  %v1382_v13 = vmul.f32 %v1354_v62, %v16228_v24  ;;  %13030 = vmatprep.mubr.msk.f32.mxu0 %vm14396_vm1, %v17471_v27  ;;  %v12312_v12 = vpop.f32.mrb[144].mxu0  ;;  %13617 = vmatpush3.bf16.msra.mxu1 %v14817_v17 }
 0x24e   :  { %v5717_v55 = vpop.f32.mrb[145].mxu0  ;;  %13631 = vmatprep.subr.bf16.mxu1 %v14781_v2  ;;  %v1393_v51 = vsel %vm1366_vm4, %v1383_v36, 0.0 }
 0x24f   :  { %v1365_v30 = vadd.f32 %v1364_v11, %v1363_v53  ;;  %v1390_v40 = vadd.f32 %v1389_v41, %v1388_v22  ;;  %v1391_v4 = vsel %vm1356_vm3, %v1382_v13, 0.0  ;;  %v1751_v10 = vpop.f32.mrb[38].mxu1  ;;  %12331 = vmatprep.mubr.msk.f32.mxu1 %vm129_vm0, %v5717_v55 }
 0x250   :  { %13031 = vmatmul.mubr.msk.f32.gmra.mrb[250].mxu0 %vm129_vm0, %v16334_v56  ;;  %1761 = vst.msk [vmem:[#allocation14 + $0x8] sm:$0xff] %vm1587_vm2, %v1751_v10  ;;  %v11580_v26 = vpop.f32.mrb[39].mxu1  ;;  %12332 = vmatmul.mubr.msk.f32.vlgmr.msra.gmra.mrb[144].mxu1 %vm129_vm0, %v12312_v12 }
 0x251   :  { %v1368_v24 = vadd.f32 %v1367_v6, %v1365_v30  ;;  %v1392_v57 = vadd.f32 %v1391_v4, %v1390_v40  ;;  %v12315_v31 = vpop.f32.mrb[146].mxu0  ;;  %13633 = vmatpush3.bf16.msra.mxu1 %v14781_v2 }
 0x252   :  { %v5727_v32 = vpop.f32.mrb[147].mxu0  ;;  %13635 = vmatprep.subr.bf16.mxu1 %v14799_v9 }
 0x253   :  { %1369 = vadd.xlane.f32.xlu0 %v1368_v24  ;;  %v1394_v35 = vadd.f32 %v1393_v51, %v1392_v57  ;;  %v1756_v25 = vpop.f32.mrb[40].mxu1  ;;  %12334 = vmatprep.mubr.msk.f32.mxu1 %vm129_vm0, %v5727_v32 }
 0x254   :  { %1762 = vst.msk [vmem:[#allocation14 + $0x10] sm:$0xff] %vm1587_vm2, %v1756_v25  ;;  %v11583_v56 = vpop.f32.mrb[41].mxu1  ;;  %12335 = vmatmul.mubr.msk.f32.gmra.mrb[146].mxu1 %vm129_vm0, %v12315_v31 }
 0x255   :  { %v12318_v16 = vpop.f32.mrb[148].mxu0  ;;  %13637 = vmatpush3.bf16.msra.mxu1 %v14799_v9 }
 0x256   :  { %v5737_v0 = vpop.f32.mrb[149].mxu0  ;;  %13639 = vmatprep.subr.bf16.mxu1 %v14817_v17 }
 0x257   :  { %1395 = vadd.xlane.f32.xlu0 %v1394_v35  ;;  %v11619_v46 = vpop.f32.mrb[42].mxu1  ;;  %12337 = vmatprep.mubr.msk.f32.mxu1 %vm129_vm0, %v5737_v0 }
 0x258   :  { %v1956_v49 = vpop.f32.mrb[43].mxu1  ;;  %12338 = vmatmul.mubr.msk.f32.gmra.mrb[148].mxu1 %vm129_vm0, %v12318_v16  ;;  %v16412_v58 = vmul.f32 %v11619_v46, %v11619_v46 }
 0x259   :  { %v12354_v47 = vpop.f32.mrb[150].mxu0  ;;  %13641 = vmatpush3.bf16.msra.mxu1 %v14817_v17  ;;  %v16419_v59 = vmul.f32 %v1956_v49, %v1956_v49 }
 0x25a   :  { %v5931_v63 = vpop.f32.mrb[151].mxu0  ;;  %13651 = vmatprep.subr.bf16.mxu1 %v17474_v8 }
 0x25b   :  { %v11622_v14 = vpop.f32.mrb[44].mxu1  ;;  %12373 = vmatprep.mubr.msk.f32.mxu1 %vm129_vm0, %v5931_v63 }
 0x25c   :  { %v1966_v43 = vpop.f32.mrb[45].mxu1  ;;  %12374 = vmatmul.mubr.msk.f32.vlgmr.msra.gmra.mrb[150].mxu1 %vm129_vm0, %v12354_v47  ;;  %v16433_v53 = vmul.f32 %v11622_v14, %v11622_v14 }
 0x25d   :  { %v12357_v5 = vpop.f32.mrb[152].mxu0  ;;  %13653 = vmatpush3.bf16.msra.mxu1 %v17480_v19  ;;  %v16440_v13 = vmul.f32 %v1966_v43, %v1966_v43 }
 0x25e   :  { %v5941_v42 = vpop.f32.mrb[153].mxu0  ;;  %13654 = vmatprep.subr.bf16.mxu1 %v17474_v8 }
 0x25f   :  { %v11625_v39 = vpop.f32.mrb[46].mxu1  ;;  %12376 = vmatprep.mubr.msk.f32.mxu1 %vm129_vm0, %v5941_v42 }
 0x260   :  { %v1976_v54 = vpop.f32.mrb[47].mxu1  ;;  %12377 = vmatmul.mubr.msk.f32.gmra.mrb[152].mxu1 %vm129_vm0, %v12357_v5  ;;  %v16454_v24 = vmul.f32 %v11625_v39, %v11625_v39 }
 0x261   :  { %v12360_v45 = vpop.f32.mrb[154].mxu0  ;;  %13656 = vmatpush3.bf16.msra.mxu1 %v17481_v38  ;;  %v16461_v35 = vmul.f32 %v1976_v54, %v1976_v54 }
 0x262   :  { %v5951_v15 = vpop.f32.mrb[155].mxu0  ;;  %13657 = vmatprep.subr.bf16.mxu1 %v17474_v8 }
 0x263   :  { %v11661_v29 = vpop.f32.mrb[48].mxu1  ;;  %12379 = vmatprep.mubr.msk.f32.mxu1 %vm129_vm0, %v5951_v15 }
 0x264   :  { %v16414_v44 = vmul.f32 %v11661_v29, %v11661_v29  ;;  %v16416_v20 = vmul.f32 %v11661_v29, %v11619_v46  ;;  %v2164_v21 = vpop.f32.mrb[49].mxu1  ;;  %12380 = vmatmul.mubr.msk.f32.gmra.mrb[154].mxu1 %vm129_vm0, %v12360_v45 }
 0x265   :  { %v16421_v60 = vmul.f32 %v2164_v21, %v2164_v21  ;;  %v16423_v61 = vmul.f32 %v2164_v21, %v1956_v49  ;;  %v6340_v7 = vpop.f32.mrb[156].mxu0  ;;  %13659 = vmatpush3.bf16.msra.mxu1 %v17482_v48  ;;  %12415 = vmatprep.mubr.msk.f32.mxu1 %vm14396_vm1, %v17471_v27 }
 0x266   :  { %v2938_v62 = vadd.f32 %v16414_v44, %v16412_v58  ;;  %v12396_v18 = vpop.f32.mrb[157].mxu0  ;;  %13669 = vmatprep.subr.bf16.mxu1 %v17474_v8 }
 0x267   :  { %v2937_v3 = vadd.f32 %v16421_v60, %v16419_v59  ;;  %v11664_v1 = vpop.f32.mrb[50].mxu1 }
 0x268   :  { %v2944_v36 = vadd.f32 6.5025, %v2938_v62  ;;  %v16435_v22 = vmul.f32 %v11664_v1, %v11664_v1  ;;  %v16437_v37 = vmul.f32 %v11664_v1, %v11622_v14  ;;  %v2174_v11 = vpop.f32.mrb[51].mxu1  ;;  %12416 = vmatmul.mubr.msk.f32.vlgmr.msra.gmra.mrb[156].mxu1 %vm129_vm0, %v6340_v7  ;;  %v2926_v62 = vmul.f32 2.0, %v16416_v20 }
 0x269   :  { %v2943_v41 = vadd.f32 6.5025, %v2937_v3  ;;  %v16442_v12 = vmul.f32 %v2174_v11, %v2174_v11  ;;  %v16444_v30 = vmul.f32 %v2174_v11, %v1966_v43  ;;  %v6345_v40 = vpop.f32.mrb[158].mxu0  ;;  %13671 = vmatpush3.bf16.msra.mxu1 %v17480_v19  ;;  %12418 = vmatprep.mubr.msk.f32.mxu1 %vm14396_vm1, %v17471_v27  ;;  %v2925_v11 = vmul.f32 2.0, %v16423_v61 }
 0x26a   :  { %14051 = vrcp.f32 %v2944_v36  ;;  %v2940_v55 = vadd.f32 %v16435_v22, %v16433_v53  ;;  %v12399_v6 = vpop.f32.mrb[159].mxu0  ;;  %13672 = vmatprep.subr.bf16.mxu1 %v17474_v8 }
 0x26b   :  { %14053 = vrcp.f32 %v2943_v41  ;;  %v2939_v4 = vadd.f32 %v16442_v12, %v16440_v13  ;;  %v11667_v10 = vpop.f32.mrb[52].mxu1 }
 0x26c   :  { %v2946_v57 = vadd.f32 6.5025, %v2940_v55  ;;  %v16456_v26 = vmul.f32 %v11667_v10, %v11667_v10  ;;  %v16458_v51 = vmul.f32 %v11667_v10, %v11625_v39  ;;  %v2184_v31 = vpop.f32.mrb[53].mxu1  ;;  %12419 = vmatmul.mubr.msk.f32.gmra.mrb[158].mxu1 %vm129_vm0, %v6345_v40 }
 0x26d   :  { %v2945_v32 = vadd.f32 6.5025, %v2939_v4  ;;  %v16463_v25 = vmul.f32 %v2184_v31, %v2184_v31  ;;  %v16465_v56 = vmul.f32 %v2184_v31, %v1976_v54  ;;  %v6350_v16 = vpop.f32.mrb[160].mxu0  ;;  %13674 = vmatpush3.bf16.msra.mxu1 %v17481_v38  ;;  %12421 = vmatprep.mubr.msk.f32.mxu1 %vm14396_vm1, %v17471_v27  ;;  %v2928_v4 = vmul.f32 2.0, %v16437_v37 }
 0x26e   :  { %14055 = vrcp.f32 %v2946_v57  ;;  %v2942_v0 = vadd.f32 %v16456_v26, %v16454_v24  ;;  %v12402_v46 = vpop.f32.mrb[161].mxu0  ;;  %13675 = vmatprep.subr.bf16.mxu1 %v17474_v8 }
 0x26f   :  { %14057 = vrcp.f32 %v2945_v32  ;;  %v2941_v49 = vadd.f32 %v16463_v25, %v16461_v35  ;;  %v16475_v47 = vpop.f32.mrb[54].mxu1 }
 0x270   :  { %v16477_v63 = vadd.f32 6.5025, %v2942_v0  ;;  %v16481_v43 = vpop.f32.mrb[55].mxu1  ;;  %12422 = vmatmul.mubr.msk.f32.gmra.mrb[160].mxu1 %vm129_vm0, %v6350_v16  ;;  %v2927_v16 = vmul.f32 2.0, %v16444_v30 }
 0x271   :  { %v16484_v5 = vadd.f32 6.5025, %v2941_v49  ;;  %v6513_v39 = vpop.f32.mrb[162].mxu0  ;;  %13677 = vmatpush3.bf16.msra.mxu1 %v17482_v48  ;;  %12457 = vmatprep.mubr.msk.f32.mxu1 %vm14396_vm1, %v17471_v27  ;;  %v2932_v49 = vadd.f32 6.5025, %v2926_v62 }
 0x272   :  { %14059 = vrcp.f32 %v16477_v63  ;;  %v12438_v54 = vpop.f32.mrb[163].mxu0  ;;  %13691 = vmatprep.subr.bf16.mxu1 %v14781_v2  ;;  %v2934_v62 = vadd.f32 6.5025, %v2928_v4 }
 0x273   :  { %14061 = vrcp.f32 %v16484_v5  ;;  %v16494_v45 = vpop.f32.mrb[56].mxu1 }
 0x274   :  { %v14052_v15 = vpop.eup %14051  ;;  %v16498_v21 = vpop.f32.mrb[57].mxu1  ;;  %12458 = vmatmul.mubr.msk.f32.vlgmr.msra.gmra.mrb[162].mxu1 %vm129_vm0, %v6513_v39 }
 0x275   :  { %v14054_v7 = vpop.eup %14053  ;;  %v2956_v18 = vmul.f32 %v14052_v15, %v2944_v36  ;;  %v6518_v1 = vpop.f32.mrb[164].mxu0  ;;  %13693 = vmatpush3.bf16.msra.mxu1 %v14781_v2  ;;  %12460 = vmatprep.mubr.msk.f32.mxu1 %vm14396_vm1, %v17471_v27 }
 0x276   :  { %v2955_v40 = vmul.f32 %v14054_v7, %v2943_v41  ;;  %v12441_v55 = vpop.f32.mrb[165].mxu0  ;;  %13695 = vmatprep.subr.bf16.mxu1 %v14799_v9 }
 0x277   :  { %v2962_v6 = vsub.f32 2.0, %v2956_v18  ;;  %v16510_v10 = vpop.f32.mrb[58].mxu1  ;;  %v2933_v18 = vadd.f32 6.5025, %v2927_v16  ;;  %v2929_v16 = vmul.f32 2.0, %v16465_v56 }
 0x278   :  { %v14056_v36 = vpop.eup %14055  ;;  %v2961_v31 = vsub.f32 2.0, %v2955_v40  ;;  %v16515_v46 = vpop.f32.mrb[59].mxu1  ;;  %12461 = vmatmul.mubr.msk.f32.gmra.mrb[164].mxu1 %vm129_vm0, %v6518_v1  ;;  %v2931_v40 = vadd.f32 6.5025, %v2925_v11 }
 0x279   :  { %v14058_v41 = vpop.eup %14057  ;;  %v2968_v39 = vmul.f32 %v14052_v15, %v2962_v6  ;;  %v2958_v54 = vmul.f32 %v14056_v36, %v2946_v57  ;;  %v6523_v55 = vpop.f32.mrb[166].mxu0  ;;  %13697 = vmatpush3.bf16.msra.mxu1 %v14799_v9  ;;  %12463 = vmatprep.mubr.msk.f32.mxu1 %vm14396_vm1, %v17471_v27 }
 0x27a   :  { %v2967_v3 = vmul.f32 %v14054_v7, %v2961_v31  ;;  %v2957_v0 = vmul.f32 %v14058_v41, %v2945_v32  ;;  %v12444_v29 = vpop.f32.mrb[167].mxu0  ;;  %13699 = vmatprep.subr.bf16.mxu1 %v14817_v17 }
 0x27b   :  { %v16524_v1 = vmul.f32 %v2968_v39, %v2932_v49  ;;  %v2964_v15 = vsub.f32 2.0, %v2958_v54  ;;  %v11745_v57 = vpop.f32.mrb[60].mxu1  ;;  %v2930_v29 = vmul.f32 2.0, %v16458_v51 }
 0x27c   :  { %v14060_v6 = vpop.eup %14059  ;;  %v16526_v42 = vmul.f32 %v2967_v3, %v2931_v40  ;;  %v2963_v14 = vsub.f32 2.0, %v2957_v0  ;;  %v2860_v48 = vsub.f32 %v11745_v57, %v16414_v44  ;;  %v2592_v38 = vpop.f32.mrb[61].mxu1  ;;  %12464 = vmatmul.mubr.msk.f32.gmra.mrb[166].mxu1 %vm129_vm0, %v6523_v55  ;;  %v17483_v44 = vsub.f32 %v16475_v47, %v16412_v58 }
 0x27d   :  { %v14062_v7 = vpop.eup %14061  ;;  %v2970_v32 = vmul.f32 %v14056_v36, %v2964_v15  ;;  %v2960_v11 = vmul.f32 %v14060_v6, %v16477_v63  ;;  %v2859_v4 = vsub.f32 %v2592_v38, %v16421_v60  ;;  %v12480_v31 = vpop.f32.mrb[168].mxu0  ;;  %13701 = vmatpush3.bf16.msra.mxu1 %v14817_v17  ;;  %v17484_v38 = vsub.f32 %v16481_v43, %v16419_v59 }
 0x27e   :  { %v2969_v3 = vmul.f32 %v14058_v41, %v2963_v14  ;;  %v2959_v0 = vmul.f32 %v14062_v7, %v16484_v5  ;;  %v2884_v49 = vadd.f32 %v2860_v48, %v17483_v44  ;;  %v6700_v39 = vpop.f32.mrb[169].mxu0  ;;  %13715 = vmatprep.subr.bf16.mxu1 %v14781_v2  ;;  %v2936_v47 = vadd.f32 6.5025, %v2930_v29 }
 0x27f   :  { %v16540_v36 = vmul.f32 %v2970_v32, %v2934_v62  ;;  %v2966_v63 = vsub.f32 2.0, %v2960_v11  ;;  %v2883_v60 = vadd.f32 %v2859_v4, %v17484_v38  ;;  %v11748_v54 = vpop.f32.mrb[62].mxu1  ;;  %12499 = vmatprep.mubr.msk.f32.mxu1 %vm129_vm0, %v6700_v39  ;;  %v2935_v59 = vadd.f32 6.5025, %v2929_v16 }
 0x280   :  { %v16546_v14 = vmul.f32 %v2969_v3, %v2933_v18  ;;  %v2965_v5 = vsub.f32 2.0, %v2959_v0  ;;  %v2890_v41 = vadd.f32 58.5225, %v2884_v49  ;;  %v2862_v58 = vsub.f32 %v11748_v54, %v16435_v22  ;;  %v2602_v48 = vpop.f32.mrb[63].mxu1  ;;  %12500 = vmatmul.mubr.msk.f32.vlgmr.msra.gmra.mrb[168].mxu1 %vm129_vm0, %v12480_v31 }
 0x281   :  { %v2972_v55 = vmul.f32 %v14060_v6, %v2966_v63  ;;  %v2889_v40 = vadd.f32 58.5225, %v2883_v60  ;;  %v2861_v62 = vsub.f32 %v2602_v48, %v16442_v12  ;;  %v12483_v15 = vpop.f32.mrb[170].mxu0  ;;  %13717 = vmatpush3.bf16.msra.mxu1 %v14781_v2  ;;  %v17485_v18 = vsub.f32 %v16494_v45, %v16433_v53 }
 0x282   :  { %v2971_v43 = vmul.f32 %v14062_v7, %v2965_v5  ;;  %14063 = vrcp.f32 %v2890_v41  ;;  %v6710_v32 = vpop.f32.mrb[171].mxu0  ;;  %13719 = vmatprep.subr.bf16.mxu1 %v14799_v9  ;;  %v17486_v6 = vsub.f32 %v16498_v21, %v16440_v13  ;;  %v17487_v13 = vsub.f32 %v16510_v10, %v16454_v24 }
 0x283   :  { %v2886_v57 = vadd.f32 %v2862_v58, %v17485_v18  ;;  %v16556_v22 = vmul.f32 %v2972_v55, %v2936_v47  ;;  %14065 = vrcp.f32 %v2889_v40  ;;  %v11751_v29 = vpop.f32.mrb[64].mxu1  ;;  %12502 = vmatprep.mubr.msk.f32.mxu1 %vm129_vm0, %v6710_v32 }
 0x284   :  { %v2885_v12 = vadd.f32 %v2861_v62, %v17486_v6  ;;  %v16562_v11 = vmul.f32 %v2971_v43, %v2935_v59  ;;  %v2864_v4 = vsub.f32 %v11751_v29, %v16456_v26  ;;  %v2612_v53 = vpop.f32.mrb[65].mxu1  ;;  %12503 = vmatmul.mubr.msk.f32.gmra.mrb[170].mxu1 %vm129_vm0, %v12483_v15  ;;  %v17488_v26 = vsub.f32 %v16515_v46, %v16461_v35 }
 0x285   :  { %v2892_v7 = vadd.f32 58.5225, %v2886_v57  ;;  %v2863_v31 = vsub.f32 %v2612_v53, %v16463_v25  ;;  %v12486_v3 = vpop.f32.mrb[172].mxu0  ;;  %13721 = vmatpush3.bf16.msra.mxu1 %v14799_v9 }
 0x286   :  { %v2891_v45 = vadd.f32 58.5225, %v2885_v12  ;;  %v2888_v21 = vadd.f32 %v2864_v4, %v17487_v13  ;;  %v6720_v16 = vpop.f32.mrb[173].mxu0  ;;  %13723 = vmatprep.subr.bf16.mxu1 %v14817_v17 }
 0x287   :  { %14067 = vrcp.f32 %v2892_v7  ;;  %v2887_v0 = vadd.f32 %v2863_v31, %v17488_v26  ;;  %v11787_v44 = vpop.f32.mrb[66].mxu1  ;;  %12505 = vmatprep.mubr.msk.f32.mxu1 %vm129_vm0, %v6720_v16 }
 0x288   :  { %14069 = vrcp.f32 %v2891_v45  ;;  %v16576_v25 = vadd.f32 58.5225, %v2888_v21  ;;  %v2866_v49 = vsub.f32 %v11787_v44, %v16416_v20  ;;  %v2806_v39 = vpop.f32.mrb[67].mxu1  ;;  %12506 = vmatmul.mubr.msk.f32.gmra.mrb[172].mxu1 %vm129_vm0, %v12486_v3 }
 0x289   :  { %v16580_v24 = vadd.f32 58.5225, %v2887_v0  ;;  %v2865_v10 = vsub.f32 %v2806_v39, %v16423_v61  ;;  %v12522_v63 = vpop.f32.mrb[174].mxu0  ;;  %13725 = vmatpush3.bf16.msra.mxu1 %v14817_v17 }
 0x28a   :  { %14071 = vrcp.f32 %v16576_v25  ;;  %v6908_v35 = vpop.f32.mrb[175].mxu0  ;;  %13739 = vmatprep.subr.bf16.mxu1 %v14781_v2  ;;  %v2872_v5 = vmul.f32 2.0, %v2866_v49 }
 0x28b   :  { %14073 = vrcp.f32 %v16580_v24  ;;  %v11790_v46 = vpop.f32.mrb[68].mxu1  ;;  %12541 = vmatprep.mubr.msk.f32.mxu1 %vm129_vm0, %v6908_v35  ;;  %v2871_v55 = vmul.f32 2.0, %v2865_v10 }
 0x28c   :  { %v14064_v20 = vpop.eup %14063  ;;  %v2868_v38 = vsub.f32 %v11790_v46, %v16437_v37  ;;  %v2816_v60 = vpop.f32.mrb[69].mxu1  ;;  %12542 = vmatmul.mubr.msk.f32.vlgmr.msra.gmra.mrb[174].mxu1 %vm129_vm0, %v12522_v63 }
 0x28d   :  { %v14066_v61 = vpop.eup %14065  ;;  %v2902_v54 = vmul.f32 %v14064_v20, %v2890_v41  ;;  %v2867_v58 = vsub.f32 %v2816_v60, %v16444_v30  ;;  %v12525_v48 = vpop.f32.mrb[176].mxu0  ;;  %13741 = vmatpush3.bf16.msra.mxu1 %v14781_v2  ;;  %v2877_v31 = vadd.f32 58.5225, %v2871_v55 }
 0x28e   :  { %v2901_v47 = vmul.f32 %v14066_v61, %v2889_v40  ;;  %v6918_v62 = vpop.f32.mrb[177].mxu0  ;;  %13743 = vmatprep.subr.bf16.mxu1 %v14799_v9  ;;  %v2874_v18 = vmul.f32 2.0, %v2868_v38  ;;  %v2878_v40 = vadd.f32 58.5225, %v2872_v5 }
 0x28f   :  { %v2908_v15 = vsub.f32 2.0, %v2902_v54  ;;  %v11793_v59 = vpop.f32.mrb[70].mxu1  ;;  %12544 = vmatprep.mubr.msk.f32.mxu1 %vm129_vm0, %v6918_v62  ;;  %v2873_v57 = vmul.f32 2.0, %v2867_v58 }
 0x290   :  { %v2907_v43 = vsub.f32 2.0, %v2901_v47  ;;  %v2870_v41 = vsub.f32 %v11793_v59, %v16458_v51  ;;  %v2826_v32 = vpop.f32.mrb[71].mxu1  ;;  %12545 = vmatmul.mubr.msk.f32.gmra.mrb[176].mxu1 %vm129_vm0, %v12525_v48  ;;  %v2880_v49 = vadd.f32 58.5225, %v2874_v18 }
 0x291   :  { %v14068_v37 = vpop.eup %14067  ;;  %v2914_v12 = vmul.f32 %v14064_v20, %v2908_v15  ;;  %v2869_v29 = vsub.f32 %v2826_v32, %v16465_v56  ;;  %v12528_v4 = vpop.f32.mrb[178].mxu0  ;;  %13745 = vmatpush3.bf16.msra.mxu1 %v14799_v9  ;;  %v2879_v56 = vadd.f32 58.5225, %v2873_v57 }
 0x292   :  { %v14070_v30 = vpop.eup %14069  ;;  %v2904_v6 = vmul.f32 %v14068_v37, %v2892_v7  ;;  %v2913_v3 = vmul.f32 %v14066_v61, %v2907_v43  ;;  %v2876_v13 = vmul.f32 2.0, %v2870_v41  ;;  %v6928_v21 = vpop.f32.mrb[179].mxu0  ;;  %13747 = vmatprep.subr.bf16.mxu1 %v14817_v17 }
 0x293   :  { %v2903_v53 = vmul.f32 %v14070_v30, %v2891_v45  ;;  %v2920_v16 = vmul.f32 %v2914_v12, %v2878_v40  ;;  %v3191_v26 = vpop.f32.mrb[72].mxu1  ;;  %12547 = vmatprep.mubr.msk.f32.mxu1 %vm129_vm0, %v6928_v21  ;;  %v2875_v46 = vmul.f32 2.0, %v2869_v29 }
 0x294   :  { %v2910_v51 = vsub.f32 2.0, %v2904_v6  ;;  %v14072_v7 = vpop.eup %14071  ;;  %v2919_v44 = vmul.f32 %v2913_v3, %v2877_v31  ;;  %3206 = vst.msk [vmem:[#allocation13 + $0x18] sm:$0xff] %vm1587_vm2, %v3191_v26  ;;  %v11829_v39 = vpop.f32.mrb[73].mxu1  ;;  %12548 = vmatmul.mubr.msk.f32.gmra.mrb[178].mxu1 %vm129_vm0, %v12528_v4  ;;  %v2882_v54 = vadd.f32 58.5225, %v2876_v13 }
 0x295   :  { %v2909_v0 = vsub.f32 2.0, %v2903_v53  ;;  %v14074_v45 = vpop.eup %14073  ;;  %v2906_v10 = vmul.f32 %v14072_v7, %v16576_v25  ;;  %v2980_v63 = vmul.f32 %v2920_v16, %v16298_v28  ;;  %v12564_v20 = vpop.f32.mrb[180].mxu0  ;;  %13749 = vmatpush3.bf16.msra.mxu1 %v14817_v17 }
 0x296   :  { %v2916_v35 = vmul.f32 %v14068_v37, %v2910_v51  ;;  %v2905_v38 = vmul.f32 %v14074_v45, %v16580_v24  ;;  %v2979_v60 = vmul.f32 %v2919_v44, %v16302_v34  ;;  %v7122_v5 = vpop.f32.mrb[181].mxu0  ;;  %13763 = vmatprep.subr.bf16.mxu1 %v14781_v2 }
 0x297   :  { %v2915_v61 = vmul.f32 %v14070_v30, %v2909_v0  ;;  %v2912_v58 = vsub.f32 2.0, %v2906_v10  ;;  %v2986_v48 = vsel %vm1356_vm3, %v2980_v63, 0.0  ;;  %v3006_v25 = vmul.f32 %v2980_v63, %v16524_v1  ;;  %v3196_v47 = vpop.f32.mrb[74].mxu1  ;;  %12583 = vmatprep.mubr.msk.f32.mxu1 %vm129_vm0, %v7122_v5 }
 0x298   :  { %v2922_v28 = vmul.f32 %v2916_v35, %v2880_v49  ;;  %v2911_v55 = vsub.f32 2.0, %v2905_v38  ;;  %v2985_v62 = vsel %vm1356_vm3, %v2979_v60, 0.0  ;;  %v3005_v24 = vmul.f32 %v2979_v60, %v16526_v42  ;;  %3207 = vst.msk [vmem:[#allocation13 + $0x20] sm:$0xff] %vm1587_vm2, %v3196_v47  ;;  %v11832_v15 = vpop.f32.mrb[75].mxu1  ;;  %12584 = vmatmul.mubr.msk.f32.vlgmr.msra.gmra.mrb[180].mxu1 %vm129_vm0, %v12564_v20 }
 0x299   :  { %v2921_v34 = vmul.f32 %v2915_v61, %v2879_v56  ;;  %v3012_v59 = vsel %vm1356_vm3, %v3006_v25, 0.0  ;;  %v2918_v1 = vmul.f32 %v14072_v7, %v2912_v58  ;;  %v12567_v43 = vpop.f32.mrb[182].mxu0  ;;  %13765 = vmatpush3.bf16.msra.mxu1 %v14781_v2  ;;  %v2987_v18 = vadd.f32 %v2986_v48, %v2985_v62 }
 0x29a   :  { %v2982_v37 = vmul.f32 %v2922_v28, %v16322_v33  ;;  %v3011_v57 = vsel %vm1356_vm3, %v3005_v24, 0.0  ;;  %v2881_v42 = vadd.f32 58.5225, %v2875_v46  ;;  %v2917_v32 = vmul.f32 %v14074_v45, %v2911_v55  ;;  %v7132_v30 = vpop.f32.mrb[183].mxu0  ;;  %13767 = vmatprep.subr.bf16.mxu1 %v14799_v9 }
 0x29b   :  { %v2981_v41 = vmul.f32 %v2921_v34, %v16328_v52  ;;  %v2924_v40 = vmul.f32 %v2918_v1, %v2882_v54  ;;  %v3201_v12 = vpop.f32.mrb[76].mxu1  ;;  %12586 = vmatprep.mubr.msk.f32.mxu1 %vm129_vm0, %v7132_v30  ;;  %v3013_v33 = vadd.f32 %v3012_v59, %v3011_v57 }
 0x29c   :  { %v3008_v6 = vmul.f32 %v2982_v37, %v16540_v36  ;;  %v2923_v4 = vmul.f32 %v2917_v32, %v2881_v42  ;;  %3208 = vst.msk [vmem:[#allocation13 + $0x28] sm:$0xff] %vm1587_vm2, %v3201_v12  ;;  %v11835_v53 = vpop.f32.mrb[77].mxu1  ;;  %12587 = vmatmul.mubr.msk.f32.gmra.mrb[182].mxu1 %vm129_vm0, %v12567_v43 }
 0x29d   :  { %v3007_v29 = vmul.f32 %v2981_v41, %v16546_v14  ;;  %v2988_v52 = vsel %vm1356_vm3, %v2981_v41, 0.0  ;;  %v12570_v31 = vpop.f32.mrb[184].mxu0  ;;  %13769 = vmatpush3.bf16.msra.mxu1 %v14799_v9  ;;  %v2984_v36 = vmul.f32 %v2924_v40, %v16351_v23  ;;  %v2990_v14 = vsel %vm1356_vm3, %v2982_v37, 0.0 }
 0x29e   :  { %v2989_v3 = vadd.f32 %v2988_v52, %v2987_v18  ;;  %v7142_v13 = vpop.f32.mrb[185].mxu0  ;;  %13771 = vmatprep.subr.bf16.mxu1 %v14817_v17  ;;  %v2983_v21 = vmul.f32 %v2923_v4, %v16355_v50  ;;  %v3016_v49 = vsel %vm1356_vm3, %v3008_v6, 0.0  ;;  %v17489_v18 = vld [vmem:[#allocation23_spill] sm:$0xff]  ;;  %v17490_v4 = vld [vmem:[#allocation24_spill] sm:$0xff] }
 0x29f   :  { %v3014_v51 = vsel %vm1356_vm3, %v3007_v29, 0.0  ;;  %v3364_v16 = vpop.f32.mrb[78].mxu1  ;;  %12589 = vmatprep.mubr.msk.f32.mxu1 %vm129_vm0, %v7142_v13  ;;  %v3010_v7 = vmul.f32 %v2984_v36, %v16556_v22  ;;  %v2994_v22 = vsel %vm1366_vm4, %v2984_v36, 0.0 }
 0x2a0   :  { %v2991_v26 = vadd.f32 %v2990_v14, %v2989_v3  ;;  %v3015_v0 = vadd.f32 %v3014_v51, %v3013_v33  ;;  %3379 = vst.msk [vmem:[#allocation14 + $0x18] sm:$0xff] %vm1587_vm2, %v3364_v16  ;;  %v11871_v23 = vpop.f32.mrb[79].mxu1  ;;  %12590 = vmatmul.mubr.msk.f32.gmra.mrb[184].mxu1 %vm129_vm0, %v12570_v31  ;;  %v2992_v44 = vsel %vm1356_vm3, %v2983_v21, 0.0  ;;  %v3009_v50 = vmul.f32 %v2983_v21, %v16562_v11 }
 0x2a1   :  { %v12606_v56 = vpop.f32.mrb[186].mxu0  ;;  %13773 = vmatpush3.bf16.msra.mxu1 %v14817_v17  ;;  %v3020_v38 = vsel %vm1366_vm4, %v3010_v7, 0.0 }
 0x2a2   :  { %v2993_v39 = vadd.f32 %v2992_v44, %v2991_v26  ;;  %v3017_v45 = vadd.f32 %v3016_v49, %v3015_v0  ;;  %v7336_v10 = vpop.f32.mrb[187].mxu0  ;;  %13787 = vmatprep.subr.bf16.mxu1 %v14781_v2  ;;  %v3018_v63 = vsel %vm1356_vm3, %v3009_v50, 0.0 }
 0x2a3   :  { %v3369_v35 = vpop.f32.mrb[80].mxu1  ;;  %12625 = vmatprep.mubr.msk.f32.mxu1 %vm129_vm0, %v7336_v10 }
 0x2a4   :  { %v2995_v46 = vadd.f32 %v2994_v22, %v2993_v39  ;;  %v3019_v20 = vadd.f32 %v3018_v63, %v3017_v45  ;;  %3380 = vst.msk [vmem:[#allocation14 + $0x20] sm:$0xff] %vm1587_vm2, %v3369_v35  ;;  %v11874_v11 = vpop.f32.mrb[81].mxu1  ;;  %12626 = vmatmul.mubr.msk.f32.vlgmr.msra.gmra.mrb[186].mxu1 %vm129_vm0, %v12606_v56 }
 0x2a5   :  { %v12609_v60 = vpop.f32.mrb[188].mxu0  ;;  %13789 = vmatpush3.bf16.msra.mxu1 %v14781_v2 }
 0x2a6   :  { %2996 = vadd.xlane.f32.xlu1 %v2995_v46  ;;  %v3021_v61 = vadd.f32 %v3020_v38, %v3019_v20  ;;  %v7346_v54 = vpop.f32.mrb[189].mxu0  ;;  %13791 = vmatprep.subr.bf16.mxu1 %v14799_v9 }
 0x2a7   :  { %v3374_v5 = vpop.f32.mrb[82].mxu1  ;;  %12628 = vmatprep.mubr.msk.f32.mxu1 %vm129_vm0, %v7346_v54 }
 0x2a8   :  { %3381 = vst.msk [vmem:[#allocation14 + $0x28] sm:$0xff] %vm1587_vm2, %v3374_v5  ;;  %v11877_v58 = vpop.f32.mrb[83].mxu1  ;;  %12629 = vmatmul.mubr.msk.f32.gmra.mrb[188].mxu1 %vm129_vm0, %v12609_v60 }
 0x2a9   :  { %v12612_v48 = vpop.f32.mrb[190].mxu0  ;;  %13793 = vmatpush3.bf16.msra.mxu1 %v14799_v9 }
 0x2aa   :  { %3022 = vadd.xlane.f32.xlu1 %v3021_v61  ;;  %v7356_v25 = vpop.f32.mrb[191].mxu0  ;;  %13795 = vmatprep.subr.bf16.mxu1 %v14817_v17 }
 0x2ab   :  { %v11913_v28 = vpop.f32.mrb[84].mxu1  ;;  %12631 = vmatprep.mubr.msk.f32.mxu1 %vm129_vm0, %v7356_v25 }
 0x2ac   :  { %v3575_v47 = vpop.f32.mrb[85].mxu1  ;;  %12632 = vmatmul.mubr.msk.f32.gmra.mrb[190].mxu1 %vm129_vm0, %v12612_v48  ;;  %v16668_v42 = vmul.f32 %v11913_v28, %v11913_v28 }
 0x2ad   :  { %v12648_v55 = vpop.f32.mrb[192].mxu0  ;;  %13797 = vmatpush3.bf16.msra.mxu1 %v14817_v17  ;;  %v16675_v40 = vmul.f32 %v3575_v47, %v3575_v47 }
 0x2ae   :  { %v7550_v62 = vpop.f32.mrb[193].mxu0  ;;  %13807 = vmatprep.subr.bf16.mxu1 %v17474_v8 }
 0x2af   :  { %v11916_v24 = vpop.f32.mrb[86].mxu1  ;;  %12667 = vmatprep.mubr.msk.f32.mxu1 %vm129_vm0, %v7550_v62 }
 0x2b0   :  { %v3585_v34 = vpop.f32.mrb[87].mxu1  ;;  %12668 = vmatmul.mubr.msk.f32.vlgmr.msra.gmra.mrb[192].mxu1 %vm129_vm0, %v12648_v55  ;;  %v16689_v3 = vmul.f32 %v11916_v24, %v11916_v24 }
 0x2b1   :  { %v12651_v15 = vpop.f32.mrb[194].mxu0  ;;  %13809 = vmatpush3.bf16.msra.mxu1 %v17480_v19  ;;  %v16696_v16 = vmul.f32 %v3585_v34, %v3585_v34 }
 0x2b2   :  { %v7560_v59 = vpop.f32.mrb[195].mxu0  ;;  %13810 = vmatprep.subr.bf16.mxu1 %v17474_v8 }
 0x2b3   :  { %v11919_v37 = vpop.f32.mrb[88].mxu1  ;;  %12670 = vmatprep.mubr.msk.f32.mxu1 %vm129_vm0, %v7560_v59 }
 0x2b4   :  { %v3595_v1 = vpop.f32.mrb[89].mxu1  ;;  %12671 = vmatmul.mubr.msk.f32.gmra.mrb[194].mxu1 %vm129_vm0, %v12651_v15  ;;  %v16710_v39 = vmul.f32 %v11919_v37, %v11919_v37 }
 0x2b5   :  { %v12654_v43 = vpop.f32.mrb[196].mxu0  ;;  %13812 = vmatpush3.bf16.msra.mxu1 %v17489_v18  ;;  %v16717_v35 = vmul.f32 %v3595_v1, %v3595_v1 }
 0x2b6   :  { %v7570_v57 = vpop.f32.mrb[197].mxu0  ;;  %13813 = vmatprep.subr.bf16.mxu1 %v17474_v8 }
 0x2b7   :  { %v11955_v41 = vpop.f32.mrb[90].mxu1  ;;  %12673 = vmatprep.mubr.msk.f32.mxu1 %vm129_vm0, %v7570_v57 }
 0x2b8   :  { %v16670_v32 = vmul.f32 %v11955_v41, %v11955_v41  ;;  %v16672_v30 = vmul.f32 %v11955_v41, %v11913_v28  ;;  %v3783_v6 = vpop.f32.mrb[91].mxu1  ;;  %12674 = vmatmul.mubr.msk.f32.gmra.mrb[196].mxu1 %vm129_vm0, %v12654_v43 }
 0x2b9   :  { %v16677_v12 = vmul.f32 %v3783_v6, %v3783_v6  ;;  %v16679_v33 = vmul.f32 %v3783_v6, %v3575_v47  ;;  %v7959_v29 = vpop.f32.mrb[198].mxu0  ;;  %13815 = vmatpush3.bf16.msra.mxu1 %v17490_v4  ;;  %12709 = vmatprep.mubr.msk.f32.mxu1 %vm14396_vm1, %v17471_v27 }
 0x2ba   :  { %v4557_v53 = vadd.f32 %v16670_v32, %v16668_v42  ;;  %v12690_v52 = vpop.f32.mrb[199].mxu0  ;;  %13825 = vmatprep.subr.bf16.mxu1 %v17474_v8 }
 0x2bb   :  { %v4556_v31 = vadd.f32 %v16677_v12, %v16675_v40  ;;  %v11958_v36 = vpop.f32.mrb[92].mxu1  ;;  %v4544_v6 = vmul.f32 2.0, %v16679_v33 }
 0x2bc   :  { %v4563_v13 = vadd.f32 6.5025, %v4557_v53  ;;  %v16691_v21 = vmul.f32 %v11958_v36, %v11958_v36  ;;  %v16693_v14 = vmul.f32 %v11958_v36, %v11916_v24  ;;  %v3793_v51 = vpop.f32.mrb[93].mxu1  ;;  %12710 = vmatmul.mubr.msk.f32.vlgmr.msra.gmra.mrb[198].mxu1 %vm129_vm0, %v7959_v29 }
 0x2bd   :  { %v4562_v26 = vadd.f32 6.5025, %v4556_v31  ;;  %v16698_v7 = vmul.f32 %v3793_v51, %v3793_v51  ;;  %v16700_v0 = vmul.f32 %v3793_v51, %v3585_v34  ;;  %v7964_v23 = vpop.f32.mrb[200].mxu0  ;;  %13827 = vmatpush3.bf16.msra.mxu1 %v17480_v19  ;;  %12712 = vmatprep.mubr.msk.f32.mxu1 %vm14396_vm1, %v17471_v27 }
 0x2be   :  { %14075 = vrcp.f32 %v4563_v13  ;;  %v4559_v44 = vadd.f32 %v16691_v21, %v16689_v3  ;;  %v12693_v50 = vpop.f32.mrb[201].mxu0  ;;  %13828 = vmatprep.subr.bf16.mxu1 %v17474_v8  ;;  %v4547_v31 = vmul.f32 2.0, %v16693_v14 }
 0x2bf   :  { %14077 = vrcp.f32 %v4562_v26  ;;  %v4558_v49 = vadd.f32 %v16698_v7, %v16696_v16  ;;  %v11961_v56 = vpop.f32.mrb[94].mxu1 }
 0x2c0   :  { %v4565_v45 = vadd.f32 6.5025, %v4559_v44  ;;  %v16712_v10 = vmul.f32 %v11961_v56, %v11961_v56  ;;  %v16714_v22 = vmul.f32 %v11961_v56, %v11919_v37  ;;  %v3803_v63 = vpop.f32.mrb[95].mxu1  ;;  %12713 = vmatmul.mubr.msk.f32.gmra.mrb[200].mxu1 %vm129_vm0, %v7964_v23  ;;  %v4546_v23 = vmul.f32 2.0, %v16700_v0 }
 0x2c1   :  { %v4564_v46 = vadd.f32 6.5025, %v4558_v49  ;;  %v16719_v20 = vmul.f32 %v3803_v63, %v3803_v63  ;;  %v16721_v11 = vmul.f32 %v3803_v63, %v3595_v1  ;;  %v7969_v38 = vpop.f32.mrb[202].mxu0  ;;  %13830 = vmatpush3.bf16.msra.mxu1 %v17489_v18  ;;  %12715 = vmatprep.mubr.msk.f32.mxu1 %vm14396_vm1, %v17471_v27  ;;  %v4545_v1 = vmul.f32 2.0, %v16672_v30 }
 0x2c2   :  { %14079 = vrcp.f32 %v4565_v45  ;;  %v4561_v60 = vadd.f32 %v16712_v10, %v16710_v39  ;;  %v12696_v61 = vpop.f32.mrb[203].mxu0  ;;  %13831 = vmatprep.subr.bf16.mxu1 %v17474_v8 }
 0x2c3   :  { %14081 = vrcp.f32 %v4564_v46  ;;  %v4560_v54 = vadd.f32 %v16719_v20, %v16717_v35  ;;  %v16731_v5 = vpop.f32.mrb[96].mxu1  ;;  %v4551_v49 = vadd.f32 6.5025, %v4545_v1  ;;  %v4550_v61 = vadd.f32 6.5025, %v4544_v6 }
 0x2c4   :  { %v16733_v58 = vadd.f32 6.5025, %v4561_v60  ;;  %v4473_v48 = vsub.f32 %v16731_v5, %v16668_v42  ;;  %v16737_v25 = vpop.f32.mrb[97].mxu1  ;;  %12716 = vmatmul.mubr.msk.f32.gmra.mrb[202].mxu1 %vm129_vm0, %v7969_v38  ;;  %v4553_v1 = vadd.f32 6.5025, %v4547_v31  ;;  %v4549_v6 = vmul.f32 2.0, %v16714_v22 }
 0x2c5   :  { %v16740_v28 = vadd.f32 6.5025, %v4560_v54  ;;  %v4472_v47 = vsub.f32 %v16737_v25, %v16675_v40  ;;  %v8132_v55 = vpop.f32.mrb[204].mxu0  ;;  %13833 = vmatpush3.bf16.msra.mxu1 %v17490_v4  ;;  %12751 = vmatprep.mubr.msk.f32.mxu1 %vm14396_vm1, %v17471_v27 }
 0x2c6   :  { %14083 = vrcp.f32 %v16733_v58  ;;  %v12732_v62 = vpop.f32.mrb[205].mxu0  ;;  %13847 = vmatprep.subr.bf16.mxu1 %v14781_v2 }
 0x2c7   :  { %14085 = vrcp.f32 %v16740_v28  ;;  %v16750_v24 = vpop.f32.mrb[98].mxu1 }
 0x2c8   :  { %v14076_v34 = vpop.eup %14075  ;;  %v4475_v15 = vsub.f32 %v16750_v24, %v16689_v3  ;;  %v16754_v59 = vpop.f32.mrb[99].mxu1  ;;  %12752 = vmatmul.mubr.msk.f32.vlgmr.msra.gmra.mrb[204].mxu1 %vm129_vm0, %v8132_v55 }
 0x2c9   :  { %v14078_v37 = vpop.eup %14077  ;;  %v4575_v43 = vmul.f32 %v14076_v34, %v4563_v13  ;;  %v4474_v57 = vsub.f32 %v16754_v59, %v16696_v16  ;;  %v8137_v41 = vpop.f32.mrb[206].mxu0  ;;  %13849 = vmatpush3.bf16.msra.mxu1 %v14781_v2  ;;  %12754 = vmatprep.mubr.msk.f32.mxu1 %vm14396_vm1, %v17471_v27 }
 0x2ca   :  { %v4574_v29 = vmul.f32 %v14078_v37, %v4562_v26  ;;  %v12735_v53 = vpop.f32.mrb[207].mxu0  ;;  %13851 = vmatprep.subr.bf16.mxu1 %v14799_v9 }
 0x2cb   :  { %v4581_v52 = vsub.f32 2.0, %v4575_v43  ;;  %v16766_v36 = vpop.f32.mrb[100].mxu1  ;;  %v4552_v53 = vadd.f32 6.5025, %v4546_v23  ;;  %v4548_v23 = vmul.f32 2.0, %v16721_v11 }
 0x2cc   :  { %v14080_v13 = vpop.eup %14079  ;;  %v4580_v51 = vsub.f32 2.0, %v4574_v29  ;;  %v16771_v50 = vpop.f32.mrb[101].mxu1  ;;  %12755 = vmatmul.mubr.msk.f32.gmra.mrb[206].mxu1 %vm129_vm0, %v8137_v41  ;;  %v17491_v16 = vsub.f32 %v16766_v36, %v16710_v39 }
 0x2cd   :  { %v14082_v26 = vpop.eup %14081  ;;  %v4587_v56 = vmul.f32 %v14076_v34, %v4581_v52  ;;  %v4577_v63 = vmul.f32 %v14080_v13, %v4565_v45  ;;  %v8142_v60 = vpop.f32.mrb[208].mxu0  ;;  %13853 = vmatpush3.bf16.msra.mxu1 %v14799_v9  ;;  %12757 = vmatprep.mubr.msk.f32.mxu1 %vm14396_vm1, %v17471_v27  ;;  %v4554_v40 = vadd.f32 6.5025, %v4548_v23 }
 0x2ce   :  { %v4586_v54 = vmul.f32 %v14078_v37, %v4580_v51  ;;  %v4576_v55 = vmul.f32 %v14082_v26, %v4564_v46  ;;  %v12738_v62 = vpop.f32.mrb[209].mxu0  ;;  %13855 = vmatprep.subr.bf16.mxu1 %v14817_v17 }
 0x2cf   :  { %v16780_v43 = vmul.f32 %v4587_v56, %v4551_v49  ;;  %v4583_v34 = vsub.f32 2.0, %v4577_v63  ;;  %v12039_v45 = vpop.f32.mrb[102].mxu1 }
 0x2d0   :  { %v14084_v41 = vpop.eup %14083  ;;  %v16782_v29 = vmul.f32 %v4586_v54, %v4550_v61  ;;  %v4582_v52 = vsub.f32 2.0, %v4576_v55  ;;  %v4479_v38 = vsub.f32 %v12039_v45, %v16670_v32  ;;  %v4211_v44 = vpop.f32.mrb[103].mxu1  ;;  %12758 = vmatmul.mubr.msk.f32.gmra.mrb[208].mxu1 %vm129_vm0, %v8142_v60 }
 0x2d1   :  { %v14086_v37 = vpop.eup %14085  ;;  %v4589_v46 = vmul.f32 %v14080_v13, %v4583_v34  ;;  %v4579_v51 = vmul.f32 %v14084_v41, %v16733_v58  ;;  %v4478_v31 = vsub.f32 %v4211_v44, %v16677_v12  ;;  %v12774_v49 = vpop.f32.mrb[210].mxu0  ;;  %13857 = vmatpush3.bf16.msra.mxu1 %v14817_v17 }
 0x2d2   :  { %v4588_v56 = vmul.f32 %v14082_v26, %v4582_v52  ;;  %v4578_v63 = vmul.f32 %v14086_v37, %v16740_v28  ;;  %v4503_v32 = vadd.f32 %v4479_v38, %v4473_v48  ;;  %v8319_v60 = vpop.f32.mrb[211].mxu0  ;;  %13871 = vmatprep.subr.bf16.mxu1 %v14781_v2  ;;  %v4555_v48 = vadd.f32 6.5025, %v4549_v6 }
 0x2d3   :  { %v16796_v13 = vmul.f32 %v4589_v46, %v4553_v1  ;;  %v4585_v58 = vsub.f32 2.0, %v4579_v51  ;;  %v4502_v12 = vadd.f32 %v4478_v31, %v4472_v47  ;;  %v12042_v44 = vpop.f32.mrb[104].mxu1  ;;  %12793 = vmatprep.mubr.msk.f32.mxu1 %vm129_vm0, %v8319_v60 }
 0x2d4   :  { %v16802_v26 = vmul.f32 %v4588_v56, %v4552_v53  ;;  %v4584_v28 = vsub.f32 2.0, %v4578_v63  ;;  %v4509_v61 = vadd.f32 58.5225, %v4503_v32  ;;  %v4481_v42 = vsub.f32 %v12042_v44, %v16691_v21  ;;  %v4221_v5 = vpop.f32.mrb[105].mxu1  ;;  %12794 = vmatmul.mubr.msk.f32.vlgmr.msra.gmra.mrb[210].mxu1 %vm129_vm0, %v12774_v49 }
 0x2d5   :  { %v4591_v38 = vmul.f32 %v14084_v41, %v4585_v58  ;;  %v4508_v54 = vadd.f32 58.5225, %v4502_v12  ;;  %v4480_v55 = vsub.f32 %v4221_v5, %v16698_v7  ;;  %v12777_v62 = vpop.f32.mrb[212].mxu0  ;;  %13873 = vmatpush3.bf16.msra.mxu1 %v14781_v2 }
 0x2d6   :  { %v4590_v25 = vmul.f32 %v14086_v37, %v4584_v28  ;;  %14087 = vrcp.f32 %v4509_v61  ;;  %v4505_v47 = vadd.f32 %v4481_v42, %v4475_v15  ;;  %v8329_v1 = vpop.f32.mrb[213].mxu0  ;;  %13875 = vmatprep.subr.bf16.mxu1 %v14799_v9 }
 0x2d7   :  { %v16812_v21 = vmul.f32 %v4591_v38, %v4555_v48  ;;  %14089 = vrcp.f32 %v4508_v54  ;;  %v4504_v7 = vadd.f32 %v4480_v55, %v4474_v57  ;;  %v12045_v34 = vpop.f32.mrb[106].mxu1  ;;  %12796 = vmatprep.mubr.msk.f32.mxu1 %vm129_vm0, %v8329_v1 }
 0x2d8   :  { %v16818_v45 = vmul.f32 %v4590_v25, %v4554_v40  ;;  %v16820_v41 = vadd.f32 58.5225, %v4505_v47  ;;  %v4483_v3 = vsub.f32 %v12045_v34, %v16712_v10  ;;  %v4231_v24 = vpop.f32.mrb[107].mxu1  ;;  %12797 = vmatmul.mubr.msk.f32.gmra.mrb[212].mxu1 %vm129_vm0, %v12777_v62  ;;  %v17492_v10 = vsub.f32 %v16771_v50, %v16717_v35 }
 0x2d9   :  { %v16824_v15 = vadd.f32 58.5225, %v4504_v7  ;;  %v4482_v53 = vsub.f32 %v4231_v24, %v16719_v20  ;;  %v12780_v52 = vpop.f32.mrb[214].mxu0  ;;  %13877 = vmatpush3.bf16.msra.mxu1 %v14799_v9 }
 0x2da   :  { %14091 = vrcp.f32 %v16820_v41  ;;  %v4507_v59 = vadd.f32 %v4483_v3, %v17491_v16  ;;  %v8339_v57 = vpop.f32.mrb[215].mxu0  ;;  %13879 = vmatprep.subr.bf16.mxu1 %v14817_v17 }
 0x2db   :  { %14093 = vrcp.f32 %v16824_v15  ;;  %v4506_v37 = vadd.f32 %v4482_v53, %v17492_v10  ;;  %v12081_v46 = vpop.f32.mrb[108].mxu1  ;;  %12799 = vmatprep.mubr.msk.f32.mxu1 %vm129_vm0, %v8339_v57 }
 0x2dc   :  { %v16838_v20 = vadd.f32 58.5225, %v4507_v59  ;;  %v4485_v6 = vsub.f32 %v12081_v46, %v16672_v30  ;;  %v4425_v51 = vpop.f32.mrb[109].mxu1  ;;  %12800 = vmatmul.mubr.msk.f32.gmra.mrb[214].mxu1 %vm129_vm0, %v12780_v52 }
 0x2dd   :  { %v16842_v39 = vadd.f32 58.5225, %v4506_v37  ;;  %v4484_v36 = vsub.f32 %v4425_v51, %v16679_v33  ;;  %v12816_v31 = vpop.f32.mrb[216].mxu0  ;;  %13881 = vmatpush3.bf16.msra.mxu1 %v14817_v17 }
 0x2de   :  { %14095 = vrcp.f32 %v16838_v20  ;;  %v4491_v35 = vmul.f32 2.0, %v4485_v6  ;;  %v8527_v50 = vpop.f32.mrb[217].mxu0  ;;  %13895 = vmatprep.subr.bf16.mxu1 %v14781_v2 }
 0x2df   :  { %14097 = vrcp.f32 %v16842_v39  ;;  %v12084_v56 = vpop.f32.mrb[110].mxu1  ;;  %12835 = vmatprep.mubr.msk.f32.mxu1 %vm129_vm0, %v8527_v50  ;;  %v4490_v63 = vmul.f32 2.0, %v4484_v36 }
 0x2e0   :  { %v1370_v49 = vpop.xlane.xlu0 %1369  ;;  %v14088_v23 = vpop.eup %14087  ;;  %v4487_v33 = vsub.f32 %v12084_v56, %v16693_v14  ;;  %12836 = vmatmul.mubr.msk.f32.vlgmr.msra.gmra.mrb[216].mxu1 %vm129_vm0, %v12816_v31  ;;  %v4497_v5 = vadd.f32 58.5225, %v4491_v35 }
 0x2e1   :  { %v1371_v30 = vrot.slane %v1370_v49, 4  ;;  %v4435_v32 = vpop.f32.mrb[111].mxu1  ;;  %v14090_v60 = vpop.eup %14089  ;;  %v4521_v58 = vmul.f32 %v14088_v23, %v4509_v61  ;;  %13897 = vmatpush3.bf16.msra.mxu1 %v14781_v2 }
 0x2e2   :  { %v4486_v44 = vsub.f32 %v4435_v32, %v16700_v0  ;;  %v12819_v28 = vpop.f32.mrb[218].mxu0  ;;  %v4520_v42 = vmul.f32 %v14090_v60, %v4508_v54  ;;  %v4493_v48 = vmul.f32 2.0, %v4487_v33  ;;  %13899 = vmatprep.subr.bf16.mxu1 %v14799_v9  ;;  %v4496_v0 = vadd.f32 58.5225, %v4490_v63  ;;  %v16870_v63 = vld [vmem:[#allocation5 + $0x8] sm:$0xff] }
 0x2e3   :  { %v1372_v12 = vadd.f32 %v1371_v30, %v1370_v49  ;;  %v8537_v38 = vpop.f32.mrb[219].mxu0  ;;  %v4527_v62 = vsub.f32 2.0, %v4521_v58  ;;  %v12087_v47 = vpop.f32.mrb[112].mxu1 }
 0x2e4   :  { %v1396_v55 = vpop.xlane.xlu0 %1395  ;;  %v4492_v40 = vmul.f32 2.0, %v4486_v44  ;;  %12838 = vmatprep.mubr.msk.f32.mxu1 %vm129_vm0, %v8537_v38  ;;  %v14092_v61 = vpop.eup %14091  ;;  %v4526_v1 = vsub.f32 2.0, %v4520_v42  ;;  %v4499_v7 = vadd.f32 58.5225, %v4493_v48  ;;  %v4489_v34 = vsub.f32 %v12087_v47, %v16714_v22  ;;  %v16875_v44 = vld [vmem:[#allocation5] sm:$0xff] }
 0x2e5   :  { %v1373_v14 = vrot.slane %v1372_v12, 2  ;;  %v1397_v25 = vrot.slane %v1396_v55, 4  ;;  %v4445_v54 = vpop.f32.mrb[113].mxu1  ;;  %12839 = vmatmul.mubr.msk.f32.gmra.mrb[218].mxu1 %vm129_vm0, %v12819_v28  ;;  %v14094_v3 = vpop.eup %14093  ;;  %v4523_v24 = vmul.f32 %v14092_v61, %v16820_v41  ;;  %v4533_v53 = vmul.f32 %v14088_v23, %v4527_v62 }
 0x2e6   :  { %v4498_v52 = vadd.f32 58.5225, %v4492_v40  ;;  %v12822_v59 = vpop.f32.mrb[220].mxu0  ;;  %13901 = vmatpush3.bf16.msra.mxu1 %v14799_v9  ;;  %v4522_v57 = vmul.f32 %v14094_v3, %v16824_v15  ;;  %v4532_v10 = vmul.f32 %v14090_v60, %v4526_v1  ;;  %v4495_v37 = vmul.f32 2.0, %v4489_v34  ;;  %v16887_v34 = vld [vmem:[#allocation5 + $0x18] sm:$0xff] }
 0x2e7   :  { %v16859_v16 = vadd.f32 %v1397_v25, %v1396_v55  ;;  %v4488_v46 = vsub.f32 %v4445_v54, %v16721_v11  ;;  %v8547_v22 = vpop.f32.mrb[221].mxu0  ;;  %13903 = vmatprep.subr.bf16.mxu1 %v14817_v17  ;;  %v4529_v6 = vsub.f32 2.0, %v4523_v24  ;;  %v4539_v51 = vmul.f32 %v4533_v53, %v4497_v5  ;;  %v4810_v36 = vpop.f32.mrb[114].mxu1 }
 0x2e8   :  { %12841 = vmatprep.mubr.msk.f32.mxu1 %vm129_vm0, %v8547_v22  ;;  %v1374_v31 = vadd.f32 %v1373_v14, %v1372_v12  ;;  %v14096_v35 = vpop.eup %14095  ;;  %v4528_v50 = vsub.f32 2.0, %v4522_v57  ;;  %v4538_v49 = vmul.f32 %v4532_v10, %v4496_v0  ;;  %v4501_v30 = vadd.f32 58.5225, %v4495_v37  ;;  %4825 = vst.msk [vmem:[#allocation13 + $0x30] sm:$0xff] %vm1587_vm2, %v4810_v36  ;;  %v12123_v56 = vpop.f32.mrb[115].mxu1 }
 0x2e9   :  { %v1399_v41 = vrot.slane %v16859_v16, 2  ;;  %v4494_v15 = vmul.f32 2.0, %v4488_v46  ;;  %12842 = vmatmul.mubr.msk.f32.gmra.mrb[220].mxu1 %vm129_vm0, %v12822_v59  ;;  %v14098_v11 = vpop.eup %14097  ;;  %v4525_v23 = vmul.f32 %v14096_v35, %v16838_v20  ;;  %v4599_v33 = vmul.f32 %v16870_v63, %v4539_v51  ;;  %v12858_v60 = vpop.f32.mrb[222].mxu0 }
 0x2ea   :  { %v4535_v32 = vmul.f32 %v14092_v61, %v4529_v6  ;;  %13905 = vmatpush3.bf16.msra.mxu1 %v14817_v17  ;;  %v1375_v58 = vrot.slane %v1374_v31, 1  ;;  %v4524_v12 = vmul.f32 %v14098_v11, %v16842_v39  ;;  %v4598_v28 = vmul.f32 %v16875_v44, %v4538_v49  ;;  %v8741_v48 = vpop.f32.mrb[223].mxu0  ;;  %v16907_v49 = vld [vmem:[#allocation5 + $0x20] sm:$0xff] }
 0x2eb   :  { %v4534_v42 = vmul.f32 %v14094_v3, %v4528_v50  ;;  %v4500_v5 = vadd.f32 58.5225, %v4494_v15  ;;  %13919 = vmatprep.subr.bf16.mxu1 %v14781_v2  ;;  %v4531_v20 = vsub.f32 2.0, %v4525_v23  ;;  %v4605_v38 = vsel %vm1356_vm3, %v4599_v33, 0.0  ;;  %v4815_v14 = vpop.f32.mrb[116].mxu1  ;;  %12877 = vmatprep.mubr.msk.f32.mxu1 %vm129_vm0, %v8741_v48 }
 0x2ec   :  { %v4625_v55 = vmul.f32 %v4599_v33, %v16780_v43  ;;  %v4541_v62 = vmul.f32 %v4535_v32, %v4499_v7  ;;  %v4530_v40 = vsub.f32 2.0, %v4524_v12  ;;  %v4604_v39 = vsel %vm1356_vm3, %v4598_v28, 0.0  ;;  %4826 = vst.msk [vmem:[#allocation13 + $0x38] sm:$0xff] %vm1587_vm2, %v4815_v14  ;;  %v12126_v61 = vpop.f32.mrb[117].mxu1 }
 0x2ed   :  { %v4624_v25 = vmul.f32 %v4598_v28, %v16782_v29  ;;  %v4540_v47 = vmul.f32 %v4534_v42, %v4498_v52  ;;  %12878 = vmatmul.mubr.msk.f32.vlgmr.msra.gmra.mrb[222].mxu1 %vm129_vm0, %v12858_v60  ;;  %v4606_v0 = vadd.f32 %v4605_v38, %v4604_v39  ;;  %v4537_v7 = vmul.f32 %v14096_v35, %v4531_v20  ;;  %v12861_v54 = vpop.f32.mrb[224].mxu0  ;;  %v16892_v29 = vld [vmem:[#allocation5 + $0x10] sm:$0xff] }
 0x2ee   :  { %v4631_v1 = vsel %vm1356_vm3, %v4625_v55, 0.0  ;;  %v4601_v43 = vmul.f32 %v16887_v34, %v4541_v62  ;;  %13921 = vmatpush3.bf16.msra.mxu1 %v14781_v2  ;;  %v4536_v53 = vmul.f32 %v14098_v11, %v4530_v40  ;;  %v1376_v52 = vadd.f32 %v1375_v58, %v1374_v31  ;;  %v8751_v59 = vpop.f32.mrb[225].mxu0 }
 0x2ef   :  { %v4630_v3 = vsel %vm1356_vm3, %v4624_v25, 0.0  ;;  %v4600_v24 = vmul.f32 %v16892_v29, %v4540_v47  ;;  %13923 = vmatprep.subr.bf16.mxu1 %v14799_v9  ;;  %v4543_v10 = vmul.f32 %v4537_v7, %v4501_v30  ;;  %v1400_v37 = vadd.f32 %v1399_v41, %v16859_v16  ;;  %v4820_v46 = vpop.f32.mrb[118].mxu1  ;;  %12880 = vmatprep.mubr.msk.f32.mxu1 %vm129_vm0, %v8751_v59  ;;  %v16904_v16 = vld [vmem:[#allocation5 + $0x28] sm:$0x3f] }
 0x2f0   :  { %v4627_v57 = vmul.f32 %v4601_v43, %v16796_v13  ;;  %v4542_v51 = vmul.f32 %v4536_v53, %v4500_v5  ;;  %13990 = vpush %v1376_v52  ;;  %v12129_v36 = vpop.f32.mrb[119].mxu1  ;;  %v4632_v31 = vadd.f32 %v4631_v1, %v4630_v3  ;;  %v4609_v15 = vsel %vm1356_vm3, %v4601_v43, 0.0 }
 0x2f1   :  { %v4607_v22 = vsel %vm1356_vm3, %v4600_v24, 0.0  ;;  %v4626_v6 = vmul.f32 %v4600_v24, %v16802_v26  ;;  %4827 = vst.msk [vmem:[#allocation13 + $0x40] sm:$0xff] %vm1587_vm2, %v4820_v46  ;;  %12881 = vmatmul.mubr.msk.f32.gmra.mrb[224].mxu1 %vm129_vm0, %v12861_v54  ;;  %v1401_v35 = vrot.slane %v1400_v37, 1  ;;  %v12864_v13 = vpop.f32.mrb[226].mxu0  ;;  %v4603_v41 = vmul.f32 %v16904_v16, %v4543_v10 }
 0x2f2   :  { %13925 = vmatpush3.bf16.msra.mxu1 %v14799_v9  ;;  %v4608_v50 = vadd.f32 %v4607_v22, %v4606_v0  ;;  %v4602_v26 = vmul.f32 %v16907_v49, %v4542_v51  ;;  %v8761_v30 = vpop.f32.mrb[227].mxu0  ;;  %v4635_v48 = vsel %vm1356_vm3, %v4627_v57, 0.0 }
 0x2f3   :  { %13927 = vmatprep.subr.bf16.mxu1 %v14817_v17  ;;  %v4633_v56 = vsel %vm1356_vm3, %v4626_v6, 0.0  ;;  %v1402_v11 = vadd.f32 %v1401_v35, %v1400_v37  ;;  %v4983_v23 = vpop.f32.mrb[120].mxu1  ;;  %12883 = vmatprep.mubr.msk.f32.mxu1 %vm129_vm0, %v8761_v30  ;;  %v4629_v32 = vmul.f32 %v4603_v41, %v16812_v21  ;;  %v4613_v21 = vsel %vm1366_vm4, %v4603_v41, 0.0 }
 0x2f4   :  { %v4610_v33 = vadd.f32 %v4609_v15, %v4608_v50  ;;  %4998 = vst.msk [vmem:[#allocation14 + $0x30] sm:$0xff] %vm1587_vm2, %v4983_v23  ;;  %v12165_v60 = vpop.f32.mrb[121].mxu1  ;;  %v4611_v58 = vsel %vm1356_vm3, %v4602_v26, 0.0  ;;  %v4628_v12 = vmul.f32 %v4602_v26, %v16818_v45  ;;  %v4634_v28 = vadd.f32 %v4633_v56, %v4632_v31 }
 0x2f5   :  { %12884 = vmatmul.mubr.msk.f32.gmra.mrb[226].mxu1 %vm129_vm0, %v12864_v13  ;;  %13992 = vpush %v1402_v11  ;;  %v12900_v42 = vpop.f32.mrb[228].mxu0  ;;  %v4639_v25 = vsel %vm1366_vm4, %v4629_v32, 0.0 }
 0x2f6   :  { %13929 = vmatpush3.bf16.msra.mxu1 %v14817_v17  ;;  %v4612_v5 = vadd.f32 %v4611_v58, %v4610_v33  ;;  %v8955_v20 = vpop.f32.mrb[229].mxu0  ;;  %v4636_v38 = vadd.f32 %v4635_v48, %v4634_v28  ;;  %v4637_v55 = vsel %vm1356_vm3, %v4628_v12, 0.0 }
 0x2f7   :  { %13943 = vmatprep.subr.bf16.mxu1 %v14781_v2  ;;  %v4988_v62 = vpop.f32.mrb[122].mxu1  ;;  %12919 = vmatprep.mubr.msk.f32.mxu1 %vm129_vm0, %v8955_v20 }
 0x2f8   :  { %v4614_v45 = vadd.f32 %v4613_v21, %v4612_v5  ;;  %4999 = vst.msk [vmem:[#allocation14 + $0x38] sm:$0xff] %vm1587_vm2, %v4988_v62  ;;  %v12168_v14 = vpop.f32.mrb[123].mxu1  ;;  %v4638_v40 = vadd.f32 %v4637_v55, %v4636_v38 }
 0x2f9   :  { %12920 = vmatmul.mubr.msk.f32.vlgmr.msra.gmra.mrb[228].mxu1 %vm129_vm0, %v12900_v42  ;;  %v12903_v39 = vpop.f32.mrb[230].mxu0 }
 0x2fa   :  { %13945 = vmatpush3.bf16.msra.mxu1 %v14781_v2  ;;  %4615 = vadd.xlane.f32.xlu0 %v4614_v45  ;;  %v8965_v47 = vpop.f32.mrb[231].mxu0  ;;  %v4640_v61 = vadd.f32 %v4639_v25, %v4638_v40 }
 0x2fb   :  { %13947 = vmatprep.subr.bf16.mxu1 %v14799_v9  ;;  %v4993_v1 = vpop.f32.mrb[124].mxu1  ;;  %12922 = vmatprep.mubr.msk.f32.mxu1 %vm129_vm0, %v8965_v47 }
 0x2fc   :  { %5000 = vst.msk [vmem:[#allocation14 + $0x40] sm:$0xff] %vm1587_vm2, %v4993_v1  ;;  %4641 = vadd.xlane.f32.xlu1 %v4640_v61  ;;  %v12171_v0 = vpop.f32.mrb[125].mxu1 }
 0x2fd   :  { %12923 = vmatmul.mubr.msk.f32.gmra.mrb[230].mxu1 %vm129_vm0, %v12903_v39  ;;  %v12906_v43 = vpop.f32.mrb[232].mxu0 }
 0x2fe   :  { %13949 = vmatpush3.bf16.msra.mxu1 %v14799_v9  ;;  %v8975_v2 = vpop.f32.mrb[233].mxu0 }
 0x2ff   :  { %13951 = vmatprep.subr.bf16.mxu1 %v14817_v17  ;;  %v12207_v7 = vpop.f32.mrb[126].mxu1  ;;  %12925 = vmatprep.mubr.msk.f32.mxu1 %vm129_vm0, %v8975_v2 }
 0x300   :  { %v5194_v54 = vpop.f32.mrb[127].mxu1  ;;  %v16948_v22 = vmul.f32 %v12207_v7, %v12207_v7 }
 0x301   :  { %12926 = vmatmul.mubr.msk.f32.gmra.mrb[232].mxu1 %vm129_vm0, %v12906_v43  ;;  %v12942_v3 = vpop.f32.mrb[234].mxu0  ;;  %v16955_v31 = vmul.f32 %v5194_v54, %v5194_v54 }
 0x302   :  { %13953 = vmatpush3.bf16.msra.mxu1 %v14817_v17  ;;  %v9169_v24 = vpop.f32.mrb[235].mxu0 }
 0x303   :  { %13963 = vmatprep.subr.bf16.mxu1 %v17474_v8  ;;  %v12210_v53 = vpop.f32.mrb[128].mxu1  ;;  %12961 = vmatprep.mubr.msk.f32.mxu1 %vm129_vm0, %v9169_v24 }
 0x304   :  { %v5204_v52 = vpop.f32.mrb[129].mxu1  ;;  %v16969_v30 = vmul.f32 %v12210_v53, %v12210_v53 }
 0x305   :  { %12962 = vmatmul.mubr.msk.f32.vlgmr.msra.gmra.mrb[234].mxu1 %vm129_vm0, %v12942_v3  ;;  %v12945_v9 = vpop.f32.mrb[236].mxu0  ;;  %v16975_v33 = vmul.f32 %v5204_v52, %v5204_v52 }
 0x306   :  { %13965 = vmatpush3.bf16.msra.mxu1 %v17480_v19  ;;  %v9179_v59 = vpop.f32.mrb[237].mxu0 }
 0x307   :  { %13966 = vmatprep.subr.bf16.mxu1 %v17474_v8  ;;  %v12213_v57 = vpop.f32.mrb[130].mxu1  ;;  %12964 = vmatprep.mubr.msk.f32.mxu1 %vm129_vm0, %v9179_v59 }
 0x308   :  { %v5214_v10 = vpop.f32.mrb[131].mxu1  ;;  %v16985_v5 = vmul.f32 %v12213_v57, %v12213_v57 }
 0x309   :  { %12965 = vmatmul.mubr.msk.f32.gmra.mrb[236].mxu1 %vm129_vm0, %v12945_v9  ;;  %v12948_v17 = vpop.f32.mrb[238].mxu0  ;;  %v16991_v55 = vmul.f32 %v5214_v10, %v5214_v10 }
 0x30a   :  { %13968 = vmatpush3.bf16.msra.mxu1 %v17489_v18  ;;  %v9189_v37 = vpop.f32.mrb[239].mxu0 }
 0x30b   :  { %13969 = vmatprep.subr.bf16.mxu1 %v17474_v8  ;;  %v12249_v46 = vpop.f32.mrb[132].mxu1  ;;  %12967 = vmatprep.mubr.msk.f32.mxu1 %vm129_vm0, %v9189_v37 }
 0x30c   :  { %v16950_v6 = vmul.f32 %v12249_v46, %v12249_v46  ;;  %v16952_v51 = vmul.f32 %v12249_v46, %v12207_v7  ;;  %v5402_v36 = vpop.f32.mrb[133].mxu1 }
 0x30d   :  { %12968 = vmatmul.mubr.msk.f32.gmra.mrb[238].mxu1 %vm129_vm0, %v12948_v17  ;;  %v16957_v35 = vmul.f32 %v5402_v36, %v5402_v36  ;;  %v16959_v13 = vmul.f32 %v5402_v36, %v5194_v54 }
 0x30e   :  { %13971 = vmatpush3.bf16.msra.mxu1 %v17490_v4  ;;  %13003 = vmatprep.mubr.msk.f32.mxu1 %vm14396_vm1, %v17471_v27  ;;  %v6176_v41 = vadd.f32 %v16950_v6, %v16948_v22  ;;  %v6164_v54 = vmul.f32 2.0, %v16952_v51 }
 0x30f   :  { %13981 = vmatprep.subr.bf16.mxu1 %v17474_v8  ;;  %v6175_v50 = vadd.f32 %v16957_v35, %v16955_v31  ;;  %v12252_v26 = vpop.f32.mrb[134].mxu1  ;;  %v6163_v59 = vmul.f32 2.0, %v16959_v13 }
 0x310   :  { %v6182_v15 = vadd.f32 6.5025, %v6176_v41  ;;  %v16971_v56 = vmul.f32 %v12252_v26, %v12252_v26  ;;  %v16973_v11 = vmul.f32 %v12252_v26, %v12210_v53  ;;  %v5412_v23 = vpop.f32.mrb[135].mxu1 }
 0x311   :  { %v6181_v32 = vadd.f32 6.5025, %v6175_v50  ;;  %v16977_v60 = vmul.f32 %v5412_v23, %v5412_v23  ;;  %v16979_v58 = vmul.f32 %v5412_v23, %v5204_v52 }
 0x312   :  { %14099 = vrcp.f32 %v6182_v15  ;;  %v6178_v12 = vadd.f32 %v16971_v56, %v16969_v30  ;;  %v6166_v17 = vmul.f32 2.0, %v16973_v11 }
 0x313   :  { %14101 = vrcp.f32 %v6181_v32  ;;  %v6177_v28 = vadd.f32 %v16977_v60, %v16975_v33  ;;  %v12255_v42 = vpop.f32.mrb[136].mxu1 }
 0x314   :  { %v6184_v48 = vadd.f32 6.5025, %v6178_v12  ;;  %v16987_v20 = vmul.f32 %v12255_v42, %v12255_v42  ;;  %v16989_v21 = vmul.f32 %v12255_v42, %v12213_v57  ;;  %v5422_v38 = vpop.f32.mrb[137].mxu1  ;;  %v6172_v42 = vadd.f32 6.5025, %v6166_v17 }
 0x315   :  { %v6183_v62 = vadd.f32 6.5025, %v6177_v28  ;;  %v16993_v45 = vmul.f32 %v5422_v38, %v5422_v38  ;;  %v16995_v14 = vmul.f32 %v5422_v38, %v5214_v10 }
 0x316   :  { %14103 = vrcp.f32 %v6184_v48  ;;  %v6180_v40 = vadd.f32 %v16987_v20, %v16985_v5 }
 0x317   :  { %14105 = vrcp.f32 %v6183_v62  ;;  %v6179_v39 = vadd.f32 %v16993_v45, %v16991_v55  ;;  %v12291_v25 = vpop.f32.mrb[138].mxu1 }
 0x318   :  { %v6186_v47 = vadd.f32 6.5025, %v6180_v40  ;;  %v6092_v61 = vsub.f32 %v12291_v25, %v16948_v22  ;;  %v5616_v1 = vpop.f32.mrb[139].mxu1  ;;  %v6170_v22 = vadd.f32 6.5025, %v6164_v54 }
 0x319   :  { %v6185_v0 = vadd.f32 6.5025, %v6179_v39  ;;  %v6091_v43 = vsub.f32 %v5616_v1, %v16955_v31  ;;  %v6168_v1 = vmul.f32 2.0, %v16989_v21 }
 0x31a   :  { %14107 = vrcp.f32 %v6186_v47 }
 0x31b   :  { %14109 = vrcp.f32 %v6185_v0  ;;  %v17003_v2 = vpop.f32.mrb[140].mxu1 }
 0x31c   :  { %v14100_v7 = vpop.eup %14099  ;;  %v6094_v3 = vsub.f32 %v17003_v2, %v16969_v30  ;;  %v5626_v24 = vpop.f32.mrb[141].mxu1 }
 0x31d   :  { %v14102_v53 = vpop.eup %14101  ;;  %v6194_v52 = vmul.f32 %v14100_v7, %v6182_v15  ;;  %v6093_v9 = vsub.f32 %v5626_v24, %v16975_v33  ;;  %v6165_v15 = vmul.f32 2.0, %v16979_v58  ;;  %v6169_v33 = vadd.f32 6.5025, %v6163_v59 }
 0x31e   :  { %v6193_v57 = vmul.f32 %v14102_v53, %v6181_v32 }
 0x31f   :  { %v6200_v10 = vsub.f32 2.0, %v6194_v52  ;;  %v12297_v37 = vpop.f32.mrb[142].mxu1  ;;  %v6167_v52 = vmul.f32 2.0, %v16995_v14 }
 0x320   :  { %v14104_v46 = vpop.eup %14103  ;;  %v6199_v36 = vsub.f32 2.0, %v6193_v57  ;;  %v6096_v31 = vsub.f32 %v12297_v37, %v16985_v5  ;;  %v5636_v41 = vpop.f32.mrb[143].mxu1 }
 0x321   :  { %v14106_v50 = vpop.eup %14105  ;;  %v6206_v26 = vmul.f32 %v14100_v7, %v6200_v10  ;;  %v6196_v30 = vmul.f32 %v14104_v46, %v6184_v48  ;;  %v6095_v23 = vsub.f32 %v5636_v41, %v16991_v55  ;;  %v6171_v55 = vadd.f32 6.5025, %v6165_v15 }
 0x322   :  { %v6205_v12 = vmul.f32 %v14102_v53, %v6199_v36  ;;  %v6195_v32 = vmul.f32 %v14106_v50, %v6183_v62  ;;  %v6173_v15 = vadd.f32 6.5025, %v6167_v52 }
 0x323   :  { %v17014_v28 = vmul.f32 %v6206_v26, %v6170_v22  ;;  %v6202_v38 = vsub.f32 2.0, %v6196_v30  ;;  %v12333_v40 = vpop.f32.mrb[144].mxu1 }
 0x324   :  { %v14108_v39 = vpop.eup %14107  ;;  %v17016_v25 = vmul.f32 %v6205_v12, %v6169_v33  ;;  %v6201_v5 = vsub.f32 2.0, %v6195_v32  ;;  %v6098_v48 = vsub.f32 %v12333_v40, %v16950_v6  ;;  %v5830_v2 = vpop.f32.mrb[145].mxu1  ;;  %v6174_v6 = vadd.f32 6.5025, %v6168_v1 }
 0x325   :  { %v14110_v7 = vpop.eup %14109  ;;  %v6208_v54 = vmul.f32 %v14104_v46, %v6202_v38  ;;  %v6198_v24 = vmul.f32 %v14108_v39, %v6186_v47  ;;  %v6097_v62 = vsub.f32 %v5830_v2, %v16957_v35 }
 0x326   :  { %v6207_v53 = vmul.f32 %v14106_v50, %v6201_v5  ;;  %v6197_v59 = vmul.f32 %v14110_v7, %v6185_v0  ;;  %v6122_v57 = vadd.f32 %v6098_v48, %v6092_v61 }
 0x327   :  { %v17022_v10 = vmul.f32 %v6208_v54, %v6172_v42  ;;  %v6204_v17 = vsub.f32 2.0, %v6198_v24  ;;  %v6121_v37 = vadd.f32 %v6097_v62, %v6091_v43  ;;  %v12336_v22 = vpop.f32.mrb[146].mxu1 }
 0x328   :  { %v17024_v36 = vmul.f32 %v6207_v53, %v6171_v55  ;;  %v6203_v41 = vsub.f32 2.0, %v6197_v59  ;;  %v6128_v26 = vadd.f32 58.5225, %v6122_v57  ;;  %v5840_v46 = vpop.f32.mrb[147].mxu1  ;;  %v6100_v35 = vsub.f32 %v12336_v22, %v16971_v56 }
 0x329   :  { %v6210_v30 = vmul.f32 %v14108_v39, %v6204_v17  ;;  %v6127_v47 = vadd.f32 58.5225, %v6121_v37  ;;  %v6099_v50 = vsub.f32 %v5840_v46, %v16977_v60 }
 0x32a   :  { %v6209_v0 = vmul.f32 %v14110_v7, %v6203_v41  ;;  %14111 = vrcp.f32 %v6128_v26  ;;  %v6124_v43 = vadd.f32 %v6100_v35, %v6094_v3 }
 0x32b   :  { %v17028_v61 = vmul.f32 %v6210_v30, %v6174_v6  ;;  %14113 = vrcp.f32 %v6127_v47  ;;  %v6123_v33 = vadd.f32 %v6099_v50, %v6093_v9  ;;  %v12339_v12 = vpop.f32.mrb[148].mxu1 }
 0x32c   :  { %v17030_v32 = vmul.f32 %v6209_v0, %v6173_v15  ;;  %v6102_v42 = vsub.f32 %v12339_v12, %v16987_v20  ;;  %v5850_v38 = vpop.f32.mrb[149].mxu1  ;;  %v6130_v40 = vadd.f32 58.5225, %v6124_v43 }
 0x32d   :  { %v6129_v39 = vadd.f32 58.5225, %v6123_v33  ;;  %v6101_v56 = vsub.f32 %v5850_v38, %v16993_v45 }
 0x32e   :  { %v6126_v5 = vadd.f32 %v6102_v42, %v6096_v31  ;;  %14115 = vrcp.f32 %v6130_v40 }
 0x32f   :  { %v6125_v60 = vadd.f32 %v6101_v56, %v6095_v23  ;;  %v12375_v1 = vpop.f32.mrb[150].mxu1  ;;  %14117 = vrcp.f32 %v6129_v39 }
 0x330   :  { %v6132_v48 = vadd.f32 58.5225, %v6126_v5  ;;  %v6104_v2 = vsub.f32 %v12375_v1, %v16952_v51  ;;  %v6044_v3 = vpop.f32.mrb[151].mxu1 }
 0x331   :  { %v6131_v9 = vadd.f32 58.5225, %v6125_v60  ;;  %v6103_v7 = vsub.f32 %v6044_v3, %v16959_v13 }
 0x332   :  { %14119 = vrcp.f32 %v6132_v48  ;;  %v6110_v54 = vmul.f32 2.0, %v6104_v2 }
 0x333   :  { %v2997_v20 = vpop.xlane.xlu1 %2996  ;;  %14121 = vrcp.f32 %v6131_v9  ;;  %v12378_v24 = vpop.f32.mrb[152].mxu1  ;;  %v6109_v45 = vmul.f32 2.0, %v6103_v7 }
 0x334   :  { %v2998_v55 = vrot.slane %v2997_v20, 4  ;;  %v14112_v62 = vpop.eup %14111  ;;  %v6106_v31 = vsub.f32 %v12378_v24, %v16973_v11  ;;  %v6054_v23 = vpop.f32.mrb[153].mxu1  ;;  %v6116_v17 = vadd.f32 58.5225, %v6110_v54 }
 0x335   :  { %v14114_v53 = vpop.eup %14113  ;;  %v6140_v52 = vmul.f32 %v14112_v62, %v6128_v26  ;;  %v6105_v51 = vsub.f32 %v6054_v23, %v16979_v58  ;;  %v6115_v50 = vadd.f32 58.5225, %v6109_v45 }
 0x336   :  { %v2999_v59 = vadd.f32 %v2998_v55, %v2997_v20  ;;  %v6139_v57 = vmul.f32 %v14114_v53, %v6127_v47  ;;  %v6112_v37 = vmul.f32 2.0, %v6106_v31 }
 0x337   :  { %v3023_v13 = vpop.xlane.xlu1 %3022  ;;  %v6146_v22 = vsub.f32 2.0, %v6140_v52  ;;  %v6111_v41 = vmul.f32 2.0, %v6105_v51  ;;  %v12381_v30 = vpop.f32.mrb[154].mxu1 }
 0x338   :  { %v3000_v6 = vrot.slane %v2999_v59, 2  ;;  %v3024_v46 = vrot.slane %v3023_v13, 4  ;;  %v6145_v35 = vsub.f32 2.0, %v6139_v57  ;;  %v6118_v15 = vadd.f32 58.5225, %v6112_v37  ;;  %v6064_v0 = vpop.f32.mrb[155].mxu1  ;;  %v14116_v43 = vpop.eup %14115 }
 0x339   :  { %v6108_v11 = vsub.f32 %v12381_v30, %v16989_v21  ;;  %v6152_v26 = vmul.f32 %v14112_v62, %v6146_v22  ;;  %v6117_v33 = vadd.f32 58.5225, %v6111_v41  ;;  %v6107_v58 = vsub.f32 %v6064_v0, %v16995_v14  ;;  %v14118_v47 = vpop.eup %14117 }
 0x33a   :  { %v3025_v12 = vadd.f32 %v3024_v46, %v3023_v13  ;;  %v6142_v42 = vmul.f32 %v14116_v43, %v6130_v40  ;;  %v6151_v38 = vmul.f32 %v14114_v53, %v6145_v35  ;;  %v3001_v5 = vadd.f32 %v3000_v6, %v2999_v59 }
 0x33b   :  { %v6114_v56 = vmul.f32 2.0, %v6108_v11  ;;  %v6141_v60 = vmul.f32 %v14118_v47, %v6129_v39  ;;  %v6158_v1 = vmul.f32 %v6152_v26, %v6116_v17  ;;  %v6113_v3 = vmul.f32 2.0, %v6107_v58  ;;  %v6429_v7 = vpop.f32.mrb[156].mxu1 }
 0x33c   :  { %v3026_v2 = vrot.slane %v3025_v12, 2  ;;  %v14120_v54 = vpop.eup %14119  ;;  %v6148_v20 = vsub.f32 2.0, %v6142_v42  ;;  %v6157_v21 = vmul.f32 %v6151_v38, %v6115_v50  ;;  %6444 = vst.msk [vmem:[#allocation13 + $0x48] sm:$0xff] %vm1587_vm2, %v6429_v7  ;;  %v12417_v24 = vpop.f32.mrb[157].mxu1  ;;  %v3002_v62 = vrot.slane %v3001_v5, 1 }
 0x33d   :  { %v6120_v55 = vadd.f32 58.5225, %v6114_v56  ;;  %v14122_v45 = vpop.eup %14121  ;;  %v6147_v14 = vsub.f32 2.0, %v6141_v60  ;;  %v6144_v31 = vmul.f32 %v14120_v54, %v6132_v48  ;;  %v6218_v40 = vmul.f32 %v16870_v63, %v6158_v1 }
 0x33e   :  { %v6119_v23 = vadd.f32 58.5225, %v6113_v3  ;;  %v6143_v53 = vmul.f32 %v14122_v45, %v6131_v9  ;;  %v6217_v39 = vmul.f32 %v16875_v44, %v6157_v21  ;;  %v6154_v52 = vmul.f32 %v14116_v43, %v6148_v20 }
 0x33f   :  { %v3003_v59 = vadd.f32 %v3002_v62, %v3001_v5  ;;  %v6150_v51 = vsub.f32 2.0, %v6144_v31  ;;  %v6224_v57 = vsel %vm1356_vm3, %v6218_v40, 0.0  ;;  %v6244_v17 = vmul.f32 %v6218_v40, %v17014_v28  ;;  %v6434_v13 = vpop.f32.mrb[158].mxu1 }
 0x340   :  { %v6153_v37 = vmul.f32 %v14118_v47, %v6147_v14  ;;  %v6149_v22 = vsub.f32 2.0, %v6143_v53  ;;  %v6223_v6 = vsel %vm1356_vm3, %v6217_v39, 0.0  ;;  %v6243_v48 = vmul.f32 %v6217_v39, %v17016_v25  ;;  %6445 = vst.msk [vmem:[#allocation13 + $0x50] sm:$0xff] %vm1587_vm2, %v6434_v13  ;;  %v12420_v63 = vpop.f32.mrb[159].mxu1 }
 0x341   :  { %v6160_v41 = vmul.f32 %v6154_v52, %v6118_v15  ;;  %13994 = vpush %v3003_v59  ;;  %v6250_v44 = vsel %vm1356_vm3, %v6244_v17, 0.0  ;;  %v6225_v9 = vadd.f32 %v6224_v57, %v6223_v6  ;;  %v6156_v30 = vmul.f32 %v14120_v54, %v6150_v51  ;;  %v9578_v63 = vpop.f32.mrb[240].mxu0 }
 0x342   :  { %v6159_v46 = vmul.f32 %v6153_v37, %v6117_v33  ;;  %v6249_v35 = vsel %vm1356_vm3, %v6243_v48, 0.0  ;;  %v6155_v50 = vmul.f32 %v14122_v45, %v6149_v22  ;;  %v3027_v11 = vadd.f32 %v3026_v2, %v3025_v12  ;;  %13004 = vmatmul.mubr.msk.f32.vlgmr.msra.gmra.mrb[240].mxu1 %vm129_vm0, %v9578_v63 }
 0x343   :  { %v6220_v28 = vmul.f32 %v16887_v34, %v6160_v41  ;;  %v6162_v43 = vmul.f32 %v6156_v30, %v6120_v55  ;;  %v6439_v25 = vpop.f32.mrb[160].mxu1  ;;  %v6251_v15 = vadd.f32 %v6250_v44, %v6249_v35  ;;  %13983 = vmatpush3.bf16.msra.mxu1 %v17480_v19  ;;  %13006 = vmatprep.mubr.msk.f32.mxu1 %vm14396_vm1, %v17471_v27 }
 0x344   :  { %v6219_v0 = vmul.f32 %v16892_v29, %v6159_v46  ;;  %v6161_v58 = vmul.f32 %v6155_v50, %v6119_v23  ;;  %v3028_v47 = vrot.slane %v3027_v11, 1  ;;  %6446 = vst.msk [vmem:[#allocation13 + $0x58] sm:$0xff] %vm1587_vm2, %v6439_v25  ;;  %v12423_v42 = vpop.f32.mrb[161].mxu1  ;;  %13984 = vmatprep.subr.bf16.mxu1 %v17474_v8 }
 0x345   :  { %v6246_v26 = vmul.f32 %v6220_v28, %v17022_v10  ;;  %v6222_v34 = vmul.f32 %v16904_v16, %v6162_v43  ;;  %v6228_v60 = vsel %vm1356_vm3, %v6220_v28, 0.0 }
 0x346   :  { %v6226_v33 = vsel %vm1356_vm3, %v6219_v0, 0.0  ;;  %v6245_v38 = vmul.f32 %v6219_v0, %v17024_v36  ;;  %v6221_v12 = vmul.f32 %v16907_v49, %v6161_v58  ;;  %v3029_v56 = vadd.f32 %v3028_v47, %v3027_v11 }
 0x347   :  { %v6227_v29 = vadd.f32 %v6226_v33, %v6225_v9  ;;  %v6602_v5 = vpop.f32.mrb[162].mxu1  ;;  %v6248_v10 = vmul.f32 %v6222_v34, %v17028_v61  ;;  %v6254_v49 = vsel %vm1356_vm3, %v6246_v26, 0.0  ;;  %v6232_v61 = vsel %vm1366_vm4, %v6222_v34, 0.0  ;;  %v12984_v9 = vpop.f32.mrb[241].mxu0  ;;  %13986 = vmatpush3.bf16.msra.mxu1 %v17489_v18 }
 0x348   :  { %v6252_v1 = vsel %vm1356_vm3, %v6245_v38, 0.0  ;;  %13996 = vpush %v3029_v56  ;;  %v12459_v2 = vpop.f32.mrb[163].mxu1  ;;  %v6230_v36 = vsel %vm1356_vm3, %v6221_v12, 0.0  ;;  %v6247_v16 = vmul.f32 %v6221_v12, %v17030_v32  ;;  %v9583_v19 = vpop.f32.mrb[242].mxu0  ;;  %13987 = vmatprep.subr.bf16.mxu1 %v17474_v8 }
 0x349   :  { %6617 = vst.msk [vmem:[#allocation14 + $0x48] sm:$0xff] %vm1587_vm2, %v6602_v5  ;;  %v6229_v3 = vadd.f32 %v6228_v60, %v6227_v29  ;;  %v6253_v7 = vadd.f32 %v6252_v1, %v6251_v15  ;;  %v6258_v14 = vsel %vm1366_vm4, %v6248_v10, 0.0  ;;  %v12987_v47 = vpop.f32.mrb[243].mxu0  ;;  %13007 = vmatmul.mubr.msk.f32.gmra.mrb[242].mxu1 %vm129_vm0, %v9583_v19 }
 0x34a   :  { %v6256_v21 = vsel %vm1356_vm3, %v6247_v16, 0.0  ;;  %13009 = vmatprep.mubr.msk.f32.mxu1 %vm14396_vm1, %v17471_v27  ;;  %v9588_v18 = vpop.f32.mrb[244].mxu0 }
 0x34b   :  { %v6231_v54 = vadd.f32 %v6230_v36, %v6229_v3  ;;  %v6255_v20 = vadd.f32 %v6254_v49, %v6253_v7  ;;  %v6607_v55 = vpop.f32.mrb[164].mxu1  ;;  %v12990_v3 = vpop.f32.mrb[245].mxu0  ;;  %13989 = vmatpush3.bf16.msra.mxu1 %v17490_v4 }
 0x34c   :  { %6618 = vst.msk [vmem:[#allocation14 + $0x50] sm:$0xff] %vm1587_vm2, %v6607_v55  ;;  %v12462_v24 = vpop.f32.mrb[165].mxu1 }
 0x34d   :  { %v6233_v62 = vadd.f32 %v6232_v61, %v6231_v54  ;;  %v6257_v45 = vadd.f32 %v6256_v21, %v6255_v20  ;;  %13010 = vmatmul.mubr.msk.f32.gmra.mrb[244].mxu1 %vm129_vm0, %v9588_v18  ;;  %v9751_v21 = vpop.f32.mrb[246].mxu0 }
 0x34e   :  { %13045 = vmatprep.mubr.msk.f32.mxu1 %vm14396_vm1, %v17471_v27  ;;  %v13026_v61 = vpop.f32.mrb[247].mxu0 }
 0x34f   :  { %6234 = vadd.xlane.f32.xlu0 %v6233_v62  ;;  %v6259_v31 = vadd.f32 %v6258_v14, %v6257_v45  ;;  %v6612_v32 = vpop.f32.mrb[166].mxu1  ;;  %v9756_v45 = vpop.f32.mrb[248].mxu0 }
 0x350   :  { %6619 = vst.msk [vmem:[#allocation14 + $0x58] sm:$0xff] %vm1587_vm2, %v6612_v32  ;;  %v12465_v40 = vpop.f32.mrb[167].mxu1 }
 0x351   :  { %6260 = vadd.xlane.f32.xlu1 %v6259_v31  ;;  %13046 = vmatmul.mubr.msk.f32.vlgmr.msra.gmra.mrb[246].mxu1 %vm129_vm0, %v9751_v21 }
 0x352   :  { %13048 = vmatprep.mubr.msk.f32.mxu1 %vm14396_vm1, %v17471_v27 }
 0x353   :  { %v12501_v23 = vpop.f32.mrb[168].mxu1 }
 0x354   :  { %v6813_v53 = vpop.f32.mrb[169].mxu1  ;;  %v17070_v17 = vmul.f32 %v12501_v23, %v12501_v23 }
 0x355   :  { %v17076_v6 = vmul.f32 %v6813_v53, %v6813_v53  ;;  %13049 = vmatmul.mubr.msk.f32.gmra.mrb[248].mxu1 %vm129_vm0, %v9756_v45 }
 0x356   :  { %13051 = vmatprep.mubr.msk.f32.mxu1 %vm14396_vm1, %v17471_v27 }
 0x357   :  { %v12504_v39 = vpop.f32.mrb[170].mxu1 }
 0x358   :  { %v6823_v52 = vpop.f32.mrb[171].mxu1  ;;  %v17090_v35 = vmul.f32 %v12504_v39, %v12504_v39 }
 0x359   :  { %v17097_v43 = vmul.f32 %v6823_v52, %v6823_v52 }
 0x35b   :  { %v12507_v59 = vpop.f32.mrb[172].mxu1 }
 0x35c   :  { %v6833_v51 = vpop.f32.mrb[173].mxu1  ;;  %v17111_v38 = vmul.f32 %v12507_v59, %v12507_v59 }
 0x35d   :  { %v17118_v5 = vmul.f32 %v6833_v51, %v6833_v51 }
 0x35f   :  { %v12543_v57 = vpop.f32.mrb[174].mxu1 }
 0x360   :  { %v17072_v37 = vmul.f32 %v12543_v57, %v12543_v57  ;;  %v17074_v13 = vmul.f32 %v12543_v57, %v12501_v23  ;;  %v7021_v22 = vpop.f32.mrb[175].mxu1  ;;  %v13029_v23 = vpop.f32.mrb[249].mxu0 }
 0x361   :  { %v17078_v48 = vmul.f32 %v7021_v22, %v7021_v22  ;;  %v17080_v41 = vmul.f32 %v7021_v22, %v6813_v53 }
 0x362   :  { %v7795_v44 = vadd.f32 %v17072_v37, %v17070_v17  ;;  %v7783_v31 = vmul.f32 2.0, %v17074_v13 }
 0x363   :  { %v7794_v46 = vadd.f32 %v17078_v48, %v17076_v6  ;;  %v12546_v30 = vpop.f32.mrb[176].mxu1  ;;  %v7782_v53 = vmul.f32 2.0, %v17080_v41 }
 0x364   :  { %v7801_v28 = vadd.f32 6.5025, %v7795_v44  ;;  %v17092_v50 = vmul.f32 %v12546_v30, %v12546_v30  ;;  %v17094_v11 = vmul.f32 %v12546_v30, %v12504_v39  ;;  %v7031_v0 = vpop.f32.mrb[177].mxu1  ;;  %v7789_v30 = vadd.f32 6.5025, %v7783_v31 }
 0x365   :  { %v7800_v25 = vadd.f32 6.5025, %v7794_v46  ;;  %v17099_v15 = vmul.f32 %v7031_v0, %v7031_v0  ;;  %v17101_v26 = vmul.f32 %v7031_v0, %v6823_v52  ;;  %v9761_v52 = vpop.f32.mrb[250].mxu0  ;;  %v7788_v19 = vadd.f32 6.5025, %v7782_v53 }
 0x366   :  { %14123 = vrcp.f32 %v7801_v28  ;;  %v7797_v58 = vadd.f32 %v17092_v50, %v17090_v35  ;;  %13052 = vmatmul.mubr.msk.f32.gmra.mrb[250].mxu1 %vm129_vm0, %v9761_v52 }
 0x367   :  { %14125 = vrcp.f32 %v7800_v25  ;;  %v7796_v42 = vadd.f32 %v17099_v15, %v17097_v43  ;;  %v12549_v33 = vpop.f32.mrb[178].mxu1  ;;  %v7784_v63 = vmul.f32 2.0, %v17101_v26 }
 0x368   :  { %v7803_v34 = vadd.f32 6.5025, %v7797_v58  ;;  %v17113_v12 = vmul.f32 %v12549_v33, %v12549_v33  ;;  %v17115_v56 = vmul.f32 %v12549_v33, %v12507_v59  ;;  %v7041_v29 = vpop.f32.mrb[179].mxu1 }
 0x369   :  { %v7802_v60 = vadd.f32 6.5025, %v7796_v42  ;;  %v17120_v10 = vmul.f32 %v7041_v29, %v7041_v29  ;;  %v17122_v1 = vmul.f32 %v7041_v29, %v6833_v51  ;;  %v7785_v51 = vmul.f32 2.0, %v17094_v11 }
 0x36a   :  { %14127 = vrcp.f32 %v7803_v34  ;;  %v7799_v2 = vadd.f32 %v17113_v12, %v17111_v38  ;;  %v7790_v27 = vadd.f32 6.5025, %v7784_v63 }
 0x36b   :  { %14129 = vrcp.f32 %v7802_v60  ;;  %v7798_v36 = vadd.f32 %v17120_v10, %v17118_v5  ;;  %v17129_v8 = vpop.f32.mrb[180].mxu1  ;;  %v7791_v33 = vadd.f32 6.5025, %v7785_v51 }
 0x36c   :  { %v7805_v16 = vadd.f32 6.5025, %v7799_v2  ;;  %v7711_v7 = vsub.f32 %v17129_v8, %v17070_v17  ;;  %v17136_v49 = vpop.f32.mrb[181].mxu1  ;;  %v13032_v17 = vpop.f32.mrb[251].mxu0 }
 0x36d   :  { %v7804_v54 = vadd.f32 6.5025, %v7798_v36  ;;  %v7710_v20 = vsub.f32 %v17136_v49, %v17076_v6  ;;  %v7787_v49 = vmul.f32 2.0, %v17115_v56 }
 0x36e   :  { %14131 = vrcp.f32 %v7805_v16 }
 0x36f   :  { %14133 = vrcp.f32 %v7804_v54  ;;  %v17140_v55 = vpop.f32.mrb[182].mxu1 }
 0x370   :  { %v14124_v4 = vpop.eup %14123  ;;  %v7713_v24 = vsub.f32 %v17140_v55, %v17090_v35  ;;  %v17145_v62 = vpop.f32.mrb[183].mxu1 }
 0x371   :  { %v14126_v14 = vpop.eup %14125  ;;  %v7813_v32 = vmul.f32 %v14124_v4, %v7801_v28  ;;  %v7712_v40 = vsub.f32 %v17145_v62, %v17097_v43 }
 0x372   :  { %v7812_v39 = vmul.f32 %v14126_v14, %v7800_v25 }
 0x373   :  { %v7819_v59 = vsub.f32 2.0, %v7813_v32  ;;  %v17154_v57 = vpop.f32.mrb[184].mxu1 }
 0x374   :  { %v14128_v22 = vpop.eup %14127  ;;  %v7818_v6 = vsub.f32 2.0, %v7812_v39  ;;  %v7715_v44 = vsub.f32 %v17154_v57, %v17111_v38  ;;  %v7255_v9 = vpop.f32.mrb[185].mxu1 }
 0x375   :  { %v14130_v46 = vpop.eup %14129  ;;  %v7825_v28 = vmul.f32 %v14124_v4, %v7819_v59  ;;  %v7815_v0 = vmul.f32 %v14128_v22, %v7803_v34  ;;  %v7714_v25 = vsub.f32 %v7255_v9, %v17118_v5  ;;  %v7786_v4 = vmul.f32 2.0, %v17122_v1 }
 0x376   :  { %v7824_v58 = vmul.f32 %v14126_v14, %v7818_v6  ;;  %v7814_v47 = vmul.f32 %v14130_v46, %v7802_v60 }
 0x377   :  { %v17163_v42 = vmul.f32 %v7825_v28, %v7789_v30  ;;  %v7821_v29 = vsub.f32 2.0, %v7815_v0  ;;  %v12627_v18 = vpop.f32.mrb[186].mxu1 }
 0x378   :  { %v14132_v38 = vpop.eup %14131  ;;  %v17166_v2 = vmul.f32 %v7824_v58, %v7788_v19  ;;  %v7820_v3 = vsub.f32 2.0, %v7814_v47  ;;  %v7717_v36 = vsub.f32 %v12627_v18, %v17072_v37  ;;  %v7449_v34 = vpop.f32.mrb[187].mxu1 }
 0x379   :  { %v14134_v8 = vpop.eup %14133  ;;  %v7827_v5 = vmul.f32 %v14128_v22, %v7821_v29  ;;  %v7817_v60 = vmul.f32 %v14132_v38, %v7805_v16  ;;  %v7716_v21 = vsub.f32 %v7449_v34, %v17078_v48  ;;  %v7793_v16 = vadd.f32 6.5025, %v7787_v49 }
 0x37a   :  { %v7826_v61 = vmul.f32 %v14130_v46, %v7820_v3  ;;  %v7816_v45 = vmul.f32 %v14134_v8, %v7804_v54  ;;  %v7741_v14 = vadd.f32 %v7717_v36, %v7711_v7  ;;  %v7792_v22 = vadd.f32 6.5025, %v7786_v4 }
 0x37b   :  { %v17172_v31 = vmul.f32 %v7827_v5, %v7791_v33  ;;  %v7823_v32 = vsub.f32 2.0, %v7817_v60  ;;  %v7740_v23 = vadd.f32 %v7716_v21, %v7710_v20  ;;  %v12630_v53 = vpop.f32.mrb[188].mxu1 }
 0x37c   :  { %v17174_v39 = vmul.f32 %v7826_v61, %v7790_v27  ;;  %v7822_v37 = vsub.f32 2.0, %v7816_v45  ;;  %v7747_v52 = vadd.f32 58.5225, %v7741_v14  ;;  %v7719_v59 = vsub.f32 %v12630_v53, %v17092_v50  ;;  %v7459_v51 = vpop.f32.mrb[189].mxu1 }
 0x37d   :  { %v7829_v57 = vmul.f32 %v14132_v38, %v7823_v32  ;;  %v7746_v48 = vadd.f32 58.5225, %v7740_v23  ;;  %v7718_v17 = vsub.f32 %v7459_v51, %v17099_v15 }
 0x37e   :  { %v7828_v54 = vmul.f32 %v14134_v8, %v7822_v37  ;;  %14135 = vrcp.f32 %v7747_v52  ;;  %v7743_v7 = vadd.f32 %v7719_v59, %v7713_v24 }
 0x37f   :  { %v17181_v20 = vmul.f32 %v7829_v57, %v7793_v16  ;;  %14137 = vrcp.f32 %v7746_v48  ;;  %v7742_v50 = vadd.f32 %v7718_v17, %v7712_v40  ;;  %v12633_v6 = vpop.f32.mrb[190].mxu1 }
 0x380   :  { %v17186_v63 = vmul.f32 %v7828_v54, %v7792_v22  ;;  %v7749_v9 = vadd.f32 58.5225, %v7743_v7  ;;  %v7721_v15 = vsub.f32 %v12633_v6, %v17113_v12  ;;  %v7469_v46 = vpop.f32.mrb[191].mxu1 }
 0x381   :  { %v7748_v30 = vadd.f32 58.5225, %v7742_v50  ;;  %v7720_v28 = vsub.f32 %v7469_v46, %v17120_v10 }
 0x382   :  { %14139 = vrcp.f32 %v7749_v9  ;;  %v7745_v35 = vadd.f32 %v7721_v15, %v7715_v44 }
 0x383   :  { %14141 = vrcp.f32 %v7748_v30  ;;  %v7744_v55 = vadd.f32 %v7720_v28, %v7714_v25  ;;  %v12669_v24 = vpop.f32.mrb[192].mxu1 }
 0x384   :  { %v7751_v0 = vadd.f32 58.5225, %v7745_v35  ;;  %v7723_v19 = vsub.f32 %v12669_v24, %v17074_v13  ;;  %v7663_v43 = vpop.f32.mrb[193].mxu1 }
 0x385   :  { %v7750_v62 = vadd.f32 58.5225, %v7744_v55  ;;  %v7722_v40 = vsub.f32 %v7663_v43, %v17080_v41 }
 0x386   :  { %14143 = vrcp.f32 %v7751_v0  ;;  %v7729_v58 = vmul.f32 2.0, %v7723_v19 }
 0x387   :  { %v4616_v47 = vpop.xlane.xlu0 %4615  ;;  %14145 = vrcp.f32 %v7750_v62  ;;  %v7728_v12 = vmul.f32 2.0, %v7722_v40  ;;  %v12672_v29 = vpop.f32.mrb[194].mxu1  ;;  %v17200_v40 = vld [vmem:[#allocation5] sm:$0xff] }
 0x388   :  { %v4617_v33 = vrot.slane %v4616_v47, 4  ;;  %v14136_v10 = vpop.eup %14135  ;;  %v7725_v44 = vsub.f32 %v12672_v29, %v17094_v11  ;;  %v7673_v18 = vpop.f32.mrb[195].mxu1  ;;  %v7735_v34 = vadd.f32 58.5225, %v7729_v58 }
 0x389   :  { %v14138_v25 = vpop.eup %14137  ;;  %v7759_v38 = vmul.f32 %v14136_v10, %v7747_v52  ;;  %v7724_v13 = vsub.f32 %v7673_v18, %v17101_v26  ;;  %v4642_v3 = vpop.xlane.xlu1 %4641  ;;  %v7734_v49 = vadd.f32 58.5225, %v7728_v12 }
 0x38a   :  { %v4618_v27 = vadd.f32 %v4617_v33, %v4616_v47  ;;  %v7758_v36 = vmul.f32 %v14138_v25, %v7746_v48  ;;  %v7731_v41 = vmul.f32 2.0, %v7725_v44  ;;  %v4643_v8 = vrot.slane %v4642_v3, 4 }
 0x38b   :  { %v7765_v5 = vsub.f32 2.0, %v7759_v38  ;;  %v7730_v21 = vmul.f32 2.0, %v7724_v13  ;;  %v12675_v61 = vpop.f32.mrb[196].mxu1 }
 0x38c   :  { %v4619_v60 = vrot.slane %v4618_v27, 2  ;;  %v14140_v4 = vpop.eup %14139  ;;  %v7764_v45 = vsub.f32 2.0, %v7758_v36  ;;  %v7737_v14 = vadd.f32 58.5225, %v7731_v41  ;;  %v4644_v11 = vadd.f32 %v4643_v8, %v4642_v3  ;;  %v7683_v23 = vpop.f32.mrb[197].mxu1  ;;  %v17209_v36 = vld [vmem:[#allocation5 + $0x18] sm:$0xff] }
 0x38d   :  { %v7727_v32 = vsub.f32 %v12675_v61, %v17115_v56  ;;  %v14142_v53 = vpop.eup %14141  ;;  %v7761_v37 = vmul.f32 %v14140_v4, %v7749_v9  ;;  %v7771_v26 = vmul.f32 %v14136_v10, %v7765_v5  ;;  %v7736_v52 = vadd.f32 58.5225, %v7730_v21  ;;  %v17213_v8 = vld [vmem:[#allocation5 + $0x10] sm:$0xff] }
 0x38e   :  { %v7726_v59 = vsub.f32 %v7683_v23, %v17122_v1  ;;  %v7760_v51 = vmul.f32 %v14142_v53, %v7748_v30  ;;  %v7770_v16 = vmul.f32 %v14138_v25, %v7764_v45  ;;  %v4645_v57 = vrot.slane %v4644_v11, 2  ;;  %v17197_v1 = vld [vmem:[#allocation5 + $0x8] sm:$0xff] }
 0x38f   :  { %v7733_v48 = vmul.f32 2.0, %v7727_v32  ;;  %v7767_v17 = vsub.f32 2.0, %v7761_v37  ;;  %v7777_v22 = vmul.f32 %v7771_v26, %v7735_v34  ;;  %v8048_v7 = vpop.f32.mrb[198].mxu1  ;;  %v4620_v50 = vadd.f32 %v4619_v60, %v4618_v27  ;;  %v17220_v37 = vld [vmem:[#allocation5 + $0x28] sm:$0x3f] }
 0x390   :  { %v7732_v54 = vmul.f32 2.0, %v7726_v59  ;;  %v14144_v6 = vpop.eup %14143  ;;  %v7766_v15 = vsub.f32 2.0, %v7760_v51  ;;  %v7776_v46 = vmul.f32 %v7770_v16, %v7734_v49  ;;  %8063 = vst.msk [vmem:[#allocation13 + $0x60] sm:$0xff] %vm1587_vm2, %v8048_v7  ;;  %v12711_v9 = vpop.f32.mrb[199].mxu1  ;;  %v4646_v28 = vadd.f32 %v4645_v57, %v4644_v11 }
 0x391   :  { %v7739_v56 = vadd.f32 58.5225, %v7733_v48  ;;  %v14146_v35 = vpop.eup %14145  ;;  %v7763_v55 = vmul.f32 %v14144_v6, %v7751_v0  ;;  %v7837_v30 = vmul.f32 %v17197_v1, %v7777_v22  ;;  %v7773_v24 = vmul.f32 %v14140_v4, %v7767_v17 }
 0x392   :  { %v7738_v19 = vadd.f32 58.5225, %v7732_v54  ;;  %v7762_v43 = vmul.f32 %v14146_v35, %v7750_v62  ;;  %v7836_v58 = vmul.f32 %v17200_v40, %v7776_v46  ;;  %v7772_v47 = vmul.f32 %v14142_v53, %v7766_v15 }
 0x393   :  { %v4621_v12 = vrot.slane %v4620_v50, 1  ;;  %v7769_v33 = vsub.f32 2.0, %v7763_v55  ;;  %v7843_v29 = vsel %vm1356_vm3, %v7837_v30, 0.0  ;;  %v7863_v10 = vmul.f32 %v7837_v30, %v17163_v42  ;;  %v8053_v0 = vpop.f32.mrb[200].mxu1 }
 0x394   :  { %v7779_v44 = vmul.f32 %v7773_v24, %v7737_v14  ;;  %v7768_v18 = vsub.f32 2.0, %v7762_v43  ;;  %v7842_v25 = vsel %vm1356_vm3, %v7836_v58, 0.0  ;;  %v7862_v38 = vmul.f32 %v7836_v58, %v17166_v2  ;;  %8064 = vst.msk [vmem:[#allocation13 + $0x68] sm:$0xff] %vm1587_vm2, %v8053_v0  ;;  %v12714_v62 = vpop.f32.mrb[201].mxu1 }
 0x395   :  { %v7778_v27 = vmul.f32 %v7772_v47, %v7736_v52  ;;  %v7869_v13 = vsel %vm1356_vm3, %v7863_v10, 0.0  ;;  %v7844_v3 = vadd.f32 %v7843_v29, %v7842_v25  ;;  %v7775_v41 = vmul.f32 %v14144_v6, %v7769_v33 }
 0x396   :  { %v7839_v34 = vmul.f32 %v17209_v36, %v7779_v44  ;;  %v7868_v42 = vsel %vm1356_vm3, %v7862_v38, 0.0  ;;  %v7774_v49 = vmul.f32 %v14146_v35, %v7768_v18  ;;  %v4622_v2 = vadd.f32 %v4621_v12, %v4620_v50 }
 0x397   :  { %v7838_v5 = vmul.f32 %v17213_v8, %v7778_v27  ;;  %v7781_v21 = vmul.f32 %v7775_v41, %v7739_v56  ;;  %v4647_v61 = vrot.slane %v4646_v28, 1  ;;  %v8058_v4 = vpop.f32.mrb[202].mxu1  ;;  %v7870_v23 = vadd.f32 %v7869_v13, %v7868_v42 }
 0x398   :  { %v7865_v60 = vmul.f32 %v7839_v34, %v17172_v31  ;;  %v7780_v11 = vmul.f32 %v7774_v49, %v7738_v19  ;;  %13998 = vpush %v4622_v2  ;;  %v12717_v32 = vpop.f32.mrb[203].mxu1  ;;  %v17223_v31 = vld [vmem:[#allocation5 + $0x20] sm:$0xff]  ;;  %v7847_v51 = vsel %vm1356_vm3, %v7839_v34, 0.0 }
 0x399   :  { %v7845_v45 = vsel %vm1356_vm3, %v7838_v5, 0.0  ;;  %v7864_v14 = vmul.f32 %v7838_v5, %v17174_v39  ;;  %8065 = vst.msk [vmem:[#allocation13 + $0x70] sm:$0xff] %vm1587_vm2, %v8058_v4  ;;  %v4648_v53 = vadd.f32 %v4647_v61, %v4646_v28  ;;  %v7841_v26 = vmul.f32 %v17220_v37, %v7781_v21 }
 0x39a   :  { %v7846_v52 = vadd.f32 %v7845_v45, %v7844_v3  ;;  %v7840_v59 = vmul.f32 %v17223_v31, %v7780_v11  ;;  %v7873_v50 = vsel %vm1356_vm3, %v7865_v60, 0.0 }
 0x39b   :  { %v7871_v39 = vsel %vm1356_vm3, %v7864_v14, 0.0  ;;  %14000 = vpush %v4648_v53  ;;  %v8221_v16 = vpop.f32.mrb[204].mxu1  ;;  %v7867_v48 = vmul.f32 %v7841_v26, %v17181_v20  ;;  %v7851_v46 = vsel %vm1366_vm4, %v7841_v26, 0.0 }
 0x39c   :  { %v7848_v57 = vadd.f32 %v7847_v51, %v7846_v52  ;;  %v7872_v17 = vadd.f32 %v7871_v39, %v7870_v23  ;;  %8236 = vst.msk [vmem:[#allocation14 + $0x60] sm:$0xff] %vm1587_vm2, %v8221_v16  ;;  %v12753_v22 = vpop.f32.mrb[205].mxu1  ;;  %v7849_v54 = vsel %vm1356_vm3, %v7840_v59, 0.0  ;;  %v7866_v7 = vmul.f32 %v7840_v59, %v17186_v63 }
 0x39d   :  { %v7877_v55 = vsel %vm1366_vm4, %v7867_v48, 0.0 }
 0x39e   :  { %v7850_v6 = vadd.f32 %v7849_v54, %v7848_v57  ;;  %v7874_v15 = vadd.f32 %v7873_v50, %v7872_v17  ;;  %v7875_v56 = vsel %vm1356_vm3, %v7866_v7, 0.0 }
 0x39f   :  { %v8226_v9 = vpop.f32.mrb[206].mxu1 }
 0x3a0   :  { %v7852_v28 = vadd.f32 %v7851_v46, %v7850_v6  ;;  %v7876_v35 = vadd.f32 %v7875_v56, %v7874_v15  ;;  %8237 = vst.msk [vmem:[#allocation14 + $0x68] sm:$0xff] %vm1587_vm2, %v8226_v9  ;;  %v12756_v20 = vpop.f32.mrb[207].mxu1 }
 0x3a2   :  { %7853 = vadd.xlane.f32.xlu0 %v7852_v28  ;;  %v7878_v30 = vadd.f32 %v7877_v55, %v7876_v35 }
 0x3a3   :  { %v8231_v24 = vpop.f32.mrb[208].mxu1 }
 0x3a4   :  { %7879 = vadd.xlane.f32.xlu1 %v7878_v30  ;;  %8238 = vst.msk [vmem:[#allocation14 + $0x70] sm:$0xff] %vm1587_vm2, %v8231_v24  ;;  %v12759_v63 = vpop.f32.mrb[209].mxu1 }
 0x3a7   :  { %v12795_v19 = vpop.f32.mrb[210].mxu1 }
 0x3a8   :  { %v8432_v43 = vpop.f32.mrb[211].mxu1  ;;  %v17238_v10 = vmul.f32 %v12795_v19, %v12795_v19 }
 0x3a9   :  { %v17244_v25 = vmul.f32 %v8432_v43, %v8432_v43 }
 0x3ab   :  { %v12798_v58 = vpop.f32.mrb[212].mxu1 }
 0x3ac   :  { %v8442_v47 = vpop.f32.mrb[213].mxu1  ;;  %v17254_v34 = vmul.f32 %v12798_v58, %v12798_v58 }
 0x3ad   :  { %v17260_v2 = vmul.f32 %v8442_v47, %v8442_v47 }
 0x3af   :  { %v12801_v12 = vpop.f32.mrb[214].mxu1 }
 0x3b0   :  { %v8452_v33 = vpop.f32.mrb[215].mxu1  ;;  %v17270_v11 = vmul.f32 %v12801_v12, %v12801_v12 }
 0x3b1   :  { %v17276_v52 = vmul.f32 %v8452_v33, %v8452_v33 }
 0x3b3   :  { %v12837_v29 = vpop.f32.mrb[216].mxu1 }
 0x3b4   :  { %v17240_v44 = vmul.f32 %v12837_v29, %v12837_v29  ;;  %v17242_v0 = vmul.f32 %v12837_v29, %v12795_v19  ;;  %v8640_v18 = vpop.f32.mrb[217].mxu1 }
 0x3b5   :  { %v17246_v38 = vmul.f32 %v8640_v18, %v8640_v18  ;;  %v17248_v27 = vmul.f32 %v8640_v18, %v8432_v43 }
 0x3b6   :  { %v9414_v62 = vadd.f32 %v17240_v44, %v17238_v10  ;;  %v9402_v28 = vmul.f32 2.0, %v17242_v0 }
 0x3b7   :  { %v9413_v13 = vadd.f32 %v17246_v38, %v17244_v25  ;;  %v9401_v55 = vmul.f32 2.0, %v17248_v27 }
 0x3b8   :  { %v12840_v3 = vpop.f32.mrb[218].mxu1  ;;  %v9420_v41 = vadd.f32 6.5025, %v9414_v62 }
 0x3b9   :  { %v17256_v42 = vmul.f32 %v12840_v3, %v12840_v3  ;;  %v17258_v5 = vmul.f32 %v12840_v3, %v12798_v58  ;;  %v8650_v49 = vpop.f32.mrb[219].mxu1  ;;  %v9419_v60 = vadd.f32 6.5025, %v9413_v13  ;;  %v9407_v13 = vadd.f32 6.5025, %v9401_v55 }
 0x3ba   :  { %v17262_v21 = vmul.f32 %v8650_v49, %v8650_v49  ;;  %v17264_v61 = vmul.f32 %v8650_v49, %v8442_v47  ;;  %14147 = vrcp.f32 %v9420_v41 }
 0x3bb   :  { %v9416_v4 = vadd.f32 %v17256_v42, %v17254_v34  ;;  %14149 = vrcp.f32 %v9419_v60  ;;  %v9404_v63 = vmul.f32 2.0, %v17258_v5 }
 0x3bc   :  { %v9415_v45 = vadd.f32 %v17262_v21, %v17260_v2  ;;  %v12843_v14 = vpop.f32.mrb[220].mxu1  ;;  %v9403_v47 = vmul.f32 2.0, %v17264_v61 }
 0x3bd   :  { %v9422_v32 = vadd.f32 6.5025, %v9416_v4  ;;  %v17272_v23 = vmul.f32 %v12843_v14, %v12843_v14  ;;  %v17274_v53 = vmul.f32 %v12843_v14, %v12801_v12  ;;  %v8660_v26 = vpop.f32.mrb[221].mxu1  ;;  %v9410_v49 = vadd.f32 6.5025, %v9404_v63 }
 0x3be   :  { %v9421_v59 = vadd.f32 6.5025, %v9415_v45  ;;  %v17278_v51 = vmul.f32 %v8660_v26, %v8660_v26  ;;  %v17280_v39 = vmul.f32 %v8660_v26, %v8452_v33  ;;  %v9409_v14 = vadd.f32 6.5025, %v9403_v47 }
 0x3bf   :  { %14151 = vrcp.f32 %v9422_v32  ;;  %v9418_v16 = vadd.f32 %v17272_v23, %v17270_v11 }
 0x3c0   :  { %14153 = vrcp.f32 %v9421_v59  ;;  %v9417_v57 = vadd.f32 %v17278_v51, %v17276_v52  ;;  %v12879_v48 = vpop.f32.mrb[222].mxu1 }
 0x3c1   :  { %v9424_v17 = vadd.f32 6.5025, %v9418_v16  ;;  %v9330_v22 = vsub.f32 %v12879_v48, %v17238_v10  ;;  %v8854_v54 = vpop.f32.mrb[223].mxu1  ;;  %v9408_v10 = vadd.f32 6.5025, %v9402_v28 }
 0x3c2   :  { %v9423_v7 = vadd.f32 6.5025, %v9417_v57  ;;  %v9329_v50 = vsub.f32 %v8854_v54, %v17244_v25 }
 0x3c3   :  { %14155 = vrcp.f32 %v9424_v17 }
 0x3c4   :  { %14157 = vrcp.f32 %v9423_v7  ;;  %v12882_v6 = vpop.f32.mrb[224].mxu1  ;;  %v14148_v15 = vpop.eup %14147 }
 0x3c5   :  { %v9332_v46 = vsub.f32 %v12882_v6, %v17254_v34  ;;  %v8864_v56 = vpop.f32.mrb[225].mxu1  ;;  %v14150_v9 = vpop.eup %14149  ;;  %v9432_v35 = vmul.f32 %v14148_v15, %v9420_v41  ;;  %v9405_v6 = vmul.f32 2.0, %v17280_v39 }
 0x3c6   :  { %v9331_v20 = vsub.f32 %v8864_v56, %v17260_v2  ;;  %v9431_v30 = vmul.f32 %v14150_v9, %v9419_v60 }
 0x3c7   :  { %v9438_v24 = vsub.f32 2.0, %v9432_v35  ;;  %v9411_v47 = vadd.f32 6.5025, %v9405_v6 }
 0x3c8   :  { %v12885_v19 = vpop.f32.mrb[226].mxu1  ;;  %v9437_v58 = vsub.f32 2.0, %v9431_v30 }
 0x3c9   :  { %v14152_v43 = vpop.eup %14151  ;;  %v9334_v12 = vsub.f32 %v12885_v19, %v17270_v11  ;;  %v8874_v33 = vpop.f32.mrb[227].mxu1  ;;  %v9444_v18 = vmul.f32 %v14148_v15, %v9438_v24 }
 0x3ca   :  { %v14154_v29 = vpop.eup %14153  ;;  %v9434_v25 = vmul.f32 %v14152_v43, %v9422_v32  ;;  %v9333_v62 = vsub.f32 %v8874_v33, %v17276_v52  ;;  %v9443_v3 = vmul.f32 %v14150_v9, %v9437_v58  ;;  %v9406_v52 = vmul.f32 2.0, %v17274_v53 }
 0x3cb   :  { %v9433_v34 = vmul.f32 %v14154_v29, %v9421_v59  ;;  %v17296_v41 = vmul.f32 %v9444_v18, %v9408_v10 }
 0x3cc   :  { %v9440_v2 = vsub.f32 2.0, %v9434_v25  ;;  %v12921_v60 = vpop.f32.mrb[228].mxu1  ;;  %v17298_v45 = vmul.f32 %v9443_v3, %v9407_v13 }
 0x3cd   :  { %v14156_v4 = vpop.eup %14155  ;;  %v9439_v11 = vsub.f32 2.0, %v9433_v34  ;;  %v9336_v26 = vsub.f32 %v12921_v60, %v17240_v44  ;;  %v9068_v16 = vpop.f32.mrb[229].mxu1 }
 0x3ce   :  { %v14158_v57 = vpop.eup %14157  ;;  %v9446_v32 = vmul.f32 %v14152_v43, %v9440_v2  ;;  %v9436_v48 = vmul.f32 %v14156_v4, %v9424_v17  ;;  %v9335_v59 = vsub.f32 %v9068_v16, %v17246_v38  ;;  %v9412_v17 = vadd.f32 6.5025, %v9406_v52 }
 0x3cf   :  { %v9445_v54 = vmul.f32 %v14154_v29, %v9439_v11  ;;  %v9435_v15 = vmul.f32 %v14158_v57, %v9423_v7  ;;  %v9360_v56 = vadd.f32 %v9336_v26, %v9330_v22 }
 0x3d0   :  { %v17304_v9 = vmul.f32 %v9446_v32, %v9410_v49  ;;  %v9442_v28 = vsub.f32 2.0, %v9436_v48  ;;  %v9359_v35 = vadd.f32 %v9335_v59, %v9329_v50  ;;  %v12924_v55 = vpop.f32.mrb[230].mxu1 }
 0x3d1   :  { %v17306_v30 = vmul.f32 %v9445_v54, %v9409_v14  ;;  %v9441_v44 = vsub.f32 2.0, %v9435_v15  ;;  %v9366_v24 = vadd.f32 58.5225, %v9360_v56  ;;  %v9338_v63 = vsub.f32 %v12924_v55, %v17256_v42  ;;  %v9078_v19 = vpop.f32.mrb[231].mxu1 }
 0x3d2   :  { %v9448_v43 = vmul.f32 %v14156_v4, %v9442_v28  ;;  %v9365_v38 = vadd.f32 58.5225, %v9359_v35  ;;  %v9337_v58 = vsub.f32 %v9078_v19, %v17262_v21 }
 0x3d3   :  { %v9447_v7 = vmul.f32 %v14158_v57, %v9441_v44  ;;  %14159 = vrcp.f32 %v9366_v24  ;;  %v9362_v22 = vadd.f32 %v9338_v63, %v9332_v46 }
 0x3d4   :  { %v17310_v33 = vmul.f32 %v9448_v43, %v9412_v17  ;;  %14161 = vrcp.f32 %v9365_v38  ;;  %v9361_v50 = vadd.f32 %v9337_v58, %v9331_v20  ;;  %v12927_v29 = vpop.f32.mrb[232].mxu1 }
 0x3d5   :  { %v17312_v10 = vmul.f32 %v9447_v7, %v9411_v47  ;;  %v9368_v18 = vadd.f32 58.5225, %v9362_v22  ;;  %v9340_v42 = vsub.f32 %v12927_v29, %v17272_v23  ;;  %v9088_v25 = vpop.f32.mrb[233].mxu1 }
 0x3d6   :  { %v9367_v13 = vadd.f32 58.5225, %v9361_v50  ;;  %v9339_v3 = vsub.f32 %v9088_v25, %v17278_v51 }
 0x3d7   :  { %14163 = vrcp.f32 %v9368_v18  ;;  %v9364_v21 = vadd.f32 %v9340_v42, %v9334_v12 }
 0x3d8   :  { %14165 = vrcp.f32 %v9367_v13  ;;  %v9363_v34 = vadd.f32 %v9339_v3, %v9333_v62  ;;  %v12963_v49 = vpop.f32.mrb[234].mxu1 }
 0x3d9   :  { %v9370_v46 = vadd.f32 58.5225, %v9364_v21  ;;  %v9342_v2 = vsub.f32 %v12963_v49, %v17242_v0  ;;  %v9282_v60 = vpop.f32.mrb[235].mxu1 }
 0x3da   :  { %v9369_v20 = vadd.f32 58.5225, %v9363_v34  ;;  %v9341_v4 = vsub.f32 %v9282_v60, %v17248_v27 }
 0x3db   :  { %14167 = vrcp.f32 %v9370_v46  ;;  %v9348_v14 = vmul.f32 2.0, %v9342_v2 }
 0x3dc   :  { %14169 = vrcp.f32 %v9369_v20  ;;  %v9347_v23 = vmul.f32 2.0, %v9341_v4  ;;  %v6235_v11 = vpop.xlane.xlu0 %6234  ;;  %v12966_v26 = vpop.f32.mrb[236].mxu1 }
 0x3dd   :  { %v14160_v16 = vpop.eup %14159  ;;  %v6236_v51 = vrot.slane %v6235_v11, 4  ;;  %v9344_v12 = vsub.f32 %v12966_v26, %v17258_v5  ;;  %v9292_v57 = vpop.f32.mrb[237].mxu1  ;;  %v9354_v52 = vadd.f32 58.5225, %v9348_v14 }
 0x3de   :  { %v14162_v62 = vpop.eup %14161  ;;  %v9378_v32 = vmul.f32 %v14160_v16, %v9366_v24  ;;  %v9343_v0 = vsub.f32 %v9292_v57, %v17264_v61  ;;  %v6261_v48 = vpop.xlane.xlu1 %6260  ;;  %v9353_v56 = vadd.f32 58.5225, %v9347_v23 }
 0x3df   :  { %v9377_v59 = vmul.f32 %v14162_v62, %v9365_v38  ;;  %v6237_v54 = vadd.f32 %v6236_v51, %v6235_v11  ;;  %v9350_v27 = vmul.f32 2.0, %v9344_v12  ;;  %v6262_v6 = vrot.slane %v6261_v48, 4 }
 0x3e0   :  { %v9384_v15 = vsub.f32 2.0, %v9378_v32  ;;  %v9349_v28 = vmul.f32 2.0, %v9343_v0  ;;  %v12969_v35 = vpop.f32.mrb[238].mxu1 }
 0x3e1   :  { %v14164_v55 = vpop.eup %14163  ;;  %v9383_v44 = vsub.f32 2.0, %v9377_v59  ;;  %v6238_v63 = vrot.slane %v6237_v54, 2  ;;  %v9356_v19 = vadd.f32 58.5225, %v9350_v27  ;;  %v6263_v5 = vadd.f32 %v6262_v6, %v6261_v48  ;;  %v9302_v17 = vpop.f32.mrb[239].mxu1 }
 0x3e2   :  { %v14166_v43 = vpop.eup %14165  ;;  %v9380_v24 = vmul.f32 %v14164_v55, %v9368_v18  ;;  %v9390_v58 = vmul.f32 %v14160_v16, %v9384_v15  ;;  %v9355_v47 = vadd.f32 58.5225, %v9349_v28  ;;  %v9346_v61 = vsub.f32 %v12969_v35, %v17274_v53 }
 0x3e3   :  { %v9379_v38 = vmul.f32 %v14166_v43, %v9367_v13  ;;  %v9389_v7 = vmul.f32 %v14162_v62, %v9383_v44  ;;  %v6264_v22 = vrot.slane %v6263_v5, 2  ;;  %v9345_v50 = vsub.f32 %v9302_v17, %v17280_v39 }
 0x3e4   :  { %v9386_v29 = vsub.f32 2.0, %v9380_v24  ;;  %v9396_v42 = vmul.f32 %v9390_v58, %v9354_v52  ;;  %v9352_v25 = vmul.f32 2.0, %v9346_v61  ;;  %v6239_v3 = vadd.f32 %v6238_v63, %v6237_v54 }
 0x3e5   :  { %v14168_v21 = vpop.eup %14167  ;;  %v9385_v34 = vsub.f32 2.0, %v9379_v38  ;;  %v9395_v49 = vmul.f32 %v9389_v7, %v9353_v56  ;;  %v9351_v2 = vmul.f32 2.0, %v9345_v50  ;;  %v6265_v60 = vadd.f32 %v6264_v22, %v6263_v5 }
 0x3e6   :  { %v14170_v4 = vpop.eup %14169  ;;  %v9382_v18 = vmul.f32 %v14168_v21, %v9370_v46  ;;  %v9456_v14 = vmul.f32 %v17197_v1, %v9396_v42  ;;  %v9392_v23 = vmul.f32 %v14164_v55, %v9386_v29  ;;  %v9358_v53 = vadd.f32 58.5225, %v9352_v25 }
 0x3e7   :  { %v9381_v13 = vmul.f32 %v14170_v4, %v9369_v20  ;;  %v9455_v11 = vmul.f32 %v17200_v40, %v9395_v49  ;;  %v9391_v26 = vmul.f32 %v14166_v43, %v9385_v34  ;;  %v9357_v39 = vadd.f32 58.5225, %v9351_v2 }
 0x3e8   :  { %v9388_v16 = vsub.f32 2.0, %v9382_v18  ;;  %v9462_v51 = vsel %vm1356_vm3, %v9456_v14, 0.0  ;;  %v9482_v12 = vmul.f32 %v9456_v14, %v17296_v41  ;;  %v9398_v57 = vmul.f32 %v9392_v23, %v9356_v19 }
 0x3e9   :  { %v9387_v62 = vsub.f32 2.0, %v9381_v13  ;;  %v9461_v32 = vsel %vm1356_vm3, %v9455_v11, 0.0  ;;  %v9481_v46 = vmul.f32 %v9455_v11, %v17298_v45  ;;  %v9397_v52 = vmul.f32 %v9391_v26, %v9355_v47 }
 0x3ea   :  { %v9488_v1 = vsel %vm1356_vm3, %v9482_v12, 0.0  ;;  %v9463_v0 = vadd.f32 %v9462_v51, %v9461_v32  ;;  %v9458_v20 = vmul.f32 %v17209_v36, %v9398_v57  ;;  %v9394_v40 = vmul.f32 %v14168_v21, %v9388_v16 }
 0x3eb   :  { %v9487_v48 = vsel %vm1356_vm3, %v9481_v46, 0.0  ;;  %v9457_v59 = vmul.f32 %v17213_v8, %v9397_v52  ;;  %v9393_v54 = vmul.f32 %v14170_v4, %v9387_v62  ;;  %v6240_v27 = vrot.slane %v6239_v3, 1 }
 0x3ec   :  { %v9484_v41 = vmul.f32 %v9458_v20, %v17304_v9  ;;  %v9400_v6 = vmul.f32 %v9394_v40, %v9358_v53  ;;  %v6266_v15 = vrot.slane %v6265_v60, 1  ;;  %v9489_v63 = vadd.f32 %v9488_v1, %v9487_v48 }
 0x3ed   :  { %v9464_v56 = vsel %vm1356_vm3, %v9457_v59, 0.0  ;;  %v9483_v45 = vmul.f32 %v9457_v59, %v17306_v30  ;;  %v9399_v28 = vmul.f32 %v9393_v54, %v9357_v39  ;;  %v6241_v35 = vadd.f32 %v6240_v27, %v6239_v3 }
 0x3ee   :  { %v6267_v55 = vadd.f32 %v6266_v15, %v6265_v60  ;;  %v9460_v36 = vmul.f32 %v17220_v37, %v9400_v6  ;;  %v9465_v44 = vadd.f32 %v9464_v56, %v9463_v0  ;;  %v9466_v8 = vsel %vm1356_vm3, %v9458_v20, 0.0 }
 0x3ef   :  { %v9459_v19 = vmul.f32 %v17223_v31, %v9399_v28  ;;  %14002 = vpush %v6241_v35  ;;  %v9490_v9 = vsel %vm1356_vm3, %v9483_v45, 0.0  ;;  %v9492_v37 = vsel %vm1356_vm3, %v9484_v41, 0.0 }
 0x3f0   :  { %14004 = vpush %v6267_v55  ;;  %v9467_v5 = vadd.f32 %v9466_v8, %v9465_v44  ;;  %v9486_v17 = vmul.f32 %v9460_v36, %v17310_v33  ;;  %v9491_v43 = vadd.f32 %v9490_v9, %v9489_v63  ;;  %v9470_v31 = vsel %vm1366_vm4, %v9460_v36, 0.0 }
 0x3f1   :  { %v9468_v30 = vsel %vm1356_vm3, %v9459_v19, 0.0  ;;  %v9485_v24 = vmul.f32 %v9459_v19, %v17312_v10 }
 0x3f2   :  { %v9469_v58 = vadd.f32 %v9468_v30, %v9467_v5  ;;  %v9493_v47 = vadd.f32 %v9492_v37, %v9491_v43  ;;  %v9496_v22 = vsel %vm1366_vm4, %v9486_v17, 0.0 }
 0x3f3   :  { %v9494_v61 = vsel %vm1356_vm3, %v9485_v24, 0.0 }
 0x3f4   :  { %v9471_v38 = vadd.f32 %v9470_v31, %v9469_v58  ;;  %v9495_v7 = vadd.f32 %v9494_v61, %v9493_v47 }
 0x3f6   :  { %9472 = vadd.xlane.f32.xlu0 %v9471_v38  ;;  %v9497_v50 = vadd.f32 %v9496_v22, %v9495_v7 }
 0x3f8   :  { %9498 = vadd.xlane.f32.xlu1 %v9497_v50 }
 0x415   :  { %v9667_v2 = vpop.f32.mrb[240].mxu1 }
 0x416   :  { %9682 = vst.msk [vmem:[#allocation13 + $0x78] sm:$0xff] %vm1587_vm2, %v9667_v2  ;;  %v13005_v60 = vpop.f32.mrb[241].mxu1 }
 0x41c   :  { %v9672_v53 = vpop.f32.mrb[242].mxu1 }
 0x41d   :  { %9683 = vst.msk [vmem:[#allocation13 + $0x80] sm:$0xff] %vm1587_vm2, %v9672_v53  ;;  %v13008_v13 = vpop.f32.mrb[243].mxu1 }
 0x420   :  { %v9677_v26 = vpop.f32.mrb[244].mxu1 }
 0x421   :  { %9684 = vst.msk [vmem:[#allocation13 + $0x88] sm:$0xff] %vm1587_vm2, %v9677_v26  ;;  %v13011_v39 = vpop.f32.mrb[245].mxu1 }
 0x424   :  { %v9840_v16 = vpop.f32.mrb[246].mxu1 }
 0x425   :  { %9855 = vst.msk [vmem:[#allocation14 + $0x78] sm:$0xff] %vm1587_vm2, %v9840_v16  ;;  %v13047_v51 = vpop.f32.mrb[247].mxu1 }
 0x428   :  { %v9845_v12 = vpop.f32.mrb[248].mxu1 }
 0x429   :  { %9856 = vst.msk [vmem:[#allocation14 + $0x80] sm:$0xff] %vm1587_vm2, %v9845_v12  ;;  %v13050_v57 = vpop.f32.mrb[249].mxu1 }
 0x42f   :  { %v7854_v33 = vpop.xlane.xlu0 %7853 }
 0x430   :  { %v7855_v29 = vrot.slane %v7854_v33, 4 }
 0x431   :  { %v7880_v42 = vpop.xlane.xlu1 %7879 }
 0x432   :  { %v7856_v25 = vadd.f32 %v7855_v29, %v7854_v33  ;;  %v7881_v10 = vrot.slane %v7880_v42, 4 }
 0x434   :  { %v7857_v3 = vrot.slane %v7856_v25, 2  ;;  %v7882_v21 = vadd.f32 %v7881_v10, %v7880_v42 }
 0x436   :  { %v7883_v34 = vrot.slane %v7882_v21, 2  ;;  %v7858_v49 = vadd.f32 %v7857_v3, %v7856_v25 }
 0x438   :  { %v7859_v4 = vrot.slane %v7858_v49, 1  ;;  %v7884_v18 = vadd.f32 %v7883_v34, %v7882_v21 }
 0x439   :  { %v9850_v62 = vpop.f32.mrb[250].mxu1 }
 0x43a   :  { %v7860_v14 = vadd.f32 %v7859_v4, %v7858_v49  ;;  %v7885_v23 = vrot.slane %v7884_v18, 1  ;;  %9857 = vst.msk [vmem:[#allocation14 + $0x88] sm:$0xff] %vm1587_vm2, %v9850_v62  ;;  %v13053_v32 = vpop.f32.mrb[251].mxu1 }
 0x43c   :  { %14006 = vpush %v7860_v14  ;;  %v7886_v11 = vadd.f32 %v7885_v23, %v7884_v18 }
 0x43e   :  { %14008 = vpush %v7886_v11 }
 0x43f   :  { %14300 = shalt.err (!%p14297_p8)
}
 0x440   :  { %s14301_s22 = scalar_lea.hbm %s17451_s10, 2304 }
 0x441   :  { %p14302_p9 = scmp.ne.s32.totalorder %s17451_s10, %s14301_s22  ;;  %p14305_p10 = scmp.lt.u32.totalorder %s14301_s22, %s17451_s10 }
 0x443   :  { %p14307_p11 = pnand %p14305_p10, %p14302_p9 }
 0x445   :  { %14310 = shalt.err (!%p14307_p11)
}
 0x446   :  { %9903 = dma.vmem_to_hbm [thread:$0]  %s9898_s21, 2304, %s17451_s10, [#allocation15], %s14391_s25, %s14391_s25, %s14392_s26   ;;  %v115_v45 = vlaneseq }
 0x447   :  { %s13991_s11 = spop %13990  ;;  %s14399_s18 = smov [#allocation11]  }
 0x448   :  { %s13993_s1 = spop %13992  ;;  %v116_v28 = vand.u32 127, %v115_v45  ;;  %v1407_v35 = vstv %s13991_s11  ;;  %s9876_s2 = sshll.u32 %s14399_s18, 4  ;;  %s9877_s2 = int_to_ptr.vmem [resolvable:$true] %s9876_s2 }
 0x449   :  { %s13995_s10 = spop %13994  ;;  %v1405_v36 = vstv %s13993_s1  ;;  %s14400_s14 = smov [#allocation13]  }
 0x44a   :  { %s17367_s16 = spop %13996  ;;  %vm1404_vm5 = vcmp.eq.s32.totalorder %v116_v28, 0  ;;  %vm3031_vm6 = vcmp.eq.s32.totalorder %v116_v28, 1  ;;  %v3034_v55 = vstv %s13995_s10  ;;  %vm4650_vm7 = vcmp.eq.s32.totalorder %v116_v28, 2  ;;  %s9885_s19 = sshll.u32 %s14400_s14, 4  ;;  %s17386_s19 = int_to_ptr.vmem [resolvable:$true] %s9885_s19 }
 0x44b   :  { %s13999_s12 = spop %13998  ;;  %v1408_v63 = vsel %vm1404_vm5, %v1407_v35, 0.0  ;;  %v3032_v19 = vstv %s17367_s16  ;;  %vm6269_vm8 = vcmp.eq.s32.totalorder %v116_v28, 3  ;;  %vm7888_vm9 = vcmp.eq.s32.totalorder %v116_v28, 4  ;;  %s14401_s21 = smov [#allocation10]  }
 0x44c   :  { %s17369_s6 = spop %14000  ;;  %v4653_v44 = vstv %s13999_s12  ;;  %v3035_v9 = vsel %vm3031_vm6, %v3034_v55, %v1408_v63  ;;  %v1406_v43 = vsel %vm1404_vm5, %v1405_v36, 0.0  ;;  %vm9507_vm10 = vcmp.eq.s32.totalorder %v116_v28, 5  ;;  %s9866_s3 = sshll.u32 %s14401_s21, 4  ;;  %s17389_s3 = int_to_ptr.vmem [resolvable:$true] %s9866_s3 }
 0x44d   :  { %s14003_s13 = spop %14002  ;;  %v4651_v5 = vstv %s17369_s6  ;;  %v4654_v30 = vsel %vm4650_vm7, %v4653_v44, %v3035_v9  ;;  %v3033_v37 = vsel %vm3031_vm6, %v3032_v19, %v1406_v43  ;;  %s14311_s4 = scalar_lea.vmem %s9877_s2, 128 }
 0x44e   :  { %s17371_s15 = spop %14004  ;;  %v6272_v8 = vstv %s14003_s13  ;;  %v4652_v31 = vsel %vm4650_vm7, %v4651_v5, %v3033_v37  ;;  %p14312_p12 = scmp.ne.s32.totalorder %s9877_s2, %s14311_s4 }
 0x44f   :  { %v6270_v24 = vstv %s17371_s15  ;;  %v6273_v58 = vsel %vm6269_vm8, %v6272_v8, %v4654_v30  ;;  %p14316_p13 = scmp.lt.s32.totalorder %s9877_s2, %s9877_s2  ;;  %p14317_p0 = scmp.lt.s32.totalorder %s14311_s4, %s14311_s4 }
 0x450   :  { %v6271_v7 = vsel %vm6269_vm8, %v6270_v24, %v4652_v31 }
 0x451   :  { %p14318_p1 = por %p14317_p0, %p14316_p13 }
 0x453   :  { %p14319_p2 = pnand %p14318_p1, %p14312_p12 }
 0x46d   :  { %s14007_s0 = spop %14006 }
 0x46e   :  { %v7891_v17 = vstv %s14007_s0 }
 0x46f   :  { %s14009_s17 = spop %14008  ;;  %v7892_v61 = vsel %vm7888_vm9, %v7891_v17, %v6273_v58 }
 0x470   :  { %v7889_v47 = vstv %s14009_s17 }
 0x471   :  { %v7890_v50 = vsel %vm7888_vm9, %v7889_v47, %v6271_v7 }
 0x483   :  { %v9473_v46 = vpop.xlane.xlu0 %9472 }
 0x484   :  { %v9474_v52 = vrot.slane %v9473_v46, 4 }
 0x485   :  { %v9499_v1 = vpop.xlane.xlu1 %9498 }
 0x486   :  { %v9475_v0 = vadd.f32 %v9474_v52, %v9473_v46  ;;  %v9500_v20 = vrot.slane %v9499_v1, 4 }
 0x488   :  { %v9476_v40 = vrot.slane %v9475_v0, 2  ;;  %v9501_v48 = vadd.f32 %v9500_v20, %v9499_v1 }
 0x48a   :  { %v9477_v59 = vadd.f32 %v9476_v40, %v9475_v0  ;;  %v9502_v54 = vrot.slane %v9501_v48, 2 }
 0x48c   :  { %v9503_v27 = vadd.f32 %v9502_v54, %v9501_v48  ;;  %v9478_v41 = vrot.slane %v9477_v59, 1 }
 0x48e   :  { %v9479_v6 = vadd.f32 %v9478_v41, %v9477_v59  ;;  %v9504_v15 = vrot.slane %v9503_v27, 1 }
 0x490   :  { %14010 = vpush %v9479_v6  ;;  %v9505_v56 = vadd.f32 %v9504_v15, %v9503_v27 }
 0x492   :  { %14012 = vpush %v9505_v56 }
 0x4c1   :  { %s14011_s5 = spop %14010 }
 0x4c2   :  { %v9510_v38 = vstv %s14011_s5 }
 0x4c3   :  { %s14013_s20 = spop %14012  ;;  %v9511_v22 = vsel %vm9507_vm10, %v9510_v38, %v7892_v61 }
 0x4c4   :  { %v9508_v33 = vstv %s14013_s20  ;;  %9859 = vst [vmem:[#allocation11] sm:$0xff] %v9511_v22 }
 0x4c5   :  { %v9509_v29 = vsel %vm9507_vm10, %v9508_v33, %v7890_v50 }
 0x4c6   :  { %14322 = shalt.err (!%p14319_p2)
}
 0x4c7   :  { %s14323_s24 = scalar_lea.hbm %s17449_s8, 128 }
 0x4c8   :  { %p14324_p3 = scmp.ne.s32.totalorder %s17449_s8, %s14323_s24  ;;  %p14327_p4 = scmp.lt.u32.totalorder %s14323_s24, %s17449_s8 }
 0x4ca   :  { %p14329_p5 = pnand %p14327_p4, %p14324_p3 }
 0x4cc   :  { %14332 = shalt.err (!%p14329_p5)
}
 0x4cd   :  { %9879 = dma.vmem_to_hbm [thread:$0]  %s9877_s2, 128, %s17449_s8, [#allocation12]   ;;  %9858 = vst [vmem:[#allocation10] sm:$0xff] %v9509_v29 }
 0x4ce   :  { %s14333_s10 = scalar_lea.vmem %s17386_s19, 2304  ;;  %p14338_p7 = scmp.lt.s32.totalorder %s17386_s19, %s17386_s19 }
 0x4cf   :  { %p14334_p6 = scmp.ne.s32.totalorder %s17386_s19, %s14333_s10  ;;  %p14339_p8 = scmp.lt.s32.totalorder %s14333_s10, %s14333_s10 }
 0x4d1   :  { %p14340_p9 = por %p14339_p8, %p14338_p7 }
 0x4d3   :  { %p14341_p10 = pnand %p14340_p9, %p14334_p6 }
 0x4d5   :  { %14344 = shalt.err (!%p14341_p10)
}
 0x4d6   :  { %s14345_s6 = scalar_lea.hbm %s17450_s9, 2304 }
 0x4d7   :  { %p14346_p11 = scmp.ne.s32.totalorder %s17450_s9, %s14345_s6  ;;  %p14349_p12 = scmp.lt.u32.totalorder %s14345_s6, %s17450_s9 }
 0x4d9   :  { %p14351_p13 = pnand %p14349_p12, %p14346_p11 }
 0x4db   :  { %14354 = shalt.err (!%p14351_p13)
}
 0x4dc   :  { %9891 = dma.vmem_to_hbm [thread:$0]  %s17386_s19, 2304, %s17450_s9, [#allocation12], %s14391_s25, %s14391_s25, %s14392_s26  }
 0x4dd   :  { %s14355_s2 = scalar_lea.vmem %s17389_s3, 128  ;;  %p14360_p1 = scmp.lt.s32.totalorder %s17389_s3, %s17389_s3 }
 0x4de   :  { %p14356_p0 = scmp.ne.s32.totalorder %s17389_s3, %s14355_s2  ;;  %p14361_p2 = scmp.lt.s32.totalorder %s14355_s2, %s14355_s2 }
 0x4e0   :  { %p14362_p3 = por %p14361_p2, %p14360_p1 }
 0x4e2   :  { %p14363_p4 = pnand %p14362_p3, %p14356_p0 }
 0x4e4   :  { %14366 = shalt.err (!%p14363_p4)
}
 0x4e5   :  { %s14367_s21 = scalar_lea.hbm %s17448_s7, 128 }
 0x4e6   :  { %p14368_p5 = scmp.ne.s32.totalorder %s17448_s7, %s14367_s21  ;;  %p14371_p6 = scmp.lt.u32.totalorder %s14367_s21, %s17448_s7 }
 0x4e8   :  { %p14373_p7 = pnand %p14371_p6, %p14368_p5 }
 0x4ea   :  { %14376 = shalt.err (!%p14373_p7)
}
 0x4eb   :  { %9869 = dma.vmem_to_hbm [thread:$0]  %s17389_s3, 128, %s17448_s7, [#allocation4]  }
 0x4ec   :  { %14383 = dma.done.wait [#allocation4], 128  }
 0x4ed   :  { %14384 = vsyncadd [#allocation4], 4294967168 }
 0x4ee   :  { %14385 = dma.done.wait [#allocation12], 2432  }
 0x4ef   :  { %14386 = vsyncadd [#allocation12], 4294964864 }
 0x4f0   :  { %14387 = dma.done.wait [#allocation15], 2304  }
 0x4f1   :  { %14388 = vsyncadd [#allocation15], 4294964992 }
 0x4f2   :  { %9916 = vsyncpa [#allocation3], 1 }
 0x4f3   :  { %9917 = vsyncpa [#allocation6], 1 }
 0x4f4   :  { %9918 = vsyncpa [#allocation9], 1 }
 0x4f5   :  { %9919 = vsyncpa [#allocation4], 1 }
 0x4f6   :  { %9920 = vsyncpa [#allocation12], 1 }
 0x4f7   :  { %9921 = vsyncpa [#allocation15], 1 }

</bundles_post_ra>
